<compile_context>
chip_gen: v7x
topology: tpu7x:2x2x1
jax: 0.10.0
libtpu: 0.0.40
codegen_flags: <defaults>
</compile_context>

<pallas_src>
import functools
import math

import jax
import jax.numpy as jnp
from jax import lax
from jax.experimental import pallas as pl
from jax.experimental.pallas import tpu as pltpu

NEG_INF = -1e30
LN_EPS = 1e-5
_BF16 = jnp.bfloat16
_F32 = jnp.float32


# --------------------------------------------------------------------------
# small shared math helpers (traced inside the kernels)
# --------------------------------------------------------------------------
def _gelu_exact(v):
    # Exact (erf-based) GELU, matching torch.nn.GELU() default.
    # erf via Abramowitz & Stegun 7.1.26 (max abs err ~1.5e-7).
    z = v * 0.7071067811865476
    a = jnp.abs(z)
    t = 1.0 / (1.0 + 0.3275911 * a)
    poly = t * (0.254829592 + t * (-0.284496736 +
                t * (1.421413741 + t * (-1.453152027 + t * 1.061405429))))
    erf_abs = 1.0 - poly * jnp.exp(-a * a)
    erf = jnp.where(z >= 0.0, erf_abs, -erf_abs)
    return 0.5 * v * (1.0 + erf)


def _layer_norm(v, g, b):
    mu = jnp.mean(v, axis=-1, keepdims=True)
    var = jnp.mean((v - mu) ** 2, axis=-1, keepdims=True)
    return (v - mu) * lax.rsqrt(var + LN_EPS) * g + b


def _proj(a, w, b):
    # bf16 MXU matmul, f32 accumulation, f32 bias add.
    return jnp.dot(a.astype(_BF16), w, preferred_element_type=_F32) + b


# --------------------------------------------------------------------------
# stage 1: per-batch LN1 + fused self-attention QKV projection (hoisted)
# --------------------------------------------------------------------------
def _make_qkv_kernel(scale):
    def kernel(x_ref, ln1g_ref, ln1b_ref, wqkv_ref, bqkv_ref, q_ref, kv_ref):
        D = x_ref.shape[2]
        xn = _layer_norm(x_ref[0], ln1g_ref[...], ln1b_ref[...])
        qkv = _proj(xn, wqkv_ref[...], bqkv_ref[...])            # (TR, 3D) f32
        # softmax 1/sqrt(hd) scale folded into Q (touches TR*D, not H*TR*S)
        q_ref[0] = (qkv[:, :D] * scale).astype(q_ref.dtype)
        kv_ref[0] = qkv[:, D:].astype(kv_ref.dtype)

    return kernel


# --------------------------------------------------------------------------
# stage 2: main fused decoder-layer kernel
# --------------------------------------------------------------------------
def _make_decoder_kernel(n_heads, tq, kv_chunk):
    def kernel(x_ref, q_ref, kv_ref, patch_ref, smask_ref, pidx_ref,
               wo_s_ref, bo_s_ref,
               wq_c_ref, bq_c_ref, wkv_c_ref, bkv_c_ref, wo_c_ref, bo_c_ref,
               ln2g_ref, ln2b_ref, ln3g_ref, ln3b_ref,
               w1_ref, b1_ref, w2_ref, b2_ref,
               out_ref):
        D = x_ref.shape[2]
        S = kv_ref.shape[1]
        P = patch_ref.shape[1]
        H = n_heads
        hd = D // H
        scale = 1.0 / math.sqrt(hd)
        n_chunks = S // kv_chunk

        # ---- 1) local self-attention over the precomputed (hoisted) K/V ----
        qh = q_ref[0].reshape(tq, H, hd)        # bf16, pre-normed, pre-scaled

        if n_chunks == 1:
            # short sequences: single-shot softmax (no online rescale needed)
            kv = kv_ref[0]                                       # (S, 2D) bf16
            k = kv[:, :D].reshape(S, H, hd)
            v = kv[:, D:].reshape(S, H, hd)
            s = jnp.einsum("qhd,khd->hqk", qh, k,
                           preferred_element_type=_F32)
            s = s + smask_ref[0].astype(_F32)[None]
            s = s - jnp.max(s, axis=-1, keepdims=True)
            e = jnp.exp(s)
            p = e * pl.reciprocal(jnp.sum(e, axis=-1, keepdims=True), approx=True)
            attn_s = jnp.einsum("hqk,khd->qhd", p.astype(_BF16), v,
                                preferred_element_type=_F32).reshape(tq, D)
        else:
            # flash-style online softmax over KV chunks: only (H,TQ,Tk) live
            def attn_chunk(c, carry):
                m, l, acc = carry
                off = pl.multiple_of(c * kv_chunk, kv_chunk)
                kv = kv_ref[0, pl.ds(off, kv_chunk), :]          # (Tk, 2D) bf16
                k = kv[:, :D].reshape(kv_chunk, H, hd)
                v = kv[:, D:].reshape(kv_chunk, H, hd)
                s = jnp.einsum("qhd,khd->hqk", qh, k,
                               preferred_element_type=_F32)      # (H, TQ, Tk)
                s = s + smask_ref[c].astype(_F32)[None]
                m_new = jnp.maximum(m, jnp.max(s, axis=-1, keepdims=True))
                alpha = jnp.exp(m - m_new)                       # (H, TQ, 1)
                p = jnp.exp(s - m_new)
                l_new = alpha * l + jnp.sum(p, axis=-1, keepdims=True)
                ctx = jnp.einsum("hqk,khd->qhd", p.astype(_BF16), v,
                                 preferred_element_type=_F32)    # (TQ, H, hd)
                alpha_q = alpha.reshape(H, tq).T[:, :, None]     # tiny relayout
                return m_new, l_new, alpha_q * acc + ctx

            m0 = jnp.full((H, tq, 1), -jnp.inf, _F32)
            l0 = jnp.zeros((H, tq, 1), _F32)
            a0 = jnp.zeros((tq, H, hd), _F32)
            m_f, l_f, acc_f = lax.fori_loop(0, n_chunks, attn_chunk, (m0, l0, a0))
            inv_l = pl.reciprocal(l_f, approx=True).reshape(H, tq).T[:, :, None]
            attn_s = (acc_f * inv_l).reshape(tq, D)

        x_tile = x_ref[0] + _proj(attn_s, wo_s_ref[...], bo_s_ref[...])

        # ---- 2) cross-attention to patch representations + residual ----
        xn2 = _layer_norm(x_tile, ln2g_ref[...], ln2b_ref[...])
        q_c = (_proj(xn2, wq_c_ref[...], bq_c_ref[...]) * scale).astype(_BF16)
        kv_c = _proj(patch_ref[0], wkv_c_ref[...], bkv_c_ref[...])   # fused K/V
        qc = q_c.reshape(tq, H, hd)
        kc = kv_c[:, :D].reshape(P, H, hd).astype(_BF16)
        vc = kv_c[:, D:].reshape(P, H, hd).astype(_BF16)
        # cross mask built in-kernel from cumsum(patch_boundaries)
        cmask = jnp.where(
            lax.broadcasted_iota(jnp.int32, (tq, P), 1) > pidx_ref[0],
            NEG_INF, 0.0).astype(_F32)
        s_c = jnp.einsum("qhd,khd->hqk", qc, kc,
                         preferred_element_type=_F32) + cmask[None]
        s_c = s_c - jnp.max(s_c, axis=-1, keepdims=True)
        e_c = jnp.exp(s_c)
        p_c = e_c * pl.reciprocal(jnp.sum(e_c, axis=-1, keepdims=True), approx=True)
        attn_c = jnp.einsum("hqk,khd->qhd", p_c.astype(_BF16), vc,
                            preferred_element_type=_F32).reshape(tq, D)
        x_tile = x_tile + _proj(attn_c, wo_c_ref[...], bo_c_ref[...])

        # ---- 3) feed-forward (Linear -> GELU -> Linear) + residual ----
        xn3 = _layer_norm(x_tile, ln3g_ref[...], ln3b_ref[...])
        h1 = _gelu_exact(_proj(xn3, w1_ref[...], b1_ref[...]))
        x_tile = x_tile + _proj(h1, w2_ref[...], b2_ref[...])

        out_ref[0] = x_tile.astype(out_ref.dtype)

    return kernel


# --------------------------------------------------------------------------
# parameter init / tiling helpers
# --------------------------------------------------------------------------
def init_params(key, d_model):
    ks = jax.random.split(key, 12)
    std = 0.02
    n = lambda k, shp: (jax.random.normal(k, shp, jnp.float32) * std)
    p = {
        "w_qkv_s": n(ks[0], (d_model, 3 * d_model)),
        "b_qkv_s": n(ks[1], (1, 3 * d_model)),
        "w_o_s":   n(ks[2], (d_model, d_model)),
        "b_o_s":   n(ks[3], (1, d_model)),
        "w_qkv_c": n(ks[4], (d_model, 3 * d_model)),
        "b_qkv_c": n(ks[5], (1, 3 * d_model)),
        "w_o_c":   n(ks[6], (d_model, d_model)),
        "b_o_c":   n(ks[7], (1, d_model)),
        "w1":      n(ks[8], (d_model, 4 * d_model)),
        "b1":      n(ks[9], (1, 4 * d_model)),
        "w2":      n(ks[10], (4 * d_model, d_model)),
        "b2":      n(ks[11], (1, d_model)),
    }
    for i in (1, 2, 3):
        p[f"ln{i}_g"] = jnp.ones((1, d_model), jnp.float32)
        p[f"ln{i}_b"] = jnp.zeros((1, d_model), jnp.float32)
    return p


def _vmem_capacity_bytes():
    try:
        return int(pltpu.get_tpu_info().vmem_capacity_bytes)
    except Exception:
        return 64 << 20      # conservative default (v7x per-TensorCore capacity)


def _clamp_vmem(est_bytes, cap):
    return int(max(16 << 20, min(est_bytes, int(0.85 * cap))))


def _pick_q_tile(seq_len, vmem_cap):
    if seq_len <= 256:
        return seq_len
    # generation-aware: bigger q tiles when 128 MiB of VMEM is available
    biggest = 512 if vmem_cap >= (96 << 20) else 256
    for t in (512, 256, 128, 64, 32, 16, 8):
        if t <= biggest and seq_len % t == 0:
            return t
    return seq_len


def _pick_kv_chunk(seq_len):
    if seq_len <= 512:
        return seq_len
    for t in (512, 256, 128):
        if seq_len % t == 0:
            return t
    return seq_len


# --------------------------------------------------------------------------
# wrapper
# --------------------------------------------------------------------------
@functools.partial(jax.jit, static_argnames=("n_heads", "single_buffer"))
def decoder_layer_pallas(x, patch_reps, patch_boundaries, attention_mask, params,
                         n_heads, single_buffer=True):
    B, S, D = x.shape
    P = patch_reps.shape[1]
    assert D % n_heads == 0
    H = n_heads
    hd = D // H
    scale = 1.0 / math.sqrt(hd)

    cap = _vmem_capacity_bytes()
    TQ = _pick_q_tile(S, cap)
    NQT = S // TQ
    TK = _pick_kv_chunk(S)
    NCH = S // TK

    def const_spec(shape):
        idx = lambda b, t, n=len(shape): (0,) * n
        if single_buffer:
            return pl.BlockSpec(shape, idx, pipeline_mode=pl.Buffered(1))
        return pl.BlockSpec(shape, idx)

    def batch_spec(shape):
        # blocks whose index map depends only on the batch index
        idx = lambda b, t, n=len(shape) - 1: (b,) + (0,) * n
        if single_buffer:
            return pl.BlockSpec(shape, idx, pipeline_mode=pl.Buffered(1))
        return pl.BlockSpec(shape, idx)

    # ---- stage 1: hoisted LN1 + fused self-attention QKV projection ----
    wqkv_s = params["w_qkv_s"].astype(_BF16)
    bqkv_s = params["b_qkv_s"]
    est1 = (wqkv_s.size * 2 + bqkv_s.size * 4 + 2 * D * 4
            + 2 * (4 * TQ * D + 2 * TQ * 3 * D) + 4 * TQ * 4 * D)
    q_s, kv_s = pl.pallas_call(
        _make_qkv_kernel(scale),
        out_shape=(jax.ShapeDtypeStruct((B, S, D), _BF16),
                   jax.ShapeDtypeStruct((B, S, 2 * D), _BF16)),
        grid=(B, NQT),
        in_specs=[pl.BlockSpec((1, TQ, D), lambda b, t: (b, t, 0)),
                  const_spec((1, D)), const_spec((1, D)),
                  const_spec((D, 3 * D)), const_spec((1, 3 * D))],
        out_specs=(pl.BlockSpec((1, TQ, D), lambda b, t: (b, t, 0)),
                   pl.BlockSpec((1, TQ, 2 * D), lambda b, t: (b, t, 0))),
        compiler_params=pltpu.CompilerParams(
            dimension_semantics=("parallel", "parallel"),
            vmem_limit_bytes=_clamp_vmem(4 * est1, cap)),
    )(x, params["ln1_g"], params["ln1_b"], wqkv_s, bqkv_s)

    # ---- masks: compact bf16 additive self mask, int32 patch cumsum ----
    smask = jnp.where(attention_mask, NEG_INF, 0.0).astype(_BF16)        # (S, S)
    smask_r = smask.reshape(S, NCH, TK).transpose(1, 0, 2)               # (NCH,S,TK)
    pidx = jnp.cumsum(patch_boundaries.astype(jnp.int32), axis=1)[:, :, None]

    # ---- pre-split cross-attention weights (no in-kernel weight slicing) ----
    wq_c = params["w_qkv_c"][:, :D].astype(_BF16)
    wkv_c = params["w_qkv_c"][:, D:].astype(_BF16)
    bq_c = params["b_qkv_c"][:, :D]
    bkv_c = params["b_qkv_c"][:, D:]
    weights = [params["w_o_s"].astype(_BF16), params["b_o_s"],
               wq_c, bq_c, wkv_c, bkv_c,
               params["w_o_c"].astype(_BF16), params["b_o_c"],
               params["ln2_g"], params["ln2_b"], params["ln3_g"], params["ln3_b"],
               params["w1"].astype(_BF16), params["b1"],
               params["w2"].astype(_BF16), params["b2"]]

    in_specs = [
        pl.BlockSpec((1, TQ, D), lambda b, t: (b, t, 0)),        # x residual tile
        pl.BlockSpec((1, TQ, D), lambda b, t: (b, t, 0)),        # q_s tile (bf16)
        batch_spec((1, S, 2 * D)),                               # K/V full seq (bf16)
        batch_spec((1, P, D)),                                   # patch reps
        pl.BlockSpec((NCH, TQ, TK), lambda b, t: (0, t, 0)),     # self mask (bf16)
        pl.BlockSpec((1, TQ, 1), lambda b, t: (b, t, 0)),        # cumsum(patch bnd)
    ] + [const_spec(tuple(w.shape)) for w in weights]

    # ---- VMEM budget (tight estimate) and advisory cost ----
    w_bytes = sum(int(w.size) * w.dtype.itemsize for w in weights)
    stream = 2 * (4 * TQ * D + 2 * TQ * D + 2 * TQ * S + 4 * TQ + 4 * TQ * D)
    const_blk = (1 if single_buffer else 2) * (2 * S * 2 * D + 4 * P * D)
    interm = 4 * (3 * H * TQ * TK + 3 * H * TQ * P + 2 * TQ * D
                  + TQ * 4 * D + 8 * TQ * D)
    vmem_main = _clamp_vmem(int(1.25 * (w_bytes + stream + const_blk + interm)), cap)

    cost = pl.CostEstimate(
        flops=int(2 * B * (3 * S * D * D + NQT * 2 * P * D * D + 8 * S * D * D
                           + 2 * S * S * D + 2 * S * P * D)),
        transcendentals=int(B * (H * S * S + H * S * P + 4 * S * D)),
        bytes_accessed=int(B * (8 * S * D + 2 * S * D + 2 * S * S + 4 * S)
                           + B * NQT * (4 * S * D + 4 * P * D + w_bytes)),
    )

    return pl.pallas_call(
        _make_decoder_kernel(n_heads, TQ, TK),
        out_shape=jax.ShapeDtypeStruct((B, S, D), _F32),
        grid=(B, NQT),
        in_specs=in_specs,
        out_specs=pl.BlockSpec((1, TQ, D), lambda b, t: (b, t, 0)),
        compiler_params=pltpu.CompilerParams(
            dimension_semantics=("parallel", "parallel"),
            vmem_limit_bytes=vmem_main),
        cost_estimate=cost,
    )(x, q_s, kv_s, patch_reps, smask_r, pidx, *weights)


# --------------------------------------------------------------------------
# pure-JAX reference (matching bf16-matmul numerics)
# --------------------------------------------------------------------------
def _build_masks(patch_boundaries, attention_mask, n_patches):
    smask = jnp.where(attention_mask, NEG_INF, 0.0).astype(jnp.float32)      # (S, S)
    pidx = jnp.cumsum(patch_boundaries.astype(jnp.int32), axis=1)            # (B, S)
    blocked = jnp.arange(n_patches, dtype=jnp.int32)[None, None, :] > pidx[:, :, None]
    cmask = jnp.where(blocked, NEG_INF, 0.0).astype(jnp.float32)             # (B, S, P)
    return smask, cmask


def reference(x, patch_reps, smask, cmask, params, n_heads):
    bf16, f32 = jnp.bfloat16, jnp.float32

    def bdot(a, w):
        return jnp.dot(a.astype(bf16), w.astype(bf16), preferred_element_type=f32)

    def ln(v, g, b):
        mu = jnp.mean(v, -1, keepdims=True)
        var = jnp.mean((v - mu) ** 2, -1, keepdims=True)
        return (v - mu) / jnp.sqrt(var + LN_EPS) * g + b

    def mha(q_in, kv_in, wqkv, bqkv, wo, bo, mask4):
        B, S, Dm = q_in.shape
        K = kv_in.shape[1]
        hd = Dm // n_heads
        pq = bdot(q_in, wqkv) + bqkv
        pkv = bdot(kv_in, wqkv) + bqkv
        q = pq[..., :Dm].reshape(B, S, n_heads, hd)
        k = pkv[..., Dm:2 * Dm].reshape(B, K, n_heads, hd)
        v = pkv[..., 2 * Dm:].reshape(B, K, n_heads, hd)
        s = jnp.einsum("bqhd,bkhd->bhqk", q.astype(bf16), k.astype(bf16),
                       preferred_element_type=f32) / math.sqrt(hd) + mask4
        p = jax.nn.softmax(s, axis=-1)
        o = jnp.einsum("bhqk,bkhd->bqhd", p.astype(bf16), v.astype(bf16),
                       preferred_element_type=f32).reshape(B, S, Dm)
        return bdot(o, wo) + bo

    g = params
    xn = ln(x, g["ln1_g"], g["ln1_b"])
    x = x + mha(xn, xn, g["w_qkv_s"], g["b_qkv_s"], g["w_o_s"], g["b_o_s"],
                smask[None, None, :, :])
    xn = ln(x, g["ln2_g"], g["ln2_b"])
    x = x + mha(xn, patch_reps, g["w_qkv_c"], g["b_qkv_c"], g["w_o_c"], g["b_o_c"],
                cmask[:, None, :, :])
    xn = ln(x, g["ln3_g"], g["ln3_b"])
    x = x + bdot(_gelu_exact(bdot(xn, g["w1"]) + g["b1"]), g["w2"]) + g["b2"]
    return x


# --------------------------------------------------------------------------
if __name__ == "__main__":
    # batch, byte seq len, n_patches, d_model, n_heads (D=128 keeps lanes dense)
    B, S, P, D, H = 2, 16, 8, 128, 4

    key = jax.random.PRNGKey(0)
    kx, kp, kb, kw = jax.random.split(key, 4)
    x = jax.random.normal(kx, (B, S, D), jnp.float32)
    patch_reps = jax.random.normal(kp, (B, P, D), jnp.float32)
    patch_boundaries = jax.random.bernoulli(kb, 0.3, (B, S)).astype(jnp.int32)
    attention_mask = jnp.triu(jnp.ones((S, S), jnp.bool_), k=1)   # True = blocked
    params = init_params(kw, D)

    try:
        out = decoder_layer_pallas(x, patch_reps, patch_boundaries, attention_mask,
                                   params, H, single_buffer=True)
        out = jax.block_until_ready(out)
    except Exception:
        # pipeline_mode=pl.Buffered(1) is a newer knob; fall back to default
        # double buffering if this jax build rejects it.
        out = decoder_layer_pallas(x, patch_reps, patch_boundaries, attention_mask,
                                   params, H, single_buffer=False)
        out = jax.block_until_ready(out)

    # sanity check against the pure-JAX reference (matching bf16 numerics)
    smask, cmask = _build_masks(patch_boundaries, attention_mask, P)
    ref = reference(x, patch_reps, smask, cmask, params, H)
    max_err = float(jnp.max(jnp.abs(out - ref)))
    assert max_err < 2e-2, f"max abs err = {max_err}"

    print("KERNEL_OK")
</pallas_src>

<mosaic_0001>
module attributes {stable_mosaic.version = 11 : i64} {
  func.func @kernel(%arg0: i32, %arg1: i32, %arg2: memref<1x16x128xf32, #tpu.memory_space<vmem>>, %arg3: memref<1x16x128xbf16, #tpu.memory_space<vmem>>, %arg4: memref<1x16x256xbf16, #tpu.memory_space<vmem>>, %arg5: memref<1x8x128xf32, #tpu.memory_space<vmem>>, %arg6: memref<1x16x16xbf16, #tpu.memory_space<vmem>>, %arg7: memref<1x16x1xi32, #tpu.memory_space<vmem>>, %arg8: memref<128x128xbf16, #tpu.memory_space<vmem>>, %arg9: memref<1x128xf32, #tpu.memory_space<vmem>>, %arg10: memref<128x128xbf16, #tpu.memory_space<vmem>>, %arg11: memref<1x128xf32, #tpu.memory_space<vmem>>, %arg12: memref<128x256xbf16, #tpu.memory_space<vmem>>, %arg13: memref<1x256xf32, #tpu.memory_space<vmem>>, %arg14: memref<128x128xbf16, #tpu.memory_space<vmem>>, %arg15: memref<1x128xf32, #tpu.memory_space<vmem>>, %arg16: memref<1x128xf32, #tpu.memory_space<vmem>>, %arg17: memref<1x128xf32, #tpu.memory_space<vmem>>, %arg18: memref<1x128xf32, #tpu.memory_space<vmem>>, %arg19: memref<1x128xf32, #tpu.memory_space<vmem>>, %arg20: memref<128x512xbf16, #tpu.memory_space<vmem>>, %arg21: memref<1x512xf32, #tpu.memory_space<vmem>>, %arg22: memref<512x128xbf16, #tpu.memory_space<vmem>>, %arg23: memref<1x128xf32, #tpu.memory_space<vmem>>, %arg24: memref<1x16x128xf32, #tpu.memory_space<vmem>>) attributes {dimension_semantics = [#tpu.dimension_semantics<parallel>, #tpu.dimension_semantics<parallel>], iteration_bounds = array<i64: 2, 1>, scalar_prefetch = 0 : i64, scratch_operands = 0 : i64, tpu.core_type = #tpu.core_type<tc>, window_params = [{transform_indices = @transform_0, window_bounds = array<i64: 1, 16, 128>}, {transform_indices = @transform_1, window_bounds = array<i64: 1, 16, 128>}, {pipeline_mode = #tpu.pipeline_mode<synchronous>, transform_indices = @transform_2, window_bounds = array<i64: 1, 16, 256>}, {pipeline_mode = #tpu.pipeline_mode<synchronous>, transform_indices = @transform_3, window_bounds = array<i64: 1, 8, 128>}, {transform_indices = @transform_4, window_bounds = array<i64: 1, 16, 16>}, {transform_indices = @transform_5, window_bounds = array<i64: 1, 16, 1>}, {pipeline_mode = #tpu.pipeline_mode<synchronous>, transform_indices = @transform_6, window_bounds = array<i64: 128, 128>}, {pipeline_mode = #tpu.pipeline_mode<synchronous>, transform_indices = @transform_7, window_bounds = array<i64: 1, 128>}, {pipeline_mode = #tpu.pipeline_mode<synchronous>, transform_indices = @transform_8, window_bounds = array<i64: 128, 128>}, {pipeline_mode = #tpu.pipeline_mode<synchronous>, transform_indices = @transform_9, window_bounds = array<i64: 1, 128>}, {pipeline_mode = #tpu.pipeline_mode<synchronous>, transform_indices = @transform_10, window_bounds = array<i64: 128, 256>}, {pipeline_mode = #tpu.pipeline_mode<synchronous>, transform_indices = @transform_11, window_bounds = array<i64: 1, 256>}, {pipeline_mode = #tpu.pipeline_mode<synchronous>, transform_indices = @transform_12, window_bounds = array<i64: 128, 128>}, {pipeline_mode = #tpu.pipeline_mode<synchronous>, transform_indices = @transform_13, window_bounds = array<i64: 1, 128>}, {pipeline_mode = #tpu.pipeline_mode<synchronous>, transform_indices = @transform_14, window_bounds = array<i64: 1, 128>}, {pipeline_mode = #tpu.pipeline_mode<synchronous>, transform_indices = @transform_15, window_bounds = array<i64: 1, 128>}, {pipeline_mode = #tpu.pipeline_mode<synchronous>, transform_indices = @transform_16, window_bounds = array<i64: 1, 128>}, {pipeline_mode = #tpu.pipeline_mode<synchronous>, transform_indices = @transform_17, window_bounds = array<i64: 1, 128>}, {pipeline_mode = #tpu.pipeline_mode<synchronous>, transform_indices = @transform_18, window_bounds = array<i64: 128, 512>}, {pipeline_mode = #tpu.pipeline_mode<synchronous>, transform_indices = @transform_19, window_bounds = array<i64: 1, 512>}, {pipeline_mode = #tpu.pipeline_mode<synchronous>, transform_indices = @transform_20, window_bounds = array<i64: 512, 128>}, {pipeline_mode = #tpu.pipeline_mode<synchronous>, transform_indices = @transform_21, window_bounds = array<i64: 1, 128>}, {transform_indices = @transform_22, window_bounds = array<i64: 1, 16, 128>}]} {
    %c0 = arith.constant 0 : index
    %c0_0 = arith.constant 0 : index
    %c0_1 = arith.constant 0 : index
    %0 = vector.load %arg3[%c0, %c0_0, %c0_1] : memref<1x16x128xbf16, #tpu.memory_space<vmem>>, vector<1x16x128xbf16>
    %1 = vector.shape_cast %0 : vector<1x16x128xbf16> to vector<16x128xbf16>
    %2 = vector.shape_cast %1 : vector<16x128xbf16> to vector<16x4x32xbf16>
    %c0_2 = arith.constant 0 : index
    %c0_3 = arith.constant 0 : index
    %c0_4 = arith.constant 0 : index
    %3 = vector.load %arg4[%c0_2, %c0_3, %c0_4] : memref<1x16x256xbf16, #tpu.memory_space<vmem>>, vector<1x16x256xbf16>
    %4 = vector.shape_cast %3 : vector<1x16x256xbf16> to vector<16x256xbf16>
    %5 = vector.extract_strided_slice %4 {offsets = [0, 0], sizes = [16, 128], strides = [1, 1]} : vector<16x256xbf16> to vector<16x128xbf16>
    %6 = vector.shape_cast %5 : vector<16x128xbf16> to vector<16x4x32xbf16>
    %7 = vector.extract_strided_slice %4 {offsets = [0, 128], sizes = [16, 128], strides = [1, 1]} : vector<16x256xbf16> to vector<16x128xbf16>
    %8 = vector.shape_cast %7 : vector<16x128xbf16> to vector<16x4x32xbf16>
    "tpu.trace_start"() <{level = 10 : i32, message = "qhd,khd->hqk"}> : () -> ()
    %cst = arith.constant dense<0.000000e+00> : vector<4x16x16xf32>
    %9 = tpu.matmul %2, %6, %cst {dimension_numbers = #tpu.dot_dimension_numbers<[2], [2], [0], [0], [0, 1, 0, 0, 1, 0], [1], [1]>} : vector<16x4x32xbf16>, vector<16x4x32xbf16>, vector<4x16x16xf32> -> vector<4x16x16xf32>
    "tpu.trace_stop"() : () -> ()
    %c0_5 = arith.constant 0 : index
    %c0_6 = arith.constant 0 : index
    %c0_7 = arith.constant 0 : index
    %10 = vector.load %arg6[%c0_5, %c0_6, %c0_7] : memref<1x16x16xbf16, #tpu.memory_space<vmem>>, vector<1x16x16xbf16>
    %11 = vector.shape_cast %10 : vector<1x16x16xbf16> to vector<16x16xbf16>
    %12 = arith.extf %11 : vector<16x16xbf16> to vector<16x16xf32>
    %13 = vector.shape_cast %12 : vector<16x16xf32> to vector<1x16x16xf32>
    %14 = vector.broadcast %13 : vector<1x16x16xf32> to vector<4x16x16xf32>
    %15 = arith.addf %9, %14 : vector<4x16x16xf32>
    %cst_8 = arith.constant dense<0xFF800000> : vector<4x16xf32>
    %16 = vector.multi_reduction <maximumf>, %15, %cst_8 [2] : vector<4x16x16xf32> to vector<4x16xf32>
    %17 = vector.shape_cast %16 : vector<4x16xf32> to vector<4x16x1xf32>
    %18 = vector.broadcast %17 : vector<4x16x1xf32> to vector<4x16x16xf32>
    %19 = arith.subf %15, %18 : vector<4x16x16xf32>
    %20 = math.exp %19 : vector<4x16x16xf32>
    %cst_9 = arith.constant dense<0.000000e+00> : vector<4x16xf32>
    %21 = vector.multi_reduction <add>, %20, %cst_9 [2] : vector<4x16x16xf32> to vector<4x16xf32>
    %22 = vector.shape_cast %21 : vector<4x16xf32> to vector<4x16x1xf32>
    %23 = tpu.reciprocal %22 {approx = true} : vector<4x16x1xf32> -> vector<4x16x1xf32>
    %24 = vector.broadcast %23 : vector<4x16x1xf32> to vector<4x16x16xf32>
    %25 = arith.mulf %20, %24 : vector<4x16x16xf32>
    %26 = arith.truncf %25 : vector<4x16x16xf32> to vector<4x16x16xbf16>
    "tpu.trace_start"() <{level = 10 : i32, message = "hqk,khd->qhd"}> : () -> ()
    %cst_10 = arith.constant dense<0.000000e+00> : vector<4x32x16xf32>
    %27 = tpu.matmul %8, %26, %cst_10 {dimension_numbers = #tpu.dot_dimension_numbers<[0], [2], [2], [1], [0, 1, 0, 2, 1, 1], [1], [0]>} : vector<16x4x32xbf16>, vector<4x16x16xbf16>, vector<4x32x16xf32> -> vector<4x32x16xf32>
    %28 = tpu.transpose %27, [2, 0, 1] : vector<4x32x16xf32> -> vector<16x4x32xf32>
    "tpu.trace_stop"() : () -> ()
    %29 = vector.shape_cast %28 : vector<16x4x32xf32> to vector<16x128xf32>
    %c0_11 = arith.constant 0 : index
    %c0_12 = arith.constant 0 : index
    %c0_13 = arith.constant 0 : index
    %30 = vector.load %arg2[%c0_11, %c0_12, %c0_13] : memref<1x16x128xf32, #tpu.memory_space<vmem>>, vector<1x16x128xf32>
    %31 = vector.shape_cast %30 : vector<1x16x128xf32> to vector<16x128xf32>
    %c0_14 = arith.constant 0 : index
    %c0_15 = arith.constant 0 : index
    %32 = vector.load %arg8[%c0_14, %c0_15] : memref<128x128xbf16, #tpu.memory_space<vmem>>, vector<128x128xbf16>
    %c0_16 = arith.constant 0 : index
    %c0_17 = arith.constant 0 : index
    %33 = vector.load %arg9[%c0_16, %c0_17] : memref<1x128xf32, #tpu.memory_space<vmem>>, vector<1x128xf32>
    %34 = arith.truncf %29 : vector<16x128xf32> to vector<16x128xbf16>
    %cst_18 = arith.constant dense<0.000000e+00> : vector<16x128xf32>
    %35 = tpu.matmul %34, %32, %cst_18 {dimension_numbers = #tpu.dot_dimension_numbers<[1], [0], [0], [1], [0, 0, 1, 1], [], []>} : vector<16x128xbf16>, vector<128x128xbf16>, vector<16x128xf32> -> vector<16x128xf32>
    %36 = vector.broadcast %33 : vector<1x128xf32> to vector<16x128xf32>
    %37 = arith.addf %35, %36 : vector<16x128xf32>
    %38 = arith.addf %31, %37 : vector<16x128xf32>
    %c0_19 = arith.constant 0 : index
    %c0_20 = arith.constant 0 : index
    %39 = vector.load %arg16[%c0_19, %c0_20] : memref<1x128xf32, #tpu.memory_space<vmem>>, vector<1x128xf32>
    %c0_21 = arith.constant 0 : index
    %c0_22 = arith.constant 0 : index
    %40 = vector.load %arg17[%c0_21, %c0_22] : memref<1x128xf32, #tpu.memory_space<vmem>>, vector<1x128xf32>
    %cst_23 = arith.constant dense<0.000000e+00> : vector<16xf32>
    %41 = vector.multi_reduction <add>, %38, %cst_23 [1] : vector<16x128xf32> to vector<16xf32>
    %42 = vector.shape_cast %41 : vector<16xf32> to vector<16x1xf32>
    %cst_24 = arith.constant 1.280000e+02 : f32
    %43 = vector.broadcast %cst_24 : f32 to vector<16x1xf32>
    %44 = arith.divf %42, %43 : vector<16x1xf32>
    %45 = vector.broadcast %44 : vector<16x1xf32> to vector<16x128xf32>
    %46 = arith.subf %38, %45 : vector<16x128xf32>
    %47 = arith.mulf %46, %46 : vector<16x128xf32>
    %cst_25 = arith.constant dense<0.000000e+00> : vector<16xf32>
    %48 = vector.multi_reduction <add>, %47, %cst_25 [1] : vector<16x128xf32> to vector<16xf32>
    %49 = vector.shape_cast %48 : vector<16xf32> to vector<16x1xf32>
    %cst_26 = arith.constant 1.280000e+02 : f32
    %50 = vector.broadcast %cst_26 : f32 to vector<16x1xf32>
    %51 = arith.divf %49, %50 : vector<16x1xf32>
    %52 = vector.broadcast %44 : vector<16x1xf32> to vector<16x128xf32>
    %53 = arith.subf %38, %52 : vector<16x128xf32>
    %cst_27 = arith.constant 9.99999974E-6 : f32
    %54 = vector.broadcast %cst_27 : f32 to vector<16x1xf32>
    %55 = arith.addf %51, %54 : vector<16x1xf32>
    %56 = math.rsqrt %55 : vector<16x1xf32>
    %57 = vector.broadcast %56 : vector<16x1xf32> to vector<16x128xf32>
    %58 = arith.mulf %53, %57 : vector<16x128xf32>
    %59 = vector.broadcast %39 : vector<1x128xf32> to vector<16x128xf32>
    %60 = arith.mulf %58, %59 : vector<16x128xf32>
    %61 = vector.broadcast %40 : vector<1x128xf32> to vector<16x128xf32>
    %62 = arith.addf %60, %61 : vector<16x128xf32>
    %c0_28 = arith.constant 0 : index
    %c0_29 = arith.constant 0 : index
    %63 = vector.load %arg10[%c0_28, %c0_29] : memref<128x128xbf16, #tpu.memory_space<vmem>>, vector<128x128xbf16>
    %c0_30 = arith.constant 0 : index
    %c0_31 = arith.constant 0 : index
    %64 = vector.load %arg11[%c0_30, %c0_31] : memref<1x128xf32, #tpu.memory_space<vmem>>, vector<1x128xf32>
    %65 = arith.truncf %62 : vector<16x128xf32> to vector<16x128xbf16>
    %cst_32 = arith.constant dense<0.000000e+00> : vector<16x128xf32>
    %66 = tpu.matmul %65, %63, %cst_32 {dimension_numbers = #tpu.dot_dimension_numbers<[1], [0], [0], [1], [0, 0, 1, 1], [], []>} : vector<16x128xbf16>, vector<128x128xbf16>, vector<16x128xf32> -> vector<16x128xf32>
    %67 = vector.broadcast %64 : vector<1x128xf32> to vector<16x128xf32>
    %68 = arith.addf %66, %67 : vector<16x128xf32>
    %cst_33 = arith.constant 0.176776692 : f32
    %69 = vector.broadcast %cst_33 : f32 to vector<16x128xf32>
    %70 = arith.mulf %68, %69 : vector<16x128xf32>
    %71 = arith.truncf %70 : vector<16x128xf32> to vector<16x128xbf16>
    %c0_34 = arith.constant 0 : index
    %c0_35 = arith.constant 0 : index
    %c0_36 = arith.constant 0 : index
    %72 = vector.load %arg5[%c0_34, %c0_35, %c0_36] : memref<1x8x128xf32, #tpu.memory_space<vmem>>, vector<1x8x128xf32>
    %73 = vector.shape_cast %72 : vector<1x8x128xf32> to vector<8x128xf32>
    %c0_37 = arith.constant 0 : index
    %c0_38 = arith.constant 0 : index
    %74 = vector.load %arg12[%c0_37, %c0_38] : memref<128x256xbf16, #tpu.memory_space<vmem>>, vector<128x256xbf16>
    %c0_39 = arith.constant 0 : index
    %c0_40 = arith.constant 0 : index
    %75 = vector.load %arg13[%c0_39, %c0_40] : memref<1x256xf32, #tpu.memory_space<vmem>>, vector<1x256xf32>
    %76 = arith.truncf %73 : vector<8x128xf32> to vector<8x128xbf16>
    %cst_41 = arith.constant dense<0.000000e+00> : vector<8x256xf32>
    %77 = tpu.matmul %76, %74, %cst_41 {dimension_numbers = #tpu.dot_dimension_numbers<[1], [0], [0], [1], [0, 0, 1, 1], [], []>} : vector<8x128xbf16>, vector<128x256xbf16>, vector<8x256xf32> -> vector<8x256xf32>
    %78 = vector.broadcast %75 : vector<1x256xf32> to vector<8x256xf32>
    %79 = arith.addf %77, %78 : vector<8x256xf32>
    %80 = vector.shape_cast %71 : vector<16x128xbf16> to vector<16x4x32xbf16>
    %81 = vector.extract_strided_slice %79 {offsets = [0, 0], sizes = [8, 128], strides = [1, 1]} : vector<8x256xf32> to vector<8x128xf32>
    %82 = vector.shape_cast %81 : vector<8x128xf32> to vector<8x4x32xf32>
    %83 = arith.truncf %82 : vector<8x4x32xf32> to vector<8x4x32xbf16>
    %84 = vector.extract_strided_slice %79 {offsets = [0, 128], sizes = [8, 128], strides = [1, 1]} : vector<8x256xf32> to vector<8x128xf32>
    %85 = vector.shape_cast %84 : vector<8x128xf32> to vector<8x4x32xf32>
    %86 = arith.truncf %85 : vector<8x4x32xf32> to vector<8x4x32xbf16>
    %87 = tpu.iota {dimensions = array<i32: 1>} : vector<16x8xi32>
    %c0_42 = arith.constant 0 : index
    %c0_43 = arith.constant 0 : index
    %c0_44 = arith.constant 0 : index
    %88 = vector.load %arg7[%c0_42, %c0_43, %c0_44] : memref<1x16x1xi32, #tpu.memory_space<vmem>>, vector<1x16x1xi32>
    %89 = vector.shape_cast %88 : vector<1x16x1xi32> to vector<16x1xi32>
    %90 = vector.broadcast %89 : vector<16x1xi32> to vector<16x8xi32>
    %91 = arith.cmpi sgt, %87, %90 : vector<16x8xi32>
    %cst_45 = arith.constant -1.000000e+30 : f32
    %cst_46 = arith.constant 0.000000e+00 : f32
    %92 = vector.broadcast %cst_45 : f32 to vector<16x8xf32>
    %93 = vector.broadcast %cst_46 : f32 to vector<16x8xf32>
    %94 = arith.select %91, %92, %93 : vector<16x8xi1>, vector<16x8xf32>
    "tpu.trace_start"() <{level = 10 : i32, message = "qhd,khd->hqk"}> : () -> ()
    %cst_47 = arith.constant dense<0.000000e+00> : vector<4x16x8xf32>
    %95 = tpu.matmul %80, %83, %cst_47 {dimension_numbers = #tpu.dot_dimension_numbers<[2], [2], [0], [0], [0, 1, 0, 0, 1, 0], [1], [1]>} : vector<16x4x32xbf16>, vector<8x4x32xbf16>, vector<4x16x8xf32> -> vector<4x16x8xf32>
    "tpu.trace_stop"() : () -> ()
    %96 = vector.shape_cast %94 : vector<16x8xf32> to vector<1x16x8xf32>
    %97 = vector.broadcast %96 : vector<1x16x8xf32> to vector<4x16x8xf32>
    %98 = arith.addf %95, %97 : vector<4x16x8xf32>
    %cst_48 = arith.constant dense<0xFF800000> : vector<4x16xf32>
    %99 = vector.multi_reduction <maximumf>, %98, %cst_48 [2] : vector<4x16x8xf32> to vector<4x16xf32>
    %100 = vector.shape_cast %99 : vector<4x16xf32> to vector<4x16x1xf32>
    %101 = vector.broadcast %100 : vector<4x16x1xf32> to vector<4x16x8xf32>
    %102 = arith.subf %98, %101 : vector<4x16x8xf32>
    %103 = math.exp %102 : vector<4x16x8xf32>
    %cst_49 = arith.constant dense<0.000000e+00> : vector<4x16xf32>
    %104 = vector.multi_reduction <add>, %103, %cst_49 [2] : vector<4x16x8xf32> to vector<4x16xf32>
    %105 = vector.shape_cast %104 : vector<4x16xf32> to vector<4x16x1xf32>
    %106 = tpu.reciprocal %105 {approx = true} : vector<4x16x1xf32> -> vector<4x16x1xf32>
    %107 = vector.broadcast %106 : vector<4x16x1xf32> to vector<4x16x8xf32>
    %108 = arith.mulf %103, %107 : vector<4x16x8xf32>
    %109 = arith.truncf %108 : vector<4x16x8xf32> to vector<4x16x8xbf16>
    "tpu.trace_start"() <{level = 10 : i32, message = "hqk,khd->qhd"}> : () -> ()
    %cst_50 = arith.constant dense<0.000000e+00> : vector<4x32x16xf32>
    %110 = tpu.matmul %86, %109, %cst_50 {dimension_numbers = #tpu.dot_dimension_numbers<[0], [2], [2], [1], [0, 1, 0, 2, 1, 1], [1], [0]>} : vector<8x4x32xbf16>, vector<4x16x8xbf16>, vector<4x32x16xf32> -> vector<4x32x16xf32>
    %111 = tpu.transpose %110, [2, 0, 1] : vector<4x32x16xf32> -> vector<16x4x32xf32>
    "tpu.trace_stop"() : () -> ()
    %112 = vector.shape_cast %111 : vector<16x4x32xf32> to vector<16x128xf32>
    %c0_51 = arith.constant 0 : index
    %c0_52 = arith.constant 0 : index
    %113 = vector.load %arg14[%c0_51, %c0_52] : memref<128x128xbf16, #tpu.memory_space<vmem>>, vector<128x128xbf16>
    %c0_53 = arith.constant 0 : index
    %c0_54 = arith.constant 0 : index
    %114 = vector.load %arg15[%c0_53, %c0_54] : memref<1x128xf32, #tpu.memory_space<vmem>>, vector<1x128xf32>
    %115 = arith.truncf %112 : vector<16x128xf32> to vector<16x128xbf16>
    %cst_55 = arith.constant dense<0.000000e+00> : vector<16x128xf32>
    %116 = tpu.matmul %115, %113, %cst_55 {dimension_numbers = #tpu.dot_dimension_numbers<[1], [0], [0], [1], [0, 0, 1, 1], [], []>} : vector<16x128xbf16>, vector<128x128xbf16>, vector<16x128xf32> -> vector<16x128xf32>
    %117 = vector.broadcast %114 : vector<1x128xf32> to vector<16x128xf32>
    %118 = arith.addf %116, %117 : vector<16x128xf32>
    %119 = arith.addf %38, %118 : vector<16x128xf32>
    %c0_56 = arith.constant 0 : index
    %c0_57 = arith.constant 0 : index
    %120 = vector.load %arg18[%c0_56, %c0_57] : memref<1x128xf32, #tpu.memory_space<vmem>>, vector<1x128xf32>
    %c0_58 = arith.constant 0 : index
    %c0_59 = arith.constant 0 : index
    %121 = vector.load %arg19[%c0_58, %c0_59] : memref<1x128xf32, #tpu.memory_space<vmem>>, vector<1x128xf32>
    %cst_60 = arith.constant dense<0.000000e+00> : vector<16xf32>
    %122 = vector.multi_reduction <add>, %119, %cst_60 [1] : vector<16x128xf32> to vector<16xf32>
    %123 = vector.shape_cast %122 : vector<16xf32> to vector<16x1xf32>
    %cst_61 = arith.constant 1.280000e+02 : f32
    %124 = vector.broadcast %cst_61 : f32 to vector<16x1xf32>
    %125 = arith.divf %123, %124 : vector<16x1xf32>
    %126 = vector.broadcast %125 : vector<16x1xf32> to vector<16x128xf32>
    %127 = arith.subf %119, %126 : vector<16x128xf32>
    %128 = arith.mulf %127, %127 : vector<16x128xf32>
    %cst_62 = arith.constant dense<0.000000e+00> : vector<16xf32>
    %129 = vector.multi_reduction <add>, %128, %cst_62 [1] : vector<16x128xf32> to vector<16xf32>
    %130 = vector.shape_cast %129 : vector<16xf32> to vector<16x1xf32>
    %cst_63 = arith.constant 1.280000e+02 : f32
    %131 = vector.broadcast %cst_63 : f32 to vector<16x1xf32>
    %132 = arith.divf %130, %131 : vector<16x1xf32>
    %133 = vector.broadcast %125 : vector<16x1xf32> to vector<16x128xf32>
    %134 = arith.subf %119, %133 : vector<16x128xf32>
    %cst_64 = arith.constant 9.99999974E-6 : f32
    %135 = vector.broadcast %cst_64 : f32 to vector<16x1xf32>
    %136 = arith.addf %132, %135 : vector<16x1xf32>
    %137 = math.rsqrt %136 : vector<16x1xf32>
    %138 = vector.broadcast %137 : vector<16x1xf32> to vector<16x128xf32>
    %139 = arith.mulf %134, %138 : vector<16x128xf32>
    %140 = vector.broadcast %120 : vector<1x128xf32> to vector<16x128xf32>
    %141 = arith.mulf %139, %140 : vector<16x128xf32>
    %142 = vector.broadcast %121 : vector<1x128xf32> to vector<16x128xf32>
    %143 = arith.addf %141, %142 : vector<16x128xf32>
    %c0_65 = arith.constant 0 : index
    %c0_66 = arith.constant 0 : index
    %144 = vector.load %arg20[%c0_65, %c0_66] : memref<128x512xbf16, #tpu.memory_space<vmem>>, vector<128x512xbf16>
    %c0_67 = arith.constant 0 : index
    %c0_68 = arith.constant 0 : index
    %145 = vector.load %arg21[%c0_67, %c0_68] : memref<1x512xf32, #tpu.memory_space<vmem>>, vector<1x512xf32>
    %146 = arith.truncf %143 : vector<16x128xf32> to vector<16x128xbf16>
    %cst_69 = arith.constant dense<0.000000e+00> : vector<16x512xf32>
    %147 = tpu.matmul %146, %144, %cst_69 {dimension_numbers = #tpu.dot_dimension_numbers<[1], [0], [0], [1], [0, 0, 1, 1], [], []>} : vector<16x128xbf16>, vector<128x512xbf16>, vector<16x512xf32> -> vector<16x512xf32>
    %148 = vector.broadcast %145 : vector<1x512xf32> to vector<16x512xf32>
    %149 = arith.addf %147, %148 : vector<16x512xf32>
    %cst_70 = arith.constant 0.707106769 : f32
    %150 = vector.broadcast %cst_70 : f32 to vector<16x512xf32>
    %151 = arith.mulf %149, %150 : vector<16x512xf32>
    %152 = math.absf %151 : vector<16x512xf32>
    %cst_71 = arith.constant 0.327591091 : f32
    %153 = vector.broadcast %cst_71 : f32 to vector<16x512xf32>
    %154 = arith.mulf %153, %152 : vector<16x512xf32>
    %cst_72 = arith.constant 1.000000e+00 : f32
    %155 = vector.broadcast %cst_72 : f32 to vector<16x512xf32>
    %156 = arith.addf %155, %154 : vector<16x512xf32>
    %cst_73 = arith.constant 1.000000e+00 : f32
    %157 = vector.broadcast %cst_73 : f32 to vector<16x512xf32>
    %158 = arith.divf %157, %156 : vector<16x512xf32>
    %cst_74 = arith.constant 1.06140542 : f32
    %159 = vector.broadcast %cst_74 : f32 to vector<16x512xf32>
    %160 = arith.mulf %158, %159 : vector<16x512xf32>
    %cst_75 = arith.constant -1.45315206 : f32
    %161 = vector.broadcast %cst_75 : f32 to vector<16x512xf32>
    %162 = arith.addf %161, %160 : vector<16x512xf32>
    %163 = arith.mulf %158, %162 : vector<16x512xf32>
    %cst_76 = arith.constant 1.42141378 : f32
    %164 = vector.broadcast %cst_76 : f32 to vector<16x512xf32>
    %165 = arith.addf %164, %163 : vector<16x512xf32>
    %166 = arith.mulf %158, %165 : vector<16x512xf32>
    %cst_77 = arith.constant -0.284496725 : f32
    %167 = vector.broadcast %cst_77 : f32 to vector<16x512xf32>
    %168 = arith.addf %167, %166 : vector<16x512xf32>
    %169 = arith.mulf %158, %168 : vector<16x512xf32>
    %cst_78 = arith.constant 0.254829586 : f32
    %170 = vector.broadcast %cst_78 : f32 to vector<16x512xf32>
    %171 = arith.addf %170, %169 : vector<16x512xf32>
    %172 = arith.mulf %158, %171 : vector<16x512xf32>
    %cst_79 = arith.constant 0.000000e+00 : f32
    %173 = vector.broadcast %cst_79 : f32 to vector<16x512xf32>
    %174 = arith.subf %173, %152 : vector<16x512xf32>
    %175 = arith.mulf %174, %152 : vector<16x512xf32>
    %176 = math.exp %175 : vector<16x512xf32>
    %177 = arith.mulf %172, %176 : vector<16x512xf32>
    %cst_80 = arith.constant 1.000000e+00 : f32
    %178 = vector.broadcast %cst_80 : f32 to vector<16x512xf32>
    %179 = arith.subf %178, %177 : vector<16x512xf32>
    %cst_81 = arith.constant 0.000000e+00 : f32
    %180 = vector.broadcast %cst_81 : f32 to vector<16x512xf32>
    %181 = arith.cmpf oge, %151, %180 : vector<16x512xf32>
    %cst_82 = arith.constant 0.000000e+00 : f32
    %182 = vector.broadcast %cst_82 : f32 to vector<16x512xf32>
    %183 = arith.subf %182, %179 : vector<16x512xf32>
    %184 = arith.select %181, %179, %183 : vector<16x512xi1>, vector<16x512xf32>
    %cst_83 = arith.constant 5.000000e-01 : f32
    %185 = vector.broadcast %cst_83 : f32 to vector<16x512xf32>
    %186 = arith.mulf %185, %149 : vector<16x512xf32>
    %cst_84 = arith.constant 1.000000e+00 : f32
    %187 = vector.broadcast %cst_84 : f32 to vector<16x512xf32>
    %188 = arith.addf %187, %184 : vector<16x512xf32>
    %189 = arith.mulf %186, %188 : vector<16x512xf32>
    %c0_85 = arith.constant 0 : index
    %c0_86 = arith.constant 0 : index
    %190 = vector.load %arg22[%c0_85, %c0_86] : memref<512x128xbf16, #tpu.memory_space<vmem>>, vector<512x128xbf16>
    %c0_87 = arith.constant 0 : index
    %c0_88 = arith.constant 0 : index
    %191 = vector.load %arg23[%c0_87, %c0_88] : memref<1x128xf32, #tpu.memory_space<vmem>>, vector<1x128xf32>
    %192 = arith.truncf %189 : vector<16x512xf32> to vector<16x512xbf16>
    %cst_89 = arith.constant dense<0.000000e+00> : vector<16x128xf32>
    %193 = tpu.matmul %192, %190, %cst_89 {dimension_numbers = #tpu.dot_dimension_numbers<[1], [0], [0], [1], [0, 0, 1, 1], [], []>} : vector<16x512xbf16>, vector<512x128xbf16>, vector<16x128xf32> -> vector<16x128xf32>
    %194 = vector.broadcast %191 : vector<1x128xf32> to vector<16x128xf32>
    %195 = arith.addf %193, %194 : vector<16x128xf32>
    %196 = arith.addf %119, %195 : vector<16x128xf32>
    %c0_90 = arith.constant 0 : index
    %c0_91 = arith.constant 0 : index
    %c0_92 = arith.constant 0 : index
    %197 = vector.load %arg24[%c0_90, %c0_91, %c0_92] : memref<1x16x128xf32, #tpu.memory_space<vmem>>, vector<1x16x128xf32>
    %198 = vector.shape_cast %197 : vector<1x16x128xf32> to vector<16x128xf32>
    %199 = vector.shape_cast %196 : vector<16x128xf32> to vector<1x16x128xf32>
    tpu.vector_store %arg24[%c0_90, %c0_91, %c0_92], %199 {strides = array<i32>} : memref<1x16x128xf32, #tpu.memory_space<vmem>>, vector<1x16x128xf32>,
    return
  }
  func.func @transform_0(%arg0: i32, %arg1: i32) -> (i32, i32, i32) {
    %c0_i32 = arith.constant 0 : i32
    %c0_i32_0 = arith.constant 0 : i32
    return %arg0, %arg1, %c0_i32 : i32, i32, i32
  }
  func.func @transform_1(%arg0: i32, %arg1: i32) -> (i32, i32, i32) {
    %c0_i32 = arith.constant 0 : i32
    %c0_i32_0 = arith.constant 0 : i32
    return %arg0, %arg1, %c0_i32 : i32, i32, i32
  }
  func.func @transform_2(%arg0: i32, %arg1: i32) -> (i32, i32, i32) {
    %c0_i32 = arith.constant 0 : i32
    %c0_i32_0 = arith.constant 0 : i32
    %c0_i32_1 = arith.constant 0 : i32
    return %arg0, %c0_i32, %c0_i32_0 : i32, i32, i32
  }
  func.func @transform_3(%arg0: i32, %arg1: i32) -> (i32, i32, i32) {
    %c0_i32 = arith.constant 0 : i32
    %c0_i32_0 = arith.constant 0 : i32
    %c0_i32_1 = arith.constant 0 : i32
    return %arg0, %c0_i32, %c0_i32_0 : i32, i32, i32
  }
  func.func @transform_4(%arg0: i32, %arg1: i32) -> (i32, i32, i32) {
    %c0_i32 = arith.constant 0 : i32
    %c0_i32_0 = arith.constant 0 : i32
    %c0_i32_1 = arith.constant 0 : i32
    return %c0_i32, %arg1, %c0_i32_0 : i32, i32, i32
  }
  func.func @transform_5(%arg0: i32, %arg1: i32) -> (i32, i32, i32) {
    %c0_i32 = arith.constant 0 : i32
    %c0_i32_0 = arith.constant 0 : i32
    return %arg0, %arg1, %c0_i32 : i32, i32, i32
  }
  func.func @transform_6(%arg0: i32, %arg1: i32) -> (i32, i32) {
    %c0_i32 = arith.constant 0 : i32
    %c0_i32_0 = arith.constant 0 : i32
    %c0_i32_1 = arith.constant 0 : i32
    return %c0_i32, %c0_i32_0 : i32, i32
  }
  func.func @transform_7(%arg0: i32, %arg1: i32) -> (i32, i32) {
    %c0_i32 = arith.constant 0 : i32
    %c0_i32_0 = arith.constant 0 : i32
    %c0_i32_1 = arith.constant 0 : i32
    return %c0_i32, %c0_i32_0 : i32, i32
  }
  func.func @transform_8(%arg0: i32, %arg1: i32) -> (i32, i32) {
    %c0_i32 = arith.constant 0 : i32
    %c0_i32_0 = arith.constant 0 : i32
    %c0_i32_1 = arith.constant 0 : i32
    return %c0_i32, %c0_i32_0 : i32, i32
  }
  func.func @transform_9(%arg0: i32, %arg1: i32) -> (i32, i32) {
    %c0_i32 = arith.constant 0 : i32
    %c0_i32_0 = arith.constant 0 : i32
    %c0_i32_1 = arith.constant 0 : i32
    return %c0_i32, %c0_i32_0 : i32, i32
  }
  func.func @transform_10(%arg0: i32, %arg1: i32) -> (i32, i32) {
    %c0_i32 = arith.constant 0 : i32
    %c0_i32_0 = arith.constant 0 : i32
    %c0_i32_1 = arith.constant 0 : i32
    return %c0_i32, %c0_i32_0 : i32, i32
  }
  func.func @transform_11(%arg0: i32, %arg1: i32) -> (i32, i32) {
    %c0_i32 = arith.constant 0 : i32
    %c0_i32_0 = arith.constant 0 : i32
    %c0_i32_1 = arith.constant 0 : i32
    return %c0_i32, %c0_i32_0 : i32, i32
  }
  func.func @transform_12(%arg0: i32, %arg1: i32) -> (i32, i32) {
    %c0_i32 = arith.constant 0 : i32
    %c0_i32_0 = arith.constant 0 : i32
    %c0_i32_1 = arith.constant 0 : i32
    return %c0_i32, %c0_i32_0 : i32, i32
  }
  func.func @transform_13(%arg0: i32, %arg1: i32) -> (i32, i32) {
    %c0_i32 = arith.constant 0 : i32
    %c0_i32_0 = arith.constant 0 : i32
    %c0_i32_1 = arith.constant 0 : i32
    return %c0_i32, %c0_i32_0 : i32, i32
  }
  func.func @transform_14(%arg0: i32, %arg1: i32) -> (i32, i32) {
    %c0_i32 = arith.constant 0 : i32
    %c0_i32_0 = arith.constant 0 : i32
    %c0_i32_1 = arith.constant 0 : i32
    return %c0_i32, %c0_i32_0 : i32, i32
  }
  func.func @transform_15(%arg0: i32, %arg1: i32) -> (i32, i32) {
    %c0_i32 = arith.constant 0 : i32
    %c0_i32_0 = arith.constant 0 : i32
    %c0_i32_1 = arith.constant 0 : i32
    return %c0_i32, %c0_i32_0 : i32, i32
  }
  func.func @transform_16(%arg0: i32, %arg1: i32) -> (i32, i32) {
    %c0_i32 = arith.constant 0 : i32
    %c0_i32_0 = arith.constant 0 : i32
    %c0_i32_1 = arith.constant 0 : i32
    return %c0_i32, %c0_i32_0 : i32, i32
  }
  func.func @transform_17(%arg0: i32, %arg1: i32) -> (i32, i32) {
    %c0_i32 = arith.constant 0 : i32
    %c0_i32_0 = arith.constant 0 : i32
    %c0_i32_1 = arith.constant 0 : i32
    return %c0_i32, %c0_i32_0 : i32, i32
  }
  func.func @transform_18(%arg0: i32, %arg1: i32) -> (i32, i32) {
    %c0_i32 = arith.constant 0 : i32
    %c0_i32_0 = arith.constant 0 : i32
    %c0_i32_1 = arith.constant 0 : i32
    return %c0_i32, %c0_i32_0 : i32, i32
  }
  func.func @transform_19(%arg0: i32, %arg1: i32) -> (i32, i32) {
    %c0_i32 = arith.constant 0 : i32
    %c0_i32_0 = arith.constant 0 : i32
    %c0_i32_1 = arith.constant 0 : i32
    return %c0_i32, %c0_i32_0 : i32, i32
  }
  func.func @transform_20(%arg0: i32, %arg1: i32) -> (i32, i32) {
    %c0_i32 = arith.constant 0 : i32
    %c0_i32_0 = arith.constant 0 : i32
    %c0_i32_1 = arith.constant 0 : i32
    return %c0_i32, %c0_i32_0 : i32, i32
  }
  func.func @transform_21(%arg0: i32, %arg1: i32) -> (i32, i32) {
    %c0_i32 = arith.constant 0 : i32
    %c0_i32_0 = arith.constant 0 : i32
    %c0_i32_1 = arith.constant 0 : i32
    return %c0_i32, %c0_i32_0 : i32, i32
  }
  func.func @transform_22(%arg0: i32, %arg1: i32) -> (i32, i32, i32) {
    %c0_i32 = arith.constant 0 : i32
    %c0_i32_0 = arith.constant 0 : i32
    return %arg0, %arg1, %c0_i32 : i32, i32, i32
  }
}

module attributes {stable_mosaic.version = 11 : i64} {
  func.func @kernel(%arg0: i32, %arg1: i32, %arg2: memref<1x16x128xf32, #tpu.memory_space<vmem>>, %arg3: memref<1x128xf32, #tpu.memory_space<vmem>>, %arg4: memref<1x128xf32, #tpu.memory_space<vmem>>, %arg5: memref<128x384xbf16, #tpu.memory_space<vmem>>, %arg6: memref<1x384xf32, #tpu.memory_space<vmem>>, %arg7: memref<1x16x128xbf16, #tpu.memory_space<vmem>>, %arg8: memref<1x16x256xbf16, #tpu.memory_space<vmem>>) attributes {dimension_semantics = [#tpu.dimension_semantics<parallel>, #tpu.dimension_semantics<parallel>], iteration_bounds = array<i64: 2, 1>, scalar_prefetch = 0 : i64, scratch_operands = 0 : i64, tpu.core_type = #tpu.core_type<tc>, window_params = [{transform_indices = @transform_0, window_bounds = array<i64: 1, 16, 128>}, {pipeline_mode = #tpu.pipeline_mode<synchronous>, transform_indices = @transform_1, window_bounds = array<i64: 1, 128>}, {pipeline_mode = #tpu.pipeline_mode<synchronous>, transform_indices = @transform_2, window_bounds = array<i64: 1, 128>}, {pipeline_mode = #tpu.pipeline_mode<synchronous>, transform_indices = @transform_3, window_bounds = array<i64: 128, 384>}, {pipeline_mode = #tpu.pipeline_mode<synchronous>, transform_indices = @transform_4, window_bounds = array<i64: 1, 384>}, {transform_indices = @transform_5, window_bounds = array<i64: 1, 16, 128>}, {transform_indices = @transform_6, window_bounds = array<i64: 1, 16, 256>}]} {
    %c0 = arith.constant 0 : index
    %c0_0 = arith.constant 0 : index
    %c0_1 = arith.constant 0 : index
    %0 = vector.load %arg2[%c0, %c0_0, %c0_1] : memref<1x16x128xf32, #tpu.memory_space<vmem>>, vector<1x16x128xf32>
    %1 = vector.shape_cast %0 : vector<1x16x128xf32> to vector<16x128xf32>
    %c0_2 = arith.constant 0 : index
    %c0_3 = arith.constant 0 : index
    %2 = vector.load %arg3[%c0_2, %c0_3] : memref<1x128xf32, #tpu.memory_space<vmem>>, vector<1x128xf32>
    %c0_4 = arith.constant 0 : index
    %c0_5 = arith.constant 0 : index
    %3 = vector.load %arg4[%c0_4, %c0_5] : memref<1x128xf32, #tpu.memory_space<vmem>>, vector<1x128xf32>
    %cst = arith.constant dense<0.000000e+00> : vector<16xf32>
    %4 = vector.multi_reduction <add>, %1, %cst [1] : vector<16x128xf32> to vector<16xf32>
    %5 = vector.shape_cast %4 : vector<16xf32> to vector<16x1xf32>
    %cst_6 = arith.constant 1.280000e+02 : f32
    %6 = vector.broadcast %cst_6 : f32 to vector<16x1xf32>
    %7 = arith.divf %5, %6 : vector<16x1xf32>
    %8 = vector.broadcast %7 : vector<16x1xf32> to vector<16x128xf32>
    %9 = arith.subf %1, %8 : vector<16x128xf32>
    %10 = arith.mulf %9, %9 : vector<16x128xf32>
    %cst_7 = arith.constant dense<0.000000e+00> : vector<16xf32>
    %11 = vector.multi_reduction <add>, %10, %cst_7 [1] : vector<16x128xf32> to vector<16xf32>
    %12 = vector.shape_cast %11 : vector<16xf32> to vector<16x1xf32>
    %cst_8 = arith.constant 1.280000e+02 : f32
    %13 = vector.broadcast %cst_8 : f32 to vector<16x1xf32>
    %14 = arith.divf %12, %13 : vector<16x1xf32>
    %15 = vector.broadcast %7 : vector<16x1xf32> to vector<16x128xf32>
    %16 = arith.subf %1, %15 : vector<16x128xf32>
    %cst_9 = arith.constant 9.99999974E-6 : f32
    %17 = vector.broadcast %cst_9 : f32 to vector<16x1xf32>
    %18 = arith.addf %14, %17 : vector<16x1xf32>
    %19 = math.rsqrt %18 : vector<16x1xf32>
    %20 = vector.broadcast %19 : vector<16x1xf32> to vector<16x128xf32>
    %21 = arith.mulf %16, %20 : vector<16x128xf32>
    %22 = vector.broadcast %2 : vector<1x128xf32> to vector<16x128xf32>
    %23 = arith.mulf %21, %22 : vector<16x128xf32>
    %24 = vector.broadcast %3 : vector<1x128xf32> to vector<16x128xf32>
    %25 = arith.addf %23, %24 : vector<16x128xf32>
    %c0_10 = arith.constant 0 : index
    %c0_11 = arith.constant 0 : index
    %26 = vector.load %arg5[%c0_10, %c0_11] : memref<128x384xbf16, #tpu.memory_space<vmem>>, vector<128x384xbf16>
    %c0_12 = arith.constant 0 : index
    %c0_13 = arith.constant 0 : index
    %27 = vector.load %arg6[%c0_12, %c0_13] : memref<1x384xf32, #tpu.memory_space<vmem>>, vector<1x384xf32>
    %28 = arith.truncf %25 : vector<16x128xf32> to vector<16x128xbf16>
    %cst_14 = arith.constant dense<0.000000e+00> : vector<16x384xf32>
    %29 = tpu.matmul %28, %26, %cst_14 {dimension_numbers = #tpu.dot_dimension_numbers<[1], [0], [0], [1], [0, 0, 1, 1], [], []>} : vector<16x128xbf16>, vector<128x384xbf16>, vector<16x384xf32> -> vector<16x384xf32>
    %30 = vector.broadcast %27 : vector<1x384xf32> to vector<16x384xf32>
    %31 = arith.addf %29, %30 : vector<16x384xf32>
    %32 = vector.extract_strided_slice %31 {offsets = [0, 0], sizes = [16, 128], strides = [1, 1]} : vector<16x384xf32> to vector<16x128xf32>
    %cst_15 = arith.constant 0.176776692 : f32
    %33 = vector.broadcast %cst_15 : f32 to vector<16x128xf32>
    %34 = arith.mulf %32, %33 : vector<16x128xf32>
    %35 = arith.truncf %34 : vector<16x128xf32> to vector<16x128xbf16>
    %c0_16 = arith.constant 0 : index
    %c0_17 = arith.constant 0 : index
    %c0_18 = arith.constant 0 : index
    %36 = vector.load %arg7[%c0_16, %c0_17, %c0_18] : memref<1x16x128xbf16, #tpu.memory_space<vmem>>, vector<1x16x128xbf16>
    %37 = vector.shape_cast %36 : vector<1x16x128xbf16> to vector<16x128xbf16>
    %38 = vector.shape_cast %35 : vector<16x128xbf16> to vector<1x16x128xbf16>
    tpu.vector_store %arg7[%c0_16, %c0_17, %c0_18], %38 {strides = array<i32>} : memref<1x16x128xbf16, #tpu.memory_space<vmem>>, vector<1x16x128xbf16>,
    %39 = vector.extract_strided_slice %31 {offsets = [0, 128], sizes = [16, 256], strides = [1, 1]} : vector<16x384xf32> to vector<16x256xf32>
    %40 = arith.truncf %39 : vector<16x256xf32> to vector<16x256xbf16>
    %c0_19 = arith.constant 0 : index
    %c0_20 = arith.constant 0 : index
    %c0_21 = arith.constant 0 : index
    %41 = vector.load %arg8[%c0_19, %c0_20, %c0_21] : memref<1x16x256xbf16, #tpu.memory_space<vmem>>, vector<1x16x256xbf16>
    %42 = vector.shape_cast %41 : vector<1x16x256xbf16> to vector<16x256xbf16>
    %43 = vector.shape_cast %40 : vector<16x256xbf16> to vector<1x16x256xbf16>
    tpu.vector_store %arg8[%c0_19, %c0_20, %c0_21], %43 {strides = array<i32>} : memref<1x16x256xbf16, #tpu.memory_space<vmem>>, vector<1x16x256xbf16>,
    return
  }
  func.func @transform_0(%arg0: i32, %arg1: i32) -> (i32, i32, i32) {
    %c0_i32 = arith.constant 0 : i32
    %c0_i32_0 = arith.constant 0 : i32
    return %arg0, %arg1, %c0_i32 : i32, i32, i32
  }
  func.func @transform_1(%arg0: i32, %arg1: i32) -> (i32, i32) {
    %c0_i32 = arith.constant 0 : i32
    %c0_i32_0 = arith.constant 0 : i32
    %c0_i32_1 = arith.constant 0 : i32
    return %c0_i32, %c0_i32_0 : i32, i32
  }
  func.func @transform_2(%arg0: i32, %arg1: i32) -> (i32, i32) {
    %c0_i32 = arith.constant 0 : i32
    %c0_i32_0 = arith.constant 0 : i32
    %c0_i32_1 = arith.constant 0 : i32
    return %c0_i32, %c0_i32_0 : i32, i32
  }
  func.func @transform_3(%arg0: i32, %arg1: i32) -> (i32, i32) {
    %c0_i32 = arith.constant 0 : i32
    %c0_i32_0 = arith.constant 0 : i32
    %c0_i32_1 = arith.constant 0 : i32
    return %c0_i32, %c0_i32_0 : i32, i32
  }
  func.func @transform_4(%arg0: i32, %arg1: i32) -> (i32, i32) {
    %c0_i32 = arith.constant 0 : i32
    %c0_i32_0 = arith.constant 0 : i32
    %c0_i32_1 = arith.constant 0 : i32
    return %c0_i32, %c0_i32_0 : i32, i32
  }
  func.func @transform_5(%arg0: i32, %arg1: i32) -> (i32, i32, i32) {
    %c0_i32 = arith.constant 0 : i32
    %c0_i32_0 = arith.constant 0 : i32
    return %arg0, %arg1, %c0_i32 : i32, i32, i32
  }
  func.func @transform_6(%arg0: i32, %arg1: i32) -> (i32, i32, i32) {
    %c0_i32 = arith.constant 0 : i32
    %c0_i32_0 = arith.constant 0 : i32
    return %arg0, %arg1, %c0_i32 : i32, i32, i32
  }
}

module attributes {stable_mosaic.version = 11 : i64} {
  func.func @kernel(%arg0: i32, %arg1: i32, %arg2: memref<1x16x128xf32, #tpu.memory_space<vmem>>, %arg3: memref<1x128xf32, #tpu.memory_space<vmem>>, %arg4: memref<1x128xf32, #tpu.memory_space<vmem>>, %arg5: memref<128x384xbf16, #tpu.memory_space<vmem>>, %arg6: memref<1x384xf32, #tpu.memory_space<vmem>>, %arg7: memref<1x16x128xbf16, #tpu.memory_space<vmem>>, %arg8: memref<1x16x256xbf16, #tpu.memory_space<vmem>>) attributes {dimension_semantics = [#tpu.dimension_semantics<parallel>, #tpu.dimension_semantics<parallel>], iteration_bounds = array<i64: 2, 1>, scalar_prefetch = 0 : i64, scratch_operands = 0 : i64, tpu.core_type = #tpu.core_type<tc>, window_params = [{transform_indices = @transform_0, window_bounds = array<i64: 1, 16, 128>}, {pipeline_mode = #tpu.pipeline_mode<synchronous>, transform_indices = @transform_1, window_bounds = array<i64: 1, 128>}, {pipeline_mode = #tpu.pipeline_mode<synchronous>, transform_indices = @transform_2, window_bounds = array<i64: 1, 128>}, {pipeline_mode = #tpu.pipeline_mode<synchronous>, transform_indices = @transform_3, window_bounds = array<i64: 128, 384>}, {pipeline_mode = #tpu.pipeline_mode<synchronous>, transform_indices = @transform_4, window_bounds = array<i64: 1, 384>}, {transform_indices = @transform_5, window_bounds = array<i64: 1, 16, 128>}, {transform_indices = @transform_6, window_bounds = array<i64: 1, 16, 256>}]} {
    %c0 = arith.constant 0 : index
    %c0_0 = arith.constant 0 : index
    %c0_1 = arith.constant 0 : index
    %0 = vector.load %arg2[%c0, %c0_0, %c0_1] : memref<1x16x128xf32, #tpu.memory_space<vmem>>, vector<1x16x128xf32>
    %1 = vector.shape_cast %0 : vector<1x16x128xf32> to vector<16x128xf32>
    %c0_2 = arith.constant 0 : index
    %c0_3 = arith.constant 0 : index
    %2 = vector.load %arg3[%c0_2, %c0_3] : memref<1x128xf32, #tpu.memory_space<vmem>>, vector<1x128xf32>
    %c0_4 = arith.constant 0 : index
    %c0_5 = arith.constant 0 : index
    %3 = vector.load %arg4[%c0_4, %c0_5] : memref<1x128xf32, #tpu.memory_space<vmem>>, vector<1x128xf32>
    %cst = arith.constant dense<0.000000e+00> : vector<16xf32>
    %4 = vector.multi_reduction <add>, %1, %cst [1] : vector<16x128xf32> to vector<16xf32>
    %5 = vector.shape_cast %4 : vector<16xf32> to vector<16x1xf32>
    %cst_6 = arith.constant 1.280000e+02 : f32
    %6 = vector.broadcast %cst_6 : f32 to vector<16x1xf32>
    %7 = arith.divf %5, %6 : vector<16x1xf32>
    %8 = vector.broadcast %7 : vector<16x1xf32> to vector<16x128xf32>
    %9 = arith.subf %1, %8 : vector<16x128xf32>
    %10 = arith.mulf %9, %9 : vector<16x128xf32>
    %cst_7 = arith.constant dense<0.000000e+00> : vector<16xf32>
    %11 = vector.multi_reduction <add>, %10, %cst_7 [1] : vector<16x128xf32> to vector<16xf32>
    %12 = vector.shape_cast %11 : vector<16xf32> to vector<16x1xf32>
    %cst_8 = arith.constant 1.280000e+02 : f32
    %13 = vector.broadcast %cst_8 : f32 to vector<16x1xf32>
    %14 = arith.divf %12, %13 : vector<16x1xf32>
    %15 = vector.broadcast %7 : vector<16x1xf32> to vector<16x128xf32>
    %16 = arith.subf %1, %15 : vector<16x128xf32>
    %cst_9 = arith.constant 9.99999974E-6 : f32
    %17 = vector.broadcast %cst_9 : f32 to vector<16x1xf32>
    %18 = arith.addf %14, %17 : vector<16x1xf32>
    %19 = math.rsqrt %18 : vector<16x1xf32>
    %20 = vector.broadcast %19 : vector<16x1xf32> to vector<16x128xf32>
    %21 = arith.mulf %16, %20 : vector<16x128xf32>
    %22 = vector.broadcast %2 : vector<1x128xf32> to vector<16x128xf32>
    %23 = arith.mulf %21, %22 : vector<16x128xf32>
    %24 = vector.broadcast %3 : vector<1x128xf32> to vector<16x128xf32>
    %25 = arith.addf %23, %24 : vector<16x128xf32>
    %c0_10 = arith.constant 0 : index
    %c0_11 = arith.constant 0 : index
    %26 = vector.load %arg5[%c0_10, %c0_11] : memref<128x384xbf16, #tpu.memory_space<vmem>>, vector<128x384xbf16>
    %c0_12 = arith.constant 0 : index
    %c0_13 = arith.constant 0 : index
    %27 = vector.load %arg6[%c0_12, %c0_13] : memref<1x384xf32, #tpu.memory_space<vmem>>, vector<1x384xf32>
    %28 = arith.truncf %25 : vector<16x128xf32> to vector<16x128xbf16>
    %cst_14 = arith.constant dense<0.000000e+00> : vector<16x384xf32>
    %29 = tpu.matmul %28, %26, %cst_14 {dimension_numbers = #tpu.dot_dimension_numbers<[1], [0], [0], [1], [0, 0, 1, 1], [], []>} : vector<16x128xbf16>, vector<128x384xbf16>, vector<16x384xf32> -> vector<16x384xf32>
    %30 = vector.broadcast %27 : vector<1x384xf32> to vector<16x384xf32>
    %31 = arith.addf %29, %30 : vector<16x384xf32>
    %32 = vector.extract_strided_slice %31 {offsets = [0, 0], sizes = [16, 128], strides = [1, 1]} : vector<16x384xf32> to vector<16x128xf32>
    %cst_15 = arith.constant 0.176776692 : f32
    %33 = vector.broadcast %cst_15 : f32 to vector<16x128xf32>
    %34 = arith.mulf %32, %33 : vector<16x128xf32>
    %35 = arith.truncf %34 : vector<16x128xf32> to vector<16x128xbf16>
    %c0_16 = arith.constant 0 : index
    %c0_17 = arith.constant 0 : index
    %c0_18 = arith.constant 0 : index
    %36 = vector.load %arg7[%c0_16, %c0_17, %c0_18] : memref<1x16x128xbf16, #tpu.memory_space<vmem>>, vector<1x16x128xbf16>
    %37 = vector.shape_cast %36 : vector<1x16x128xbf16> to vector<16x128xbf16>
    %38 = vector.shape_cast %35 : vector<16x128xbf16> to vector<1x16x128xbf16>
    tpu.vector_store %arg7[%c0_16, %c0_17, %c0_18], %38 {strides = array<i32>} : memref<1x16x128xbf16, #tpu.memory_space<vmem>>, vector<1x16x128xbf16>,
    %39 = vector.extract_strided_slice %31 {offsets = [0, 128], sizes = [16, 256], strides = [1, 1]} : vector<16x384xf32> to vector<16x256xf32>
    %40 = arith.truncf %39 : vector<16x256xf32> to vector<16x256xbf16>
    %c0_19 = arith.constant 0 : index
    %c0_20 = arith.constant 0 : index
    %c0_21 = arith.constant 0 : index
    %41 = vector.load %arg8[%c0_19, %c0_20, %c0_21] : memref<1x16x256xbf16, #tpu.memory_space<vmem>>, vector<1x16x256xbf16>
    %42 = vector.shape_cast %41 : vector<1x16x256xbf16> to vector<16x256xbf16>
    %43 = vector.shape_cast %40 : vector<16x256xbf16> to vector<1x16x256xbf16>
    tpu.vector_store %arg8[%c0_19, %c0_20, %c0_21], %43 {strides = array<i32>} : memref<1x16x256xbf16, #tpu.memory_space<vmem>>, vector<1x16x256xbf16>,
    return
  }
  func.func @transform_0(%arg0: i32, %arg1: i32) -> (i32, i32, i32) {
    %c0_i32 = arith.constant 0 : i32
    %c0_i32_0 = arith.constant 0 : i32
    return %arg0, %arg1, %c0_i32 : i32, i32, i32
  }
  func.func @transform_1(%arg0: i32, %arg1: i32) -> (i32, i32) {
    %c0_i32 = arith.constant 0 : i32
    %c0_i32_0 = arith.constant 0 : i32
    %c0_i32_1 = arith.constant 0 : i32
    return %c0_i32, %c0_i32_0 : i32, i32
  }
  func.func @transform_2(%arg0: i32, %arg1: i32) -> (i32, i32) {
    %c0_i32 = arith.constant 0 : i32
    %c0_i32_0 = arith.constant 0 : i32
    %c0_i32_1 = arith.constant 0 : i32
    return %c0_i32, %c0_i32_0 : i32, i32
  }
  func.func @transform_3(%arg0: i32, %arg1: i32) -> (i32, i32) {
    %c0_i32 = arith.constant 0 : i32
    %c0_i32_0 = arith.constant 0 : i32
    %c0_i32_1 = arith.constant 0 : i32
    return %c0_i32, %c0_i32_0 : i32, i32
  }
  func.func @transform_4(%arg0: i32, %arg1: i32) -> (i32, i32) {
    %c0_i32 = arith.constant 0 : i32
    %c0_i32_0 = arith.constant 0 : i32
    %c0_i32_1 = arith.constant 0 : i32
    return %c0_i32, %c0_i32_0 : i32, i32
  }
  func.func @transform_5(%arg0: i32, %arg1: i32) -> (i32, i32, i32) {
    %c0_i32 = arith.constant 0 : i32
    %c0_i32_0 = arith.constant 0 : i32
    return %arg0, %arg1, %c0_i32 : i32, i32, i32
  }
  func.func @transform_6(%arg0: i32, %arg1: i32) -> (i32, i32, i32) {
    %c0_i32 = arith.constant 0 : i32
    %c0_i32_0 = arith.constant 0 : i32
    return %arg0, %arg1, %c0_i32 : i32, i32, i32
  }
}

module attributes {stable_mosaic.version = 11 : i64} {
  func.func @kernel(%arg0: i32, %arg1: i32, %arg2: memref<1x16x128xf32, #tpu.memory_space<vmem>>, %arg3: memref<1x16x128xbf16, #tpu.memory_space<vmem>>, %arg4: memref<1x16x256xbf16, #tpu.memory_space<vmem>>, %arg5: memref<1x8x128xf32, #tpu.memory_space<vmem>>, %arg6: memref<1x16x16xbf16, #tpu.memory_space<vmem>>, %arg7: memref<1x16x1xi32, #tpu.memory_space<vmem>>, %arg8: memref<128x128xbf16, #tpu.memory_space<vmem>>, %arg9: memref<1x128xf32, #tpu.memory_space<vmem>>, %arg10: memref<128x128xbf16, #tpu.memory_space<vmem>>, %arg11: memref<1x128xf32, #tpu.memory_space<vmem>>, %arg12: memref<128x256xbf16, #tpu.memory_space<vmem>>, %arg13: memref<1x256xf32, #tpu.memory_space<vmem>>, %arg14: memref<128x128xbf16, #tpu.memory_space<vmem>>, %arg15: memref<1x128xf32, #tpu.memory_space<vmem>>, %arg16: memref<1x128xf32, #tpu.memory_space<vmem>>, %arg17: memref<1x128xf32, #tpu.memory_space<vmem>>, %arg18: memref<1x128xf32, #tpu.memory_space<vmem>>, %arg19: memref<1x128xf32, #tpu.memory_space<vmem>>, %arg20: memref<128x512xbf16, #tpu.memory_space<vmem>>, %arg21: memref<1x512xf32, #tpu.memory_space<vmem>>, %arg22: memref<512x128xbf16, #tpu.memory_space<vmem>>, %arg23: memref<1x128xf32, #tpu.memory_space<vmem>>, %arg24: memref<1x16x128xf32, #tpu.memory_space<vmem>>) attributes {dimension_semantics = [#tpu.dimension_semantics<parallel>, #tpu.dimension_semantics<parallel>], iteration_bounds = array<i64: 2, 1>, scalar_prefetch = 0 : i64, scratch_operands = 0 : i64, tpu.core_type = #tpu.core_type<tc>, window_params = [{transform_indices = @transform_0, window_bounds = array<i64: 1, 16, 128>}, {transform_indices = @transform_1, window_bounds = array<i64: 1, 16, 128>}, {transform_indices = @transform_2, window_bounds = array<i64: 1, 16, 256>}, {transform_indices = @transform_3, window_bounds = array<i64: 1, 8, 128>}, {transform_indices = @transform_4, window_bounds = array<i64: 1, 16, 16>}, {transform_indices = @transform_5, window_bounds = array<i64: 1, 16, 1>}, {pipeline_mode = #tpu.pipeline_mode<synchronous>, transform_indices = @transform_6, window_bounds = array<i64: 128, 128>}, {pipeline_mode = #tpu.pipeline_mode<synchronous>, transform_indices = @transform_7, window_bounds = array<i64: 1, 128>}, {pipeline_mode = #tpu.pipeline_mode<synchronous>, transform_indices = @transform_8, window_bounds = array<i64: 128, 128>}, {pipeline_mode = #tpu.pipeline_mode<synchronous>, transform_indices = @transform_9, window_bounds = array<i64: 1, 128>}, {pipeline_mode = #tpu.pipeline_mode<synchronous>, transform_indices = @transform_10, window_bounds = array<i64: 128, 256>}, {pipeline_mode = #tpu.pipeline_mode<synchronous>, transform_indices = @transform_11, window_bounds = array<i64: 1, 256>}, {pipeline_mode = #tpu.pipeline_mode<synchronous>, transform_indices = @transform_12, window_bounds = array<i64: 128, 128>}, {pipeline_mode = #tpu.pipeline_mode<synchronous>, transform_indices = @transform_13, window_bounds = array<i64: 1, 128>}, {pipeline_mode = #tpu.pipeline_mode<synchronous>, transform_indices = @transform_14, window_bounds = array<i64: 1, 128>}, {pipeline_mode = #tpu.pipeline_mode<synchronous>, transform_indices = @transform_15, window_bounds = array<i64: 1, 128>}, {pipeline_mode = #tpu.pipeline_mode<synchronous>, transform_indices = @transform_16, window_bounds = array<i64: 1, 128>}, {pipeline_mode = #tpu.pipeline_mode<synchronous>, transform_indices = @transform_17, window_bounds = array<i64: 1, 128>}, {pipeline_mode = #tpu.pipeline_mode<synchronous>, transform_indices = @transform_18, window_bounds = array<i64: 128, 512>}, {pipeline_mode = #tpu.pipeline_mode<synchronous>, transform_indices = @transform_19, window_bounds = array<i64: 1, 512>}, {pipeline_mode = #tpu.pipeline_mode<synchronous>, transform_indices = @transform_20, window_bounds = array<i64: 512, 128>}, {pipeline_mode = #tpu.pipeline_mode<synchronous>, transform_indices = @transform_21, window_bounds = array<i64: 1, 128>}, {transform_indices = @transform_22, window_bounds = array<i64: 1, 16, 128>}]} {
    %c0 = arith.constant 0 : index
    %c0_0 = arith.constant 0 : index
    %c0_1 = arith.constant 0 : index
    %0 = vector.load %arg3[%c0, %c0_0, %c0_1] : memref<1x16x128xbf16, #tpu.memory_space<vmem>>, vector<1x16x128xbf16>
    %1 = vector.shape_cast %0 : vector<1x16x128xbf16> to vector<16x128xbf16>
    %2 = vector.shape_cast %1 : vector<16x128xbf16> to vector<16x4x32xbf16>
    %c0_2 = arith.constant 0 : index
    %c0_3 = arith.constant 0 : index
    %c0_4 = arith.constant 0 : index
    %3 = vector.load %arg4[%c0_2, %c0_3, %c0_4] : memref<1x16x256xbf16, #tpu.memory_space<vmem>>, vector<1x16x256xbf16>
    %4 = vector.shape_cast %3 : vector<1x16x256xbf16> to vector<16x256xbf16>
    %5 = vector.extract_strided_slice %4 {offsets = [0, 0], sizes = [16, 128], strides = [1, 1]} : vector<16x256xbf16> to vector<16x128xbf16>
    %6 = vector.shape_cast %5 : vector<16x128xbf16> to vector<16x4x32xbf16>
    %7 = vector.extract_strided_slice %4 {offsets = [0, 128], sizes = [16, 128], strides = [1, 1]} : vector<16x256xbf16> to vector<16x128xbf16>
    %8 = vector.shape_cast %7 : vector<16x128xbf16> to vector<16x4x32xbf16>
    "tpu.trace_start"() <{level = 10 : i32, message = "qhd,khd->hqk"}> : () -> ()
    %cst = arith.constant dense<0.000000e+00> : vector<4x16x16xf32>
    %9 = tpu.matmul %2, %6, %cst {dimension_numbers = #tpu.dot_dimension_numbers<[2], [2], [0], [0], [0, 1, 0, 0, 1, 0], [1], [1]>} : vector<16x4x32xbf16>, vector<16x4x32xbf16>, vector<4x16x16xf32> -> vector<4x16x16xf32>
    "tpu.trace_stop"() : () -> ()
    %c0_5 = arith.constant 0 : index
    %c0_6 = arith.constant 0 : index
    %c0_7 = arith.constant 0 : index
    %10 = vector.load %arg6[%c0_5, %c0_6, %c0_7] : memref<1x16x16xbf16, #tpu.memory_space<vmem>>, vector<1x16x16xbf16>
    %11 = vector.shape_cast %10 : vector<1x16x16xbf16> to vector<16x16xbf16>
    %12 = arith.extf %11 : vector<16x16xbf16> to vector<16x16xf32>
    %13 = vector.shape_cast %12 : vector<16x16xf32> to vector<1x16x16xf32>
    %14 = vector.broadcast %13 : vector<1x16x16xf32> to vector<4x16x16xf32>
    %15 = arith.addf %9, %14 : vector<4x16x16xf32>
    %cst_8 = arith.constant dense<0xFF800000> : vector<4x16xf32>
    %16 = vector.multi_reduction <maximumf>, %15, %cst_8 [2] : vector<4x16x16xf32> to vector<4x16xf32>
    %17 = vector.shape_cast %16 : vector<4x16xf32> to vector<4x16x1xf32>
    %18 = vector.broadcast %17 : vector<4x16x1xf32> to vector<4x16x16xf32>
    %19 = arith.subf %15, %18 : vector<4x16x16xf32>
    %20 = math.exp %19 : vector<4x16x16xf32>
    %cst_9 = arith.constant dense<0.000000e+00> : vector<4x16xf32>
    %21 = vector.multi_reduction <add>, %20, %cst_9 [2] : vector<4x16x16xf32> to vector<4x16xf32>
    %22 = vector.shape_cast %21 : vector<4x16xf32> to vector<4x16x1xf32>
    %23 = tpu.reciprocal %22 {approx = true} : vector<4x16x1xf32> -> vector<4x16x1xf32>
    %24 = vector.broadcast %23 : vector<4x16x1xf32> to vector<4x16x16xf32>
    %25 = arith.mulf %20, %24 : vector<4x16x16xf32>
    %26 = arith.truncf %25 : vector<4x16x16xf32> to vector<4x16x16xbf16>
    "tpu.trace_start"() <{level = 10 : i32, message = "hqk,khd->qhd"}> : () -> ()
    %cst_10 = arith.constant dense<0.000000e+00> : vector<4x32x16xf32>
    %27 = tpu.matmul %8, %26, %cst_10 {dimension_numbers = #tpu.dot_dimension_numbers<[0], [2], [2], [1], [0, 1, 0, 2, 1, 1], [1], [0]>} : vector<16x4x32xbf16>, vector<4x16x16xbf16>, vector<4x32x16xf32> -> vector<4x32x16xf32>
    %28 = tpu.transpose %27, [2, 0, 1] : vector<4x32x16xf32> -> vector<16x4x32xf32>
    "tpu.trace_stop"() : () -> ()
    %29 = vector.shape_cast %28 : vector<16x4x32xf32> to vector<16x128xf32>
    %c0_11 = arith.constant 0 : index
    %c0_12 = arith.constant 0 : index
    %c0_13 = arith.constant 0 : index
    %30 = vector.load %arg2[%c0_11, %c0_12, %c0_13] : memref<1x16x128xf32, #tpu.memory_space<vmem>>, vector<1x16x128xf32>
    %31 = vector.shape_cast %30 : vector<1x16x128xf32> to vector<16x128xf32>
    %c0_14 = arith.constant 0 : index
    %c0_15 = arith.constant 0 : index
    %32 = vector.load %arg8[%c0_14, %c0_15] : memref<128x128xbf16, #tpu.memory_space<vmem>>, vector<128x128xbf16>
    %c0_16 = arith.constant 0 : index
    %c0_17 = arith.constant 0 : index
    %33 = vector.load %arg9[%c0_16, %c0_17] : memref<1x128xf32, #tpu.memory_space<vmem>>, vector<1x128xf32>
    %34 = arith.truncf %29 : vector<16x128xf32> to vector<16x128xbf16>
    %cst_18 = arith.constant dense<0.000000e+00> : vector<16x128xf32>
    %35 = tpu.matmul %34, %32, %cst_18 {dimension_numbers = #tpu.dot_dimension_numbers<[1], [0], [0], [1], [0, 0, 1, 1], [], []>} : vector<16x128xbf16>, vector<128x128xbf16>, vector<16x128xf32> -> vector<16x128xf32>
    %36 = vector.broadcast %33 : vector<1x128xf32> to vector<16x128xf32>
    %37 = arith.addf %35, %36 : vector<16x128xf32>
    %38 = arith.addf %31, %37 : vector<16x128xf32>
    %c0_19 = arith.constant 0 : index
    %c0_20 = arith.constant 0 : index
    %39 = vector.load %arg16[%c0_19, %c0_20] : memref<1x128xf32, #tpu.memory_space<vmem>>, vector<1x128xf32>
    %c0_21 = arith.constant 0 : index
    %c0_22 = arith.constant 0 : index
    %40 = vector.load %arg17[%c0_21, %c0_22] : memref<1x128xf32, #tpu.memory_space<vmem>>, vector<1x128xf32>
    %cst_23 = arith.constant dense<0.000000e+00> : vector<16xf32>
    %41 = vector.multi_reduction <add>, %38, %cst_23 [1] : vector<16x128xf32> to vector<16xf32>
    %42 = vector.shape_cast %41 : vector<16xf32> to vector<16x1xf32>
    %cst_24 = arith.constant 1.280000e+02 : f32
    %43 = vector.broadcast %cst_24 : f32 to vector<16x1xf32>
    %44 = arith.divf %42, %43 : vector<16x1xf32>
    %45 = vector.broadcast %44 : vector<16x1xf32> to vector<16x128xf32>
    %46 = arith.subf %38, %45 : vector<16x128xf32>
    %47 = arith.mulf %46, %46 : vector<16x128xf32>
    %cst_25 = arith.constant dense<0.000000e+00> : vector<16xf32>
    %48 = vector.multi_reduction <add>, %47, %cst_25 [1] : vector<16x128xf32> to vector<16xf32>
    %49 = vector.shape_cast %48 : vector<16xf32> to vector<16x1xf32>
    %cst_26 = arith.constant 1.280000e+02 : f32
    %50 = vector.broadcast %cst_26 : f32 to vector<16x1xf32>
    %51 = arith.divf %49, %50 : vector<16x1xf32>
    %52 = vector.broadcast %44 : vector<16x1xf32> to vector<16x128xf32>
    %53 = arith.subf %38, %52 : vector<16x128xf32>
    %cst_27 = arith.constant 9.99999974E-6 : f32
    %54 = vector.broadcast %cst_27 : f32 to vector<16x1xf32>
    %55 = arith.addf %51, %54 : vector<16x1xf32>
    %56 = math.rsqrt %55 : vector<16x1xf32>
    %57 = vector.broadcast %56 : vector<16x1xf32> to vector<16x128xf32>
    %58 = arith.mulf %53, %57 : vector<16x128xf32>
    %59 = vector.broadcast %39 : vector<1x128xf32> to vector<16x128xf32>
    %60 = arith.mulf %58, %59 : vector<16x128xf32>
    %61 = vector.broadcast %40 : vector<1x128xf32> to vector<16x128xf32>
    %62 = arith.addf %60, %61 : vector<16x128xf32>
    %c0_28 = arith.constant 0 : index
    %c0_29 = arith.constant 0 : index
    %63 = vector.load %arg10[%c0_28, %c0_29] : memref<128x128xbf16, #tpu.memory_space<vmem>>, vector<128x128xbf16>
    %c0_30 = arith.constant 0 : index
    %c0_31 = arith.constant 0 : index
    %64 = vector.load %arg11[%c0_30, %c0_31] : memref<1x128xf32, #tpu.memory_space<vmem>>, vector<1x128xf32>
    %65 = arith.truncf %62 : vector<16x128xf32> to vector<16x128xbf16>
    %cst_32 = arith.constant dense<0.000000e+00> : vector<16x128xf32>
    %66 = tpu.matmul %65, %63, %cst_32 {dimension_numbers = #tpu.dot_dimension_numbers<[1], [0], [0], [1], [0, 0, 1, 1], [], []>} : vector<16x128xbf16>, vector<128x128xbf16>, vector<16x128xf32> -> vector<16x128xf32>
    %67 = vector.broadcast %64 : vector<1x128xf32> to vector<16x128xf32>
    %68 = arith.addf %66, %67 : vector<16x128xf32>
    %cst_33 = arith.constant 0.176776692 : f32
    %69 = vector.broadcast %cst_33 : f32 to vector<16x128xf32>
    %70 = arith.mulf %68, %69 : vector<16x128xf32>
    %71 = arith.truncf %70 : vector<16x128xf32> to vector<16x128xbf16>
    %c0_34 = arith.constant 0 : index
    %c0_35 = arith.constant 0 : index
    %c0_36 = arith.constant 0 : index
    %72 = vector.load %arg5[%c0_34, %c0_35, %c0_36] : memref<1x8x128xf32, #tpu.memory_space<vmem>>, vector<1x8x128xf32>
    %73 = vector.shape_cast %72 : vector<1x8x128xf32> to vector<8x128xf32>
    %c0_37 = arith.constant 0 : index
    %c0_38 = arith.constant 0 : index
    %74 = vector.load %arg12[%c0_37, %c0_38] : memref<128x256xbf16, #tpu.memory_space<vmem>>, vector<128x256xbf16>
    %c0_39 = arith.constant 0 : index
    %c0_40 = arith.constant 0 : index
    %75 = vector.load %arg13[%c0_39, %c0_40] : memref<1x256xf32, #tpu.memory_space<vmem>>, vector<1x256xf32>
    %76 = arith.truncf %73 : vector<8x128xf32> to vector<8x128xbf16>
    %cst_41 = arith.constant dense<0.000000e+00> : vector<8x256xf32>
    %77 = tpu.matmul %76, %74, %cst_41 {dimension_numbers = #tpu.dot_dimension_numbers<[1], [0], [0], [1], [0, 0, 1, 1], [], []>} : vector<8x128xbf16>, vector<128x256xbf16>, vector<8x256xf32> -> vector<8x256xf32>
    %78 = vector.broadcast %75 : vector<1x256xf32> to vector<8x256xf32>
    %79 = arith.addf %77, %78 : vector<8x256xf32>
    %80 = vector.shape_cast %71 : vector<16x128xbf16> to vector<16x4x32xbf16>
    %81 = vector.extract_strided_slice %79 {offsets = [0, 0], sizes = [8, 128], strides = [1, 1]} : vector<8x256xf32> to vector<8x128xf32>
    %82 = vector.shape_cast %81 : vector<8x128xf32> to vector<8x4x32xf32>
    %83 = arith.truncf %82 : vector<8x4x32xf32> to vector<8x4x32xbf16>
    %84 = vector.extract_strided_slice %79 {offsets = [0, 128], sizes = [8, 128], strides = [1, 1]} : vector<8x256xf32> to vector<8x128xf32>
    %85 = vector.shape_cast %84 : vector<8x128xf32> to vector<8x4x32xf32>
    %86 = arith.truncf %85 : vector<8x4x32xf32> to vector<8x4x32xbf16>
    %87 = tpu.iota {dimensions = array<i32: 1>} : vector<16x8xi32>
    %c0_42 = arith.constant 0 : index
    %c0_43 = arith.constant 0 : index
    %c0_44 = arith.constant 0 : index
    %88 = vector.load %arg7[%c0_42, %c0_43, %c0_44] : memref<1x16x1xi32, #tpu.memory_space<vmem>>, vector<1x16x1xi32>
    %89 = vector.shape_cast %88 : vector<1x16x1xi32> to vector<16x1xi32>
    %90 = vector.broadcast %89 : vector<16x1xi32> to vector<16x8xi32>
    %91 = arith.cmpi sgt, %87, %90 : vector<16x8xi32>
    %cst_45 = arith.constant -1.000000e+30 : f32
    %cst_46 = arith.constant 0.000000e+00 : f32
    %92 = vector.broadcast %cst_45 : f32 to vector<16x8xf32>
    %93 = vector.broadcast %cst_46 : f32 to vector<16x8xf32>
    %94 = arith.select %91, %92, %93 : vector<16x8xi1>, vector<16x8xf32>
    "tpu.trace_start"() <{level = 10 : i32, message = "qhd,khd->hqk"}> : () -> ()
    %cst_47 = arith.constant dense<0.000000e+00> : vector<4x16x8xf32>
    %95 = tpu.matmul %80, %83, %cst_47 {dimension_numbers = #tpu.dot_dimension_numbers<[2], [2], [0], [0], [0, 1, 0, 0, 1, 0], [1], [1]>} : vector<16x4x32xbf16>, vector<8x4x32xbf16>, vector<4x16x8xf32> -> vector<4x16x8xf32>
    "tpu.trace_stop"() : () -> ()
    %96 = vector.shape_cast %94 : vector<16x8xf32> to vector<1x16x8xf32>
    %97 = vector.broadcast %96 : vector<1x16x8xf32> to vector<4x16x8xf32>
    %98 = arith.addf %95, %97 : vector<4x16x8xf32>
    %cst_48 = arith.constant dense<0xFF800000> : vector<4x16xf32>
    %99 = vector.multi_reduction <maximumf>, %98, %cst_48 [2] : vector<4x16x8xf32> to vector<4x16xf32>
    %100 = vector.shape_cast %99 : vector<4x16xf32> to vector<4x16x1xf32>
    %101 = vector.broadcast %100 : vector<4x16x1xf32> to vector<4x16x8xf32>
    %102 = arith.subf %98, %101 : vector<4x16x8xf32>
    %103 = math.exp %102 : vector<4x16x8xf32>
    %cst_49 = arith.constant dense<0.000000e+00> : vector<4x16xf32>
    %104 = vector.multi_reduction <add>, %103, %cst_49 [2] : vector<4x16x8xf32> to vector<4x16xf32>
    %105 = vector.shape_cast %104 : vector<4x16xf32> to vector<4x16x1xf32>
    %106 = tpu.reciprocal %105 {approx = true} : vector<4x16x1xf32> -> vector<4x16x1xf32>
    %107 = vector.broadcast %106 : vector<4x16x1xf32> to vector<4x16x8xf32>
    %108 = arith.mulf %103, %107 : vector<4x16x8xf32>
    %109 = arith.truncf %108 : vector<4x16x8xf32> to vector<4x16x8xbf16>
    "tpu.trace_start"() <{level = 10 : i32, message = "hqk,khd->qhd"}> : () -> ()
    %cst_50 = arith.constant dense<0.000000e+00> : vector<4x32x16xf32>
    %110 = tpu.matmul %86, %109, %cst_50 {dimension_numbers = #tpu.dot_dimension_numbers<[0], [2], [2], [1], [0, 1, 0, 2, 1, 1], [1], [0]>} : vector<8x4x32xbf16>, vector<4x16x8xbf16>, vector<4x32x16xf32> -> vector<4x32x16xf32>
    %111 = tpu.transpose %110, [2, 0, 1] : vector<4x32x16xf32> -> vector<16x4x32xf32>
    "tpu.trace_stop"() : () -> ()
    %112 = vector.shape_cast %111 : vector<16x4x32xf32> to vector<16x128xf32>
    %c0_51 = arith.constant 0 : index
    %c0_52 = arith.constant 0 : index
    %113 = vector.load %arg14[%c0_51, %c0_52] : memref<128x128xbf16, #tpu.memory_space<vmem>>, vector<128x128xbf16>
    %c0_53 = arith.constant 0 : index
    %c0_54 = arith.constant 0 : index
    %114 = vector.load %arg15[%c0_53, %c0_54] : memref<1x128xf32, #tpu.memory_space<vmem>>, vector<1x128xf32>
    %115 = arith.truncf %112 : vector<16x128xf32> to vector<16x128xbf16>
    %cst_55 = arith.constant dense<0.000000e+00> : vector<16x128xf32>
    %116 = tpu.matmul %115, %113, %cst_55 {dimension_numbers = #tpu.dot_dimension_numbers<[1], [0], [0], [1], [0, 0, 1, 1], [], []>} : vector<16x128xbf16>, vector<128x128xbf16>, vector<16x128xf32> -> vector<16x128xf32>
    %117 = vector.broadcast %114 : vector<1x128xf32> to vector<16x128xf32>
    %118 = arith.addf %116, %117 : vector<16x128xf32>
    %119 = arith.addf %38, %118 : vector<16x128xf32>
    %c0_56 = arith.constant 0 : index
    %c0_57 = arith.constant 0 : index
    %120 = vector.load %arg18[%c0_56, %c0_57] : memref<1x128xf32, #tpu.memory_space<vmem>>, vector<1x128xf32>
    %c0_58 = arith.constant 0 : index
    %c0_59 = arith.constant 0 : index
    %121 = vector.load %arg19[%c0_58, %c0_59] : memref<1x128xf32, #tpu.memory_space<vmem>>, vector<1x128xf32>
    %cst_60 = arith.constant dense<0.000000e+00> : vector<16xf32>
    %122 = vector.multi_reduction <add>, %119, %cst_60 [1] : vector<16x128xf32> to vector<16xf32>
    %123 = vector.shape_cast %122 : vector<16xf32> to vector<16x1xf32>
    %cst_61 = arith.constant 1.280000e+02 : f32
    %124 = vector.broadcast %cst_61 : f32 to vector<16x1xf32>
    %125 = arith.divf %123, %124 : vector<16x1xf32>
    %126 = vector.broadcast %125 : vector<16x1xf32> to vector<16x128xf32>
    %127 = arith.subf %119, %126 : vector<16x128xf32>
    %128 = arith.mulf %127, %127 : vector<16x128xf32>
    %cst_62 = arith.constant dense<0.000000e+00> : vector<16xf32>
    %129 = vector.multi_reduction <add>, %128, %cst_62 [1] : vector<16x128xf32> to vector<16xf32>
    %130 = vector.shape_cast %129 : vector<16xf32> to vector<16x1xf32>
    %cst_63 = arith.constant 1.280000e+02 : f32
    %131 = vector.broadcast %cst_63 : f32 to vector<16x1xf32>
    %132 = arith.divf %130, %131 : vector<16x1xf32>
    %133 = vector.broadcast %125 : vector<16x1xf32> to vector<16x128xf32>
    %134 = arith.subf %119, %133 : vector<16x128xf32>
    %cst_64 = arith.constant 9.99999974E-6 : f32
    %135 = vector.broadcast %cst_64 : f32 to vector<16x1xf32>
    %136 = arith.addf %132, %135 : vector<16x1xf32>
    %137 = math.rsqrt %136 : vector<16x1xf32>
    %138 = vector.broadcast %137 : vector<16x1xf32> to vector<16x128xf32>
    %139 = arith.mulf %134, %138 : vector<16x128xf32>
    %140 = vector.broadcast %120 : vector<1x128xf32> to vector<16x128xf32>
    %141 = arith.mulf %139, %140 : vector<16x128xf32>
    %142 = vector.broadcast %121 : vector<1x128xf32> to vector<16x128xf32>
    %143 = arith.addf %141, %142 : vector<16x128xf32>
    %c0_65 = arith.constant 0 : index
    %c0_66 = arith.constant 0 : index
    %144 = vector.load %arg20[%c0_65, %c0_66] : memref<128x512xbf16, #tpu.memory_space<vmem>>, vector<128x512xbf16>
    %c0_67 = arith.constant 0 : index
    %c0_68 = arith.constant 0 : index
    %145 = vector.load %arg21[%c0_67, %c0_68] : memref<1x512xf32, #tpu.memory_space<vmem>>, vector<1x512xf32>
    %146 = arith.truncf %143 : vector<16x128xf32> to vector<16x128xbf16>
    %cst_69 = arith.constant dense<0.000000e+00> : vector<16x512xf32>
    %147 = tpu.matmul %146, %144, %cst_69 {dimension_numbers = #tpu.dot_dimension_numbers<[1], [0], [0], [1], [0, 0, 1, 1], [], []>} : vector<16x128xbf16>, vector<128x512xbf16>, vector<16x512xf32> -> vector<16x512xf32>
    %148 = vector.broadcast %145 : vector<1x512xf32> to vector<16x512xf32>
    %149 = arith.addf %147, %148 : vector<16x512xf32>
    %cst_70 = arith.constant 0.707106769 : f32
    %150 = vector.broadcast %cst_70 : f32 to vector<16x512xf32>
    %151 = arith.mulf %149, %150 : vector<16x512xf32>
    %152 = math.absf %151 : vector<16x512xf32>
    %cst_71 = arith.constant 0.327591091 : f32
    %153 = vector.broadcast %cst_71 : f32 to vector<16x512xf32>
    %154 = arith.mulf %153, %152 : vector<16x512xf32>
    %cst_72 = arith.constant 1.000000e+00 : f32
    %155 = vector.broadcast %cst_72 : f32 to vector<16x512xf32>
    %156 = arith.addf %155, %154 : vector<16x512xf32>
    %cst_73 = arith.constant 1.000000e+00 : f32
    %157 = vector.broadcast %cst_73 : f32 to vector<16x512xf32>
    %158 = arith.divf %157, %156 : vector<16x512xf32>
    %cst_74 = arith.constant 1.06140542 : f32
    %159 = vector.broadcast %cst_74 : f32 to vector<16x512xf32>
    %160 = arith.mulf %158, %159 : vector<16x512xf32>
    %cst_75 = arith.constant -1.45315206 : f32
    %161 = vector.broadcast %cst_75 : f32 to vector<16x512xf32>
    %162 = arith.addf %161, %160 : vector<16x512xf32>
    %163 = arith.mulf %158, %162 : vector<16x512xf32>
    %cst_76 = arith.constant 1.42141378 : f32
    %164 = vector.broadcast %cst_76 : f32 to vector<16x512xf32>
    %165 = arith.addf %164, %163 : vector<16x512xf32>
    %166 = arith.mulf %158, %165 : vector<16x512xf32>
    %cst_77 = arith.constant -0.284496725 : f32
    %167 = vector.broadcast %cst_77 : f32 to vector<16x512xf32>
    %168 = arith.addf %167, %166 : vector<16x512xf32>
    %169 = arith.mulf %158, %168 : vector<16x512xf32>
    %cst_78 = arith.constant 0.254829586 : f32
    %170 = vector.broadcast %cst_78 : f32 to vector<16x512xf32>
    %171 = arith.addf %170, %169 : vector<16x512xf32>
    %172 = arith.mulf %158, %171 : vector<16x512xf32>
    %cst_79 = arith.constant 0.000000e+00 : f32
    %173 = vector.broadcast %cst_79 : f32 to vector<16x512xf32>
    %174 = arith.subf %173, %152 : vector<16x512xf32>
    %175 = arith.mulf %174, %152 : vector<16x512xf32>
    %176 = math.exp %175 : vector<16x512xf32>
    %177 = arith.mulf %172, %176 : vector<16x512xf32>
    %cst_80 = arith.constant 1.000000e+00 : f32
    %178 = vector.broadcast %cst_80 : f32 to vector<16x512xf32>
    %179 = arith.subf %178, %177 : vector<16x512xf32>
    %cst_81 = arith.constant 0.000000e+00 : f32
    %180 = vector.broadcast %cst_81 : f32 to vector<16x512xf32>
    %181 = arith.cmpf oge, %151, %180 : vector<16x512xf32>
    %cst_82 = arith.constant 0.000000e+00 : f32
    %182 = vector.broadcast %cst_82 : f32 to vector<16x512xf32>
    %183 = arith.subf %182, %179 : vector<16x512xf32>
    %184 = arith.select %181, %179, %183 : vector<16x512xi1>, vector<16x512xf32>
    %cst_83 = arith.constant 5.000000e-01 : f32
    %185 = vector.broadcast %cst_83 : f32 to vector<16x512xf32>
    %186 = arith.mulf %185, %149 : vector<16x512xf32>
    %cst_84 = arith.constant 1.000000e+00 : f32
    %187 = vector.broadcast %cst_84 : f32 to vector<16x512xf32>
    %188 = arith.addf %187, %184 : vector<16x512xf32>
    %189 = arith.mulf %186, %188 : vector<16x512xf32>
    %c0_85 = arith.constant 0 : index
    %c0_86 = arith.constant 0 : index
    %190 = vector.load %arg22[%c0_85, %c0_86] : memref<512x128xbf16, #tpu.memory_space<vmem>>, vector<512x128xbf16>
    %c0_87 = arith.constant 0 : index
    %c0_88 = arith.constant 0 : index
    %191 = vector.load %arg23[%c0_87, %c0_88] : memref<1x128xf32, #tpu.memory_space<vmem>>, vector<1x128xf32>
    %192 = arith.truncf %189 : vector<16x512xf32> to vector<16x512xbf16>
    %cst_89 = arith.constant dense<0.000000e+00> : vector<16x128xf32>
    %193 = tpu.matmul %192, %190, %cst_89 {dimension_numbers = #tpu.dot_dimension_numbers<[1], [0], [0], [1], [0, 0, 1, 1], [], []>} : vector<16x512xbf16>, vector<512x128xbf16>, vector<16x128xf32> -> vector<16x128xf32>
    %194 = vector.broadcast %191 : vector<1x128xf32> to vector<16x128xf32>
    %195 = arith.addf %193, %194 : vector<16x128xf32>
    %196 = arith.addf %119, %195 : vector<16x128xf32>
    %c0_90 = arith.constant 0 : index
    %c0_91 = arith.constant 0 : index
    %c0_92 = arith.constant 0 : index
    %197 = vector.load %arg24[%c0_90, %c0_91, %c0_92] : memref<1x16x128xf32, #tpu.memory_space<vmem>>, vector<1x16x128xf32>
    %198 = vector.shape_cast %197 : vector<1x16x128xf32> to vector<16x128xf32>
    %199 = vector.shape_cast %196 : vector<16x128xf32> to vector<1x16x128xf32>
    tpu.vector_store %arg24[%c0_90, %c0_91, %c0_92], %199 {strides = array<i32>} : memref<1x16x128xf32, #tpu.memory_space<vmem>>, vector<1x16x128xf32>,
    return
  }
  func.func @transform_0(%arg0: i32, %arg1: i32) -> (i32, i32, i32) {
    %c0_i32 = arith.constant 0 : i32
    %c0_i32_0 = arith.constant 0 : i32
    return %arg0, %arg1, %c0_i32 : i32, i32, i32
  }
  func.func @transform_1(%arg0: i32, %arg1: i32) -> (i32, i32, i32) {
    %c0_i32 = arith.constant 0 : i32
    %c0_i32_0 = arith.constant 0 : i32
    return %arg0, %arg1, %c0_i32 : i32, i32, i32
  }
  func.func @transform_2(%arg0: i32, %arg1: i32) -> (i32, i32, i32) {
    %c0_i32 = arith.constant 0 : i32
    %c0_i32_0 = arith.constant 0 : i32
    %c0_i32_1 = arith.constant 0 : i32
    return %arg0, %c0_i32, %c0_i32_0 : i32, i32, i32
  }
  func.func @transform_3(%arg0: i32, %arg1: i32) -> (i32, i32, i32) {
    %c0_i32 = arith.constant 0 : i32
    %c0_i32_0 = arith.constant 0 : i32
    %c0_i32_1 = arith.constant 0 : i32
    return %arg0, %c0_i32, %c0_i32_0 : i32, i32, i32
  }
  func.func @transform_4(%arg0: i32, %arg1: i32) -> (i32, i32, i32) {
    %c0_i32 = arith.constant 0 : i32
    %c0_i32_0 = arith.constant 0 : i32
    %c0_i32_1 = arith.constant 0 : i32
    return %c0_i32, %arg1, %c0_i32_0 : i32, i32, i32
  }
  func.func @transform_5(%arg0: i32, %arg1: i32) -> (i32, i32, i32) {
    %c0_i32 = arith.constant 0 : i32
    %c0_i32_0 = arith.constant 0 : i32
    return %arg0, %arg1, %c0_i32 : i32, i32, i32
  }
  func.func @transform_6(%arg0: i32, %arg1: i32) -> (i32, i32) {
    %c0_i32 = arith.constant 0 : i32
    %c0_i32_0 = arith.constant 0 : i32
    %c0_i32_1 = arith.constant 0 : i32
    return %c0_i32, %c0_i32_0 : i32, i32
  }
  func.func @transform_7(%arg0: i32, %arg1: i32) -> (i32, i32) {
    %c0_i32 = arith.constant 0 : i32
    %c0_i32_0 = arith.constant 0 : i32
    %c0_i32_1 = arith.constant 0 : i32
    return %c0_i32, %c0_i32_0 : i32, i32
  }
  func.func @transform_8(%arg0: i32, %arg1: i32) -> (i32, i32) {
    %c0_i32 = arith.constant 0 : i32
    %c0_i32_0 = arith.constant 0 : i32
    %c0_i32_1 = arith.constant 0 : i32
    return %c0_i32, %c0_i32_0 : i32, i32
  }
  func.func @transform_9(%arg0: i32, %arg1: i32) -> (i32, i32) {
    %c0_i32 = arith.constant 0 : i32
    %c0_i32_0 = arith.constant 0 : i32
    %c0_i32_1 = arith.constant 0 : i32
    return %c0_i32, %c0_i32_0 : i32, i32
  }
  func.func @transform_10(%arg0: i32, %arg1: i32) -> (i32, i32) {
    %c0_i32 = arith.constant 0 : i32
    %c0_i32_0 = arith.constant 0 : i32
    %c0_i32_1 = arith.constant 0 : i32
    return %c0_i32, %c0_i32_0 : i32, i32
  }
  func.func @transform_11(%arg0: i32, %arg1: i32) -> (i32, i32) {
    %c0_i32 = arith.constant 0 : i32
    %c0_i32_0 = arith.constant 0 : i32
    %c0_i32_1 = arith.constant 0 : i32
    return %c0_i32, %c0_i32_0 : i32, i32
  }
  func.func @transform_12(%arg0: i32, %arg1: i32) -> (i32, i32) {
    %c0_i32 = arith.constant 0 : i32
    %c0_i32_0 = arith.constant 0 : i32
    %c0_i32_1 = arith.constant 0 : i32
    return %c0_i32, %c0_i32_0 : i32, i32
  }
  func.func @transform_13(%arg0: i32, %arg1: i32) -> (i32, i32) {
    %c0_i32 = arith.constant 0 : i32
    %c0_i32_0 = arith.constant 0 : i32
    %c0_i32_1 = arith.constant 0 : i32
    return %c0_i32, %c0_i32_0 : i32, i32
  }
  func.func @transform_14(%arg0: i32, %arg1: i32) -> (i32, i32) {
    %c0_i32 = arith.constant 0 : i32
    %c0_i32_0 = arith.constant 0 : i32
    %c0_i32_1 = arith.constant 0 : i32
    return %c0_i32, %c0_i32_0 : i32, i32
  }
  func.func @transform_15(%arg0: i32, %arg1: i32) -> (i32, i32) {
    %c0_i32 = arith.constant 0 : i32
    %c0_i32_0 = arith.constant 0 : i32
    %c0_i32_1 = arith.constant 0 : i32
    return %c0_i32, %c0_i32_0 : i32, i32
  }
  func.func @transform_16(%arg0: i32, %arg1: i32) -> (i32, i32) {
    %c0_i32 = arith.constant 0 : i32
    %c0_i32_0 = arith.constant 0 : i32
    %c0_i32_1 = arith.constant 0 : i32
    return %c0_i32, %c0_i32_0 : i32, i32
  }
  func.func @transform_17(%arg0: i32, %arg1: i32) -> (i32, i32) {
    %c0_i32 = arith.constant 0 : i32
    %c0_i32_0 = arith.constant 0 : i32
    %c0_i32_1 = arith.constant 0 : i32
    return %c0_i32, %c0_i32_0 : i32, i32
  }
  func.func @transform_18(%arg0: i32, %arg1: i32) -> (i32, i32) {
    %c0_i32 = arith.constant 0 : i32
    %c0_i32_0 = arith.constant 0 : i32
    %c0_i32_1 = arith.constant 0 : i32
    return %c0_i32, %c0_i32_0 : i32, i32
  }
  func.func @transform_19(%arg0: i32, %arg1: i32) -> (i32, i32) {
    %c0_i32 = arith.constant 0 : i32
    %c0_i32_0 = arith.constant 0 : i32
    %c0_i32_1 = arith.constant 0 : i32
    return %c0_i32, %c0_i32_0 : i32, i32
  }
  func.func @transform_20(%arg0: i32, %arg1: i32) -> (i32, i32) {
    %c0_i32 = arith.constant 0 : i32
    %c0_i32_0 = arith.constant 0 : i32
    %c0_i32_1 = arith.constant 0 : i32
    return %c0_i32, %c0_i32_0 : i32, i32
  }
  func.func @transform_21(%arg0: i32, %arg1: i32) -> (i32, i32) {
    %c0_i32 = arith.constant 0 : i32
    %c0_i32_0 = arith.constant 0 : i32
    %c0_i32_1 = arith.constant 0 : i32
    return %c0_i32, %c0_i32_0 : i32, i32
  }
  func.func @transform_22(%arg0: i32, %arg1: i32) -> (i32, i32, i32) {
    %c0_i32 = arith.constant 0 : i32
    %c0_i32_0 = arith.constant 0 : i32
    return %arg0, %arg1, %c0_i32 : i32, i32, i32
  }
}

</mosaic_0001>

<bundles_post_ra>
// kernel: decoder_layer_pallas.2
= control target key start
LH: loop header
LB: loop body
LE: loop exit
PB: predicated region body
PF: predicated region fallthrough
CT: control target
= control target key end

     0   :  { %s1001_s21 = smov 0   ;;  %s1003_s22 = smov 0   ;;  %s1145_s0 = inlined_call_operand.vmem [shape: f32[2,16,128], index: 0, kind: input, shape index: {}]   ;;  %s1146_s1 = inlined_call_operand.vmem [shape: f32[1,128], index: 1, kind: input, shape index: {}]   ;;  %s1147_s2 = inlined_call_operand.vmem [shape: f32[1,128], index: 2, kind: input, shape index: {}]   ;;  %s1148_s3 = inlined_call_operand.vmem [shape: bf16[128,384], index: 3, kind: input, shape index: {}]   ;;  %s1149_s4 = inlined_call_operand.vmem [shape: f32[1,384], index: 4, kind: input, shape index: {}]   ;;  %s1150_s5 = inlined_call_operand.vmem [shape: bf16[2,16,128], index: 5, kind: output, shape index: {0}]   ;;  %s1151_s6 = inlined_call_operand.vmem [shape: bf16[2,16,256], index: 6, kind: output, shape index: {1}]  }
   0x1   :  { %s1005_s23 = smov 0  }
   0x2 LB: > { %s29_s24 = sadd.s32 1, %s957_s22  ;;  %p796_p0 = scmp.ge.s32.totalorder %s961_s23, 1  ;;  %s961_s23 = sphi %s1005_s23, %s17_s23   ;;  %s957_s22 = sphi %s1003_s22, %s1153_s22   ;;  %s953_s21 = sphi %s1001_s21, %s1152_s21  }
   0x3   : > { %p31_p1 = scmp.ge.s32.totalorder %s29_s24, 2  ;;  %p238_p2 = scmp.lt.s32.totalorder %s961_s23, 3 }
   0x5   : > { %s1155_s24 = smov (%p31_p1, %s29_s24), 0  ;;  %p239_p3 = pnand %p796_p0, %p238_p2 }
   0x6   : > { %p287_p4 = scmp.lt.s32.totalorder (!%p239_p3), %s953_s21, 1  ;;  %v903_v2 = vld [vmem:[%s1148_s3 + $0x4] ss:$12 sps:$4 sm:$0xff] (!%p239_p3)   ;;  %v905_v3 = vld [vmem:[%s1148_s3] ss:$12 sps:$4 sm:$0xff] (!%p239_p3)   ;;  %v963_v4 = vmov (!%p239_p3), 0.0   ;;  %v396_v53 = vlaneseq (!%p239_p3) }
   0x7   : > { %242 = sbr.rel (%p239_p3) target bundleno = 556 (0x22c), region = 40  ;;  %856 = vmatprep.subr.bf16.mxu1 (!%p239_p3), %v963_v4  ;;  %v906_v5 = vld [vmem:[%s1148_s3 + $0x8] ss:$12 sps:$4 sm:$0xff] (!%p239_p3)   ;;  %539 = vmatprep.subr.bf16.mxu0 (!%p239_p3), %v903_v2  ;;  %v909_v15 = vld [vmem:[%s1148_s3 + $0x18] ss:$12 sps:$4 sm:$0xff] (!%p239_p3)   ;;  %v964_v30 = vmov (!%p239_p3), 0  }
   0x8   : > { %v907_v6 = vld [vmem:[%s1148_s3 + $0x1c] ss:$12 sps:$4 sm:$0xff] (!%p239_p3)   ;;  %540 = vmatpush1.bf16.msra.mxu0 (!%p239_p3), %v905_v3  ;;  %857 = vmatpush3.bf16.msra.mxu1 (!%p239_p3), %v906_v5  ;;  %v910_v16 = vld [vmem:[%s1148_s3 + $0x20] ss:$12 sps:$4 sm:$0xff] (!%p239_p3)   ;;  %v914_v19 = vld [vmem:[%s1148_s3 + $0x38] ss:$12 sps:$4 sm:$0xff] (!%p239_p3)  }
   0x9   : > { %541 = vmatprep.subr.bf16.mxu0 (!%p239_p3), %v907_v6  ;;  %858 = vmatprep.subr.bf16.mxu1 (!%p239_p3), %v963_v4  ;;  %v911_v17 = vld [vmem:[%s1148_s3 + $0x34] ss:$12 sps:$4 sm:$0xff] (!%p239_p3)   ;;  %v913_v18 = vld [vmem:[%s1148_s3 + $0x30] ss:$12 sps:$4 sm:$0xff] (!%p239_p3)   ;;  %v915_v20 = vld [vmem:[%s1148_s3 + $0x4c] ss:$12 sps:$4 sm:$0xff] (!%p239_p3)  }
   0xa   : > { %v917_v21 = vld [vmem:[%s1148_s3 + $0x48] ss:$12 sps:$4 sm:$0xff] (!%p239_p3)   ;;  %v918_v22 = vld [vmem:[%s1148_s3 + $0x50] ss:$12 sps:$4 sm:$0xff] (!%p239_p3)   ;;  %v921_v24 = vld [vmem:[%s1148_s3 + $0x60] ss:$12 sps:$4 sm:$0xff] (!%p239_p3)   ;;  %571 = vmatprep.mubr.bf16.mxu0 (!%p239_p3), %v964_v30 }
   0xb   : > { %v919_v23 = vld [vmem:[%s1148_s3 + $0x64] ss:$12 sps:$4 sm:$0xff] (!%p239_p3)   ;;  %v922_v25 = vld [vmem:[%s1148_s3 + $0x68] ss:$12 sps:$4 sm:$0xff] (!%p239_p3)   ;;  %v926_v28 = vld [vmem:[%s1148_s3 + $0x80] ss:$12 sps:$4 sm:$0xff] (!%p239_p3)  }
   0xc   : > { %542 = vmatpush1.bf16.msra.mxu0 (!%p239_p3), %v909_v15  ;;  %859 = vmatpush3.bf16.msra.mxu1 (!%p239_p3), %v910_v16  ;;  %v923_v26 = vld [vmem:[%s1148_s3 + $0x7c] ss:$12 sps:$4 sm:$0xff] (!%p239_p3)   ;;  %v925_v27 = vld [vmem:[%s1148_s3 + $0x78] ss:$12 sps:$4 sm:$0xff] (!%p239_p3)   ;;  %v927_v29 = vld [vmem:[%s1148_s3 + $0x94] ss:$12 sps:$4 sm:$0xff] (!%p239_p3)  }
   0xd   : > { %860 = vmatprep.subr.bf16.mxu1 (!%p239_p3), %v963_v4  ;;  %543 = vmatprep.subr.bf16.mxu0 (!%p239_p3), %v911_v17  ;;  %vm965_vm0 = vmmov (!%p239_p3), 0   ;;  %v929_v31 = vld [vmem:[%s1148_s3 + $0x90] ss:$12 sps:$4 sm:$0xff] (!%p239_p3)   ;;  %v930_v32 = vld [vmem:[%s1148_s3 + $0x98] ss:$12 sps:$4 sm:$0xff] (!%p239_p3)   ;;  %v397_v54 = vshrl.u32 (!%p239_p3), %v396_v53, 7 }
   0xe   : > { %s1157_s21 = smov (!%p287_p4, %s953_s21), 1  ;;  %872 = vmatprep.mubr.msk.bf16.mxu1 %vm965_vm0, %v963_v4  ;;  %v931_v33 = vld [vmem:[%s1148_s3 + $0xac] ss:$12 sps:$4 sm:$0xff]   ;;  %v933_v34 = vld [vmem:[%s1148_s3 + $0xa8] ss:$12 sps:$4 sm:$0xff]  }
   0xf   : > { %s835_s25 = sshll.u32 %s1157_s21, 4  ;;  %v934_v35 = vld [vmem:[%s1148_s3 + $0xb0] ss:$12 sps:$4 sm:$0xff]   ;;  %v803_v44 = vld [vmem:[%s1146_s1] ss:$0 sm:$0xff]  ;;  %v398_v55 = vsub.s32 0, %v397_v54 }
  0x10   : > { %s294_s28 = scalar_lea.vmem %s1145_s0, %s835_s25  ;;  %544 = vmatpush1.bf16.msra.mxu0 %v913_v18  ;;  %861 = vmatpush3.bf16.msra.mxu1 %v914_v19  ;;  %v804_v48 = vld [vmem:[%s1147_s2] ss:$0 sm:$0xff]  ;;  %v406_v56 = vsub.s32 2, %v397_v54  ;;  %v402_v58 = vsub.s32 1, %v397_v54  ;;  %s836_s29 = sshll.u32 %s1157_s21, 3 }
  0x11   : > { %v318_v0 = vld [vmem:[%s294_s28] sm:$0xff]  ;;  %v319_v1 = vld [vmem:[%s294_s28 + $0x8] sm:$0xff]  ;;  %862 = vmatprep.subr.bf16.mxu1 %v963_v4  ;;  %545 = vmatprep.subr.bf16.mxu0 %v915_v20  ;;  %s315_s28 = scalar_lea.vmem %s1151_s6, %s835_s25  ;;  %s304_s8 = scalar_lea.vmem %s1150_s5, %s836_s29 }
  0x12   : > { %322 = vadd.xlane.f32.xlu0 %v318_v0  ;;  %v393_v57 = vld [vmem:[%s1149_s4] sm:$0x7] }
  0x13   : > { %v399_v59 = vrot.slane %v393_v57, %v398_v55  ;;  %v407_v60 = vrot.slane %v393_v57, %v406_v56  ;;  %v403_v61 = vrot.slane %v393_v57, %v402_v58 }
  0x14   : > { %546 = vmatpush1.bf16.msra.mxu0 %v917_v21  ;;  %863 = vmatpush3.bf16.msra.mxu1 %v918_v22 }
  0x15   : > { %864 = vmatprep.subr.bf16.mxu1 %v963_v4  ;;  %547 = vmatprep.subr.bf16.mxu0 %v919_v23 }
  0x16   : > { %324 = vadd.xlane.f32.xlu0 %v319_v1 }
  0x18   : > { %548 = vmatpush1.bf16.msra.mxu0 %v921_v24  ;;  %865 = vmatpush3.bf16.msra.mxu1 %v922_v25 }
  0x19   : > { %549 = vmatprep.subr.bf16.mxu0 %v923_v26  ;;  %866 = vmatprep.subr.bf16.mxu1 %v963_v4 }
  0x1c   : > { %550 = vmatpush1.bf16.msra.mxu0 %v925_v27  ;;  %867 = vmatpush3.bf16.msra.mxu1 %v926_v28 }
  0x1d   : > { %551 = vmatprep.subr.bf16.mxu0 %v927_v29  ;;  %868 = vmatprep.subr.bf16.mxu1 %v963_v4 }
  0x20   : > { %552 = vmatpush1.bf16.msra.mxu0 %v929_v31  ;;  %869 = vmatpush3.bf16.msra.mxu1 %v930_v32 }
  0x21   : > { %553 = vmatprep.subr.bf16.mxu0 %v931_v33  ;;  %870 = vmatprep.subr.bf16.mxu1 %v963_v4 }
  0x24   : > { %554 = vmatpush1.bf16.msra.mxu0 %v933_v34  ;;  %871 = vmatpush3.bf16.msra.mxu1 %v934_v35 }
  0x9f   : > { %v323_v7 = vpop.xlane.xlu0 %322 }
  0xa0   : > { %v327_v8 = vmul.f32 0.0078125, %v323_v7 }
  0xa2   : > { %v1041_v9 = vsub.f32 %v318_v0, %v327_v8 }
  0xa3   : > { %v325_v10 = vpop.xlane.xlu0 %324 }
  0xa4   : > { %v328_v11 = vmul.f32 0.0078125, %v325_v10  ;;  %v331_v12 = vmul.f32 %v1041_v9, %v1041_v9 }
  0xa6   : > { %v1045_v13 = vsub.f32 %v319_v1, %v328_v11  ;;  %333 = vadd.xlane.f32.xlu1 %v331_v12 }
  0xa8   : > { %v332_v14 = vmul.f32 %v1045_v13, %v1045_v13 }
  0xaa   : > { %335 = vadd.xlane.f32.xlu1 %v332_v14 }
 0x133   : > { %v334_v36 = vpop.xlane.xlu1 %333 }
 0x134   : > { %v337_v37 = vmul.f32 0.0078125, %v334_v36 }
 0x136   : > { %v339_v38 = vadd.f32 1e-05, %v337_v37 }
 0x137   : > { %v336_v39 = vpop.xlane.xlu1 %335 }
 0x138   : > { %935 = vrsqrt.f32 %v339_v38  ;;  %v338_v40 = vmul.f32 0.0078125, %v336_v39 }
 0x13a   : > { %v340_v41 = vadd.f32 1e-05, %v338_v40 }
 0x13c   : > { %937 = vrsqrt.f32 %v340_v41 }
 0x142   : > { %v936_v42 = vpop.eup %935 }
 0x143   : > { %v343_v43 = vmul.f32 %v936_v42, %v1041_v9 }
 0x145   : > { %v351_v47 = vmul.f32 %v803_v44, %v343_v43 }
 0x146   : > { %v938_v45 = vpop.eup %937 }
 0x147   : > { %v344_v46 = vmul.f32 %v938_v45, %v1045_v13  ;;  %v359_v50 = vadd.f32 %v804_v48, %v351_v47 }
 0x149   : > { %v352_v49 = vmul.f32 %v803_v44, %v344_v46 }
 0x14b   : > { %v360_v51 = vadd.f32 %v804_v48, %v352_v49 }
 0x14d   : > { %v394_v52 = vpack.c.bf16 %v360_v51, %v359_v50 }
 0x14f   : > { %572 = vmatmul.mubr.bf16.vlgmr.msra.gmra.mrb[0].mxu0 %v394_v52  ;;  %873 = vmatmul.mubr.bf16.vlgmr.msra.gmra.mrb[0].mxu1 %v394_v52 }
 0x222   : > { %v573_v62 = vpop.f32.mrb[0].mxu0  ;;  %v616_v63 = vpop.f32.mrb[0].mxu1 }
 0x223   : > { %v574_v0 = vadd.f32 %v573_v62, %v399_v59  ;;  %v617_v1 = vadd.f32 %v616_v63, %v407_v60  ;;  %v575_v2 = vpop.f32.mrb[1].mxu0  ;;  %v874_v3 = vpop.f32.mrb[1].mxu1 }
 0x224   : > { %v576_v4 = vadd.f32 %v575_v2, %v403_v61  ;;  %v577_v5 = vpop.f32.mrb[2].mxu0  ;;  %v619_v6 = vpop.f32.mrb[2].mxu1 }
 0x225   : > { %v578_v7 = vadd.f32 %v577_v5, %v399_v59  ;;  %v620_v8 = vadd.f32 %v619_v6, %v407_v60  ;;  %v579_v9 = vpop.f32.mrb[3].mxu0  ;;  %v875_v10 = vpop.f32.mrb[3].mxu1  ;;  %v623_v13 = vmul.f32 0.17677669, %v574_v0 }
 0x226   : > { %v840_v11 = vpack.c.bf16 %v617_v1, %v576_v4  ;;  %v580_v12 = vadd.f32 %v579_v9, %v403_v61 }
 0x227   : > { %v624_v14 = vmul.f32 0.17677669, %v578_v7 }
 0x228   : > { %647 = vst [vmem:[%s315_s28] sm:$0xff] %v840_v11  ;;  %v841_v15 = vpack.c.bf16 %v620_v8, %v580_v12 }
 0x229   : > { %v845_v16 = vpack.c.bf16 %v624_v14, %v623_v13 }
 0x22a   : > { %648 = vst [vmem:[%s315_s28 + $0x8] sm:$0xff] %v841_v15 }
 0x22b   : > { %846 = vst [vmem:[%s304_s8] sm:$0xff] %v845_v16  }
 0x22c PF: > { %s17_s23 = sadd.s32 1, %s961_s23   ;;  %s1152_s21 = smov %s957_s22 }
 0x22d   : > { %p14_p5 = scmp.ge.s32.totalorder %s17_s23, 4   ;;  %s1153_s22 = smov %s1155_s24 }
 0x22f   :  { %16 = sbr.rel (!%p14_p5) target bundleno = 2 (0x2), region = 82 }

// kernel: decoder_layer_pallas.3
= control target key start
LH: loop header
LB: loop body
LE: loop exit
PB: predicated region body
PF: predicated region fallthrough
CT: control target
= control target key end

     0   :  { %s9870_s0 = inlined_call_operand.vmem [shape: f32[2,16,128], index: 0, kind: input, shape index: {}]   ;;  %s9871_s1 = inlined_call_operand.vmem [shape: bf16[2,16,128], index: 1, kind: input, shape index: {}]   ;;  %s9872_s2 = inlined_call_operand.vmem [shape: bf16[2,16,256], index: 2, kind: input, shape index: {}]   ;;  %s9873_s3 = inlined_call_operand.vmem [shape: f32[2,8,128], index: 3, kind: input, shape index: {}]   ;;  %s9874_s4 = inlined_call_operand.vmem [shape: bf16[1,16,16], index: 4, kind: input, shape index: {}]   ;;  %s9875_s5 = inlined_call_operand.vmem [shape: s32[2,16,1], index: 5, kind: input, shape index: {}]   ;;  %s9876_s6 = inlined_call_operand.vmem [shape: bf16[128,128], index: 6, kind: input, shape index: {}]   ;;  %s9877_s7 = inlined_call_operand.vmem [shape: f32[1,128], index: 7, kind: input, shape index: {}]   ;;  %s9878_s8 = inlined_call_operand.vmem [shape: bf16[128,128], index: 8, kind: input, shape index: {}]   ;;  %s9879_s9 = inlined_call_operand.vmem [shape: f32[1,128], index: 9, kind: input, shape index: {}]   ;;  %s9880_s10 = inlined_call_operand.vmem [shape: bf16[128,256], index: 10, kind: input, shape index: {}]   ;;  %s9881_s11 = inlined_call_operand.vmem [shape: f32[1,256], index: 11, kind: input, shape index: {}]   ;;  %s9882_s12 = inlined_call_operand.vmem [shape: bf16[128,128], index: 12, kind: input, shape index: {}]   ;;  %s9883_s13 = inlined_call_operand.vmem [shape: f32[1,128], index: 13, kind: input, shape index: {}]   ;;  %s9884_s14 = inlined_call_operand.vmem [shape: f32[1,128], index: 14, kind: input, shape index: {}]   ;;  %s9885_s15 = inlined_call_operand.vmem [shape: f32[1,128], index: 15, kind: input, shape index: {}]   ;;  %s9886_s16 = inlined_call_operand.vmem [shape: f32[1,128], index: 16, kind: input, shape index: {}]   ;;  %s9887_s17 = inlined_call_operand.vmem [shape: f32[1,128], index: 17, kind: input, shape index: {}]   ;;  %s9888_s18 = inlined_call_operand.vmem [shape: bf16[128,512], index: 18, kind: input, shape index: {}]   ;;  %s9889_s19 = inlined_call_operand.vmem [shape: f32[1,512], index: 19, kind: input, shape index: {}]   ;;  %s9890_s20 = inlined_call_operand.vmem [shape: bf16[512,128], index: 20, kind: input, shape index: {}]   ;;  %s9891_s21 = inlined_call_operand.vmem [shape: f32[1,128], index: 21, kind: input, shape index: {}]   ;;  %s9892_s22 = inlined_call_operand.hbm [shape: f32[2,16,128], index: 22, kind: output, shape index: {}]  }
   0x1   :  { %9914 = sst [smem:[#allocation15_spill]] %s9870_s0 }
   0x2   :  { %9915 = sst [smem:[#allocation16_spill]] %s9871_s1 }
   0x3   :  { %9916 = sst [smem:[#allocation17_spill]] %s9872_s2 }
   0x4   :  { %9917 = sst [smem:[#allocation18_spill]] %s9873_s3 }
   0x5   :  { %9918 = sst [smem:[#allocation19_spill]] %s9874_s4 }
   0x6   :  { %9919 = sst [smem:[#allocation20_spill]] %s9875_s5 }
   0x7   :  { %9920 = sst [smem:[#allocation21_spill]] %s9876_s6 }
   0x8   :  { %9921 = sst [smem:[#allocation22_spill]] %s9889_s19 }
   0x9   :  { %9922 = sst [smem:[#allocation23_spill]] %s9891_s21 }
   0xa   :  { %9923 = sst [smem:[#allocation24_spill]] %s9892_s22 }
   0xb   :  { %27 = vsyncpa [#allocation3], 0 }
   0xc   :  { %29 = vsyncpa [#allocation3 + $0x1], 0  ;;  %s8462_s3 = smov 0   ;;  %s8464_s28 = smov 0  }
   0xd   :  { %s8466_s29 = smov 0   ;;  %s8468_s30 = smov 0  }
   0xe   :  { %s8470_s4 = smov 0   ;;  %s8472_s0 = smov 0  }
   0xf LB: > { %9924 = sst [smem:[#allocation5_spill]] %s8314_s3  ;;  %s7437_s23 = sadd.s32 4294967295, %s8334_s0   ;;  %s8334_s0 = sphi %s8472_s0, %s35_s0   ;;  %s8330_s4 = sphi %s8470_s4, %s9962_s4   ;;  %s8326_s30 = sphi %s8468_s30, %s9961_s30   ;;  %s8322_s29 = sphi %s8466_s29, %s9960_s29   ;;  %s8318_s28 = sphi %s8464_s28, %s9959_s28   ;;  %s8314_s3 = sphi %s8462_s3, %s9958_s3  }
  0x10   : > { %9925 = sst [smem:[#allocation6_spill]] %s8318_s28  ;;  %s7438_s1 = sadd.s32 4294967294, %s8334_s0  }
  0x11   : > { %9926 = sst [smem:[#allocation7_spill]] %s8322_s29  ;;  %s47_s5 = sadd.s32 1, %s8330_s4 }
  0x12   : > { %9927 = sst [smem:[#allocation8_spill]] %s8326_s30  ;;  %s554_s24 = sadd.s32 1, %s8322_s29 }
  0x13   : > { %9928 = sst [smem:[#allocation9_spill]] %s8330_s4  ;;  %p49_p0 = scmp.ge.s32.totalorder %s47_s5, 2 }
  0x14   : > { %9929 = sst [smem:[#allocation10_spill]] %s8334_s0  ;;  %p564_p1 = scmp.ne.s32.totalorder %s8322_s29, %s8318_s28 }
  0x15   : > { %p565_p2 = scmp.eq.s32.totalorder %s7437_s23, 1  ;;  %p570_p3 = scmp.ne.s32.totalorder %s8318_s28, %s8314_s3 }
  0x16   : > { %s9964_s5 = smov (%p49_p0, %s47_s5), 0  ;;  %p571_p5 = scmp.eq.s32.totalorder %s7438_s1, 1 }
  0x17   : > { %9930 = sst [smem:[#allocation11_spill]] %s9964_s5  ;;  %p8502_p4 = por %p565_p2, %p564_p1 }
  0x18   : > { %s549_s25 = ssub.s32 %s8330_s4, %s9964_s5  ;;  %p7442_p6 = scmp.ge.s32.totalorder %s8334_s0, 1 }
  0x19   : > { %s9931_s6 = scalar_select %p8502_p4, 1, 0 }
  0x1a   : > { %p552_p7 = scmp.eq.s32.totalorder %s549_s25, 0  ;;  %p8509_p8 = por %p571_p5, %p570_p3 }
  0x1b   : > { %9932 = sst [smem:[#allocation12_spill]] %s9931_s6  ;;  %p700_p9 = scmp.lt.s32.totalorder %s8334_s0, 3 }
  0x1c   : > { %s9933_s26 = scalar_select %p8509_p8, 1, 0 }
  0x1d   : > { %s8515_s2 = scalar_select %p552_p7, %s8322_s29, %s554_s24  }
  0x1e   : > { %9934 = sst [smem:[#allocation13_spill]] %s9933_s26  ;;  %p701_p10 = pnand %p7442_p6, %p700_p9 }
  0x1f   : > { %9935 = sst [smem:[#allocation14_spill]] %s8515_s2  ;;  %p799_p11 = scmp.lt.s32.totalorder (!%p701_p10), %s8326_s30, 1  ;;  %v8339_v4 = vmov (!%p701_p10), 0.0   ;;  %vm8340_vm0 = vmmov (!%p701_p10), 0   ;;  %v8341_v12 = vmov (!%p701_p10), 1983009808   ;;  %v889_v14 = vlaneseq (!%p701_p10) }
  0x20   : > { %704 = sbr.rel (%p701_p10) target bundleno = 4369 (0x1111), region = 108  ;;  %s9936_s5 = sld [smem:[#allocation17_spill]] (!%p701_p10)  ;;  %7746 = vmatprep.subr.bf16.mxu1 (!%p701_p10), %v8339_v4  ;;  %7750 = vmatprep.mubr.msk.bf16.mxu1 (!%p701_p10), %vm8340_vm0, %v8339_v4  ;;  %v887_v13 = vunpack.c.l.s4 (!%p701_p10), %v8341_v12  ;;  %v8342_v24 = vmov (!%p701_p10), 1934713408   ;;  %vm1256_vm1 = vcmask (!%p701_p10), 261120   ;;  %vm1442_vm2 = vcmask (!%p701_p10), 130048  }
  0x21   : > { %s9900_s24 = smov (!%p701_p10), 96   ;;  %s9904_s2 = smov (!%p701_p10), 64   ;;  %v8580_v19 = vshrl.u32 (!%p701_p10), %v889_v14, 7  ;;  %v904_v25 = vunpack.c.l.s4 (!%p701_p10), %v8342_v24  ;;  %vm2273_vm3 = vcmask (!%p701_p10), 523264   ;;  %vm2276_vm4 = vcmask (!%p701_p10), 785408  }
  0x22   : > { %s9937_s25 = sld [smem:[#allocation16_spill]] (!%p701_p10)  ;;  %s9902_s3 = smov (!%p701_p10), 32   ;;  %v888_v18 = vunpack.c.0.s8 (!%p701_p10), %v887_v13  ;;  %vm4281_vm7 = vcmask (!%p701_p10), 64512  }
  0x23   : > { %v905_v34 = vunpack.c.0.s8 (!%p701_p10), %v904_v25  ;;  %s9946_s22 = sld [smem:[#allocation15_spill]] (!%p701_p10)  ;;  %s9947_s0 = sld [smem:[#allocation20_spill]] (!%p701_p10) }
  0x24   : > { %v8583_v26 = vsub.s32 (!%p701_p10), %v888_v18, %v8580_v19  ;;  %s9949_s1 = sld [smem:[#allocation6_spill]] (!%p701_p10) }
  0x25   : > { %v8589_v47 = vsub.s32 (!%p701_p10), %v905_v34, %v8580_v19 }
  0x27   : > { %s8519_s27 = scalar_select %p799_p11, %s8326_s30, 1 }
  0x28   : > { %s9953_s30 = sld [smem:[#allocation24_spill]] }
  0x29   : > { %s8522_s23 = sshll.u32 %s8519_s27, 4  ;;  %s9899_s29 = sshll.u32 %s8519_s27, 3 }
  0x2a   : > { %s822_s4 = scalar_lea.vmem %s9936_s5, %s8522_s23  ;;  %s816_s26 = scalar_lea.vmem %s9937_s25, %s9899_s29 }
  0x2b   : > { %v8528_v0 = vld [vmem:[%s822_s4] sm:$0xff]  ;;  %v8534_v1 = vld [vmem:[%s822_s4 + $0x8] sm:$0xff]  ;;  %s9938_s5 = sld [smem:[#allocation19_spill]]  ;;  %s9939_s4 = sld [smem:[#allocation21_spill]] }
  0x2c   : > { %1025 = vrot.lane.b32.xlu0 %v8528_v0, %s9900_s24  ;;  %1029 = vrot.lane.b32.xlu1 %v8528_v0, %s9904_s2  ;;  %v845_v2 = vld [vmem:[%s816_s26] sm:$0xf]  ;;  %v846_v3 = vld [vmem:[%s816_s26 + $0x4] sm:$0xf]  ;;  %v7457_v5 = vcombine.low %v8528_v0, %v8534_v1  ;;  %s9941_s29 = smov 64   ;;  %s9942_s25 = smov 32  }
  0x2d   : > { %v876_v22 = vshrl.u32 %v846_v3, 16  ;;  %v864_v28 = vshrl.u32 %v845_v2, 16  ;;  %s795_s6 = sand.u32 1, %s9949_s1   ;;  %s8344_s1 = smov [#allocation2]  }
  0x30   : > { %1027 = vrot.lane.b32.xlu0 %v8534_v1, %s9900_s24  ;;  %1031 = vrot.lane.b32.xlu1 %v8534_v1, %s9904_s2 }
  0x31   : > { %s9940_s26 = smov %s9939_s4 }
  0x34   : > { %1033 = vrot.lane.b32.xlu0 %v8528_v0, %s9902_s3  ;;  %1035 = vrot.lane.b32.xlu1 %v8534_v1, %s9902_s3 }
  0x38   : > { %849 = vrot.lane.b32.xlu0 %v845_v2, %s9900_s24  ;;  %851 = vrot.lane.b32.xlu1 %v846_v3, %s9900_s24  ;;  %s9944_s24 = sshll.u32 %s8519_s27, 3  ;;  %s841_s27 = scalar_lea.vmem %s9947_s0, %s8522_s23 }
  0x39   : > { %s9950_s0 = sld [smem:[#allocation23_spill]] }
  0x3c   : > { %853 = vrot.lane.b32.xlu0 %v845_v2, %s9904_s2  ;;  %855 = vrot.lane.b32.xlu1 %v846_v3, %s9904_s2  ;;  %s9954_s2 = smov %s9953_s30 }
  0x40   : > { %857 = vrot.lane.b32.xlu0 %v845_v2, %s9902_s3  ;;  %859 = vrot.lane.b32.xlu1 %v846_v3, %s9902_s3  ;;  %s9943_s3 = smov 96  }
  0x5e   : > { %1189 = vxpose.xlu0.c.b16.start.end [1/1] (short) (narrow) %v7457_v5, 32 }
  0x9e   : > { %v8561_v6 = vpop.permute.xlu0 %1025  ;;  %v8563_v7 = vpop.permute.xlu1 %1029 }
  0xa2   : > { %v8565_v8 = vpop.permute.xlu0 %1027  ;;  %v8567_v9 = vpop.permute.xlu1 %1031 }
  0xa3   : > { %v7458_v10 = vcombine.low %v8561_v6, %v8565_v8  ;;  %v7459_v11 = vcombine.low %v8563_v7, %v8567_v9 }
  0xa5   : > { %1205 = vxpose.xlu1.c.b16.start.end [1/1] (short) (narrow) %v7458_v10, 32  ;;  %1221 = vxpose.xlu0.c.b16.start.end [1/1] (short) (narrow) %v7459_v11, 32 }
  0xa6   : > { %v8573_v15 = vpop.permute.xlu1 %1035  ;;  %v8575_v16 = vpop.permute.xlu0 %1033 }
  0xa7   : > { %v7460_v17 = vcombine.low %v8575_v16, %v8573_v15 }
  0xaa   : > { %v852_v20 = vpop.permute.xlu1 %851  ;;  %v850_v21 = vpop.permute.xlu0 %849  ;;  %1237 = vxpose.xlu0.c.b16.start.end [1/1] (short) (narrow) %v7460_v17, 32 }
  0xab   : > { %v877_v23 = vshrl.u32 %v852_v20, 16  ;;  %v875_v27 = vpack.i.b16 %v852_v20, %v846_v3  ;;  %v863_v29 = vpack.i.b16 %v850_v21, %v845_v2  ;;  %v865_v30 = vshrl.u32 %v850_v21, 16 }
  0xad   : > { %v878_v33 = vpack.i.b16 %v877_v23, %v876_v22  ;;  %v960_v37 = vrot.slane %v875_v27, %v8583_v26  ;;  %v866_v38 = vpack.i.b16 %v865_v30, %v864_v28  ;;  %v892_v39 = vrot.slane %v863_v29, %v8583_v26 }
  0xae   : > { %v856_v31 = vpop.permute.xlu1 %855  ;;  %v854_v32 = vpop.permute.xlu0 %853 }
  0xaf   : > { %v882_v35 = vshrl.u32 %v856_v31, 16  ;;  %v870_v36 = vshrl.u32 %v854_v32, 16  ;;  %v994_v46 = vrot.slane %v878_v33, %v8583_v26  ;;  %v926_v52 = vrot.slane %v866_v38, %v8583_v26 }
  0xb2   : > { %v860_v40 = vpop.permute.xlu1 %859  ;;  %v858_v41 = vpop.permute.xlu0 %857 }
  0xb3   : > { %v881_v42 = vpack.i.b16 %v860_v40, %v856_v31  ;;  %v883_v43 = vshrl.u32 %v860_v40, 16  ;;  %v869_v44 = vpack.i.b16 %v858_v41, %v854_v32  ;;  %v871_v45 = vshrl.u32 %v858_v41, 16 }
  0xb5   : > { %v884_v48 = vpack.i.b16 %v883_v43, %v882_v35  ;;  %v968_v49 = vrot.slane %v881_v42, %v8583_v26  ;;  %v872_v50 = vpack.i.b16 %v871_v45, %v870_v36  ;;  %v900_v51 = vrot.slane %v869_v44, %v8583_v26 }
  0xb6   : > { %v8343_v43 = vmov 0  }
  0xb7   : > { %v969_v53 = vcombine.low %v960_v37, %v968_v49  ;;  %v970_v54 = vcombine.high %v960_v37, %v968_v49  ;;  %v1002_v55 = vrot.slane %v884_v48, %v8583_v26  ;;  %v901_v56 = vcombine.low %v892_v39, %v900_v51 }
  0xb8   : > { %v902_v57 = vcombine.high %v892_v39, %v900_v51  ;;  %v934_v58 = vrot.slane %v872_v50, %v8583_v26 }
  0xb9   : > { %v977_v59 = vrot.slane %v969_v53, %v8589_v47  ;;  %v984_v60 = vrot.slane %v970_v54, %v8589_v47  ;;  %v1003_v61 = vcombine.low %v994_v46, %v1002_v55  ;;  %v1004_v62 = vcombine.high %v994_v46, %v1002_v55 }
  0xba   : > { %v909_v63 = vrot.slane %v901_v56, %v8589_v47  ;;  %v916_v2 = vrot.slane %v902_v57, %v8589_v47  ;;  %v935_v3 = vcombine.low %v926_v52, %v934_v58  ;;  %v936_v5 = vcombine.high %v926_v52, %v934_v58 }
  0xbb   : > { %v1011_v10 = vrot.slane %v1003_v61, %v8589_v47  ;;  %v1018_v11 = vrot.slane %v1004_v62, %v8589_v47  ;;  %v1099_v12 = vcombine.low %v977_v59, %v984_v60  ;;  %v7455_v13 = vcombine.high %v977_v59, %v984_v60 }
  0xbc   : > { %v943_v17 = vrot.slane %v935_v3, %v8589_v47  ;;  %v950_v18 = vrot.slane %v936_v5, %v8589_v47  ;;  %v1049_v20 = vcombine.low %v909_v63, %v916_v2  ;;  %v7453_v21 = vcombine.high %v909_v63, %v916_v2 }
  0xbd   : > { %v1106_v22 = vrot.slane %v1099_v12, %v8583_v26  ;;  %v1114_v23 = vrot.slane %v7455_v13, %v8583_v26  ;;  %v1124_v24 = vcombine.low %v1011_v10, %v1018_v11  ;;  %v7456_v25 = vcombine.high %v1011_v10, %v1018_v11 }
  0xbe   : > { %v1056_v27 = vrot.slane %v1049_v20, %v8583_v26  ;;  %v1064_v28 = vrot.slane %v7453_v21, %v8583_v26  ;;  %v1074_v29 = vcombine.low %v943_v17, %v950_v18  ;;  %v7454_v30 = vcombine.high %v943_v17, %v950_v18 }
  0xbf   : > { %v1115_v31 = vcombine.low %v1106_v22, %v1114_v23  ;;  %v1131_v32 = vrot.slane %v1124_v24, %v8583_v26  ;;  %v1139_v33 = vrot.slane %v7456_v25, %v8583_v26  ;;  %v7624_v24 = vld [vmem:[%s9938_s5] sm:$0xff]   ;;  %s9945_s5 = sld [smem:[#allocation18_spill]] }
  0xc0   : > { %v1065_v34 = vcombine.low %v1056_v27, %v1064_v28  ;;  %v1081_v35 = vrot.slane %v1074_v29, %v8583_v26  ;;  %v1089_v36 = vrot.slane %v7454_v30, %v8583_v26  ;;  %v7625_v25 = vunpack.c.l.bf16 %v7624_v24 }
  0xc1   : > { %v1122_v37 = vrot.slane %v1115_v31, %v8589_v47  ;;  %v1140_v38 = vcombine.low %v1131_v32, %v1139_v33  ;;  %v7626_v27 = vunpack.c.h.bf16 %v7624_v24 }
  0xc2   : > { %v1072_v39 = vrot.slane %v1065_v34, %v8589_v47  ;;  %v1090_v40 = vcombine.low %v1081_v35, %v1089_v36 }
  0xc3   : > { %v1147_v41 = vrot.slane %v1140_v38, %v8589_v47  ;;  %v1164_v42 = vshrl.u32 %v1122_v37, 16  ;;  %v1123_v44 = vcombine.high %v1122_v37, %v8343_v43 }
  0xc4   : > { %v1197_v45 = vpop.trf.xlu0  ;;  %v1097_v46 = vrot.slane %v1090_v40, %v8589_v47  ;;  %v1152_v48 = vshrl.u32 %v1072_v39, 16  ;;  %v1073_v49 = vcombine.high %v1072_v39, %v8343_v43 }
  0xc5   : > { %7747 = vmatpush3.bf16.msra.mxu1 %v1197_v45  ;;  %v1163_v50 = vpack.i.b16 %v1147_v41, %v1122_v37  ;;  %v1165_v51 = vshrl.u32 %v1147_v41, 16  ;;  %v1148_v52 = vcombine.high %v1147_v41, %v8343_v43  ;;  %v1170_v53 = vshrl.u32 %v1123_v44, 16  ;;  %s826_s21 = scalar_lea.vmem %s9945_s5, %s9944_s24  ;;  %s9948_s5 = sld [smem:[#allocation22_spill]] }
  0xc6   : > { %7748 = vmatprep.subr.bf16.mxu1 %v8339_v4  ;;  %v1151_v54 = vpack.i.b16 %v1097_v46, %v1072_v39  ;;  %v1153_v55 = vshrl.u32 %v1097_v46, 16  ;;  %v1098_v56 = vcombine.high %v1097_v46, %v8343_v43  ;;  %v1158_v57 = vshrl.u32 %v1073_v49, 16 }
  0xc7   : > { %v1166_v58 = vpack.i.b16 %v1165_v51, %v1164_v42  ;;  %v1169_v59 = vpack.i.b16 %v1148_v52, %v1123_v44  ;;  %v1171_v60 = vshrl.u32 %v1148_v52, 16 }
  0xc8   : > { %v1198_v61 = vpop.trf.xlu0  ;;  %v7461_v62 = vcombine.low %v1151_v54, %v1163_v50  ;;  %v1154_v63 = vpack.i.b16 %v1153_v55, %v1152_v48  ;;  %v1157_v2 = vpack.i.b16 %v1098_v56, %v1073_v49  ;;  %v1159_v3 = vshrl.u32 %v1098_v56, 16 }
  0xc9   : > { %7749 = vmatpush3.bf16.msra.mxu1 %v1198_v61  ;;  %v1172_v5 = vpack.i.b16 %v1171_v60, %v1170_v53 }
  0xca   : > { %7754 = vmatprep.subr.bf16.mxu1 %v8339_v4  ;;  %v7463_v10 = vcombine.low %v1154_v63, %v1166_v58  ;;  %v7465_v11 = vcombine.low %v1157_v2, %v1169_v59  ;;  %v1160_v12 = vpack.i.b16 %v1159_v3, %v1158_v57 }
  0xcc   : > { %7751 = vmatmul.mubr.msk.bf16.vlgmr.msra.gmra.mrb[0].mxu1 %vm1256_vm1, %v7461_v62  ;;  %v7467_v13 = vcombine.low %v1160_v12, %v1172_v5 }
  0xcd   : > { %7758 = vmatprep.mubr.msk.bf16.mxu1 %vm8340_vm0, %v8339_v4 }
 0x10b   : > { %v1213_v17 = vpop.trf.xlu1  ;;  %v1229_v18 = vpop.trf.xlu0 }
 0x10c   : > { %7755 = vmatpush3.bf16.msra.mxu1 %v1213_v17 }
 0x10d   : > { %7756 = vmatprep.subr.bf16.mxu1 %v8339_v4 }
 0x10f   : > { %v1214_v20 = vpop.trf.xlu1  ;;  %v1230_v21 = vpop.trf.xlu0 }
 0x110   : > { %7757 = vmatpush3.bf16.msra.mxu1 %v1214_v20 }
 0x111   : > { %7762 = vmatprep.subr.bf16.mxu1 %v8339_v4 }
 0x113   : > { %7759 = vmatmul.mubr.msk.bf16.vlgmr.msra.gmra.mrb[4].mxu1 %vm1256_vm1, %v7463_v10  ;;  %v1245_v22 = vpop.trf.xlu0 }
 0x114   : > { %7763 = vmatpush3.bf16.msra.mxu1 %v1229_v18  ;;  %7766 = vmatprep.mubr.msk.bf16.mxu1 %vm8340_vm0, %v8339_v4 }
 0x115   : > { %7764 = vmatprep.subr.bf16.mxu1 %v8339_v4 }
 0x117   : > { %v1246_v23 = vpop.trf.xlu0 }
 0x118   : > { %7765 = vmatpush3.bf16.msra.mxu1 %v1230_v21 }
 0x119   : > { %7770 = vmatprep.subr.bf16.mxu1 %v8339_v4 }
 0x11b   : > { %7767 = vmatmul.mubr.msk.bf16.vlgmr.msra.gmra.mrb[8].mxu1 %vm1256_vm1, %v7465_v11 }
 0x11c   : > { %7771 = vmatpush3.bf16.msra.mxu1 %v1245_v22  ;;  %7774 = vmatprep.mubr.msk.bf16.mxu1 %vm8340_vm0, %v8339_v4 }
 0x11d   : > { %7772 = vmatprep.subr.bf16.mxu1 %v8339_v4 }
 0x120   : > { %7773 = vmatpush3.bf16.msra.mxu1 %v1246_v23 }
 0x123   : > { %7775 = vmatmul.mubr.msk.bf16.vlgmr.msra.gmra.mrb[12].mxu1 %vm1256_vm1, %v7467_v13 }
 0x19f   : > { %v1294_v28 = vpop.f32.mrb[0].mxu1 }
 0x1a0   : > { %v1295_v29 = vadd.f32 %v7625_v25, %v1294_v28  ;;  %v7752_v30 = vpop.f32.mrb[1].mxu1 }
 0x1a1   : > { %v1297_v31 = vpop.f32.mrb[2].mxu1 }
 0x1a2   : > { %v1298_v32 = vadd.f32 %v7626_v27, %v1297_v31  ;;  %v1443_v33 = vsel %vm1442_vm2, %v1295_v29, -inf  ;;  %v7753_v34 = vpop.f32.mrb[3].mxu1 }
 0x1a3   : > { %1444 = vmax.xlane.f32.xlu1 %v1443_v33 }
 0x1a4   : > { %v1446_v35 = vsel %vm1442_vm2, %v1298_v32, -inf }
 0x1a5   : > { %1447 = vmax.xlane.f32.xlu0 %v1446_v35 }
 0x1e6   : > { %v1341_v36 = vpop.f32.mrb[4].mxu1 }
 0x1e7   : > { %v1342_v37 = vadd.f32 %v7625_v25, %v1341_v36  ;;  %v7760_v38 = vpop.f32.mrb[5].mxu1 }
 0x1e8   : > { %v1344_v39 = vpop.f32.mrb[6].mxu1 }
 0x1e9   : > { %v1345_v40 = vadd.f32 %v7626_v27, %v1344_v39  ;;  %v7761_v41 = vpop.f32.mrb[7].mxu1  ;;  %v1449_v42 = vsel %vm1442_vm2, %v1342_v37, -inf }
 0x1ea   : > { %1450 = vmax.xlane.f32.xlu1 %v1449_v42 }
 0x1eb   : > { %v1452_v44 = vsel %vm1442_vm2, %v1345_v40, -inf }
 0x1ee   : > { %1453 = vmax.xlane.f32.xlu1 %v1452_v44  ;;  %v1388_v45 = vpop.f32.mrb[8].mxu1 }
 0x1ef   : > { %v1389_v46 = vadd.f32 %v7625_v25, %v1388_v45  ;;  %v7768_v48 = vpop.f32.mrb[9].mxu1 }
 0x1f0   : > { %v1391_v49 = vpop.f32.mrb[10].mxu1 }
 0x1f1   : > { %v1392_v50 = vadd.f32 %v7626_v27, %v1391_v49  ;;  %v7769_v51 = vpop.f32.mrb[11].mxu1  ;;  %v1455_v52 = vsel %vm1442_vm2, %v1389_v46, -inf }
 0x1f2   : > { %1456 = vmax.xlane.f32.xlu0 %v1455_v52  ;;  %v1037_v52 = vrot.slane %v8528_v0, 4 }
 0x1f3   : > { %v1458_v53 = vsel %vm1442_vm2, %v1392_v50, -inf }
 0x1f4   : > { %1459 = vmax.xlane.f32.xlu1 %v1458_v53  ;;  %v1038_v53 = vrot.slane %v8534_v1, 4 }
 0x1f6   : > { %v1435_v54 = vpop.f32.mrb[12].mxu1 }
 0x1f7   : > { %v1436_v55 = vadd.f32 %v7625_v25, %v1435_v54  ;;  %v7776_v56 = vpop.f32.mrb[13].mxu1  ;;  %v1040_v54 = vrot.slane %v8565_v8, 4 }
 0x1f8   : > { %v1438_v57 = vpop.f32.mrb[14].mxu1  ;;  %v1039_v56 = vrot.slane %v8561_v6, 4 }
 0x1f9   : > { %v1439_v58 = vadd.f32 %v7626_v27, %v1438_v57  ;;  %v7777_v59 = vpop.f32.mrb[15].mxu1  ;;  %v1461_v60 = vsel %vm1442_vm2, %v1436_v55, -inf  ;;  %v1041_v57 = vrot.slane %v8563_v7, 4 }
 0x1fa   : > { %1462 = vmax.xlane.f32.xlu0 %v1461_v60  ;;  %v7470_v59 = vcombine.low %v1039_v56, %v1040_v54  ;;  %v1043_v60 = vrot.slane %v8575_v16, 4 }
 0x1fb   : > { %v1464_v61 = vsel %vm1442_vm2, %v1439_v58, -inf }
 0x1fc   : > { %1465 = vmax.xlane.f32.xlu1 %v1464_v61  ;;  %v1044_v61 = vrot.slane %v8573_v15, 4 }
 0x1fe   : > { %v7472_v0 = vcombine.low %v1043_v60, %v1044_v61 }
 0x230   : > { %v1445_v62 = vpop.xlane.xlu1 %1444 }
 0x231   : > { %v1467_v63 = vsub.f32 %v1295_v29, %v1445_v62 }
 0x232   : > { %v1448_v2 = vpop.xlane.xlu0 %1447 }
 0x233   : > { %v1475_v3 = vmul.f32 1.442695, %v1467_v63  ;;  %v1468_v5 = vsub.f32 %v1298_v32, %v1448_v2 }
 0x235   : > { %8152 = vpow2.f32 %v1475_v3  ;;  %v1477_v10 = vmul.f32 1.442695, %v1468_v5 }
 0x237   : > { %8154 = vpow2.f32 %v1477_v10 }
 0x23f   : > { %v8648_v11 = vpop.eup %8152 }
 0x240   : > { %v1491_v12 = vsel %vm1442_vm2, %v8648_v11, 0.0 }
 0x241   : > { %v8652_v13 = vpop.eup %8154  ;;  %1492 = vadd.xlane.f32.xlu0 %v1491_v12 }
 0x242   : > { %v1494_v17 = vsel %vm1442_vm2, %v8652_v13, 0.0 }
 0x243   : > { %1495 = vadd.xlane.f32.xlu1 %v1494_v17 }
 0x277   : > { %v1451_v18 = vpop.xlane.xlu1 %1450 }
 0x278   : > { %v1469_v20 = vsub.f32 %v1342_v37, %v1451_v18 }
 0x27a   : > { %v1479_v21 = vmul.f32 1.442695, %v1469_v20 }
 0x27b   : > { %v1454_v22 = vpop.xlane.xlu1 %1453 }
 0x27c   : > { %8156 = vpow2.f32 %v1479_v21  ;;  %v1470_v23 = vsub.f32 %v1345_v40, %v1454_v22 }
 0x27e   : > { %v1481_v24 = vmul.f32 1.442695, %v1470_v23 }
 0x27f   : > { %v1457_v25 = vpop.xlane.xlu0 %1456 }
 0x280   : > { %8158 = vpow2.f32 %v1481_v24  ;;  %v1471_v27 = vsub.f32 %v1389_v46, %v1457_v25 }
 0x281   : > { %v1460_v28 = vpop.xlane.xlu1 %1459 }
 0x282   : > { %v1483_v29 = vmul.f32 1.442695, %v1471_v27  ;;  %v1472_v30 = vsub.f32 %v1392_v50, %v1460_v28 }
 0x284   : > { %8160 = vpow2.f32 %v1483_v29  ;;  %v1485_v31 = vmul.f32 1.442695, %v1472_v30 }
 0x286   : > { %v8656_v32 = vpop.eup %8156  ;;  %8162 = vpow2.f32 %v1485_v31 }
 0x287   : > { %v1463_v33 = vpop.xlane.xlu0 %1462  ;;  %v1497_v34 = vsel %vm1442_vm2, %v8656_v32, 0.0 }
 0x288   : > { %v1473_v35 = vsub.f32 %v1436_v55, %v1463_v33  ;;  %1498 = vadd.xlane.f32.xlu0 %v1497_v34  ;;  %v7469_v55 = vcombine.low %v1037_v52, %v1038_v53 }
 0x289   : > { %v1466_v36 = vpop.xlane.xlu1 %1465 }
 0x28a   : > { %v8159_v37 = vpop.eup %8158  ;;  %v1487_v38 = vmul.f32 1.442695, %v1473_v35  ;;  %v1474_v39 = vsub.f32 %v1439_v58, %v1466_v36  ;;  %v1042_v58 = vrot.slane %v8567_v9, 4 }
 0x28b   : > { %v1500_v40 = vsel %vm1442_vm2, %v8159_v37, 0.0 }
 0x28c   : > { %8164 = vpow2.f32 %v1487_v38  ;;  %v1489_v41 = vmul.f32 1.442695, %v1474_v39  ;;  %1501 = vadd.xlane.f32.xlu1 %v1500_v40  ;;  %v7471_v62 = vcombine.low %v1041_v57, %v1042_v58 }
 0x28e   : > { %v8661_v42 = vpop.eup %8160  ;;  %8166 = vpow2.f32 %v1489_v41 }
 0x28f   : > { %v1503_v44 = vsel %vm1442_vm2, %v8661_v42, 0.0 }
 0x290   : > { %v8163_v45 = vpop.eup %8162  ;;  %1504 = vadd.xlane.f32.xlu0 %v1503_v44 }
 0x291   : > { %v1506_v46 = vsel %vm1442_vm2, %v8163_v45, 0.0 }
 0x292   : > { %1507 = vadd.xlane.f32.xlu1 %v1506_v46 }
 0x296   : > { %v8666_v48 = vpop.eup %8164 }
 0x297   : > { %v1509_v49 = vsel %vm1442_vm2, %v8666_v48, 0.0 }
 0x298   : > { %v8670_v50 = vpop.eup %8166  ;;  %1510 = vadd.xlane.f32.xlu0 %v1509_v49 }
 0x299   : > { %v1512_v51 = vsel %vm1442_vm2, %v8670_v50, 0.0 }
 0x29a   : > { %1513 = vadd.xlane.f32.xlu1 %v1512_v51 }
 0x2c5   : > { %1551 = vxpose.xlu0.c.b16.start.end [1/1] (short) (narrow) %v7469_v55, 32 }
 0x2c7   : > { %1567 = vxpose.xlu1.c.b16.start.end [1/1] (short) (narrow) %v7470_v59, 32 }
 0x2ca   : > { %1583 = vxpose.xlu0.c.b16.start.end [1/1] (short) (narrow) %v7471_v62, 32  ;;  %v8024_v62 = vld [vmem:[%s9939_s4] sm:$0xff]   ;;  %s9824_s4 = scalar_lea.sflag [#allocation3], %s795_s6 }
 0x2cc   : > { %1599 = vxpose.xlu1.c.b16.start.end [1/1] (short) (narrow) %v7472_v0, 32  ;;  %v8025_v0 = vld [vmem:[%s9940_s26 + $0x8] sm:$0xff]  }
 0x2ce   : > { %v1493_v1 = vpop.xlane.xlu0 %1492 }
 0x2cf   : > { %8168 = vrcp.f32 %v1493_v1  ;;  %v8026_v1 = vld [vmem:[%s9940_s26 + $0x10] sm:$0xff]  }
 0x2d0   : > { %v1496_v8 = vpop.xlane.xlu1 %1495 }
 0x2d1   : > { %8170 = vrcp.f32 %v1496_v8  ;;  %v8027_v8 = vld [vmem:[%s9940_s26 + $0x18] sm:$0xff]  }
 0x2d9   : > { %v8169_v6 = vpop.eup %8168 }
 0x2da   : > { %v1523_v7 = vmul.f32 %v8169_v6, %v8648_v11  ;;  %v8028_v6 = vld [vmem:[%s9940_s26 + $0x20] sm:$0xff]  }
 0x2db   : > { %v8171_v63 = vpop.eup %8170 }
 0x2dc   : > { %v1524_v9 = vmul.f32 %v8171_v63, %v8652_v13  ;;  %v8029_v63 = vld [vmem:[%s9940_s26 + $0x28] sm:$0xff]  }
 0x2de   : > { %v1531_v2 = vpack.c.bf16 %v1524_v9, %v1523_v7 }
 0x2e0   : > { %7918 = vmatprep.subr.msk.bf16.mxu0 %vm1442_vm2, %v1531_v2  ;;  %v1622_v15 = vsel %vm1442_vm2, %v1531_v2, 0 }
 0x2e1   : > { %7779 = vmatpush3.bf16.xpose.msra.mxu0 %v1622_v15 }
 0x315   : > { %v1499_v16 = vpop.xlane.xlu0 %1498 }
 0x316   : > { %8172 = vrcp.f32 %v1499_v16 }
 0x319   : > { %v1502_v3 = vpop.xlane.xlu1 %1501 }
 0x31a   : > { %8174 = vrcp.f32 %v1502_v3 }
 0x31d   : > { %v1505_v5 = vpop.xlane.xlu0 %1504 }
 0x31e   : > { %8176 = vrcp.f32 %v1505_v5 }
 0x31f   : > { %v1508_v10 = vpop.xlane.xlu1 %1507 }
 0x320   : > { %8178 = vrcp.f32 %v1508_v10  ;;  %v8173_v12 = vpop.eup %8172 }
 0x321   : > { %v1525_v11 = vmul.f32 %v8173_v12, %v8656_v32 }
 0x324   : > { %v8175_v17 = vpop.eup %8174 }
 0x325   : > { %v1511_v18 = vpop.xlane.xlu0 %1510  ;;  %v1526_v13 = vmul.f32 %v8175_v17, %v8159_v37 }
 0x326   : > { %8180 = vrcp.f32 %v1511_v18 }
 0x327   : > { %v1514_v20 = vpop.xlane.xlu1 %1513  ;;  %v1532_v21 = vpack.c.bf16 %v1526_v13, %v1525_v11 }
 0x328   : > { %v8177_v22 = vpop.eup %8176  ;;  %8182 = vrcp.f32 %v1514_v20 }
 0x329   : > { %7919 = vmatprep.subr.msk.bf16.mxu1 %vm1442_vm2, %v1532_v21  ;;  %v1680_v23 = vsel %vm1442_vm2, %v1532_v21, 0  ;;  %v1527_v27 = vmul.f32 %v8177_v22, %v8661_v42 }
 0x32a   : > { %v8179_v24 = vpop.eup %8178  ;;  %7785 = vmatpush3.bf16.xpose.msra.mxu1 %v1680_v23 }
 0x32b   : > { %v1559_v25 = vpop.trf.xlu0  ;;  %v1528_v28 = vmul.f32 %v8179_v24, %v8163_v45 }
 0x32c   : > { %7780 = vmatprep.mubr.msk.bf16.mxu0 %vm1442_vm2, %v1559_v25 }
 0x32d   : > { %v1575_v29 = vpop.trf.xlu1  ;;  %v1533_v30 = vpack.c.bf16 %v1528_v28, %v1527_v27 }
 0x32e   : > { %7786 = vmatprep.mubr.msk.bf16.mxu1 %vm1442_vm2, %v1575_v29 }
 0x32f   : > { %7920 = vmatprep.subr.msk.bf16.mxu0 %vm1442_vm2, %v1533_v30  ;;  %v1560_v31 = vpop.trf.xlu0  ;;  %v1738_v32 = vsel %vm1442_vm2, %v1533_v30, 0 }
 0x330   : > { %v8181_v33 = vpop.eup %8180  ;;  %7781 = vmatmul.mubr.msk.bf16.vlgmr.msra.gmra.mrb[0].mxu0 %vm1442_vm2, %v1560_v31 }
 0x331   : > { %7791 = vmatpush3.bf16.xpose.msra.mxu0 %v1738_v32  ;;  %v1576_v34 = vpop.trf.xlu1  ;;  %v1529_v36 = vmul.f32 %v8181_v33, %v8666_v48 }
 0x332   : > { %v8183_v35 = vpop.eup %8182  ;;  %7787 = vmatmul.mubr.msk.bf16.vlgmr.msra.gmra.mrb[16].mxu1 %vm1442_vm2, %v1576_v34  ;;  %7802 = vmatprep.subr.bf16.mxu0 %v8339_v4 }
 0x333   : > { %v1530_v37 = vmul.f32 %v8183_v35, %v8670_v50  ;;  %v1591_v38 = vpop.trf.xlu0 }
 0x334   : > { %7792 = vmatprep.mubr.msk.bf16.mxu0 %vm1442_vm2, %v1591_v38 }
 0x335   : > { %v1534_v39 = vpack.c.bf16 %v1530_v37, %v1529_v36  ;;  %v1607_v40 = vpop.trf.xlu1 }
 0x336   : > { %7798 = vmatprep.mubr.msk.bf16.mxu1 %vm1442_vm2, %v1607_v40 }
 0x337   : > { %7921 = vmatprep.subr.msk.bf16.mxu1 %vm1442_vm2, %v1534_v39  ;;  %v1796_v41 = vsel %vm1442_vm2, %v1534_v39, 0  ;;  %v1592_v42 = vpop.trf.xlu0 }
 0x338   : > { %7797 = vmatpush3.bf16.xpose.msra.mxu1 %v1796_v41  ;;  %7793 = vmatmul.mubr.msk.bf16.vlgmr.msra.gmra.mrb[4].mxu0 %vm1442_vm2, %v1592_v42 }
 0x339   : > { %7818 = vmatprep.mubr.msk.bf16.mxu0 %vm8340_vm0, %v8339_v4  ;;  %7822 = vmatprep.subr.bf16.mxu1 %v8339_v4  ;;  %v1608_v44 = vpop.trf.xlu1 }
 0x33a   : > { %7803 = vmatpush3.bf16.msra.mxu0 %v8024_v62  ;;  %v8030_v62 = vld [vmem:[%s9940_s26 + $0x30] sm:$0xff]  }
 0x33b   : > { %7804 = vmatprep.subr.bf16.mxu0 %v8339_v4 }
 0x33e   : > { %7805 = vmatpush3.bf16.msra.mxu0 %v8025_v0 }
 0x33f   : > { %7799 = vmatmul.mubr.msk.bf16.vlgmr.msra.gmra.mrb[20].mxu1 %vm1442_vm2, %v1608_v44  ;;  %7806 = vmatprep.subr.bf16.mxu0 %v8339_v4 }
 0x340   : > { %7838 = vmatprep.mubr.msk.bf16.mxu1 %vm8340_vm0, %v8339_v4 }
 0x342   : > { %7807 = vmatpush3.bf16.msra.mxu0 %v8026_v1 }
 0x343   : > { %7808 = vmatprep.subr.bf16.mxu0 %v8339_v4 }
 0x346   : > { %7809 = vmatpush3.bf16.msra.mxu0 %v8027_v8 }
 0x347   : > { %7810 = vmatprep.subr.bf16.mxu0 %v8339_v4 }
 0x34a   : > { %7811 = vmatpush3.bf16.msra.mxu0 %v8028_v6 }
 0x34b   : > { %7812 = vmatprep.subr.bf16.mxu0 %v8339_v4 }
 0x34e   : > { %7813 = vmatpush3.bf16.msra.mxu0 %v8029_v63 }
 0x34f   : > { %7814 = vmatprep.subr.bf16.mxu0 %v8339_v4 }
 0x352   : > { %7815 = vmatpush3.bf16.msra.mxu0 %v8030_v62  ;;  %v8044_v62 = vld [vmem:[%s9880_s10 + $0x40] ss:$8 sps:$4 sm:$0xff]  }
 0x353   : > { %7816 = vmatprep.subr.bf16.mxu0 %v8339_v4 }
 0x403   : > { %v7782_v45 = vpop.f32.mrb[0].mxu0 }
 0x404   : > { %v1658_v46 = vpop.f32.mrb[1].mxu0 }
 0x405   : > { %v7788_v48 = vpop.f32.mrb[16].mxu1  ;;  %1847 = vxpose.xlu0.b32.start [1/4] (short) (narrow) %v1658_v46, 16  ;;  %v7783_v49 = vpop.f32.mrb[2].mxu0 }
 0x406   : > { %v1661_v50 = vpop.f32.mrb[3].mxu0  ;;  %v1716_v51 = vpop.f32.mrb[17].mxu1 }
 0x407   : > { %1879 = vxpose.xlu1.b32.start [1/4] (short) (narrow) %v1716_v51, 16  ;;  %v7789_v52 = vpop.f32.mrb[18].mxu1 }
 0x408   : > { %v1719_v53 = vpop.f32.mrb[19].mxu1 }
 0x409   : > { %1848 = vxpose.xlu0.b32.cont [2/4] (short) (narrow) %v1661_v50, 16 }
 0x40b   : > { %1880 = vxpose.xlu1.b32.cont [2/4] (short) (narrow) %v1719_v53, 16  ;;  %v7794_v54 = vpop.f32.mrb[4].mxu0 }
 0x40c   : > { %v1774_v55 = vpop.f32.mrb[5].mxu0 }
 0x40d   : > { %1849 = vxpose.xlu0.b32.cont [3/4] (short) (narrow) %v7782_v45, 16  ;;  %v7795_v56 = vpop.f32.mrb[6].mxu0 }
 0x40e   : > { %v1777_v57 = vpop.f32.mrb[7].mxu0 }
 0x40f   : > { %1881 = vxpose.xlu1.b32.cont [3/4] (short) (narrow) %v7788_v48, 16 }
 0x411   : > { %1850 = vxpose.xlu0.b32.end [4/4] (short) (narrow) %v7783_v49, 16 }
 0x412   : > { %v7800_v58 = vpop.f32.mrb[20].mxu1 }
 0x413   : > { %1882 = vxpose.xlu1.b32.end [4/4] (short) (narrow) %v7789_v52, 16  ;;  %v1832_v59 = vpop.f32.mrb[21].mxu1 }
 0x414   : > { %v7801_v60 = vpop.f32.mrb[22].mxu1 }
 0x415   : > { %1911 = vxpose.xlu0.b32.start [1/4] (short) (narrow) %v1774_v55, 16  ;;  %v1835_v61 = vpop.f32.mrb[23].mxu1 }
 0x417   : > { %1943 = vxpose.xlu1.b32.start [1/4] (short) (narrow) %v1832_v59, 16 }
 0x419   : > { %1912 = vxpose.xlu0.b32.cont [2/4] (short) (narrow) %v1777_v57, 16 }
 0x41b   : > { %1944 = vxpose.xlu1.b32.cont [2/4] (short) (narrow) %v1835_v61, 16 }
 0x41d   : > { %1913 = vxpose.xlu0.b32.cont [3/4] (short) (narrow) %v7794_v54, 16 }
 0x41f   : > { %1945 = vxpose.xlu1.b32.cont [3/4] (short) (narrow) %v7800_v58, 16 }
 0x421   : > { %1914 = vxpose.xlu0.b32.end [4/4] (short) (narrow) %v7795_v56, 16 }
 0x423   : > { %1946 = vxpose.xlu1.b32.end [4/4] (short) (narrow) %v7801_v60, 16 }
 0x485   : > { %v1863_v7 = vpop.trf.xlu0 }
 0x487   : > { %v1895_v9 = vpop.trf.xlu1 }
 0x489   : > { %v1864_v2 = vpop.trf.xlu0 }
 0x48b   : > { %v1896_v15 = vpop.trf.xlu1 }
 0x495   : > { %v1927_v16 = vpop.trf.xlu0 }
 0x496   : > { %v1975_v3 = vcombine.low %v1863_v7, %v1927_v16  ;;  %v1976_v5 = vcombine.high %v1863_v7, %v1927_v16 }
 0x497   : > { %v1959_v10 = vpop.trf.xlu1 }
 0x498   : > { %v1991_v12 = vcombine.low %v1895_v9, %v1959_v10  ;;  %v1992_v17 = vcombine.high %v1895_v9, %v1959_v10  ;;  %v1983_v11 = vrot.slane %v1975_v3, %v8583_v26  ;;  %v1990_v13 = vrot.slane %v1976_v5, %v8583_v26 }
 0x499   : > { %v1928_v18 = vpop.trf.xlu0 }
 0x49a   : > { %v1999_v20 = vrot.slane %v1991_v12, %v8583_v26  ;;  %v2006_v21 = vrot.slane %v1992_v17, %v8583_v26  ;;  %v2043_v22 = vcombine.low %v1864_v2, %v1928_v18  ;;  %v2044_v23 = vcombine.high %v1864_v2, %v1928_v18  ;;  %v8031_v12 = vld [vmem:[%s9940_s26 + $0x38] sm:$0xff]   ;;  %s806_s26 = scalar_lea.vmem %s9946_s22, %s8522_s23  ;;  %s7443_s23 = sshll.u32 %s795_s6, 4 }
 0x49b   : > { %v1960_v24 = vpop.trf.xlu1  ;;  %7817 = vmatpush3.bf16.msra.mxu0 %v8031_v12  ;;  %v2280_v12 = vld [vmem:[%s806_s26 + $0x8] sm:$0xff]  ;;  %s8260_s22 = sshll.u32 %s8344_s1, 4  ;;  %s8261_s22 = int_to_ptr.vmem [resolvable:$false] %s8260_s22 }
 0x49c   : > { %v2007_v25 = vcombine.low %v1983_v11, %v1999_v20  ;;  %v2008_v27 = vcombine.high %v1983_v11, %v1999_v20  ;;  %v2023_v28 = vcombine.low %v1990_v13, %v2006_v21  ;;  %v2024_v29 = vcombine.high %v1990_v13, %v2006_v21 }
 0x49d   : > { %v2059_v30 = vcombine.low %v1896_v15, %v1960_v24  ;;  %v2060_v31 = vcombine.high %v1896_v15, %v1960_v24  ;;  %v2051_v36 = vrot.slane %v2043_v22, %v8583_v26  ;;  %v2058_v37 = vrot.slane %v2044_v23, %v8583_v26 }
 0x49e   : > { %v2015_v32 = vrot.slane %v2007_v25, %v8589_v47  ;;  %v2022_v33 = vrot.slane %v2008_v27, %v8589_v47  ;;  %v2031_v34 = vrot.slane %v2023_v28, %v8589_v47  ;;  %v2038_v35 = vrot.slane %v2024_v29, %v8589_v47 }
 0x49f   : > { %v2067_v38 = vrot.slane %v2059_v30, %v8583_v26  ;;  %v2074_v39 = vrot.slane %v2060_v31, %v8583_v26  ;;  %v8034_v30 = vld [vmem:[%s9880_s10 + $0x4] ss:$8 sps:$4 sm:$0xff]  }
 0x4a0   : > { %v2111_v40 = vcombine.low %v2015_v32, %v2022_v33  ;;  %v7481_v41 = vcombine.high %v2015_v32, %v2022_v33  ;;  %v2127_v42 = vcombine.low %v2031_v34, %v2038_v35  ;;  %v7482_v44 = vcombine.high %v2031_v34, %v2038_v35  ;;  %2663 = vmatprep.subr.bf16.mxu0 %v8034_v30 }
 0x4a1   : > { %v2075_v45 = vcombine.low %v2051_v36, %v2067_v38  ;;  %v2076_v46 = vcombine.high %v2051_v36, %v2067_v38  ;;  %v2091_v48 = vcombine.low %v2058_v37, %v2074_v39  ;;  %v2092_v49 = vcombine.high %v2058_v37, %v2074_v39 }
 0x4a2   : > { %v2118_v50 = vrot.slane %v2111_v40, %v8583_v26  ;;  %v2126_v51 = vrot.slane %v7481_v41, %v8583_v26  ;;  %v2134_v52 = vrot.slane %v2127_v42, %v8583_v26  ;;  %v2142_v53 = vrot.slane %v7482_v44, %v8583_v26 }
 0x4a3   : > { %v2083_v54 = vrot.slane %v2075_v45, %v8589_v47  ;;  %v2090_v55 = vrot.slane %v2076_v46, %v8589_v47  ;;  %v2099_v56 = vrot.slane %v2091_v48, %v8589_v47  ;;  %v2106_v57 = vrot.slane %v2092_v49, %v8589_v47 }
 0x4a4   : > { %v2144_v58 = vcombine.high %v2118_v50, %v2126_v51  ;;  %v2160_v59 = vcombine.high %v2134_v52, %v2142_v53  ;;  %v2143_v60 = vcombine.low %v2118_v50, %v2126_v51  ;;  %v2159_v61 = vcombine.low %v2134_v52, %v2142_v53  ;;  %v8032_v53 = vld [vmem:[%s9880_s10] ss:$8 sps:$4 sm:$0xff]  }
 0x4a5   : > { %v2179_v0 = vcombine.low %v2083_v54, %v2090_v55  ;;  %v7483_v1 = vcombine.high %v2083_v54, %v2090_v55  ;;  %v2195_v8 = vcombine.low %v2099_v56, %v2106_v57  ;;  %v7484_v6 = vcombine.high %v2099_v56, %v2106_v57  ;;  %v8037_v55 = vld [vmem:[%s9880_s10 + $0x14] ss:$8 sps:$4 sm:$0xff]   ;;  %v8035_v56 = vld [vmem:[%s9880_s10 + $0x10] ss:$8 sps:$4 sm:$0xff]   ;;  %v8040_v57 = vld [vmem:[%s9880_s10 + $0x24] ss:$8 sps:$4 sm:$0xff]  }
 0x4a6   : > { %v2151_v63 = vrot.slane %v2143_v60, %v8589_v47  ;;  %v2167_v7 = vrot.slane %v2159_v61, %v8589_v47  ;;  %v2158_v3 = vrot.slane %v2144_v58, %v8589_v47  ;;  %v2174_v5 = vrot.slane %v2160_v59, %v8589_v47  ;;  %v8038_v58 = vld [vmem:[%s9880_s10 + $0x20] ss:$8 sps:$4 sm:$0xff]   ;;  %v8043_v59 = vld [vmem:[%s9880_s10 + $0x34] ss:$8 sps:$4 sm:$0xff]   ;;  %v8041_v60 = vld [vmem:[%s9880_s10 + $0x30] ss:$8 sps:$4 sm:$0xff]  }
 0x4a7   : > { %v2186_v9 = vrot.slane %v2179_v0, %v8583_v26  ;;  %v2194_v2 = vrot.slane %v7483_v1, %v8583_v26  ;;  %v2202_v15 = vrot.slane %v2195_v8, %v8583_v26  ;;  %v2210_v16 = vrot.slane %v7484_v6, %v8583_v26  ;;  %v8046_v61 = vld [vmem:[%s9880_s10 + $0x44] ss:$8 sps:$4 sm:$0xff]   ;;  %v8049_v0 = vld [vmem:[%s9880_s10 + $0x54] ss:$8 sps:$4 sm:$0xff]   ;;  %v8047_v1 = vld [vmem:[%s9880_s10 + $0x50] ss:$8 sps:$4 sm:$0xff]  }
 0x4a8   : > { %v2175_v10 = vcombine.low %v2151_v63, %v2167_v7  ;;  %v2177_v24 = vcombine.low %v2158_v3, %v2174_v5  ;;  %v2176_v27 = vcombine.high %v2151_v63, %v2167_v7  ;;  %v2178_v34 = vcombine.high %v2158_v3, %v2174_v5  ;;  %v8052_v8 = vld [vmem:[%s9880_s10 + $0x64] ss:$8 sps:$4 sm:$0xff]   ;;  %v8050_v6 = vld [vmem:[%s9880_s10 + $0x60] ss:$8 sps:$4 sm:$0xff]   ;;  %v8055_v63 = vld [vmem:[%s9880_s10 + $0x74] ss:$8 sps:$4 sm:$0xff]  }
 0x4a9   : > { %v2212_v17 = vcombine.high %v2186_v9, %v2194_v2  ;;  %v2228_v18 = vcombine.high %v2202_v15, %v2210_v16  ;;  %v2211_v11 = vcombine.low %v2186_v9, %v2194_v2  ;;  %v2227_v13 = vcombine.low %v2202_v15, %v2210_v16  ;;  %v8053_v7 = vld [vmem:[%s9880_s10 + $0x70] ss:$8 sps:$4 sm:$0xff]   ;;  %v2553_v9 = vld [vmem:[%s826_s21] sm:$0xff] }
 0x4aa   : > { %v2571_v2 = vpack.c.bf16 %v2553_v9, %v2553_v9  ;;  %v7485_v15 = vld [vmem:[%s9877_s7] ss:$0 sm:$0xff] }
 0x4ab   : > { %v2226_v20 = vrot.slane %v2212_v17, %v8589_v47  ;;  %v2242_v21 = vrot.slane %v2228_v18, %v8589_v47  ;;  %v2219_v22 = vrot.slane %v2211_v11, %v8589_v47  ;;  %v2235_v23 = vrot.slane %v2227_v13, %v8589_v47  ;;  %v2279_v16 = vld [vmem:[%s806_s26] sm:$0xff]  ;;  %s8262_s26 = scalar_lea.vmem %s8261_s22, 512 }
 0x4ad   : > { %v2245_v25 = vcombine.low %v2226_v20, %v2242_v21  ;;  %v2244_v28 = vcombine.high %v2219_v22, %v2235_v23  ;;  %v2243_v29 = vcombine.low %v2219_v22, %v2235_v23  ;;  %v2246_v33 = vcombine.high %v2226_v20, %v2242_v21  ;;  %v2570_v21 = vld [vmem:[%s9881_s11] sm:$0x3] }
 0x4ae   : > { %v2575_v22 = vsub.s32 0, %v8580_v19 }
 0x4af   : > { %v7996_v31 = vpack.i.bf16 %v2245_v25, %v2177_v24  ;;  %v7991_v32 = vpack.i.bf16 %v2244_v28, %v2176_v27  ;;  %v8001_v35 = vpack.i.bf16 %v2246_v33, %v2178_v34  ;;  %v2579_v27 = vsub.s32 1, %v8580_v19 }
 0x4b0   : > { %v2576_v23 = vrot.slane %v2570_v21, %v2575_v22 }
 0x4b1   : > { %7997 = vrot.lane.b32.xlu1 %v7996_v31, %s9941_s29  ;;  %7992 = vrot.lane.b32.xlu0 %v7991_v32, %s9942_s25  ;;  %v2580_v31 = vrot.slane %v2570_v21, %v2579_v27 }
 0x4b5   : > { %8002 = vrot.lane.b32.xlu1 %v8001_v35, %s9943_s3 }
 0x523   : > { %v7998_v36 = vpop.permute.xlu1 %7997  ;;  %v7993_v37 = vpop.permute.xlu0 %7992 }
 0x524   : > { %v7995_v38 = vunpack.i.h.bf16 %v7993_v37  ;;  %v7994_v39 = vunpack.i.l.bf16 %v7993_v37  ;;  %v8000_v40 = vunpack.i.h.bf16 %v7998_v36  ;;  %v7999_v41 = vunpack.i.l.bf16 %v7998_v36 }
 0x526   : > { %v2271_v42 = vsel %vm1256_vm1, %v2175_v10, %v7994_v39  ;;  %v2272_v44 = vsel %vm1256_vm1, %v2243_v29, %v7995_v38  ;;  %v8056_v29 = vld [vmem:[%s9878_s8] sm:$0xff]  }
 0x527   : > { %v8003_v45 = vpop.permute.xlu1 %8002  ;;  %v2274_v49 = vsel %vm2273_vm3, %v2271_v42, %v7999_v41  ;;  %v2275_v50 = vsel %vm2273_vm3, %v2272_v44, %v8000_v40  ;;  %7823 = vmatpush3.bf16.msra.mxu1 %v8056_v29  ;;  %v8057_v42 = vld [vmem:[%s9878_s8 + $0x8] sm:$0xff]   ;;  %v8058_v44 = vld [vmem:[%s9878_s8 + $0x10] sm:$0xff]  }
 0x528   : > { %v8005_v46 = vunpack.i.h.bf16 %v8003_v45  ;;  %v8004_v48 = vunpack.i.l.bf16 %v8003_v45  ;;  %7824 = vmatprep.subr.bf16.mxu1 %v8339_v4  ;;  %v8059_v45 = vld [vmem:[%s9878_s8 + $0x18] sm:$0xff]  }
 0x52a   : > { %v2277_v51 = vsel %vm2276_vm4, %v2274_v49, %v8004_v48  ;;  %v2278_v52 = vsel %vm2276_vm4, %v2275_v50, %v8005_v46  ;;  %v8060_v46 = vld [vmem:[%s9878_s8 + $0x20] sm:$0xff]   ;;  %v8061_v48 = vld [vmem:[%s9878_s8 + $0x28] sm:$0xff]   ;;  %v8062_v49 = vld [vmem:[%s9878_s8 + $0x30] sm:$0xff]  }
 0x52b   : > { %v2298_v54 = vpack.c.bf16 %v2278_v52, %v2277_v51  ;;  %7825 = vmatpush3.bf16.msra.mxu1 %v8057_v42  ;;  %v8063_v50 = vld [vmem:[%s9878_s8 + $0x38] sm:$0xff]  }
 0x52c   : > { %7826 = vmatprep.subr.bf16.mxu1 %v8339_v4 }
 0x52d   : > { %7819 = vmatmul.mubr.bf16.vlgmr.msra.gmra.mrb[8].mxu0 %v2298_v54 }
 0x52e   : > { %2664 = vmatpush1.bf16.msra.mxu0 %v8032_v53  ;;  %2695 = vmatprep.mubr.bf16.mxu0 %v8343_v43 }
 0x52f   : > { %2665 = vmatprep.subr.bf16.mxu0 %v8037_v55  ;;  %7827 = vmatpush3.bf16.msra.mxu1 %v8058_v44 }
 0x530   : > { %7828 = vmatprep.subr.bf16.mxu1 %v8339_v4 }
 0x532   : > { %2666 = vmatpush1.bf16.msra.mxu0 %v8035_v56 }
 0x533   : > { %2667 = vmatprep.subr.bf16.mxu0 %v8040_v57  ;;  %7829 = vmatpush3.bf16.msra.mxu1 %v8059_v45 }
 0x534   : > { %7830 = vmatprep.subr.bf16.mxu1 %v8339_v4 }
 0x536   : > { %2668 = vmatpush1.bf16.msra.mxu0 %v8038_v58 }
 0x537   : > { %2669 = vmatprep.subr.bf16.mxu0 %v8043_v59  ;;  %7831 = vmatpush3.bf16.msra.mxu1 %v8060_v46 }
 0x538   : > { %7832 = vmatprep.subr.bf16.mxu1 %v8339_v4 }
 0x53a   : > { %2670 = vmatpush1.bf16.msra.mxu0 %v8041_v60 }
 0x53b   : > { %2671 = vmatprep.subr.bf16.mxu0 %v8046_v61  ;;  %7833 = vmatpush3.bf16.msra.mxu1 %v8061_v48 }
 0x53c   : > { %7834 = vmatprep.subr.bf16.mxu1 %v8339_v4 }
 0x53e   : > { %2672 = vmatpush1.bf16.msra.mxu0 %v8044_v62 }
 0x53f   : > { %2673 = vmatprep.subr.bf16.mxu0 %v8049_v0  ;;  %7835 = vmatpush3.bf16.msra.mxu1 %v8062_v49 }
 0x540   : > { %7836 = vmatprep.subr.bf16.mxu1 %v8339_v4 }
 0x542   : > { %2674 = vmatpush1.bf16.msra.mxu0 %v8047_v1 }
 0x543   : > { %2675 = vmatprep.subr.bf16.mxu0 %v8052_v8  ;;  %7837 = vmatpush3.bf16.msra.mxu1 %v8063_v50 }
 0x544   : > { %7842 = vmatprep.subr.bf16.mxu1 %v8339_v4 }
 0x546   : > { %2676 = vmatpush1.bf16.msra.mxu0 %v8050_v6 }
 0x547   : > { %2677 = vmatprep.subr.bf16.mxu0 %v8055_v63 }
 0x54a   : > { %2678 = vmatpush1.bf16.msra.mxu0 %v8053_v7 }
 0x54d   : > { %2696 = vmatmul.mubr.bf16.vlgmr.msra.gmra.mrb[12].mxu0 %v2571_v2 }
 0x600   : > { %v2387_v3 = vpop.f32.mrb[8].mxu0 }
 0x601   : > { %v2388_v5 = vadd.f32 %v7485_v15, %v2387_v3  ;;  %v7820_v10 = vpop.f32.mrb[9].mxu0 }
 0x602   : > { %v2390_v17 = vpop.f32.mrb[10].mxu0 }
 0x603   : > { %v8843_v18 = vadd.f32 %v2388_v5, %v2279_v16  ;;  %v2391_v11 = vadd.f32 %v7485_v15, %v2390_v17  ;;  %v7821_v13 = vpop.f32.mrb[11].mxu0  ;;  %v7494_v17 = vld [vmem:[%s9884_s14] ss:$0 sm:$0xff] }
 0x605   : > { %v8845_v20 = vadd.f32 %v2391_v11, %v2280_v12  ;;  %2398 = vadd.xlane.f32.xlu0 %v8843_v18 }
 0x607   : > { %2400 = vadd.xlane.f32.xlu1 %v8845_v20 }
 0x620   : > { %v2697_v24 = vpop.f32.mrb[12].mxu0 }
 0x621   : > { %v8855_v25 = vadd.f32 %v2697_v24, %v2576_v23  ;;  %v2699_v28 = vpop.f32.mrb[13].mxu0 }
 0x622   : > { %v2701_v30 = vpop.f32.mrb[14].mxu0  ;;  %v8868_v33 = vadd.f32 %v2699_v28, %v2580_v31  ;;  %v7495_v28 = vld [vmem:[%s9885_s15] ss:$0 sm:$0xff] }
 0x623   : > { %2712 = vrot.lane.b32.xlu1 %v8855_v25, %s9943_s3  ;;  %v2702_v32 = vpop.f32.mrb[15].mxu0 }
 0x627   : > { %2718 = vrot.lane.b32.xlu1 %v8855_v25, %s9942_s25 }
 0x692   : > { %v2399_v34 = vpop.xlane.xlu0 %2398 }
 0x693   : > { %v2403_v35 = vmul.f32 0.0078125, %v2399_v34 }
 0x694   : > { %v2401_v36 = vpop.xlane.xlu1 %2400 }
 0x695   : > { %v2404_v37 = vmul.f32 0.0078125, %v2401_v36  ;;  %v2405_v38 = vsub.f32 %v8843_v18, %v2403_v35 }
 0x697   : > { %v2407_v39 = vmul.f32 %v2405_v38, %v2405_v38  ;;  %v2406_v40 = vsub.f32 %v8845_v20, %v2404_v37 }
 0x698   : > { %v2713_v51 = vpop.permute.xlu1 %2712 }
 0x699   : > { %2409 = vadd.xlane.f32.xlu0 %v2407_v39  ;;  %v2408_v41 = vmul.f32 %v2406_v40, %v2406_v40 }
 0x69c   : > { %v2719_v54 = vpop.permute.xlu1 %2718 }
 0x69d   : > { %2411 = vadd.xlane.f32.xlu0 %v2408_v41  ;;  %v2737_v58 = vcombine.low %v2713_v51, %v2719_v54  ;;  %v2738_v59 = vcombine.high %v2713_v51, %v2719_v54 }
 0x69f   : > { %v2745_v62 = vrot.slane %v2737_v58, %v8583_v26  ;;  %v2752_v8 = vrot.slane %v2738_v59, %v8583_v26 }
 0x6b3   : > { %2715 = vrot.lane.b32.xlu0 %v8855_v25, %s9941_s29 }
 0x726   : > { %v2410_v52 = vpop.xlane.xlu0 %2409 }
 0x727   : > { %v2413_v53 = vmul.f32 0.0078125, %v2410_v52 }
 0x729   : > { %v2415_v55 = vadd.f32 1e-05, %v2413_v53 }
 0x72a   : > { %v2412_v56 = vpop.xlane.xlu0 %2411 }
 0x72b   : > { %8184 = vrsqrt.f32 %v2415_v55  ;;  %v2414_v57 = vmul.f32 0.0078125, %v2412_v56 }
 0x72d   : > { %v2416_v60 = vadd.f32 1e-05, %v2414_v57 }
 0x72e   : > { %v2716_v61 = vpop.permute.xlu0 %2715 }
 0x72f   : > { %8186 = vrsqrt.f32 %v2416_v60  ;;  %v2721_v0 = vcombine.low %v8855_v25, %v2716_v61  ;;  %v2722_v1 = vcombine.high %v8855_v25, %v2716_v61 }
 0x731   : > { %v2729_v6 = vrot.slane %v2721_v0, %v8583_v26  ;;  %v2736_v63 = vrot.slane %v2722_v1, %v8583_v26 }
 0x733   : > { %v2753_v7 = vcombine.low %v2729_v6, %v2745_v62  ;;  %v2754_v9 = vcombine.high %v2729_v6, %v2745_v62  ;;  %v2769_v2 = vcombine.low %v2736_v63, %v2752_v8  ;;  %v2770_v23 = vcombine.high %v2736_v63, %v2752_v8 }
 0x735   : > { %v8185_v15 = vpop.eup %8184  ;;  %v2768_v16 = vrot.slane %v2754_v9, %v8589_v47  ;;  %v2761_v3 = vrot.slane %v2753_v7, %v8589_v47  ;;  %v2777_v11 = vrot.slane %v2769_v2, %v8589_v47  ;;  %v2784_v32 = vrot.slane %v2770_v23, %v8589_v47 }
 0x736   : > { %v2419_v5 = vmul.f32 %v8185_v15, %v2405_v38 }
 0x737   : > { %v2791_v10 = vpack.c.bf16 %v2768_v16, %v2768_v16  ;;  %v2789_v12 = vpack.c.bf16 %v2761_v3, %v2761_v3  ;;  %v2786_v13 = vcombine.high %v2768_v16, %v8339_v4  ;;  %v2793_v29 = vpack.c.bf16 %v2777_v11, %v2777_v11 }
 0x738   : > { %v2427_v25 = vmul.f32 %v7494_v17, %v2419_v5  ;;  %v2787_v34 = vcombine.high %v2777_v11, %v8339_v4  ;;  %v2795_v38 = vpack.c.bf16 %v2784_v32, %v2784_v32  ;;  %v2785_v41 = vcombine.high %v2761_v3, %v8339_v4 }
 0x739   : > { %v8187_v21 = vpop.eup %8186  ;;  %2929 = vxpose.xlu0.c.b16.start.end [1/1] (short) (narrow) %v2791_v10, 32  ;;  %2897 = vxpose.xlu1.c.b16.start.end [1/1] (short) (narrow) %v2789_v12, 32  ;;  %v2792_v30 = vpack.c.bf16 %v2786_v13, %v2786_v13 }
 0x73a   : > { %v2420_v24 = vmul.f32 %v8187_v21, %v2406_v40  ;;  %v2435_v35 = vadd.f32 %v7495_v28, %v2427_v25  ;;  %v2794_v39 = vpack.c.bf16 %v2787_v34, %v2787_v34  ;;  %v2788_v40 = vcombine.high %v2784_v32, %v8339_v4 }
 0x73b   : > { %v2790_v44 = vpack.c.bf16 %v2785_v41, %v2785_v41 }
 0x73c   : > { %v2428_v31 = vmul.f32 %v7494_v17, %v2420_v24  ;;  %v2796_v42 = vpack.c.bf16 %v2788_v40, %v2788_v40 }
 0x73e   : > { %2961 = vxpose.xlu0.c.b16.start.end [1/1] (short) (narrow) %v2793_v29, 32  ;;  %2945 = vxpose.xlu1.c.b16.start.end [1/1] (short) (narrow) %v2792_v30, 32  ;;  %v2436_v36 = vadd.f32 %v7495_v28, %v2428_v31 }
 0x740   : > { %v2454_v37 = vpack.c.bf16 %v2436_v36, %v2435_v35 }
 0x742   : > { %7839 = vmatmul.mubr.bf16.vlgmr.msra.gmra.mrb[24].mxu1 %v2454_v37 }
 0x743   : > { %2993 = vxpose.xlu0.c.b16.start.end [1/1] (short) (narrow) %v2795_v38, 32  ;;  %2977 = vxpose.xlu1.c.b16.start.end [1/1] (short) (narrow) %v2794_v39, 32 }
 0x744   : > { %7846 = vmatprep.mubr.msk.bf16.mxu1 %vm8340_vm0, %v8339_v4 }
 0x748   : > { %3009 = vxpose.xlu1.c.b16.start.end [1/1] (short) (narrow) %v2796_v42, 32  ;;  %2913 = vxpose.xlu0.c.b16.start.end [1/1] (short) (narrow) %v2790_v44, 32 }
 0x79f   : > { %v2937_v45 = vpop.trf.xlu0  ;;  %v2905_v46 = vpop.trf.xlu1 }
 0x7a0   : > { %v3037_v58 = vshrl.u32 %v2937_v45, 16  ;;  %v3029_v62 = vshrl.u32 %v2905_v46, 16 }
 0x7a3   : > { %v8924_v48 = vpop.trf.xlu0  ;;  %v8926_v49 = vpop.trf.xlu1 }
 0x7a7   : > { %v2969_v50 = vpop.trf.xlu0  ;;  %v2953_v51 = vpop.trf.xlu1 }
 0x7a8   : > { %v3045_v59 = vshrl.u32 %v2969_v50, 16  ;;  %v3038_v60 = vshrl.u32 %v2953_v51, 16  ;;  %v3035_v0 = vpack.i.b16 %v2953_v51, %v2937_v45 }
 0x7aa   : > { %v3039_v16 = vpack.i.b16 %v3038_v60, %v3037_v58 }
 0x7ab   : > { %v8928_v52 = vpop.trf.xlu0  ;;  %v8930_v53 = vpop.trf.xlu1 }
 0x7af   : > { %v3001_v54 = vpop.trf.xlu0  ;;  %v2985_v55 = vpop.trf.xlu1 }
 0x7b0   : > { %v3046_v61 = vshrl.u32 %v2985_v55, 16  ;;  %v3053_v1 = vshrl.u32 %v3001_v54, 16  ;;  %v3043_v8 = vpack.i.b16 %v2985_v55, %v2969_v50 }
 0x7b2   : > { %v3047_v3 = vpack.i.b16 %v3046_v61, %v3045_v59 }
 0x7b3   : > { %v8932_v56 = vpop.trf.xlu0  ;;  %v8934_v57 = vpop.trf.xlu1 }
 0x7b7   : > { %v3017_v6 = vpop.trf.xlu1  ;;  %v2921_v63 = vpop.trf.xlu0 }
 0x7b8   : > { %v3051_v7 = vpack.i.b16 %v3017_v6, %v3001_v54  ;;  %v3054_v9 = vshrl.u32 %v3017_v6, 16  ;;  %v3027_v2 = vpack.i.b16 %v2921_v63, %v2905_v46  ;;  %v3030_v15 = vshrl.u32 %v2921_v63, 16 }
 0x7b9   : > { %v3070_v6 = vshrl.u32 %v8930_v53, 16  ;;  %v3085_v63 = vshrl.u32 %v8932_v56, 16 }
 0x7ba   : > { %v3055_v5 = vpack.i.b16 %v3054_v9, %v3053_v1  ;;  %v3105_v10 = vcombine.low %v3035_v0, %v3051_v7  ;;  %v3031_v12 = vpack.i.b16 %v3030_v15, %v3029_v62  ;;  %v3089_v17 = vcombine.low %v3027_v2, %v3043_v8 }
 0x7bb   : > { %v3106_v11 = vcombine.high %v3035_v0, %v3051_v7  ;;  %v3090_v13 = vcombine.high %v3027_v2, %v3043_v8  ;;  %v3018_v59 = vpop.trf.xlu1  ;;  %v2922_v60 = vpop.trf.xlu0  ;;  %v3069_v62 = vshrl.u32 %v8924_v48, 16  ;;  %v3061_v0 = vshrl.u32 %v8926_v49, 16 }
 0x7bc   : > { %v3097_v21 = vrot.slane %v3089_v17, %v8583_v26  ;;  %v3113_v23 = vrot.slane %v3105_v10, %v8583_v26  ;;  %v3157_v24 = vcombine.low %v3031_v12, %v3047_v3  ;;  %v3173_v25 = vcombine.low %v3039_v16, %v3055_v5 }
 0x7bd   : > { %v3104_v34 = vrot.slane %v3090_v13, %v8583_v26  ;;  %v3120_v35 = vrot.slane %v3106_v11, %v8583_v26  ;;  %v3158_v36 = vcombine.high %v3031_v12, %v3047_v3  ;;  %v3174_v38 = vcombine.high %v3039_v16, %v3055_v5 }
 0x7be   : > { %v3121_v28 = vcombine.low %v3097_v21, %v3113_v23  ;;  %v3165_v29 = vrot.slane %v3157_v24, %v8583_v26  ;;  %v3181_v30 = vrot.slane %v3173_v25, %v8583_v26  ;;  %v3122_v31 = vcombine.high %v3097_v21, %v3113_v23 }
 0x7bf   : > { %v3172_v41 = vrot.slane %v3158_v36, %v8583_v26  ;;  %v3188_v42 = vrot.slane %v3174_v38, %v8583_v26  ;;  %v3137_v45 = vcombine.low %v3104_v34, %v3120_v35  ;;  %v3138_v54 = vcombine.high %v3104_v34, %v3120_v35 }
 0x7c0   : > { %v3129_v32 = vrot.slane %v3121_v28, %v8589_v47  ;;  %v3189_v37 = vcombine.low %v3165_v29, %v3181_v30  ;;  %v3190_v40 = vcombine.high %v3165_v29, %v3181_v30  ;;  %v3136_v44 = vrot.slane %v3122_v31, %v8589_v47 }
 0x7c1   : > { %v3205_v50 = vcombine.low %v3172_v41, %v3188_v42  ;;  %v3145_v51 = vrot.slane %v3137_v45, %v8589_v47  ;;  %v3206_v58 = vcombine.high %v3172_v41, %v3188_v42  ;;  %v3152_v61 = vrot.slane %v3138_v54, %v8589_v47 }
 0x7c2   : > { %3361 = vxpose.xlu0.c.b16.start.end [1/1] (short) (narrow) %v3129_v32, 16  ;;  %v3197_v39 = vrot.slane %v3189_v37, %v8589_v47  ;;  %v3204_v46 = vrot.slane %v3190_v40, %v8589_v47  ;;  %v3077_v1 = vshrl.u32 %v8928_v52, 16  ;;  %v3067_v8 = vpack.i.b16 %v8930_v53, %v8924_v48 }
 0x7c3   : > { %v3213_v55 = vrot.slane %v3205_v50, %v8589_v47  ;;  %v3078_v7 = vshrl.u32 %v8934_v57, 16  ;;  %v3086_v9 = vshrl.u32 %v3018_v59, 16  ;;  %v3062_v2 = vshrl.u32 %v2922_v60, 16 }
 0x7c4   : > { %3377 = vxpose.xlu1.c.b16.start.end [1/1] (short) (narrow) %v3197_v39, 16  ;;  %v3220_v15 = vrot.slane %v3206_v58, %v8589_v47  ;;  %v3075_v16 = vpack.i.b16 %v8934_v57, %v8928_v52  ;;  %v3083_v3 = vpack.i.b16 %v3018_v59, %v8932_v56  ;;  %v3059_v5 = vpack.i.b16 %v2922_v60, %v8926_v49 }
 0x7c5   : > { %v3153_v48 = vcombine.high %v3129_v32, %v8343_v43  ;;  %v3071_v53 = vpack.i.b16 %v3070_v6, %v3069_v62  ;;  %v3079_v10 = vpack.i.b16 %v3078_v7, %v3077_v1  ;;  %v3087_v12 = vpack.i.b16 %v3086_v9, %v3085_v63 }
 0x7c6   : > { %3425 = vxpose.xlu0.c.b16.start.end [1/1] (short) (narrow) %v3136_v44, 16  ;;  %v3063_v17 = vpack.i.b16 %v3062_v2, %v3061_v0  ;;  %v3221_v11 = vcombine.high %v3197_v39, %v8343_v43  ;;  %v3241_v13 = vcombine.low %v3067_v8, %v3083_v3  ;;  %v3225_v21 = vcombine.low %v3059_v5, %v3075_v16 }
 0x7c7   : > { %v3154_v23 = vcombine.high %v3136_v44, %v8343_v43  ;;  %v3222_v52 = vcombine.high %v3204_v46, %v8343_v43  ;;  %v3309_v49 = vcombine.low %v3071_v53, %v3087_v12  ;;  %v3155_v57 = vcombine.high %v3145_v51, %v8343_v43 }
 0x7c8   : > { %3441 = vxpose.xlu1.c.b16.start.end [1/1] (short) (narrow) %v3204_v46, 16  ;;  %v3293_v56 = vcombine.low %v3063_v17, %v3079_v10  ;;  %v3233_v24 = vrot.slane %v3225_v21, %v8583_v26  ;;  %v3249_v25 = vrot.slane %v3241_v13, %v8583_v26  ;;  %v3223_v28 = vcombine.high %v3213_v55, %v8343_v43 }
 0x7c9   : > { %v3317_v30 = vrot.slane %v3309_v49, %v8583_v26  ;;  %v3242_v31 = vcombine.high %v3067_v8, %v3083_v3  ;;  %v3226_v32 = vcombine.high %v3059_v5, %v3075_v16  ;;  %v3156_v34 = vcombine.high %v3152_v61, %v8343_v43  ;;  %v7496_v5 = vld [vmem:[%s9879_s9] ss:$0 sm:$0xff] }
 0x7ca   : > { %3489 = vxpose.xlu0.c.b16.start.end [1/1] (short) (narrow) %v3145_v51, 16  ;;  %v3301_v29 = vrot.slane %v3293_v56, %v8583_v26  ;;  %v3257_v35 = vcombine.low %v3233_v24, %v3249_v25  ;;  %v3224_v36 = vcombine.high %v3220_v15, %v8343_v43  ;;  %v3294_v38 = vcombine.high %v3063_v17, %v3079_v10  ;;  %v2886_v56 = vld [vmem:[%s841_s27 + $0x8] sm:$0xff] }
 0x7cb   : > { %v3310_v39 = vcombine.high %v3071_v53, %v3087_v12  ;;  %v3256_v40 = vrot.slane %v3242_v31, %v8583_v26  ;;  %v3240_v41 = vrot.slane %v3226_v32, %v8583_v26  ;;  %v3258_v44 = vcombine.high %v3233_v24, %v3249_v25 }
 0x7cc   : > { %3505 = vxpose.xlu1.c.b16.start.end [1/1] (short) (narrow) %v3213_v55, 16  ;;  %v3325_v37 = vcombine.low %v3301_v29, %v3317_v30  ;;  %v3265_v42 = vrot.slane %v3257_v35, %v8589_v47  ;;  %v3326_v46 = vcombine.high %v3301_v29, %v3317_v30  ;;  %v3308_v50 = vrot.slane %v3294_v38, %v8583_v26 }
 0x7cd   : > { %v3324_v51 = vrot.slane %v3310_v39, %v8583_v26  ;;  %v3272_v54 = vrot.slane %v3258_v44, %v8589_v47  ;;  %v3273_v55 = vcombine.low %v3240_v41, %v3256_v40 }
 0x7ce   : > { %3553 = vxpose.xlu0.c.b16.start.end [1/1] (short) (narrow) %v3152_v61, 16  ;;  %v3333_v45 = vrot.slane %v3325_v37, %v8589_v47  ;;  %v3340_v58 = vrot.slane %v3326_v46, %v8589_v47  ;;  %v3274_v61 = vcombine.high %v3240_v41, %v3256_v40  ;;  %v3289_v6 = vcombine.high %v3265_v42, %v8343_v43 }
 0x7cf   : > { %v3341_v59 = vcombine.low %v3308_v50, %v3324_v51  ;;  %v3281_v60 = vrot.slane %v3273_v55, %v8589_v47  ;;  %v3342_v0 = vcombine.high %v3308_v50, %v3324_v51  ;;  %v3290_v7 = vcombine.high %v3272_v54, %v8343_v43 }
 0x7d0   : > { %3569 = vxpose.xlu1.c.b16.start.end [1/1] (short) (narrow) %v3220_v15, 16  ;;  %v3288_v1 = vrot.slane %v3274_v61, %v8589_v47  ;;  %v3357_v63 = vcombine.high %v3333_v45, %v8343_v43  ;;  %v3358_v9 = vcombine.high %v3340_v58, %v8343_v43 }
 0x7d1   : > { %v3349_v62 = vrot.slane %v3341_v59, %v8589_v47  ;;  %v3356_v8 = vrot.slane %v3342_v0, %v8589_v47  ;;  %v3291_v2 = vcombine.high %v3281_v60, %v8343_v43 }
 0x7d2   : > { %3393 = vxpose.xlu0.c.b16.start.end [1/1] (short) (narrow) %v3153_v48, 16  ;;  %v3292_v16 = vcombine.high %v3288_v1, %v8343_v43 }
 0x7d3   : > { %v3359_v15 = vcombine.high %v3349_v62, %v8343_v43  ;;  %v3360_v3 = vcombine.high %v3356_v8, %v8343_v43 }
 0x7d4   : > { %3409 = vxpose.xlu1.c.b16.start.end [1/1] (short) (narrow) %v3221_v11, 16 }
 0x7d6   : > { %3457 = vxpose.xlu0.c.b16.start.end [1/1] (short) (narrow) %v3154_v23, 16 }
 0x7d8   : > { %3473 = vxpose.xlu1.c.b16.start.end [1/1] (short) (narrow) %v3222_v52, 16  ;;  %v2885_v52 = vld [vmem:[%s841_s27] sm:$0xff]  ;;  %s9951_s27 = sld [smem:[#allocation8_spill]] }
 0x7da   : > { %3521 = vxpose.xlu0.c.b16.start.end [1/1] (short) (narrow) %v3155_v57, 16 }
 0x7dc   : > { %3537 = vxpose.xlu1.c.b16.start.end [1/1] (short) (narrow) %v3223_v28, 16 }
 0x7de   : > { %3585 = vxpose.xlu0.c.b16.start.end [1/1] (short) (narrow) %v3156_v34, 16  ;;  %s7622_s19 = sshll.u32 %s9951_s27, 8 }
 0x7df   : > { %s9822_s24 = scalar_lea.hbm %s9953_s30, %s7622_s19 }
 0x7e0   : > { %3601 = vxpose.xlu1.c.b16.start.end [1/1] (short) (narrow) %v3224_v36, 16 }
 0x7e2   : > { %3617 = vxpose.xlu0.c.b16.start.end [1/1] (short) (narrow) %v3265_v42, 16 }
 0x7e4   : > { %3633 = vxpose.xlu1.c.b16.start.end [1/1] (short) (narrow) %v3333_v45, 16 }
 0x7e6   : > { %3681 = vxpose.xlu0.c.b16.start.end [1/1] (short) (narrow) %v3272_v54, 16 }
 0x7e8   : > { %3697 = vxpose.xlu1.c.b16.start.end [1/1] (short) (narrow) %v3340_v58, 16 }
 0x7ea   : > { %3745 = vxpose.xlu0.c.b16.start.end [1/1] (short) (narrow) %v3281_v60, 16 }
 0x7ec   : > { %3761 = vxpose.xlu1.c.b16.start.end [1/1] (short) (narrow) %v3349_v62, 16 }
 0x7ee   : > { %3809 = vxpose.xlu0.c.b16.start.end [1/1] (short) (narrow) %v3288_v1, 16 }
 0x7f0   : > { %3825 = vxpose.xlu1.c.b16.start.end [1/1] (short) (narrow) %v3356_v8, 16 }
 0x7f2   : > { %3649 = vxpose.xlu0.c.b16.start.end [1/1] (short) (narrow) %v3289_v6, 16 }
 0x7f4   : > { %3665 = vxpose.xlu1.c.b16.start.end [1/1] (short) (narrow) %v3357_v63, 16 }
 0x7f6   : > { %3713 = vxpose.xlu0.c.b16.start.end [1/1] (short) (narrow) %v3290_v7, 16 }
 0x7f8   : > { %3729 = vxpose.xlu1.c.b16.start.end [1/1] (short) (narrow) %v3358_v9, 16 }
 0x7fa   : > { %3777 = vxpose.xlu0.c.b16.start.end [1/1] (short) (narrow) %v3291_v2, 16 }
 0x7fc   : > { %3793 = vxpose.xlu1.c.b16.start.end [1/1] (short) (narrow) %v3359_v15, 16 }
 0x7fe   : > { %3841 = vxpose.xlu0.c.b16.start.end [1/1] (short) (narrow) %v3292_v16, 16 }
 0x800   : > { %3857 = vxpose.xlu1.c.b16.start.end [1/1] (short) (narrow) %v3360_v3, 16 }
 0x804   : > { %8007 = vset.pattern.permute.xlu1 %v8343_v43 }
 0x807   : > { %8006 = vset.pattern.permute.xlu0 %v8343_v43 }
 0x815   : > { %v2543_v48 = vpop.f32.mrb[24].mxu1 }
 0x816   : > { %v2544_v53 = vadd.f32 %v7496_v5, %v2543_v48  ;;  %v7840_v10 = vpop.f32.mrb[25].mxu1 }
 0x817   : > { %v2546_v12 = vpop.f32.mrb[26].mxu1 }
 0x818   : > { %v2547_v17 = vadd.f32 %v7496_v5, %v2546_v12  ;;  %v7841_v11 = vpop.f32.mrb[27].mxu1  ;;  %v2550_v13 = vmul.f32 0.17677669, %v2544_v53 }
 0x81a   : > { %v2551_v21 = vmul.f32 0.17677669, %v2547_v17 }
 0x81c   : > { %v9001_v23 = vpack.c.bf16 %v2551_v21, %v2550_v13 }
 0x81e   : > { %2707 = vrot.lane.b32.xlu1 %v9001_v23, %s9941_s29  ;;  %2705 = vrot.lane.b32.xlu0 %v9001_v23, %s9943_s3 }
 0x822   : > { %2709 = vrot.lane.b32.xlu1 %v9001_v23, %s9942_s25  ;;  %2888 = vperm.xlu0 %8006, %v2885_v52  }
 0x826   : > { %2891 = vperm.xlu1 %8007, %v2886_v56   ;;  %2798 = vrot.lane.b32.xlu0 %v8868_v33, %s9943_s3 }
 0x828   : > { %v3369_v49 = vpop.trf.xlu0 }
 0x82a   : > { %2801 = vrot.lane.b32.xlu1 %v8868_v33, %s9941_s29  ;;  %v3385_v57 = vpop.trf.xlu1 }
 0x82c   : > { %v3433_v24 = vpop.trf.xlu0 }
 0x82d   : > { %v3873_v36 = vcombine.low %v3369_v49, %v3433_v24 }
 0x82e   : > { %2804 = vrot.lane.b32.xlu1 %v8868_v33, %s9942_s25  ;;  %v3449_v25 = vpop.trf.xlu1 }
 0x82f   : > { %v3923_v39 = vcombine.low %v3385_v57, %v3449_v25  ;;  %v3880_v44 = vrot.slane %v3873_v36, %v8583_v26 }
 0x830   : > { %v3497_v28 = vpop.trf.xlu0 }
 0x831   : > { %v3930_v50 = vrot.slane %v3923_v39, %v8583_v26 }
 0x832   : > { %v3513_v29 = vpop.trf.xlu1 }
 0x834   : > { %v3561_v30 = vpop.trf.xlu0 }
 0x835   : > { %v3889_v42 = vcombine.low %v3497_v28, %v3561_v30 }
 0x836   : > { %v3577_v31 = vpop.trf.xlu1 }
 0x837   : > { %v3939_v51 = vcombine.low %v3513_v29, %v3577_v31  ;;  %v3896_v58 = vrot.slane %v3889_v42, %v8583_v26 }
 0x838   : > { %v3401_v32 = vpop.trf.xlu0 }
 0x839   : > { %v3946_v0 = vrot.slane %v3939_v51, %v8583_v26 }
 0x83a   : > { %v3417_v34 = vpop.trf.xlu1 }
 0x83c   : > { %v3465_v35 = vpop.trf.xlu0 }
 0x83d   : > { %v3881_v37 = vcombine.low %v3401_v32, %v3465_v35 }
 0x83e   : > { %v3481_v38 = vpop.trf.xlu1 }
 0x83f   : > { %v3931_v40 = vcombine.low %v3417_v34, %v3481_v38  ;;  %v3888_v45 = vrot.slane %v3881_v37, %v8583_v26 }
 0x840   : > { %v3529_v41 = vpop.trf.xlu0 }
 0x841   : > { %v3938_v54 = vrot.slane %v3931_v40, %v8583_v26  ;;  %v3905_v60 = vcombine.low %v3880_v44, %v3888_v45 }
 0x842   : > { %v3545_v46 = vpop.trf.xlu1 }
 0x843   : > { %v3955_v1 = vcombine.low %v3930_v50, %v3938_v54  ;;  %v9027_v7 = vrot.slane %v3905_v60, %v8589_v47 }
 0x844   : > { %v3593_v55 = vpop.trf.xlu0 }
 0x845   : > { %v3897_v59 = vcombine.low %v3529_v41, %v3593_v55  ;;  %v9034_v16 = vrot.slane %v3955_v1, %v8589_v47 }
 0x846   : > { %v3609_v61 = vpop.trf.xlu1 }
 0x847   : > { %v3904_v62 = vrot.slane %v3897_v59, %v8583_v26  ;;  %v3947_v8 = vcombine.low %v3545_v46, %v3609_v61 }
 0x848   : > { %v3625_v6 = vpop.trf.xlu0 }
 0x849   : > { %v3913_v63 = vcombine.low %v3896_v58, %v3904_v62  ;;  %v3954_v9 = vrot.slane %v3947_v8, %v8583_v26 }
 0x84a   : > { %v3641_v15 = vpop.trf.xlu1 }
 0x84b   : > { %v9031_v2 = vrot.slane %v3913_v63, %v8589_v47  ;;  %v3963_v3 = vcombine.low %v3946_v0, %v3954_v9 }
 0x84c   : > { %v3689_v5 = vpop.trf.xlu0 }
 0x84d   : > { %v3970_v48 = vrot.slane %v3963_v3, %v8589_v47  ;;  %v3921_v53 = vcombine.low %v9027_v7, %v9031_v2  ;;  %v3973_v24 = vcombine.low %v3625_v6, %v3689_v5 }
 0x84e   : > { %v3705_v10 = vpop.trf.xlu1 }
 0x84f   : > { %v3971_v17 = vcombine.low %v9034_v16, %v3970_v48  ;;  %v4023_v29 = vcombine.low %v3641_v15, %v3705_v10  ;;  %v3980_v34 = vrot.slane %v3973_v24, %v8583_v26  ;;  %v4077_v63 = vshrl.u32 %v3921_v53, 16 }
 0x850   : > { %v3753_v12 = vpop.trf.xlu0 }
 0x851   : > { %v4075_v11 = vpack.i.b16 %v3971_v17, %v3921_v53  ;;  %v4030_v37 = vrot.slane %v4023_v29, %v8583_v26  ;;  %v4078_v9 = vshrl.u32 %v3971_v17, 16  ;;  %v3922_v53 = vcombine.high %v9027_v7, %v9031_v2 }
 0x852   : > { %v3769_v13 = vpop.trf.xlu1 }
 0x853   : > { %7843 = vmatpush3.bf16.msra.mxu1 %v4075_v11  ;;  %v4079_v5 = vpack.i.b16 %v4078_v9, %v4077_v63 }
 0x854   : > { %v3817_v21 = vpop.trf.xlu0  ;;  %7844 = vmatprep.subr.bf16.mxu1 %v8339_v4 }
 0x855   : > { %v3989_v32 = vcombine.low %v3753_v12, %v3817_v21  ;;  %v3972_v12 = vcombine.high %v9034_v16, %v3970_v48 }
 0x856   : > { %v3833_v52 = vpop.trf.xlu1 }
 0x857   : > { %v4039_v38 = vcombine.low %v3769_v13, %v3833_v52  ;;  %v3996_v41 = vrot.slane %v3989_v32, %v8583_v26  ;;  %v4083_v21 = vpack.i.b16 %v3972_v12, %v3922_v53  ;;  %v4085_v52 = vshrl.u32 %v3922_v53, 16 }
 0x858   : > { %v3657_v56 = vpop.trf.xlu0 }
 0x859   : > { %v4046_v50 = vrot.slane %v4039_v38, %v8583_v26 }
 0x85a   : > { %v3673_v49 = vpop.trf.xlu1 }
 0x85c   : > { %v3721_v57 = vpop.trf.xlu0 }
 0x85d   : > { %v3981_v25 = vcombine.low %v3657_v56, %v3721_v57  ;;  %v4086_v56 = vshrl.u32 %v3972_v12, 16 }
 0x85e   : > { %v3737_v28 = vpop.trf.xlu1 }
 0x85f   : > { %v4031_v30 = vcombine.low %v3673_v49, %v3737_v28  ;;  %v3988_v35 = vrot.slane %v3981_v25, %v8583_v26  ;;  %v4087_v2 = vpack.i.b16 %v4086_v56, %v4085_v52 }
 0x860   : > { %v3785_v31 = vpop.trf.xlu0 }
 0x861   : > { %v4038_v39 = vrot.slane %v4031_v30, %v8583_v26  ;;  %v4005_v44 = vcombine.low %v3980_v34, %v3988_v35 }
 0x862   : > { %v3801_v36 = vpop.trf.xlu1 }
 0x863   : > { %v4055_v51 = vcombine.low %v4030_v37, %v4038_v39  ;;  %v4012_v58 = vrot.slane %v4005_v44, %v8589_v47 }
 0x864   : > { %v3849_v40 = vpop.trf.xlu0 }
 0x865   : > { %v3997_v42 = vcombine.low %v3785_v31, %v3849_v40  ;;  %v4062_v61 = vrot.slane %v4055_v51, %v8589_v47 }
 0x866   : > { %v3865_v45 = vpop.trf.xlu1 }
 0x867   : > { %v4004_v46 = vrot.slane %v3997_v42, %v8583_v26  ;;  %v4047_v54 = vcombine.low %v3801_v36, %v3865_v45 }
 0x869   : > { %v4013_v55 = vcombine.low %v3996_v41, %v4004_v46  ;;  %v4054_v59 = vrot.slane %v4047_v54, %v8583_v26 }
 0x86b   : > { %v4020_v60 = vrot.slane %v4013_v55, %v8589_v47  ;;  %v4063_v62 = vcombine.low %v4046_v50, %v4054_v59 }
 0x86d   : > { %v4070_v0 = vrot.slane %v4063_v62, %v8589_v47  ;;  %v4021_v1 = vcombine.low %v4012_v58, %v4020_v60  ;;  %v4022_v11 = vcombine.high %v4012_v58, %v4020_v60 }
 0x86f   : > { %v4071_v8 = vcombine.low %v4062_v61, %v4070_v0  ;;  %v4093_v15 = vshrl.u32 %v4021_v1, 16  ;;  %v4072_v17 = vcombine.high %v4062_v61, %v4070_v0  ;;  %v4101_v16 = vshrl.u32 %v4022_v11, 16 }
 0x871   : > { %v4091_v6 = vpack.i.b16 %v4071_v8, %v4021_v1  ;;  %v4094_v3 = vshrl.u32 %v4071_v8, 16  ;;  %v4102_v48 = vshrl.u32 %v4072_v17, 16 }
 0x873   : > { %7845 = vmatpush3.bf16.msra.mxu1 %v4091_v6  ;;  %v4095_v10 = vpack.i.b16 %v4094_v3, %v4093_v15  ;;  %v4103_v49 = vpack.i.b16 %v4102_v48, %v4101_v16 }
 0x874   : > { %7850 = vmatprep.subr.bf16.mxu1 %v8339_v4 }
 0x876   : > { %7847 = vmatmul.mubr.msk.bf16.vlgmr.msra.gmra.mrb[28].mxu1 %vm1256_vm1, %v9001_v23  ;;  %v4099_v23 = vpack.i.b16 %v4072_v17, %v4022_v11 }
 0x877   : > { %7851 = vmatpush3.bf16.msra.mxu1 %v4079_v5  ;;  %7854 = vmatprep.mubr.msk.bf16.mxu1 %vm8340_vm0, %v8339_v4 }
 0x878   : > { %7852 = vmatprep.subr.bf16.mxu1 %v8339_v4 }
 0x87b   : > { %7853 = vmatpush3.bf16.msra.mxu1 %v4095_v10 }
 0x87c   : > { %7858 = vmatprep.subr.bf16.mxu1 %v8339_v4 }
 0x890   : > { %v2706_v13 = vpop.permute.xlu0 %2705  ;;  %v2708_v7 = vpop.permute.xlu1 %2707 }
 0x891   : > { %7855 = vmatmul.mubr.msk.bf16.vlgmr.msra.gmra.mrb[32].mxu1 %vm1256_vm1, %v2706_v13 }
 0x892   : > { %7859 = vmatpush3.bf16.msra.mxu1 %v4083_v21  ;;  %7862 = vmatprep.mubr.msk.bf16.mxu1 %vm8340_vm0, %v8339_v4 }
 0x893   : > { %7860 = vmatprep.subr.bf16.mxu1 %v8339_v4 }
 0x894   : > { %v2710_v57 = vpop.permute.xlu1 %2709 }
 0x896   : > { %7861 = vmatpush3.bf16.msra.mxu1 %v4099_v23 }
 0x897   : > { %7866 = vmatprep.subr.bf16.mxu1 %v8339_v4 }
 0x899   : > { %7863 = vmatmul.mubr.msk.bf16.vlgmr.msra.gmra.mrb[36].mxu1 %vm1256_vm1, %v2708_v7 }
 0x89a   : > { %7867 = vmatpush3.bf16.msra.mxu1 %v4087_v2  ;;  %7870 = vmatprep.mubr.msk.bf16.mxu1 %vm8340_vm0, %v8339_v4 }
 0x89b   : > { %7868 = vmatprep.subr.bf16.mxu1 %v8339_v4 }
 0x89e   : > { %7869 = vmatpush3.bf16.msra.mxu1 %v4103_v49 }
 0x8a1   : > { %7871 = vmatmul.mubr.msk.bf16.vlgmr.msra.gmra.mrb[40].mxu1 %vm1256_vm1, %v2710_v57  ;;  %v9075_v25 = vpop.permute.xlu0 %2888 }
 0x8a5   : > { %v9073_v24 = vpop.permute.xlu1 %2891  ;;  %v2799_v30 = vpop.permute.xlu0 %2798 }
 0x8a9   : > { %v2802_v28 = vpop.permute.xlu1 %2801 }
 0x8aa   : > { %v2807_v29 = vcombine.low %v8868_v33, %v2802_v28  ;;  %v2808_v35 = vcombine.high %v8868_v33, %v2802_v28 }
 0x8ac   : > { %v2815_v36 = vrot.slane %v2807_v29, %v8583_v26  ;;  %v2822_v41 = vrot.slane %v2808_v35, %v8583_v26 }
 0x8ad   : > { %v2805_v31 = vpop.permute.xlu1 %2804 }
 0x8ae   : > { %v2823_v32 = vcombine.low %v2799_v30, %v2805_v31  ;;  %v2824_v34 = vcombine.high %v2799_v30, %v2805_v31 }
 0x8b0   : > { %v2831_v37 = vrot.slane %v2823_v32, %v8583_v26  ;;  %v2838_v38 = vrot.slane %v2824_v34, %v8583_v26 }
 0x8b2   : > { %v2839_v39 = vcombine.low %v2815_v36, %v2831_v37  ;;  %v2840_v40 = vcombine.high %v2815_v36, %v2831_v37  ;;  %v2855_v45 = vcombine.low %v2822_v41, %v2838_v38  ;;  %v2856_v55 = vcombine.high %v2822_v41, %v2838_v38 }
 0x8b4   : > { %v2847_v42 = vrot.slane %v2839_v39, %v8589_v47  ;;  %v2854_v44 = vrot.slane %v2840_v40, %v8589_v47  ;;  %v2863_v54 = vrot.slane %v2855_v45, %v8589_v47  ;;  %v2870_v61 = vrot.slane %v2856_v55, %v8589_v47 }
 0x8b6   : > { %v2871_v46 = vcombine.high %v2847_v42, %v8339_v4  ;;  %v2875_v50 = vpack.c.bf16 %v2847_v42, %v2847_v42  ;;  %v2872_v33 = vcombine.high %v2854_v44, %v8339_v4  ;;  %v2877_v58 = vpack.c.bf16 %v2854_v44, %v2854_v44 }
 0x8b7   : > { %v2873_v60 = vcombine.high %v2863_v54, %v8339_v4  ;;  %v2879_v62 = vpack.c.bf16 %v2863_v54, %v2863_v54  ;;  %v2874_v1 = vcombine.high %v2870_v61, %v8339_v4  ;;  %v2881_v8 = vpack.c.bf16 %v2870_v61, %v2870_v61 }
 0x8b8   : > { %v2876_v51 = vpack.c.bf16 %v2871_v46, %v2871_v46  ;;  %4374 = vxpose.xlu1.c.b16.start.end [1/1] (short) (narrow) %v2875_v50, 32  ;;  %v2878_v59 = vpack.c.bf16 %v2872_v33, %v2872_v33 }
 0x8b9   : > { %v2880_v0 = vpack.c.bf16 %v2873_v60, %v2873_v60  ;;  %v2882_v6 = vpack.c.bf16 %v2874_v1, %v2874_v1 }
 0x8ba   : > { %4390 = vxpose.xlu0.c.b16.start.end [1/1] (short) (narrow) %v2876_v51, 32 }
 0x8bd   : > { %4406 = vxpose.xlu1.c.b16.start.end [1/1] (short) (narrow) %v2877_v58, 32 }
 0x8bf   : > { %4422 = vxpose.xlu0.c.b16.start.end [1/1] (short) (narrow) %v2878_v59, 32 }
 0x8c2   : > { %4438 = vxpose.xlu1.c.b16.start.end [1/1] (short) (narrow) %v2879_v62, 32 }
 0x8c4   : > { %4454 = vxpose.xlu0.c.b16.start.end [1/1] (short) (narrow) %v2880_v0, 32 }
 0x8c7   : > { %4470 = vxpose.xlu1.c.b16.start.end [1/1] (short) (narrow) %v2881_v8, 32 }
 0x8c9   : > { %4486 = vxpose.xlu0.c.b16.start.end [1/1] (short) (narrow) %v2882_v6, 32 }
 0x91e   : > { %v4382_v63 = vpop.trf.xlu1 }
 0x91f   : > { %v4506_v16 = vshrl.u32 %v4382_v63, 16 }
 0x920   : > { %v4398_v9 = vpop.trf.xlu0 }
 0x921   : > { %v4507_v49 = vshrl.u32 %v4398_v9, 16  ;;  %v9097_v31 = vpack.i.b16 %v4398_v9, %v4382_v63 }
 0x922   : > { %v4383_v15 = vpop.trf.xlu1 }
 0x923   : > { %v4538_v21 = vshrl.u32 %v4383_v15, 16  ;;  %v9109_v46 = vpack.i.b16 %v4507_v49, %v4506_v16 }
 0x924   : > { %v4399_v3 = vpop.trf.xlu0 }
 0x925   : > { %v4539_v23 = vshrl.u32 %v4399_v3, 16  ;;  %v9093_v57 = vpack.i.b16 %v4399_v3, %v4383_v15 }
 0x926   : > { %v4414_v5 = vpop.trf.xlu1 }
 0x927   : > { %v4514_v32 = vshrl.u32 %v4414_v5, 16  ;;  %v9099_v36 = vpack.i.b16 %v4539_v23, %v4538_v21 }
 0x928   : > { %v4430_v10 = vpop.trf.xlu0 }
 0x929   : > { %v4515_v34 = vshrl.u32 %v4430_v10, 16  ;;  %v4512_v41 = vpack.i.b16 %v4430_v10, %v4414_v5 }
 0x92a   : > { %v4415_v53 = vpop.trf.xlu1 }
 0x92b   : > { %v4516_v33 = vpack.i.b16 %v4515_v34, %v4514_v32  ;;  %v4546_v58 = vshrl.u32 %v4415_v53, 16 }
 0x92c   : > { %v4431_v12 = vpop.trf.xlu0 }
 0x92d   : > { %v4547_v59 = vshrl.u32 %v4431_v12, 16  ;;  %v9119_v9 = vpack.i.b16 %v4431_v12, %v4415_v53  ;;  %v2884_v53 = vand.u32 127, %v889_v14 }
 0x92e   : > { %v4446_v17 = vpop.trf.xlu1 }
 0x92f   : > { %v4522_v52 = vshrl.u32 %v4446_v17, 16  ;;  %v9121_v3 = vpack.i.b16 %v4547_v59, %v4546_v58  ;;  %vm2893_vm5 = vcmp.gt.s32.totalorder %v2884_v53, %v9075_v25  ;;  %vm2894_vm6 = vcmp.gt.s32.totalorder %v2884_v53, %v9073_v24 }
 0x930   : > { %v4462_v11 = vpop.trf.xlu0  ;;  %v9167_v24 = vsel %vm2894_vm6, -1e+30, %v8339_v4 }
 0x931   : > { %v4523_v56 = vshrl.u32 %v4462_v11, 16  ;;  %v9091_v48 = vpack.i.b16 %v4462_v11, %v4446_v17 }
 0x932   : > { %v4447_v13 = vpop.trf.xlu1 }
 0x933   : > { %v4554_v7 = vshrl.u32 %v4447_v13, 16  ;;  %v9101_v37 = vpack.i.b16 %v4523_v56, %v4522_v52  ;;  %v4566_v42 = vcombine.low %v9097_v31, %v9091_v48  ;;  %v4567_v32 = vcombine.high %v9097_v31, %v9091_v48 }
 0x934   : > { %v4463_v2 = vpop.trf.xlu0  ;;  %v9162_v48 = vsel %vm2893_vm5, -1e+30, %v8339_v4 }
 0x935   : > { %v9095_v28 = vpack.i.b16 %v4463_v2, %v4447_v13  ;;  %v4555_v29 = vshrl.u32 %v4463_v2, 16  ;;  %v4634_v60 = vcombine.low %v9109_v46, %v9101_v37  ;;  %v4574_v0 = vrot.slane %v4566_v42, %v8583_v26 }
 0x936   : > { %v4478_v30 = vpop.trf.xlu1  ;;  %v4635_v31 = vcombine.high %v9109_v46, %v9101_v37 }
 0x937   : > { %v4530_v35 = vshrl.u32 %v4478_v30, 16  ;;  %v9103_v38 = vpack.i.b16 %v4555_v29, %v4554_v7  ;;  %v4703_v39 = vcombine.high %v9093_v57, %v9095_v28  ;;  %v4642_v5 = vrot.slane %v4634_v60, %v8583_v26 }
 0x938   : > { %v4494_v40 = vpop.trf.xlu0  ;;  %v4649_v60 = vrot.slane %v4635_v31, %v8583_v26 }
 0x939   : > { %v4528_v44 = vpack.i.b16 %v4494_v40, %v4478_v30  ;;  %v4531_v45 = vshrl.u32 %v4494_v40, 16  ;;  %v4771_v50 = vcombine.high %v9099_v36, %v9103_v38  ;;  %v9134_v12 = vrot.slane %v4703_v39, %v8583_v26 }
 0x93a   : > { %v4479_v51 = vpop.trf.xlu1 }
 0x93b   : > { %v4532_v54 = vpack.i.b16 %v4531_v45, %v4530_v35  ;;  %v4582_v55 = vcombine.low %v4512_v41, %v4528_v44  ;;  %v4562_v61 = vshrl.u32 %v4479_v51, 16  ;;  %v9140_v56 = vrot.slane %v4771_v50, %v8583_v26 }
 0x93c   : > { %v4495_v62 = vpop.trf.xlu0  ;;  %v4583_v7 = vcombine.high %v4512_v41, %v4528_v44  ;;  %v4581_v44 = vrot.slane %v4567_v32, %v8583_v26 }
 0x93d   : > { %v4590_v1 = vrot.slane %v4582_v55, %v8583_v26  ;;  %v4650_v8 = vcombine.low %v4516_v33, %v4532_v54  ;;  %v9117_v6 = vpack.i.b16 %v4495_v62, %v4479_v51  ;;  %v4563_v63 = vshrl.u32 %v4495_v62, 16 }
 0x93e   : > { %v4597_v35 = vrot.slane %v4583_v7, %v8583_v26  ;;  %v4651_v39 = vcombine.high %v4516_v33, %v4532_v54 }
 0x93f   : > { %v4598_v15 = vcombine.low %v4574_v0, %v4590_v1  ;;  %v4658_v10 = vrot.slane %v4650_v8, %v8583_v26  ;;  %v9125_v17 = vpack.i.b16 %v4563_v63, %v4562_v61  ;;  %v4719_v11 = vcombine.high %v9119_v9, %v9117_v6 }
 0x940   : > { %v4599_v2 = vcombine.high %v4574_v0, %v4590_v1  ;;  %v4614_v25 = vcombine.low %v4581_v44, %v4597_v35  ;;  %v4665_v33 = vrot.slane %v4651_v39, %v8583_v26  ;;  %v4718_v1 = vcombine.low %v9119_v9, %v9117_v6 }
 0x941   : > { %v4606_v13 = vrot.slane %v4598_v15, %v8589_v47  ;;  %v4787_v21 = vcombine.high %v9121_v3, %v9125_v17  ;;  %v4666_v23 = vcombine.low %v4642_v5, %v4658_v10  ;;  %v9137_v52 = vrot.slane %v4719_v11, %v8583_v26 }
 0x942   : > { %v4613_v41 = vrot.slane %v4599_v2, %v8589_v47  ;;  %v4667_v42 = vcombine.high %v4642_v5, %v4658_v10  ;;  %v4622_v62 = vrot.slane %v4614_v25, %v8589_v47  ;;  %v4682_v0 = vcombine.low %v4649_v60, %v4665_v33 }
 0x943   : > { %4838 = vxpose.xlu1.c.b16.start.end [1/1] (short) (narrow) %v4606_v13, 16  ;;  %v9143_v16 = vrot.slane %v4787_v21, %v8583_v26  ;;  %v4750_v49 = vcombine.low %v9134_v12, %v9137_v52  ;;  %v4751_v14 = vcombine.high %v9134_v12, %v9137_v52  ;;  %v4674_v29 = vrot.slane %v4666_v23, %v8589_v47 }
 0x944   : > { %v4630_v30 = vcombine.high %v4606_v13, %v8343_v43  ;;  %v4681_v55 = vrot.slane %v4667_v42, %v8589_v47  ;;  %v4631_v58 = vcombine.high %v4613_v41, %v8343_v43  ;;  %v4615_v8 = vcombine.high %v4581_v44, %v4597_v35 }
 0x945   : > { %v4818_v34 = vcombine.low %v9140_v56, %v9143_v16  ;;  %4854 = vxpose.xlu0.c.b16.start.end [1/1] (short) (narrow) %v4674_v29, 16  ;;  %v4698_v40 = vcombine.high %v4674_v29, %v8343_v43  ;;  %v4819_v37 = vcombine.high %v9140_v56, %v9143_v16  ;;  %v4690_v63 = vrot.slane %v4682_v0, %v8589_v47 }
 0x946   : > { %v4699_v61 = vcombine.high %v4681_v55, %v8343_v43  ;;  %v4632_v15 = vcombine.high %v4622_v62, %v8343_v43  ;;  %v4702_v5 = vcombine.low %v9093_v57, %v9095_v28  ;;  %v4726_v10 = vrot.slane %v4718_v1, %v8583_v26 }
 0x947   : > { %4870 = vxpose.xlu1.c.b16.start.end [1/1] (short) (narrow) %v4630_v30, 16  ;;  %v4786_v11 = vcombine.low %v9121_v3, %v9125_v17  ;;  %v4700_v13 = vcombine.high %v4690_v63, %v8343_v43  ;;  %v4629_v21 = vrot.slane %v4615_v8, %v8589_v47  ;;  %v4683_v6 = vcombine.high %v4649_v60, %v4665_v33 }
 0x948   : > { %v4710_v9 = vrot.slane %v4702_v5, %v8583_v26  ;;  %v4770_v23 = vcombine.low %v9099_v36, %v9103_v38 }
 0x949   : > { %v4142_v45 = vpop.f32.mrb[28].mxu1  ;;  %4886 = vxpose.xlu0.c.b16.start.end [1/1] (short) (narrow) %v4698_v40, 16  ;;  %v4794_v28 = vrot.slane %v4786_v11, %v8583_v26  ;;  %v4697_v53 = vrot.slane %v4683_v6, %v8589_v47  ;;  %v4633_v7 = vcombine.high %v4629_v21, %v8343_v43 }
 0x94a   : > { %v9170_v50 = vadd.f32 %v4142_v45, %v9162_v48  ;;  %v7848_v51 = vpop.f32.mrb[29].mxu1  ;;  %v4734_v57 = vcombine.low %v4710_v9, %v4726_v10  ;;  %v4778_v3 = vrot.slane %v4770_v23, %v8583_v26  ;;  %v4735_v38 = vcombine.high %v4710_v9, %v4726_v10 }
 0x94b   : > { %4902 = vxpose.xlu1.c.b16.start.end [1/1] (short) (narrow) %v4613_v41, 16  ;;  %v4145_v54 = vpop.f32.mrb[30].mxu1  ;;  %v4701_v17 = vcombine.high %v4697_v53, %v8343_v43 }
 0x94c   : > { %v9178_v46 = vadd.f32 %v4145_v54, %v9167_v24  ;;  %v7849_v59 = vpop.f32.mrb[31].mxu1  ;;  %v4742_v2 = vrot.slane %v4734_v57, %v8589_v47  ;;  %v4802_v29 = vcombine.low %v4778_v3, %v4794_v28  ;;  %v4749_v31 = vrot.slane %v4735_v38, %v8589_v47 }
 0x94d   : > { %4918 = vxpose.xlu0.c.b16.start.end [1/1] (short) (narrow) %v4681_v55, 16  ;;  %v4803_v45 = vcombine.high %v4778_v3, %v4794_v28 }
 0x94e   : > { %v4810_v35 = vrot.slane %v4802_v29, %v8589_v47  ;;  %v4766_v39 = vcombine.high %v4742_v2, %v8343_v43 }
 0x94f   : > { %4934 = vxpose.xlu1.c.b16.start.end [1/1] (short) (narrow) %v4631_v58, 16  ;;  %v4817_v54 = vrot.slane %v4803_v45, %v8589_v47 }
 0x950   : > { %v4834_v44 = vcombine.high %v4810_v35, %v8343_v43 }
 0x951   : > { %4950 = vxpose.xlu0.c.b16.start.end [1/1] (short) (narrow) %v4699_v61, 16  ;;  %v4835_v11 = vcombine.high %v4817_v54, %v8343_v43 }
 0x953   : > { %4966 = vxpose.xlu1.c.b16.start.end [1/1] (short) (narrow) %v4622_v62, 16 }
 0x955   : > { %4982 = vxpose.xlu0.c.b16.start.end [1/1] (short) (narrow) %v4690_v63, 16  ;;  %v4282_v63 = vsel %vm4281_vm7, %v9170_v50, -inf }
 0x957   : > { %4998 = vxpose.xlu1.c.b16.start.end [1/1] (short) (narrow) %v4632_v15, 16  ;;  %v4285_v15 = vsel %vm4281_vm7, %v9178_v46, -inf }
 0x959   : > { %5014 = vxpose.xlu0.c.b16.start.end [1/1] (short) (narrow) %v4700_v13, 16 }
 0x95b   : > { %5030 = vxpose.xlu1.c.b16.start.end [1/1] (short) (narrow) %v4629_v21, 16 }
 0x95d   : > { %5046 = vxpose.xlu0.c.b16.start.end [1/1] (short) (narrow) %v4697_v53, 16 }
 0x95f   : > { %5062 = vxpose.xlu1.c.b16.start.end [1/1] (short) (narrow) %v4633_v7, 16 }
 0x961   : > { %5078 = vxpose.xlu0.c.b16.start.end [1/1] (short) (narrow) %v4701_v17, 16 }
 0x963   : > { %5094 = vxpose.xlu1.c.b16.start.end [1/1] (short) (narrow) %v4742_v2, 16 }
 0x964   : > { %v4186_v36 = vpop.f32.mrb[32].mxu1 }
 0x965   : > { %v9204_v30 = vadd.f32 %v4186_v36, %v9162_v48  ;;  %v7856_v32 = vpop.f32.mrb[33].mxu1  ;;  %5110 = vxpose.xlu0.c.b16.start.end [1/1] (short) (narrow) %v4810_v35, 16 }
 0x966   : > { %v4189_v40 = vpop.f32.mrb[34].mxu1 }
 0x967   : > { %v9209_v41 = vadd.f32 %v4189_v40, %v9167_v24  ;;  %v7857_v42 = vpop.f32.mrb[35].mxu1  ;;  %5126 = vxpose.xlu1.c.b16.start.end [1/1] (short) (narrow) %v4766_v39, 16 }
 0x969   : > { %5142 = vxpose.xlu0.c.b16.start.end [1/1] (short) (narrow) %v4834_v44, 16  ;;  %v4291_v5 = vsel %vm4281_vm7, %v9209_v41, -inf }
 0x96b   : > { %5158 = vxpose.xlu1.c.b16.start.end [1/1] (short) (narrow) %v4749_v31, 16 }
 0x96c   : > { %v4230_v25 = vpop.f32.mrb[36].mxu1 }
 0x96d   : > { %v9214_v51 = vadd.f32 %v4230_v25, %v9162_v48  ;;  %v7864_v33 = vpop.f32.mrb[37].mxu1  ;;  %5174 = vxpose.xlu0.c.b16.start.end [1/1] (short) (narrow) %v4817_v54, 16 }
 0x96e   : > { %v4233_v55 = vpop.f32.mrb[38].mxu1 }
 0x96f   : > { %v9218_v58 = vadd.f32 %v4233_v55, %v9167_v24  ;;  %v7865_v59 = vpop.f32.mrb[39].mxu1  ;;  %v4294_v53 = vsel %vm4281_vm7, %v9214_v51, -inf }
 0x971   : > { %v4297_v23 = vsel %vm4281_vm7, %v9218_v58, -inf }
 0x974   : > { %v4274_v60 = vpop.f32.mrb[40].mxu1 }
 0x975   : > { %v9221_v61 = vadd.f32 %v4274_v60, %v9162_v48  ;;  %v7872_v62 = vpop.f32.mrb[41].mxu1  ;;  %v4288_v48 = vsel %vm4281_vm7, %v9204_v30, -inf }
 0x976   : > { %v4277_v0 = vpop.f32.mrb[42].mxu1 }
 0x977   : > { %v9224_v1 = vadd.f32 %v4277_v0, %v9167_v24  ;;  %v7873_v8 = vpop.f32.mrb[43].mxu1  ;;  %v4767_v24 = vcombine.high %v4749_v31, %v8343_v43  ;;  %v4300_v17 = vsel %vm4281_vm7, %v9221_v61, -inf }
 0x978   : > { %4283 = vmax.xlane.f32.xlu1 %v4282_v63 }
 0x979   : > { %v4303_v32 = vsel %vm4281_vm7, %v9224_v1, -inf }
 0x97a   : > { %4286 = vmax.xlane.f32.xlu0 %v4285_v15 }
 0x97c   : > { %4292 = vmax.xlane.f32.xlu1 %v4291_v5 }
 0x97e   : > { %4289 = vmax.xlane.f32.xlu0 %v4288_v48 }
 0x9a9   : > { %5190 = vxpose.xlu1.c.b16.start.end [1/1] (short) (narrow) %v4767_v24, 16  ;;  %v4846_v10 = vpop.trf.xlu1 }
 0x9ab   : > { %5206 = vxpose.xlu0.c.b16.start.end [1/1] (short) (narrow) %v4835_v11, 16  ;;  %v4862_v13 = vpop.trf.xlu0 }
 0x9ad   : > { %v4878_v21 = vpop.trf.xlu1 }
 0x9af   : > { %v4894_v6 = vpop.trf.xlu0 }
 0x9b1   : > { %v4910_v9 = vpop.trf.xlu1 }
 0x9b2   : > { %v5350_v2 = vcombine.low %v4846_v10, %v4910_v9 }
 0x9b3   : > { %v4926_v57 = vpop.trf.xlu0 }
 0x9b4   : > { %v5357_v35 = vrot.slane %v5350_v2, %v8583_v26  ;;  %v5400_v39 = vcombine.low %v4862_v13, %v4926_v57 }
 0x9b5   : > { %v4942_v28 = vpop.trf.xlu1 }
 0x9b6   : > { %4298 = vmax.xlane.f32.xlu1 %v4297_v23  ;;  %v5358_v29 = vcombine.low %v4878_v21, %v4942_v28  ;;  %v5407_v25 = vrot.slane %v5400_v39, %v8583_v26 }
 0x9b7   : > { %v4958_v7 = vpop.trf.xlu0 }
 0x9b8   : > { %4295 = vmax.xlane.f32.xlu0 %v4294_v53  ;;  %v5365_v40 = vrot.slane %v5358_v29, %v8583_v26  ;;  %v5408_v31 = vcombine.low %v4894_v6, %v4958_v7 }
 0x9b9   : > { %v4974_v3 = vpop.trf.xlu1 }
 0x9ba   : > { %v5382_v33 = vcombine.low %v5357_v35, %v5365_v40  ;;  %v5415_v59 = vrot.slane %v5408_v31, %v8583_v26 }
 0x9bb   : > { %v4990_v36 = vpop.trf.xlu0 }
 0x9bc   : > { %4301 = vmax.xlane.f32.xlu0 %v4300_v17  ;;  %v5389_v63 = vrot.slane %v5382_v33, %v8589_v47  ;;  %v5432_v48 = vcombine.low %v5407_v25, %v5415_v59  ;;  %v4758_v33 = vrot.slane %v4750_v49, %v8589_v47  ;;  %v4826_v59 = vrot.slane %v4818_v34, %v8589_v47 }
 0x9bd   : > { %v5006_v38 = vpop.trf.xlu1 }
 0x9be   : > { %v5439_v23 = vrot.slane %v5432_v48, %v8589_v47  ;;  %v4836_v49 = vcombine.high %v4826_v59, %v8343_v43 }
 0x9bf   : > { %v5022_v42 = vpop.trf.xlu0 }
 0x9c0   : > { %4304 = vmax.xlane.f32.xlu0 %v4303_v32 }
 0x9c1   : > { %v5038_v44 = vpop.trf.xlu1 }
 0x9c2   : > { %v5366_v45 = vcombine.low %v4974_v3, %v5038_v44 }
 0x9c3   : > { %v5054_v54 = vpop.trf.xlu0 }
 0x9c4   : > { %v5373_v60 = vrot.slane %v5366_v45, %v8583_v26  ;;  %v5416_v62 = vcombine.low %v4990_v36, %v5054_v54  ;;  %v4768_v54 = vcombine.high %v4758_v33, %v8343_v43 }
 0x9c5   : > { %v5070_v55 = vpop.trf.xlu1 }
 0x9c6   : > { %v5374_v0 = vcombine.low %v5006_v38, %v5070_v55  ;;  %v5423_v24 = vrot.slane %v5416_v62, %v8583_v26  ;;  %v9277_v55 = vrot.slane %v4751_v14, %v8589_v47 }
 0x9c7   : > { %v5086_v15 = vpop.trf.xlu0 }
 0x9c8   : > { %v5381_v8 = vrot.slane %v5374_v0, %v8583_v26  ;;  %v5424_v11 = vcombine.low %v5022_v42, %v5086_v15 }
 0x9c9   : > { %v5102_v5 = vpop.trf.xlu1 }
 0x9ca   : > { %v5390_v10 = vcombine.low %v5373_v60, %v5381_v8  ;;  %v5431_v21 = vrot.slane %v5424_v11, %v8583_v26  ;;  %v9289_v60 = vrot.slane %v4819_v37, %v8589_v47 }
 0x9cb   : > { %v5118_v6 = vpop.trf.xlu0 }
 0x9cc   : > { %v5397_v13 = vrot.slane %v5390_v10, %v8589_v47  ;;  %v5440_v53 = vcombine.low %v5423_v24, %v5431_v21 }
 0x9cd   : > { %v5134_v9 = vpop.trf.xlu1 }
 0x9ce   : > { %v5398_v57 = vcombine.low %v5389_v63, %v5397_v13  ;;  %v9255_v28 = vcombine.high %v5389_v63, %v5397_v13  ;;  %v5447_v7 = vrot.slane %v5440_v53, %v8589_v47 }
 0x9cf   : > { %v5150_v3 = vpop.trf.xlu0 }
 0x9d0   : > { %v5448_v2 = vcombine.low %v5439_v23, %v5447_v7  ;;  %v9258_v29 = vcombine.high %v5439_v23, %v5447_v7  ;;  %v5553_v38 = vshrl.u32 %v5398_v57, 16  ;;  %v5559_v32 = vshrl.u32 %v9255_v28, 16 }
 0x9d1   : > { %v5166_v17 = vpop.trf.xlu1 }
 0x9d2   : > { %v5450_v36 = vcombine.low %v5102_v5, %v5166_v17  ;;  %v5552_v35 = vpack.i.b16 %v5448_v2, %v5398_v57  ;;  %v5554_v39 = vshrl.u32 %v5448_v2, 16  ;;  %v5558_v40 = vpack.i.b16 %v9258_v29, %v9255_v28 }
 0x9d3   : > { %v5182_v42 = vpop.trf.xlu0  ;;  %v5560_v44 = vshrl.u32 %v9258_v29, 16 }
 0x9d4   : > { %v5500_v31 = vcombine.low %v5118_v6, %v5182_v42  ;;  %7876 = vmatprep.mubr.msk.bf16.mxu0 %vm4281_vm7, %v5552_v35  ;;  %v5555_v45 = vpack.i.b16 %v5554_v39, %v5553_v38  ;;  %v9297_v37 = vrot.slane %v5450_v36, %v8583_v26 }
 0x9d5   : > { %v9265_v25 = vpack.i.b16 %v5560_v44, %v5559_v32 }
 0x9d6   : > { %7882 = vmatprep.mubr.msk.bf16.mxu1 %vm4281_vm7, %v5555_v45 }
 0x9e3   : > { %5222 = vxpose.xlu1.c.b16.start.end [1/1] (short) (narrow) %v4758_v33, 16 }
 0x9e7   : > { %5254 = vxpose.xlu1.c.b16.start.end [1/1] (short) (narrow) %v4768_v54, 16 }
 0x9eb   : > { %5286 = vxpose.xlu1.c.b16.start.end [1/1] (short) (narrow) %v9277_v55, 16 }
 0x9ed   : > { %5238 = vxpose.xlu0.c.b16.start.end [1/1] (short) (narrow) %v4826_v59, 16 }
 0x9f1   : > { %5270 = vxpose.xlu0.c.b16.start.end [1/1] (short) (narrow) %v4836_v49, 16 }
 0x9f5   : > { %5302 = vxpose.xlu0.c.b16.start.end [1/1] (short) (narrow) %v9289_v60, 16 }
 0xa05   : > { %v4284_v12 = vpop.xlane.xlu1 %4283 }
 0xa06   : > { %v4306_v52 = vsub.f32 %v9170_v50, %v4284_v12 }
 0xa07   : > { %v4287_v62 = vpop.xlane.xlu0 %4286 }
 0xa08   : > { %v4314_v14 = vmul.f32 1.442695, %v4306_v52  ;;  %v4307_v34 = vsub.f32 %v9178_v46, %v4287_v62  ;;  %v4769_v52 = vcombine.high %v9277_v55, %v8343_v43 }
 0xa09   : > { %v4293_v0 = vpop.xlane.xlu1 %4292 }
 0xa0a   : > { %8188 = vpow2.f32 %v4314_v14  ;;  %v4309_v8 = vsub.f32 %v9209_v41, %v4293_v0  ;;  %v4316_v63 = vmul.f32 1.442695, %v4307_v34  ;;  %v9305_v41 = vrot.slane %v5500_v31, %v8583_v26 }
 0xa0b   : > { %v4290_v5 = vpop.xlane.xlu0 %4289  ;;  %v4837_v14 = vcombine.high %v9289_v60, %v8343_v43 }
 0xa0c   : > { %v4320_v15 = vmul.f32 1.442695, %v4309_v8  ;;  %8190 = vpow2.f32 %v4316_v63  ;;  %v4308_v56 = vsub.f32 %v9204_v30, %v4290_v5 }
 0xa0e   : > { %8192 = vpow2.f32 %v4320_v15  ;;  %v4318_v50 = vmul.f32 1.442695, %v4308_v56 }
 0xa0f   : > { %v5198_v16 = vpop.trf.xlu1 }
 0xa10   : > { %v5458_v48 = vcombine.low %v5134_v9, %v5198_v16  ;;  %8194 = vpow2.f32 %v4318_v50 }
 0xa11   : > { %v5214_v46 = vpop.trf.xlu0 }
 0xa12   : > { %v9300_v24 = vrot.slane %v5458_v48, %v8583_v26  ;;  %v5508_v11 = vcombine.low %v5150_v3, %v5214_v46 }
 0xa14   : > { %v9302_v10 = vpop.eup %8188  ;;  %v5482_v30 = vcombine.low %v9297_v37, %v9300_v24  ;;  %v9312_v21 = vrot.slane %v5508_v11, %v8583_v26 }
 0xa15   : > { %v4330_v13 = vsel %vm4281_vm7, %v9302_v10, 0.0 }
 0xa16   : > { %4331 = vadd.xlane.f32.xlu1 %v4330_v13  ;;  %v8191_v6 = vpop.eup %8190  ;;  %v5532_v9 = vcombine.low %v9305_v41, %v9312_v21 }
 0xa17   : > { %v4333_v23 = vsel %vm4281_vm7, %v8191_v6, 0.0 }
 0xa18   : > { %v9317_v57 = vpop.eup %8192  ;;  %4334 = vadd.xlane.f32.xlu0 %v4333_v23  ;;  %v5539_v37 = vrot.slane %v5532_v9, %v8589_v47 }
 0xa19   : > { %v4339_v7 = vsel %vm4281_vm7, %v9317_v57, 0.0 }
 0xa1a   : > { %v8195_v53 = vpop.eup %8194 }
 0xa1b   : > { %v4336_v3 = vsel %vm4281_vm7, %v8195_v53, 0.0 }
 0xa1c   : > { %4340 = vadd.xlane.f32.xlu0 %v4339_v7  ;;  %4337 = vadd.xlane.f32.xlu1 %v4336_v3 }
 0xa43   : > { %v4299_v17 = vpop.xlane.xlu1 %4298 }
 0xa44   : > { %v4311_v2 = vsub.f32 %v9218_v58, %v4299_v17 }
 0xa45   : > { %v4296_v38 = vpop.xlane.xlu0 %4295 }
 0xa46   : > { %v4324_v36 = vmul.f32 1.442695, %v4311_v2  ;;  %v4310_v32 = vsub.f32 %v9214_v51, %v4296_v38 }
 0xa48   : > { %8196 = vpow2.f32 %v4324_v36  ;;  %v4322_v35 = vmul.f32 1.442695, %v4310_v32 }
 0xa49   : > { %v4302_v39 = vpop.xlane.xlu0 %4301  ;;  %v5230_v62 = vpop.trf.xlu1 }
 0xa4a   : > { %8198 = vpow2.f32 %v4322_v35  ;;  %v4312_v42 = vsub.f32 %v9221_v61, %v4302_v39 }
 0xa4c   : > { %v4326_v44 = vmul.f32 1.442695, %v4312_v42 }
 0xa4d   : > { %v4305_v31 = vpop.xlane.xlu0 %4304  ;;  %v5262_v34 = vpop.trf.xlu1 }
 0xa4e   : > { %8200 = vpow2.f32 %v4326_v44  ;;  %v4313_v45 = vsub.f32 %v9224_v1, %v4305_v31 }
 0xa50   : > { %v4328_v54 = vmul.f32 1.442695, %v4313_v45 }
 0xa51   : > { %v5294_v63 = vpop.trf.xlu1 }
 0xa52   : > { %v8197_v33 = vpop.eup %8196  ;;  %8202 = vpow2.f32 %v4328_v54  ;;  %v5466_v39 = vcombine.low %v5230_v62, %v5294_v63  ;;  %v5489_v62 = vrot.slane %v5482_v30, %v8589_v47 }
 0xa53   : > { %v4345_v59 = vsel %vm4281_vm7, %v8197_v33, 0.0  ;;  %v5246_v0 = vpop.trf.xlu0 }
 0xa54   : > { %4346 = vadd.xlane.f32.xlu0 %v4345_v59  ;;  %v8199_v58 = vpop.eup %8198  ;;  %v5473_v45 = vrot.slane %v5466_v39, %v8583_v26  ;;  %v8064_v39 = vld [vmem:[%s9882_s12] sm:$0xff]  }
 0xa55   : > { %v4342_v49 = vsel %vm4281_vm7, %v8199_v58, 0.0 }
 0xa56   : > { %4343 = vadd.xlane.f32.xlu1 %v4342_v49 }
 0xa57   : > { %v5278_v8 = vpop.trf.xlu0 }
 0xa58   : > { %v9328_v51 = vpop.eup %8200 }
 0xa59   : > { %v4348_v61 = vsel %vm4281_vm7, %v9328_v51, 0.0 }
 0xa5a   : > { %4349 = vadd.xlane.f32.xlu1 %v4348_v61 }
 0xa5b   : > { %v5310_v15 = vpop.trf.xlu0 }
 0xa5c   : > { %v9332_v12 = vpop.eup %8202  ;;  %v5516_v54 = vcombine.low %v5246_v0, %v5310_v15 }
 0xa5d   : > { %v4351_v1 = vsel %vm4281_vm7, %v9332_v12, 0.0 }
 0xa5e   : > { %4352 = vadd.xlane.f32.xlu0 %v4351_v1 }
 0xa87   : > { %5318 = vxpose.xlu1.c.b16.start.end [1/1] (short) (narrow) %v4769_v52, 16 }
 0xa8b   : > { %5334 = vxpose.xlu0.c.b16.start.end [1/1] (short) (narrow) %v4837_v14, 16 }
 0xaa3   : > { %v4332_v5 = vpop.xlane.xlu1 %4331 }
 0xaa4   : > { %8204 = vrcp.f32 %v4332_v5 }
 0xaa5   : > { %v4335_v56 = vpop.xlane.xlu0 %4334 }
 0xaa6   : > { %8206 = vrcp.f32 %v4335_v56 }
 0xaa9   : > { %v4338_v16 = vpop.xlane.xlu1 %4337  ;;  %v4341_v50 = vpop.xlane.xlu0 %4340 }
 0xaaa   : > { %8208 = vrcp.f32 %v4338_v16 }
 0xaab   : > { %8210 = vrcp.f32 %v4341_v50 }
 0xaae   : > { %v8205_v55 = vpop.eup %8204 }
 0xaaf   : > { %v4362_v46 = vmul.f32 %v8205_v55, %v9302_v10 }
 0xab0   : > { %v8207_v48 = vpop.eup %8206 }
 0xab1   : > { %v4363_v60 = vmul.f32 %v8207_v48, %v8191_v6 }
 0xab3   : > { %v4370_v11 = vpack.c.bf16 %v4363_v60, %v4362_v46 }
 0xab4   : > { %v8209_v13 = vpop.eup %8208 }
 0xab5   : > { %v8211_v23 = vpop.eup %8210  ;;  %7922 = vmatprep.subr.msk.bf16.mxu0 %vm4281_vm7, %v4370_v11  ;;  %v5581_v7 = vsel %vm4281_vm7, %v4370_v11, 0  ;;  %v4364_v3 = vmul.f32 %v8209_v13, %v8195_v53 }
 0xab6   : > { %7875 = vmatpush3.bf16.xpose.msra.mxu0 %v5581_v7  ;;  %v4365_v17 = vmul.f32 %v8211_v23, %v9317_v57 }
 0xab8   : > { %v4371_v2 = vpack.c.bf16 %v4365_v17, %v4364_v3 }
 0xaba   : > { %7923 = vmatprep.subr.msk.bf16.mxu1 %vm4281_vm7, %v4371_v2  ;;  %v5639_v36 = vsel %vm4281_vm7, %v4371_v2, 0 }
 0xabb   : > { %7881 = vmatpush3.bf16.xpose.msra.mxu1 %v5639_v36 }
 0xae1   : > { %v4347_v38 = vpop.xlane.xlu0 %4346 }
 0xae2   : > { %8212 = vrcp.f32 %v4347_v38 }
 0xae3   : > { %v4344_v10 = vpop.xlane.xlu1 %4343 }
 0xae4   : > { %8214 = vrcp.f32 %v4344_v10 }
 0xae7   : > { %v4350_v6 = vpop.xlane.xlu1 %4349 }
 0xae8   : > { %8216 = vrcp.f32 %v4350_v6 }
 0xaeb   : > { %v4353_v32 = vpop.xlane.xlu0 %4352 }
 0xaec   : > { %v8213_v35 = vpop.eup %8212  ;;  %8218 = vrcp.f32 %v4353_v32 }
 0xaed   : > { %v5326_v53 = vpop.trf.xlu1  ;;  %v4367_v31 = vmul.f32 %v8213_v35, %v8197_v33 }
 0xaee   : > { %v8215_v42 = vpop.eup %8214  ;;  %v5474_v44 = vcombine.low %v5262_v34, %v5326_v53  ;;  %v8065_v53 = vld [vmem:[%s9882_s12 + $0x8] sm:$0xff]  }
 0xaef   : > { %v4366_v57 = vmul.f32 %v8215_v42, %v8199_v58  ;;  %v5523_v58 = vrot.slane %v5516_v54, %v8583_v26  ;;  %v8066_v42 = vld [vmem:[%s9882_s12 + $0x10] sm:$0xff]  }
 0xaf0   : > { %v5481_v59 = vrot.slane %v5474_v44, %v8583_v26  ;;  %v8067_v44 = vld [vmem:[%s9882_s12 + $0x18] sm:$0xff]  }
 0xaf1   : > { %v5342_v49 = vpop.trf.xlu0  ;;  %v4372_v61 = vpack.c.bf16 %v4367_v31, %v4366_v57  ;;  %v8068_v57 = vld [vmem:[%s9882_s12 + $0x20] sm:$0xff]   ;;  %v8069_v31 = vld [vmem:[%s9882_s12 + $0x28] sm:$0xff]  }
 0xaf2   : > { %v5490_v1 = vcombine.low %v5473_v45, %v5481_v59  ;;  %v5524_v52 = vcombine.low %v5278_v8, %v5342_v49  ;;  %v8217_v14 = vpop.eup %8216 }
 0xaf3   : > { %7924 = vmatprep.subr.msk.bf16.mxu0 %vm4281_vm7, %v4372_v61  ;;  %v4368_v8 = vmul.f32 %v8217_v14, %v9328_v51 }
 0xaf4   : > { %v5497_v33 = vrot.slane %v5490_v1, %v8589_v47  ;;  %v5531_v0 = vrot.slane %v5524_v52, %v8583_v26 }
 0xaf6   : > { %v8219_v34 = vpop.eup %8218  ;;  %v5498_v63 = vcombine.low %v5489_v62, %v5497_v33  ;;  %v5499_v15 = vcombine.high %v5489_v62, %v5497_v33  ;;  %v5540_v5 = vcombine.low %v5523_v58, %v5531_v0 }
 0xaf7   : > { %v4369_v56 = vmul.f32 %v8219_v34, %v9332_v12  ;;  %v5697_v12 = vsel %vm4281_vm7, %v4372_v61, 0 }
 0xaf8   : > { %v5547_v24 = vrot.slane %v5540_v5, %v8589_v47  ;;  %v5565_v55 = vshrl.u32 %v5498_v63, 16  ;;  %v5571_v48 = vshrl.u32 %v5499_v15, 16 }
 0xaf9   : > { %v4373_v30 = vpack.c.bf16 %v4369_v56, %v4368_v8 }
 0xafa   : > { %v5548_v16 = vcombine.low %v5539_v37, %v5547_v24  ;;  %v5549_v50 = vcombine.high %v5539_v37, %v5547_v24 }
 0xafb   : > { %7925 = vmatprep.subr.msk.bf16.mxu1 %vm4281_vm7, %v4373_v30  ;;  %v5755_v21 = vsel %vm4281_vm7, %v4373_v30, 0 }
 0xafc   : > { %v5564_v46 = vpack.i.b16 %v5548_v16, %v5498_v63  ;;  %v5566_v60 = vshrl.u32 %v5548_v16, 16  ;;  %v5570_v11 = vpack.i.b16 %v5549_v50, %v5499_v15  ;;  %v5572_v51 = vshrl.u32 %v5549_v50, 16 }
 0xafe   : > { %7877 = vmatmul.mubr.msk.bf16.vlgmr.msra.gmra.mrb[16].mxu0 %vm4281_vm7, %v5564_v46  ;;  %v5567_v13 = vpack.i.b16 %v5566_v60, %v5565_v55  ;;  %v5573_v41 = vpack.i.b16 %v5572_v51, %v5571_v48 }
 0xaff   : > { %7887 = vmatpush3.bf16.xpose.msra.mxu0 %v5697_v12  ;;  %7888 = vmatprep.mubr.msk.bf16.mxu0 %vm4281_vm7, %v5558_v40 }
 0xb00   : > { %7883 = vmatmul.mubr.msk.bf16.vlgmr.msra.gmra.mrb[44].mxu1 %vm4281_vm7, %v5567_v13  ;;  %7898 = vmatprep.subr.bf16.mxu0 %v8339_v4 }
 0xb01   : > { %7893 = vmatpush3.bf16.xpose.msra.mxu1 %v5755_v21  ;;  %7894 = vmatprep.mubr.msk.bf16.mxu1 %vm4281_vm7, %v9265_v25 }
 0xb06   : > { %7889 = vmatmul.mubr.msk.bf16.vlgmr.msra.gmra.mrb[20].mxu0 %vm4281_vm7, %v5570_v11 }
 0xb07   : > { %7914 = vmatprep.mubr.msk.bf16.mxu0 %vm8340_vm0, %v8339_v4  ;;  %7899 = vmatpush3.bf16.msra.mxu0 %v8064_v39 }
 0xb08   : > { %7895 = vmatmul.mubr.msk.bf16.vlgmr.msra.gmra.mrb[48].mxu1 %vm4281_vm7, %v5573_v41  ;;  %7900 = vmatprep.subr.bf16.mxu0 %v8339_v4 }
 0xb09   : > { %6638 = vmatprep.mubr.bf16.mxu1 %v8343_v43 }
 0xb0b   : > { %7901 = vmatpush3.bf16.msra.mxu0 %v8065_v53 }
 0xb0c   : > { %7902 = vmatprep.subr.bf16.mxu0 %v8339_v4 }
 0xb0f   : > { %7903 = vmatpush3.bf16.msra.mxu0 %v8066_v42 }
 0xb10   : > { %7904 = vmatprep.subr.bf16.mxu0 %v8339_v4 }
 0xb13   : > { %7905 = vmatpush3.bf16.msra.mxu0 %v8067_v44 }
 0xb14   : > { %7906 = vmatprep.subr.bf16.mxu0 %v8339_v4 }
 0xb17   : > { %7907 = vmatpush3.bf16.msra.mxu0 %v8068_v57 }
 0xb18   : > { %7908 = vmatprep.subr.bf16.mxu0 %v8339_v4 }
 0xb1b   : > { %7909 = vmatpush3.bf16.msra.mxu0 %v8069_v31 }
 0xb1c   : > { %7910 = vmatprep.subr.bf16.mxu0 %v8339_v4 }
 0xbd1   : > { %v7878_v28 = vpop.f32.mrb[16].mxu0 }
 0xbd2   : > { %v5617_v29 = vpop.f32.mrb[17].mxu0 }
 0xbd3   : > { %v7884_v40 = vpop.f32.mrb[44].mxu1  ;;  %5806 = vxpose.xlu1.b32.start [1/4] (short) (narrow) %v5617_v29, 16  ;;  %v7879_v9 = vpop.f32.mrb[18].mxu0 }
 0xbd4   : > { %v5620_v23 = vpop.f32.mrb[19].mxu0  ;;  %v5675_v7 = vpop.f32.mrb[45].mxu1 }
 0xbd5   : > { %5838 = vxpose.xlu0.b32.start [1/4] (short) (narrow) %v5675_v7, 16  ;;  %v7885_v3 = vpop.f32.mrb[46].mxu1 }
 0xbd6   : > { %v5678_v17 = vpop.f32.mrb[47].mxu1 }
 0xbd7   : > { %5807 = vxpose.xlu1.b32.cont [2/4] (short) (narrow) %v5620_v23, 16 }
 0xbd9   : > { %5839 = vxpose.xlu0.b32.cont [2/4] (short) (narrow) %v5678_v17, 16  ;;  %v7890_v25 = vpop.f32.mrb[20].mxu0 }
 0xbda   : > { %v5733_v2 = vpop.f32.mrb[21].mxu0 }
 0xbdb   : > { %v7896_v36 = vpop.f32.mrb[48].mxu1  ;;  %5808 = vxpose.xlu1.b32.cont [3/4] (short) (narrow) %v7878_v28, 16  ;;  %v7891_v38 = vpop.f32.mrb[22].mxu0 }
 0xbdc   : > { %v5736_v10 = vpop.f32.mrb[23].mxu0  ;;  %v5791_v6 = vpop.f32.mrb[49].mxu1 }
 0xbdd   : > { %5840 = vxpose.xlu0.b32.cont [3/4] (short) (narrow) %v7884_v40, 16  ;;  %v7897_v32 = vpop.f32.mrb[50].mxu1 }
 0xbde   : > { %v5794_v35 = vpop.f32.mrb[51].mxu1 }
 0xbdf   : > { %5809 = vxpose.xlu1.b32.end [4/4] (short) (narrow) %v7879_v9, 16 }
 0xbe1   : > { %5841 = vxpose.xlu0.b32.end [4/4] (short) (narrow) %v7885_v3, 16 }
 0xbe3   : > { %5902 = vxpose.xlu1.b32.start [1/4] (short) (narrow) %v5791_v6, 16 }
 0xbe5   : > { %5870 = vxpose.xlu0.b32.start [1/4] (short) (narrow) %v5733_v2, 16 }
 0xbe7   : > { %5903 = vxpose.xlu1.b32.cont [2/4] (short) (narrow) %v5794_v35, 16 }
 0xbe9   : > { %5871 = vxpose.xlu0.b32.cont [2/4] (short) (narrow) %v5736_v10, 16 }
 0xbeb   : > { %5904 = vxpose.xlu1.b32.cont [3/4] (short) (narrow) %v7896_v36, 16 }
 0xbed   : > { %5872 = vxpose.xlu0.b32.cont [3/4] (short) (narrow) %v7890_v25, 16 }
 0xbef   : > { %5905 = vxpose.xlu1.b32.end [4/4] (short) (narrow) %v7897_v32, 16 }
 0xbf1   : > { %5873 = vxpose.xlu0.b32.end [4/4] (short) (narrow) %v7891_v38, 16 }
 0xc53   : > { %v5822_v45 = vpop.trf.xlu1 }
 0xc55   : > { %v5854_v54 = vpop.trf.xlu0 }
 0xc57   : > { %v5823_v59 = vpop.trf.xlu1 }
 0xc59   : > { %v5855_v49 = vpop.trf.xlu0 }
 0xc63   : > { %v5918_v61 = vpop.trf.xlu1 }
 0xc64   : > { %v5950_v1 = vcombine.low %v5854_v54, %v5918_v61  ;;  %v5951_v52 = vcombine.high %v5854_v54, %v5918_v61 }
 0xc65   : > { %v5886_v14 = vpop.trf.xlu0 }
 0xc66   : > { %v5934_v62 = vcombine.low %v5822_v45, %v5886_v14  ;;  %v5935_v58 = vcombine.high %v5822_v45, %v5886_v14  ;;  %v5958_v0 = vrot.slane %v5950_v1, %v8583_v26  ;;  %v5965_v34 = vrot.slane %v5951_v52, %v8583_v26 }
 0xc67   : > { %v5919_v33 = vpop.trf.xlu1 }
 0xc68   : > { %v5942_v63 = vrot.slane %v5934_v62, %v8583_v26  ;;  %v5949_v15 = vrot.slane %v5935_v58, %v8583_v26  ;;  %v6018_v5 = vcombine.low %v5855_v49, %v5919_v33  ;;  %v6019_v8 = vcombine.high %v5855_v49, %v5919_v33  ;;  %v8070_v49 = vld [vmem:[%s9882_s12 + $0x30] sm:$0xff]  }
 0xc69   : > { %v5887_v56 = vpop.trf.xlu0  ;;  %7911 = vmatpush3.bf16.msra.mxu0 %v8070_v49 }
 0xc6a   : > { %v5966_v37 = vcombine.low %v5942_v63, %v5958_v0  ;;  %v5967_v24 = vcombine.high %v5942_v63, %v5958_v0  ;;  %v5982_v30 = vcombine.low %v5949_v15, %v5965_v34  ;;  %v5983_v16 = vcombine.high %v5949_v15, %v5965_v34  ;;  %7912 = vmatprep.subr.bf16.mxu0 %v8339_v4 }
 0xc6b   : > { %v6002_v50 = vcombine.low %v5823_v59, %v5887_v56  ;;  %v6003_v55 = vcombine.high %v5823_v59, %v5887_v56  ;;  %v6026_v51 = vrot.slane %v6018_v5, %v8583_v26  ;;  %v6033_v12 = vrot.slane %v6019_v8, %v8583_v26 }
 0xc6c   : > { %v5974_v48 = vrot.slane %v5966_v37, %v8589_v47  ;;  %v5981_v46 = vrot.slane %v5967_v24, %v8589_v47  ;;  %v5990_v60 = vrot.slane %v5982_v30, %v8589_v47  ;;  %v5997_v11 = vrot.slane %v5983_v16, %v8589_v47  ;;  %v8071_v37 = vld [vmem:[%s9882_s12 + $0x38] sm:$0xff]  }
 0xc6d   : > { %v6010_v13 = vrot.slane %v6002_v50, %v8583_v26  ;;  %v6017_v41 = vrot.slane %v6003_v55, %v8583_v26  ;;  %7913 = vmatpush3.bf16.msra.mxu0 %v8071_v37  ;;  %v8101_v37 = vld [vmem:[%s9888_s18 + $0x8c] ss:$16 sps:$4 sm:$0xff]  }
 0xc6e   : > { %v6070_v21 = vcombine.low %v5974_v48, %v5981_v46  ;;  %v7533_v28 = vcombine.high %v5974_v48, %v5981_v46  ;;  %v6086_v29 = vcombine.low %v5990_v60, %v5997_v11  ;;  %v7534_v40 = vcombine.high %v5990_v60, %v5997_v11 }
 0xc6f   : > { %v6034_v9 = vcombine.low %v6010_v13, %v6026_v51  ;;  %v6035_v23 = vcombine.high %v6010_v13, %v6026_v51  ;;  %v6050_v7 = vcombine.low %v6017_v41, %v6033_v12  ;;  %v6051_v3 = vcombine.high %v6017_v41, %v6033_v12 }
 0xc70   : > { %v6077_v17 = vrot.slane %v6070_v21, %v8583_v26  ;;  %v6085_v25 = vrot.slane %v7533_v28, %v8583_v26  ;;  %v6093_v2 = vrot.slane %v6086_v29, %v8583_v26  ;;  %v6101_v36 = vrot.slane %v7534_v40, %v8583_v26 }
 0xc71   : > { %v6042_v38 = vrot.slane %v6034_v9, %v8589_v47  ;;  %v6049_v10 = vrot.slane %v6035_v23, %v8589_v47  ;;  %v6058_v6 = vrot.slane %v6050_v7, %v8589_v47  ;;  %v6065_v32 = vrot.slane %v6051_v3, %v8589_v47 }
 0xc72   : > { %v6103_v35 = vcombine.high %v6077_v17, %v6085_v25  ;;  %v6119_v39 = vcombine.high %v6093_v2, %v6101_v36  ;;  %v6102_v53 = vcombine.low %v6077_v17, %v6085_v25  ;;  %v6118_v42 = vcombine.low %v6093_v2, %v6101_v36  ;;  %v7537_v36 = vld [vmem:[%s9883_s13] ss:$0 sm:$0xff] }
 0xc73   : > { %v6138_v44 = vcombine.low %v6042_v38, %v6049_v10  ;;  %v7535_v57 = vcombine.high %v6042_v38, %v6049_v10  ;;  %v6154_v31 = vcombine.low %v6058_v6, %v6065_v32  ;;  %v7536_v45 = vcombine.high %v6058_v6, %v6065_v32 }
 0xc74   : > { %v6110_v54 = vrot.slane %v6102_v53, %v8589_v47  ;;  %v6126_v59 = vrot.slane %v6118_v42, %v8589_v47  ;;  %v6117_v62 = vrot.slane %v6103_v35, %v8589_v47  ;;  %v6133_v58 = vrot.slane %v6119_v39, %v8589_v47 }
 0xc75   : > { %v6145_v61 = vrot.slane %v6138_v44, %v8583_v26  ;;  %v6153_v1 = vrot.slane %v7535_v57, %v8583_v26  ;;  %v6161_v52 = vrot.slane %v6154_v31, %v8583_v26  ;;  %v6169_v14 = vrot.slane %v7536_v45, %v8583_v26  ;;  %v8074_v44 = vld [vmem:[%s9888_s18 + $0x4] ss:$16 sps:$4 sm:$0xff]   ;;  %v8083_v31 = vld [vmem:[%s9888_s18 + $0x2c] ss:$16 sps:$4 sm:$0xff]   ;;  %v8078_v45 = vld [vmem:[%s9888_s18 + $0x20] ss:$16 sps:$4 sm:$0xff]  }
 0xc76   : > { %v6134_v33 = vcombine.low %v6110_v54, %v6126_v59  ;;  %v6136_v24 = vcombine.low %v6117_v62, %v6133_v58  ;;  %v6135_v16 = vcombine.high %v6110_v54, %v6126_v59  ;;  %v6137_v60 = vcombine.high %v6117_v62, %v6133_v58  ;;  %v8080_v57 = vld [vmem:[%s9888_s18 + $0x24] ss:$16 sps:$4 sm:$0xff]   ;;  %6606 = vmatprep.subr.bf16.mxu1 %v8074_v44  ;;  %v8081_v54 = vld [vmem:[%s9888_s18 + $0x28] ss:$16 sps:$4 sm:$0xff]  }
 0xc77   : > { %v6171_v0 = vcombine.high %v6145_v61, %v6153_v1  ;;  %v6187_v34 = vcombine.high %v6161_v52, %v6169_v14  ;;  %v6170_v63 = vcombine.low %v6145_v61, %v6153_v1  ;;  %v6186_v15 = vcombine.low %v6161_v52, %v6169_v14  ;;  %v8123_v44 = vld [vmem:[%s9890_s20 + $0x80] sm:$0xff]  }
 0xc79   : > { %v6185_v5 = vrot.slane %v6171_v0, %v8589_v47  ;;  %v6201_v8 = vrot.slane %v6187_v34, %v8589_v47  ;;  %v6178_v56 = vrot.slane %v6170_v63, %v8589_v47  ;;  %v6194_v26 = vrot.slane %v6186_v15, %v8589_v47  ;;  %v8089_v0 = vld [vmem:[%s9888_s18 + $0x4c] ss:$16 sps:$4 sm:$0xff]   ;;  %v8084_v34 = vld [vmem:[%s9888_s18 + $0x40] ss:$16 sps:$4 sm:$0xff]   ;;  %v8087_v63 = vld [vmem:[%s9888_s18 + $0x48] ss:$16 sps:$4 sm:$0xff]  }
 0xc7a   : > { %v8092_v15 = vld [vmem:[%s9888_s18 + $0x64] ss:$16 sps:$4 sm:$0xff]  }
 0xc7b   : > { %v6204_v30 = vcombine.low %v6185_v5, %v6201_v8  ;;  %v6203_v50 = vcombine.high %v6178_v56, %v6194_v26  ;;  %v6202_v55 = vcombine.low %v6178_v56, %v6194_v26  ;;  %v6205_v46 = vcombine.high %v6185_v5, %v6201_v8  ;;  %v8095_v5 = vld [vmem:[%s9888_s18 + $0x6c] ss:$16 sps:$4 sm:$0xff]   ;;  %v8090_v8 = vld [vmem:[%s9888_s18 + $0x60] ss:$16 sps:$4 sm:$0xff]   ;;  %v8093_v56 = vld [vmem:[%s9888_s18 + $0x68] ss:$16 sps:$4 sm:$0xff]  }
 0xc7c   : > { %v8098_v26 = vld [vmem:[%s9888_s18 + $0x84] ss:$16 sps:$4 sm:$0xff]  }
 0xc7d   : > { %v8013_v48 = vpack.i.bf16 %v6204_v30, %v6136_v24  ;;  %v8008_v4 = vpack.i.bf16 %v6203_v50, %v6135_v16  ;;  %v8018_v11 = vpack.i.bf16 %v6205_v46, %v6137_v60  ;;  %v8096_v24 = vld [vmem:[%s9888_s18 + $0x80] ss:$16 sps:$4 sm:$0xff]   ;;  %v8099_v30 = vld [vmem:[%s9888_s18 + $0x88] ss:$16 sps:$4 sm:$0xff]   ;;  %v8104_v50 = vld [vmem:[%s9888_s18 + $0xa4] ss:$16 sps:$4 sm:$0xff]  }
 0xc7e   : > { %v8102_v16 = vld [vmem:[%s9888_s18 + $0xa0] ss:$16 sps:$4 sm:$0xff]   ;;  %v8113_v46 = vld [vmem:[%s9888_s18 + $0xcc] ss:$16 sps:$4 sm:$0xff]  }
 0xc7f   : > { %8014 = vrot.lane.b32.xlu1 %v8013_v48, %s9941_s29  ;;  %8009 = vrot.lane.b32.xlu0 %v8008_v4, %s9942_s25  ;;  %v8107_v48 = vld [vmem:[%s9888_s18 + $0xac] ss:$16 sps:$4 sm:$0xff]   ;;  %v8110_v4 = vld [vmem:[%s9888_s18 + $0xc4] ss:$16 sps:$4 sm:$0xff]   ;;  %s797_s25 = scalar_lea.vmem [#allocation2], %s7443_s23 }
 0xc80   : > { %v8108_v60 = vld [vmem:[%s9888_s18 + $0xc0] ss:$16 sps:$4 sm:$0xff]  }
 0xc83   : > { %8019 = vrot.lane.b32.xlu1 %v8018_v11, %s9943_s3  ;;  %v8111_v11 = vld [vmem:[%s9888_s18 + $0xc8] ss:$16 sps:$4 sm:$0xff]   ;;  %s7277_s3 = sshll.u32 %s797_s25, 4  ;;  %s9816_s3 = int_to_ptr.vmem [resolvable:$true] %s7277_s3 }
 0xc84   : > { %p8263_p1 = scmp.lt.s32.totalorder %s9816_s3, %s8261_s22 }
 0xcf1   : > { %v8015_v47 = vpop.permute.xlu1 %8014  ;;  %v8010_v51 = vpop.permute.xlu0 %8009 }
 0xcf2   : > { %v8012_v12 = vunpack.i.h.bf16 %v8010_v51  ;;  %v8011_v13 = vunpack.i.l.bf16 %v8010_v51  ;;  %v8017_v41 = vunpack.i.h.bf16 %v8015_v47  ;;  %v8016_v21 = vunpack.i.l.bf16 %v8015_v47  ;;  %v8116_v47 = vld [vmem:[%s9888_s18 + $0xe4] ss:$16 sps:$4 sm:$0xff]   ;;  %v8119_v51 = vld [vmem:[%s9888_s18 + $0xec] ss:$16 sps:$4 sm:$0xff]  }
 0xcf4   : > { %v6230_v28 = vsel %vm1256_vm1, %v6134_v33, %v8011_v13  ;;  %v6231_v29 = vsel %vm1256_vm1, %v6202_v55, %v8012_v12  ;;  %v8086_v33 = vld [vmem:[%s9888_s18 + $0x44] ss:$16 sps:$4 sm:$0xff]   ;;  %v8105_v55 = vld [vmem:[%s9888_s18 + $0xa8] ss:$16 sps:$4 sm:$0xff]   ;;  %v8114_v12 = vld [vmem:[%s9888_s18 + $0xe0] ss:$16 sps:$4 sm:$0xff]  }
 0xcf5   : > { %v8020_v40 = vpop.permute.xlu1 %8019  ;;  %v6232_v7 = vsel %vm2273_vm3, %v6230_v28, %v8016_v21  ;;  %v6233_v3 = vsel %vm2273_vm3, %v6231_v29, %v8017_v41  ;;  %v8117_v13 = vld [vmem:[%s9888_s18 + $0xe8] ss:$16 sps:$4 sm:$0xff]  }
 0xcf6   : > { %v8022_v9 = vunpack.i.h.bf16 %v8020_v40  ;;  %v8021_v23 = vunpack.i.l.bf16 %v8020_v40 }
 0xcf8   : > { %v6234_v17 = vsel %vm2276_vm4, %v6232_v7, %v8021_v23  ;;  %v6235_v25 = vsel %vm2276_vm4, %v6233_v3, %v8022_v9  ;;  %v7546_v7 = vld [vmem:[%s9886_s16] ss:$0 sm:$0xff] }
 0xcf9   : > { %v6253_v2 = vpack.c.bf16 %v6235_v25, %v6234_v17 }
 0xcfb   : > { %7915 = vmatmul.mubr.bf16.vlgmr.msra.gmra.mrb[24].mxu0 %v6253_v2 }
 0xcfc   : > { %6681 = vmatprep.mubr.bf16.mxu0 %v8343_v43  ;;  %v8072_v43 = vld [vmem:[%s9888_s18] ss:$16 sps:$4 sm:$0xff]  }
 0xcfd   : > { %6607 = vmatpush1.bf16.msra.mxu1 %v8072_v43  ;;  %v8122_v43 = vld [vmem:[%s9890_s20] sm:$0xff]  }
 0xcfe   : > { %6608 = vmatprep.subr.bf16.mxu1 %v8080_v57  ;;  %v8126_v57 = vld [vmem:[%s9890_s20 + $0x8] sm:$0xff]  }
 0xd01   : > { %6609 = vmatpush1.bf16.msra.mxu1 %v8078_v45  ;;  %v8128_v45 = vld [vmem:[%s9890_s20 + $0x50] sm:$0xff]  }
 0xd02   : > { %6610 = vmatprep.subr.bf16.mxu1 %v8086_v33  ;;  %v8138_v33 = vld [vmem:[%s9890_s20 + $0x20] sm:$0xff]  }
 0xd05   : > { %6611 = vmatpush1.bf16.msra.mxu1 %v8084_v34  ;;  %v8140_v34 = vld [vmem:[%s9890_s20 + $0x68] sm:$0xff]  }
 0xd06   : > { %6612 = vmatprep.subr.bf16.mxu1 %v8092_v15  ;;  %v8142_v15 = vld [vmem:[%s9890_s20 + $0x28] sm:$0xff]  }
 0xd09   : > { %6613 = vmatpush1.bf16.msra.mxu1 %v8090_v8  ;;  %v8144_v8 = vld [vmem:[%s9890_s20 + $0x70] sm:$0xff]  }
 0xd0a   : > { %6614 = vmatprep.subr.bf16.mxu1 %v8098_v26  ;;  %v8146_v26 = vld [vmem:[%s9890_s20 + $0x30] sm:$0xff]  }
 0xd0d   : > { %6615 = vmatpush1.bf16.msra.mxu1 %v8096_v24  ;;  %v8148_v24 = vld [vmem:[%s9890_s20 + $0x78] sm:$0xff]  }
 0xd0e   : > { %6616 = vmatprep.subr.bf16.mxu1 %v8104_v50  ;;  %v8151_v50 = vld [vmem:[%s9890_s20 + $0xb8] sm:$0xff]  }
 0xd11   : > { %6617 = vmatpush1.bf16.msra.mxu1 %v8102_v16  ;;  %v8150_v16 = vld [vmem:[%s9890_s20 + $0x38] sm:$0xff]  }
 0xd12   : > { %6618 = vmatprep.subr.bf16.mxu1 %v8110_v4  ;;  %v6440_v4 = vsub.s32 3, %v8580_v19 }
 0xd15   : > { %6619 = vmatpush1.bf16.msra.mxu1 %v8108_v60 }
 0xd16   : > { %6620 = vmatprep.subr.bf16.mxu1 %v8116_v47 }
 0xd19   : > { %6621 = vmatpush1.bf16.msra.mxu1 %v8114_v12 }
 0xdce   : > { %v6342_v38 = vpop.f32.mrb[24].mxu0 }
 0xdcf   : > { %v6343_v10 = vadd.f32 %v7537_v36, %v6342_v38  ;;  %v7916_v6 = vpop.f32.mrb[25].mxu0 }
 0xdd0   : > { %v6345_v32 = vpop.f32.mrb[26].mxu0 }
 0xdd1   : > { %v9457_v35 = vadd.f32 %v6343_v10, %v8843_v18  ;;  %v6346_v39 = vadd.f32 %v7537_v36, %v6345_v32  ;;  %v7917_v53 = vpop.f32.mrb[27].mxu0  ;;  %v8075_v18 = vld [vmem:[%s9888_s18 + $0x8] ss:$16 sps:$4 sm:$0xff]   ;;  %v7547_v36 = vld [vmem:[%s9887_s17] ss:$0 sm:$0xff] }
 0xdd2   : > { %v8121_v53 = vld [vmem:[%s9890_s20 + $0xc0] sm:$0xff]  }
 0xdd3   : > { %v9460_v42 = vadd.f32 %v6346_v39, %v8845_v20  ;;  %6353 = vadd.xlane.f32.xlu1 %v9457_v35  ;;  %v8077_v20 = vld [vmem:[%s9888_s18 + $0xc] ss:$16 sps:$4 sm:$0xff]   ;;  %v8120_v39 = vld [vmem:[%s9890_s20 + $0x40] sm:$0xff]  }
 0xdd4   : > { %6649 = vmatprep.subr.bf16.mxu0 %v8077_v20  ;;  %7702 = vmatprep.subr.bf16.mxu1 %v8120_v39  ;;  %v8125_v20 = vld [vmem:[%s9890_s20 + $0xc8] sm:$0xff]  }
 0xdd5   : > { %6355 = vadd.xlane.f32.xlu0 %v9460_v42  ;;  %6650 = vmatpush1.bf16.msra.mxu0 %v8075_v18  ;;  %v8124_v18 = vld [vmem:[%s9890_s20 + $0x48] sm:$0xff]  }
 0xdd6   : > { %6651 = vmatprep.subr.bf16.mxu0 %v8083_v31  ;;  %v8127_v31 = vld [vmem:[%s9890_s20 + $0x88] sm:$0xff]  }
 0xdd9   : > { %6652 = vmatpush1.bf16.msra.mxu0 %v8081_v54  ;;  %v8129_v54 = vld [vmem:[%s9890_s20 + $0xd0] sm:$0xff]  }
 0xdda   : > { %6653 = vmatprep.subr.bf16.mxu0 %v8089_v0  ;;  %v8139_v0 = vld [vmem:[%s9890_s20 + $0xa0] sm:$0xff]  }
 0xddd   : > { %6654 = vmatpush1.bf16.msra.mxu0 %v8087_v63  ;;  %v8141_v63 = vld [vmem:[%s9890_s20 + $0xe8] sm:$0xff]  }
 0xdde   : > { %6655 = vmatprep.subr.bf16.mxu0 %v8095_v5  ;;  %v8143_v5 = vld [vmem:[%s9890_s20 + $0xa8] sm:$0xff]  }
 0xde1   : > { %6656 = vmatpush1.bf16.msra.mxu0 %v8093_v56  ;;  %v8145_v56 = vld [vmem:[%s9890_s20 + $0xf0] sm:$0xff]  }
 0xde2   : > { %6657 = vmatprep.subr.bf16.mxu0 %v8101_v37  ;;  %v8147_v37 = vld [vmem:[%s9890_s20 + $0xb0] sm:$0xff]  }
 0xde5   : > { %6658 = vmatpush1.bf16.msra.mxu0 %v8099_v30  ;;  %v8149_v30 = vld [vmem:[%s9890_s20 + $0xf8] sm:$0xff]  }
 0xde6   : > { %6659 = vmatprep.subr.bf16.mxu0 %v8107_v48  ;;  %v6423_v48 = vld [vmem:[%s9948_s5] sm:$0xf]  ;;  %s8256_s5 = scalar_lea.vmem %s9816_s3, 256 }
 0xde7   : > { %v6441_v47 = vrot.slane %v6423_v48, %v6440_v4  ;;  %p8257_p12 = scmp.ne.s32.totalorder %s9816_s3, %s8256_s5  ;;  %p8264_p2 = scmp.lt.s32.totalorder %s8262_s26, %s8256_s5 }
 0xde9   : > { %6660 = vmatpush1.bf16.msra.mxu0 %v8105_v55  ;;  %v6436_v55 = vsub.s32 2, %v8580_v19  ;;  %p8258_p13 = pnand %p8257_p12, %p8502_p4  ;;  %p8265_p3 = por %p8264_p2, %p8263_p1 }
 0xdea   : > { %6661 = vmatprep.subr.bf16.mxu0 %v8113_v46  ;;  %v6429_v46 = vrot.slane %v6423_v48, %v2575_v22 }
 0xdeb   : > { %v6437_v60 = vrot.slane %v6423_v48, %v6436_v55  ;;  %p8259_p0 = pneg %p8258_p13 }
 0xded   : > { %6662 = vmatpush1.bf16.msra.mxu0 %v8111_v11  ;;  %v6433_v11 = vrot.slane %v6423_v48, %v2579_v27  ;;  %p8266_p5 = pnand %p8265_p3, %p8259_p0 }
 0xdee   : > { %6663 = vmatprep.subr.bf16.mxu0 %v8119_v51 }
 0xdf1   : > { %6664 = vmatpush1.bf16.msra.mxu0 %v8117_v13 }
 0xdf2   : > { %7724 = vmatprep.subr.bf16.mxu0 %v8121_v53 }
 0xe60   : > { %v6354_v59 = vpop.xlane.xlu1 %6353 }
 0xe61   : > { %v6357_v49 = vmul.f32 0.0078125, %v6354_v59  ;;  %v8130_v59 = vld [vmem:[%s9890_s20 + $0x10] sm:$0xff]  }
 0xe62   : > { %v6356_v61 = vpop.xlane.xlu0 %6355 }
 0xe63   : > { %v9489_v1 = vsub.f32 %v9457_v35, %v6357_v49  ;;  %v6358_v52 = vmul.f32 0.0078125, %v6356_v61  ;;  %v8131_v49 = vld [vmem:[%s9890_s20 + $0x90] sm:$0xff]   ;;  %v8132_v61 = vld [vmem:[%s9890_s20 + $0x58] sm:$0xff]  }
 0xe65   : > { %v9492_v14 = vsub.f32 %v9460_v42, %v6358_v52  ;;  %v6361_v62 = vmul.f32 %v9489_v1, %v9489_v1  ;;  %v8134_v52 = vld [vmem:[%s9890_s20 + $0x18] sm:$0xff]  }
 0xe67   : > { %6363 = vadd.xlane.f32.xlu0 %v6361_v62  ;;  %v6362_v58 = vmul.f32 %v9492_v14, %v9492_v14  ;;  %v8136_v62 = vld [vmem:[%s9890_s20 + $0x60] sm:$0xff]  }
 0xe69   : > { %6365 = vadd.xlane.f32.xlu1 %v6362_v58  ;;  %v8137_v58 = vld [vmem:[%s9890_s20 + $0xe0] sm:$0xff]  }
 0xef4   : > { %v6364_v41 = vpop.xlane.xlu0 %6363 }
 0xef5   : > { %v6367_v21 = vmul.f32 0.0078125, %v6364_v41 }
 0xef6   : > { %v6366_v28 = vpop.xlane.xlu1 %6365 }
 0xef7   : > { %v6369_v29 = vadd.f32 1e-05, %v6367_v21  ;;  %v6368_v40 = vmul.f32 0.0078125, %v6366_v28 }
 0xef9   : > { %8220 = vrsqrt.f32 %v6369_v29  ;;  %v6370_v9 = vadd.f32 1e-05, %v6368_v40 }
 0xefb   : > { %8222 = vrsqrt.f32 %v6370_v9 }
 0xf03   : > { %v8221_v23 = vpop.eup %8220 }
 0xf04   : > { %v6373_v3 = vmul.f32 %v8221_v23, %v9489_v1  ;;  %v8133_v1 = vld [vmem:[%s9890_s20 + $0xd8] sm:$0xff]  }
 0xf05   : > { %v8223_v17 = vpop.eup %8222 }
 0xf06   : > { %v6374_v25 = vmul.f32 %v8223_v17, %v9492_v14  ;;  %v6381_v2 = vmul.f32 %v7546_v7, %v6373_v3  ;;  %v8135_v14 = vld [vmem:[%s9890_s20 + $0x98] sm:$0xff]  }
 0xf08   : > { %v6382_v38 = vmul.f32 %v7546_v7, %v6374_v25  ;;  %v6389_v10 = vadd.f32 %v7547_v36, %v6381_v2 }
 0xf0a   : > { %v6390_v6 = vadd.f32 %v7547_v36, %v6382_v38 }
 0xf0c   : > { %v6424_v32 = vpack.c.bf16 %v6390_v6, %v6389_v10 }
 0xf0e   : > { %6639 = vmatmul.mubr.bf16.vlgmr.msra.gmra.mrb[52].mxu1 %v6424_v32  ;;  %6682 = vmatmul.mubr.bf16.vlgmr.msra.gmra.mrb[28].mxu0 %v6424_v32 }
 0xf0f   : > { %7703 = vmatpush3.bf16.msra.mxu1 %v8122_v43  ;;  %7725 = vmatpush3.bf16.msra.mxu0 %v8123_v44 }
 0xf10   : > { %7704 = vmatprep.subr.bf16.mxu1 %v8124_v18  ;;  %7726 = vmatprep.subr.bf16.mxu0 %v8125_v20 }
 0xf13   : > { %7705 = vmatpush3.bf16.msra.mxu1 %v8126_v57  ;;  %7727 = vmatpush3.bf16.msra.mxu0 %v8127_v31 }
 0xf14   : > { %7706 = vmatprep.subr.bf16.mxu1 %v8128_v45  ;;  %7728 = vmatprep.subr.bf16.mxu0 %v8129_v54 }
 0xf17   : > { %7707 = vmatpush3.bf16.msra.mxu1 %v8130_v59  ;;  %7729 = vmatpush3.bf16.msra.mxu0 %v8131_v49 }
 0xf18   : > { %7708 = vmatprep.subr.bf16.mxu1 %v8132_v61  ;;  %7730 = vmatprep.subr.bf16.mxu0 %v8133_v1 }
 0xf1b   : > { %7709 = vmatpush3.bf16.msra.mxu1 %v8134_v52  ;;  %7731 = vmatpush3.bf16.msra.mxu0 %v8135_v14 }
 0xf1c   : > { %7710 = vmatprep.subr.bf16.mxu1 %v8136_v62  ;;  %7732 = vmatprep.subr.bf16.mxu0 %v8137_v58 }
 0xf1f   : > { %7711 = vmatpush3.bf16.msra.mxu1 %v8138_v33  ;;  %7733 = vmatpush3.bf16.msra.mxu0 %v8139_v0 }
 0xf20   : > { %7712 = vmatprep.subr.bf16.mxu1 %v8140_v34  ;;  %7734 = vmatprep.subr.bf16.mxu0 %v8141_v63 }
 0xf23   : > { %7713 = vmatpush3.bf16.msra.mxu1 %v8142_v15  ;;  %7735 = vmatpush3.bf16.msra.mxu0 %v8143_v5 }
 0xf24   : > { %7714 = vmatprep.subr.bf16.mxu1 %v8144_v8  ;;  %7736 = vmatprep.subr.bf16.mxu0 %v8145_v56 }
 0xf27   : > { %7715 = vmatpush3.bf16.msra.mxu1 %v8146_v26  ;;  %7737 = vmatpush3.bf16.msra.mxu0 %v8147_v37 }
 0xf28   : > { %7716 = vmatprep.subr.bf16.mxu1 %v8148_v24  ;;  %7738 = vmatprep.subr.bf16.mxu0 %v8149_v30 }
 0xf2b   : > { %7717 = vmatpush3.bf16.msra.mxu1 %v8150_v16  ;;  %7739 = vmatpush3.bf16.msra.mxu0 %v8151_v50 }
 0xfe1   : > { %v6640_v51 = vpop.f32.mrb[52].mxu1  ;;  %v6683_v12 = vpop.f32.mrb[28].mxu0 }
 0xfe2   : > { %v9683_v13 = vadd.f32 %v6640_v51, %v6429_v46  ;;  %v9685_v41 = vadd.f32 %v6683_v12, %v6437_v60  ;;  %v6642_v21 = vpop.f32.mrb[53].mxu1  ;;  %v6685_v28 = vpop.f32.mrb[29].mxu0 }
 0xfe3   : > { %v9687_v29 = vadd.f32 %v6642_v21, %v6433_v11  ;;  %v9689_v40 = vadd.f32 %v6685_v28, %v6441_v47  ;;  %v6644_v9 = vpop.f32.mrb[54].mxu1  ;;  %v6687_v23 = vpop.f32.mrb[30].mxu0 }
 0xfe4   : > { %v9692_v22 = vmul.f32 0.70710677, %v9683_v13  ;;  %v9695_v19 = vmul.f32 0.70710677, %v9685_v41  ;;  %v6646_v53 = vpop.f32.mrb[55].mxu1  ;;  %v6689_v43 = vpop.f32.mrb[31].mxu0  ;;  %v9707_v18 = vadd.f32 %v6644_v9, %v6429_v46  ;;  %v9709_v20 = vadd.f32 %v6687_v23, %v6437_v60 }
 0xfe5   : > { %v9698_v27 = vmul.f32 0.70710677, %v9687_v29  ;;  %v9701_v7 = vmul.f32 0.70710677, %v9689_v40  ;;  %v9714_v45 = vadd.f32 %v6646_v53, %v6433_v11  ;;  %v9724_v14 = vadd.f32 %v6689_v43, %v6441_v47 }
 0xfe6   : > { %v6700_v3 = vand.u32 2147483647, %v9692_v22  ;;  %v6702_v17 = vand.u32 2147483647, %v9695_v19  ;;  %v9712_v31 = vmul.f32 0.70710677, %v9707_v18 }
 0xfe7   : > { %v6701_v25 = vand.u32 2147483647, %v9698_v27  ;;  %v6703_v2 = vand.u32 2147483647, %v9701_v7  ;;  %v9717_v54 = vmul.f32 0.70710677, %v9709_v20 }
 0xfe8   : > { %v6708_v36 = vmul.f32 0.3275911, %v6700_v3  ;;  %v6710_v38 = vmul.f32 0.3275911, %v6702_v17  ;;  %v6812_v59 = vsub.f32 0.0, %v6700_v3  ;;  %v6814_v1 = vsub.f32 0.0, %v6702_v17 }
 0xfe9   : > { %v6709_v10 = vmul.f32 0.3275911, %v6701_v25  ;;  %v6711_v39 = vmul.f32 0.3275911, %v6703_v2  ;;  %v6704_v49 = vand.u32 2147483647, %v9712_v31 }
 0xfea   : > { %v6716_v6 = vadd.f32 1.0, %v6708_v36  ;;  %v6718_v32 = vadd.f32 1.0, %v6710_v38  ;;  %v9721_v61 = vmul.f32 0.70710677, %v9714_v45  ;;  %v6706_v52 = vand.u32 2147483647, %v9717_v54 }
 0xfeb   : > { %v6717_v44 = vadd.f32 1.0, %v6709_v10  ;;  %v6719_v57 = vadd.f32 1.0, %v6711_v39  ;;  %v6813_v62 = vsub.f32 0.0, %v6701_v25  ;;  %v6712_v58 = vmul.f32 0.3275911, %v6704_v49 }
 0xfec   : > { %8224 = vrcp.f32 %v6716_v6  ;;  %v6705_v33 = vand.u32 2147483647, %v9721_v61  ;;  %v6815_v0 = vsub.f32 0.0, %v6703_v2  ;;  %v6714_v34 = vmul.f32 0.3275911, %v6706_v52 }
 0xfed   : > { %8226 = vrcp.f32 %v6718_v32  ;;  %v6820_v63 = vmul.f32 %v6812_v59, %v6700_v3  ;;  %v6720_v15 = vadd.f32 1.0, %v6712_v58  ;;  %v6822_v8 = vmul.f32 %v6814_v1, %v6702_v17 }
 0xfee   : > { %8228 = vrcp.f32 %v6717_v44  ;;  %v6713_v5 = vmul.f32 0.3275911, %v6705_v33  ;;  %v6722_v56 = vadd.f32 1.0, %v6714_v34  ;;  %v9728_v26 = vmul.f32 0.70710677, %v9724_v14 }
 0xfef   : > { %8230 = vrcp.f32 %v6719_v57  ;;  %v6821_v24 = vmul.f32 %v6813_v62, %v6701_v25  ;;  %v6816_v30 = vsub.f32 0.0, %v6704_v49  ;;  %v6823_v48 = vmul.f32 %v6815_v0, %v6703_v2 }
 0xff0   : > { %8232 = vrcp.f32 %v6720_v15  ;;  %v6721_v16 = vadd.f32 1.0, %v6713_v5  ;;  %v9736_v4 = vand.u32 2147483647, %v9728_v26  ;;  %v6828_v46 = vmul.f32 1.442695, %v6820_v63 }
 0xff1   : > { %8234 = vrcp.f32 %v6722_v56  ;;  %v6818_v11 = vsub.f32 0.0, %v6706_v52  ;;  %v6832_v51 = vmul.f32 1.442695, %v6822_v8  ;;  %v6830_v9 = vmul.f32 1.442695, %v6821_v24 }
 0xff2   : > { %v6715_v12 = vmul.f32 0.3275911, %v9736_v4  ;;  %v6824_v23 = vmul.f32 %v6816_v30, %v6704_v49  ;;  %8236 = vrcp.f32 %v6721_v16  ;;  %v6834_v25 = vmul.f32 1.442695, %v6823_v48 }
 0xff3   : > { %8238 = vpow2.f32 %v6828_v46  ;;  %v6826_v10 = vmul.f32 %v6818_v11, %v6706_v52  ;;  %v6817_v6 = vsub.f32 0.0, %v6705_v33  ;;  %v6819_v24 = vsub.f32 0.0, %v9736_v4 }
 0xff4   : > { %v6723_v2 = vadd.f32 1.0, %v6715_v12  ;;  %v6836_v44 = vmul.f32 1.442695, %v6824_v23  ;;  %vm6860_vm8 = vcmp.ge.f32.partialorder %v9692_v22, 0.0  ;;  %vm6862_vm9 = vcmp.ge.f32.partialorder %v9695_v19, 0.0 }
 0xff5   : > { %v6840_v52 = vmul.f32 1.442695, %v6826_v10  ;;  %v6825_v58 = vmul.f32 %v6817_v6, %v6705_v33  ;;  %vm6861_vm10 = vcmp.ge.f32.partialorder %v9698_v27, 0.0  ;;  %vm6864_vm11 = vcmp.ge.f32.partialorder %v9712_v31, 0.0 }
 0xff6   : > { %v9730_v37 = vpop.eup %8224  ;;  %8240 = vrcp.f32 %v6723_v2  ;;  %vm6866_vm12 = vcmp.ge.f32.partialorder %v9717_v54, 0.0  ;;  %vm6865_vm13 = vcmp.ge.f32.partialorder %v9721_v61, 0.0  ;;  %vm6863_vm14 = vcmp.ge.f32.partialorder %v9701_v7, 0.0 }
 0xff7   : > { %v9732_v50 = vpop.eup %8226  ;;  %v6740_v55 = vmul.f32 1.0614054, %v9730_v37  ;;  %8242 = vpow2.f32 %v6832_v51  ;;  %v6838_v11 = vmul.f32 1.442695, %v6825_v58  ;;  %vm6867_vm15 = vcmp.ge.f32.partialorder %v9728_v26, 0.0 }
 0xff8   : > { %v6742_v60 = vmul.f32 1.0614054, %v9732_v50  ;;  %v9740_v21 = vpop.eup %8228  ;;  %8244 = vpow2.f32 %v6830_v9  ;;  %v6891_v7 = vmul.f32 0.5, %v9724_v14  ;;  %v7580_v26 = vld [vmem:[%s9950_s0] ss:$0 sm:$0xff] }
 0xff9   : > { %v6748_v47 = vadd.f32 -1.4531521, %v6740_v55  ;;  %v6741_v17 = vmul.f32 1.0614054, %v9740_v21  ;;  %v9744_v36 = vpop.eup %8230  ;;  %8246 = vpow2.f32 %v6834_v25  ;;  %v6827_v25 = vmul.f32 %v6819_v24, %v9736_v4 }
 0xffa   : > { %v6750_v28 = vadd.f32 -1.4531521, %v6742_v60  ;;  %v6743_v53 = vmul.f32 1.0614054, %v9744_v36  ;;  %v9750_v1 = vpop.eup %8232  ;;  %8248 = vpow2.f32 %v6836_v44 }
 0xffb   : > { %v6756_v3 = vmul.f32 %v9730_v37, %v6748_v47  ;;  %v6749_v39 = vadd.f32 -1.4531521, %v6741_v17  ;;  %v9753_v0 = vpop.eup %8234  ;;  %v6744_v5 = vmul.f32 1.0614054, %v9750_v1  ;;  %8250 = vpow2.f32 %v6840_v52 }
 0xffc   : > { %v6758_v38 = vmul.f32 %v9732_v50, %v6750_v28  ;;  %v6751_v49 = vadd.f32 -1.4531521, %v6743_v53  ;;  %v6746_v56 = vmul.f32 1.0614054, %v9753_v0  ;;  %v9761_v48 = vpop.eup %8236  ;;  %8252 = vpow2.f32 %v6838_v11 }
 0xffd   : > { %v6764_v32 = vadd.f32 1.4214138, %v6756_v3  ;;  %v6757_v59 = vmul.f32 %v9740_v21, %v6749_v39  ;;  %v6752_v33 = vadd.f32 -1.4531521, %v6744_v5  ;;  %v8239_v9 = vpop.eup %8238  ;;  %v6745_v17 = vmul.f32 1.0614054, %v9761_v48 }
 0xffe   : > { %v6766_v43 = vadd.f32 1.4214138, %v6758_v38  ;;  %v6759_v15 = vmul.f32 %v9744_v36, %v6751_v49  ;;  %v6754_v60 = vadd.f32 -1.4531521, %v6746_v56 }
 0xfff   : > { %v6772_v57 = vmul.f32 %v9730_v37, %v6764_v32  ;;  %v6765_v63 = vadd.f32 1.4214138, %v6757_v59  ;;  %v6760_v28 = vmul.f32 %v9750_v1, %v6752_v33  ;;  %v6753_v44 = vadd.f32 -1.4531521, %v6745_v17 }
0x1000   : > { %v6774_v62 = vmul.f32 %v9732_v50, %v6766_v43  ;;  %v6767_v55 = vadd.f32 1.4214138, %v6759_v15  ;;  %v6762_v3 = vmul.f32 %v9753_v0, %v6754_v60  ;;  %v9769_v2 = vpop.eup %8240  ;;  %v6842_v60 = vmul.f32 1.442695, %v6827_v25 }
0x1001   : > { %v6780_v34 = vadd.f32 -0.28449672, %v6772_v57  ;;  %v6773_v16 = vmul.f32 %v9740_v21, %v6765_v63  ;;  %v6768_v32 = vadd.f32 1.4214138, %v6760_v28  ;;  %v8243_v39 = vpop.eup %8242  ;;  %v6747_v57 = vmul.f32 1.0614054, %v9769_v2 }
0x1002   : > { %v6782_v8 = vadd.f32 -0.28449672, %v6774_v62  ;;  %v6775_v12 = vmul.f32 %v9744_v36, %v6767_v55  ;;  %v6770_v43 = vadd.f32 1.4214138, %v6762_v3  ;;  %v8245_v59 = vpop.eup %8244  ;;  %v6761_v63 = vmul.f32 %v9761_v48, %v6753_v44 }
0x1003   : > { %v6788_v30 = vmul.f32 %v9730_v37, %v6780_v34  ;;  %v6781_v51 = vadd.f32 -0.28449672, %v6773_v16  ;;  %v6776_v52 = vmul.f32 %v9750_v1, %v6768_v32  ;;  %v8247_v58 = vpop.eup %8246  ;;  %v6755_v15 = vadd.f32 -1.4531521, %v6747_v57 }
0x1004   : > { %v6790_v46 = vmul.f32 %v9732_v50, %v6782_v8  ;;  %v6783_v6 = vadd.f32 -0.28449672, %v6775_v12  ;;  %v6778_v34 = vmul.f32 %v9753_v0, %v6770_v43  ;;  %v8249_v56 = vpop.eup %8248  ;;  %v6884_v3 = vmul.f32 0.5, %v9683_v13 }
0x1005   : > { %v6796_v47 = vadd.f32 0.2548296, %v6788_v30  ;;  %v6789_v10 = vmul.f32 %v9740_v21, %v6781_v51  ;;  %v6784_v8 = vadd.f32 -0.28449672, %v6776_v52  ;;  %v6769_v30 = vadd.f32 1.4214138, %v6761_v63 }
0x1006   : > { %v6798_v23 = vadd.f32 0.2548296, %v6790_v46  ;;  %v6791_v4 = vmul.f32 %v9744_v36, %v6783_v6  ;;  %v6786_v24 = vadd.f32 -0.28449672, %v6778_v34  ;;  %v6763_v16 = vmul.f32 %v9769_v2, %v6755_v15 }
0x1007   : > { %v6804_v38 = vmul.f32 %v9730_v37, %v6796_v47  ;;  %v6797_v62 = vadd.f32 0.2548296, %v6789_v10  ;;  %v6792_v46 = vmul.f32 %v9750_v1, %v6784_v8  ;;  %v8251_v47 = vpop.eup %8250  ;;  %v6777_v28 = vmul.f32 %v9761_v48, %v6769_v30 }
0x1008   : > { %v6806_v53 = vmul.f32 %v9732_v50, %v6798_v23  ;;  %v6799_v5 = vadd.f32 0.2548296, %v6791_v4  ;;  %v6794_v12 = vmul.f32 %v9753_v0, %v6786_v24  ;;  %8254 = vpow2.f32 %v6842_v60 }
0x1009   : > { %v6844_v49 = vmul.f32 %v8239_v9, %v6804_v38  ;;  %v6805_v50 = vmul.f32 %v9740_v21, %v6797_v62  ;;  %v6771_v21 = vadd.f32 1.4214138, %v6763_v16  ;;  %v6800_v23 = vadd.f32 0.2548296, %v6792_v46  ;;  %v8253_v62 = vpop.eup %8252 }
0x100a   : > { %v6846_v37 = vmul.f32 %v8243_v39, %v6806_v53  ;;  %v6807_v9 = vmul.f32 %v9744_v36, %v6799_v5  ;;  %v6802_v11 = vadd.f32 0.2548296, %v6794_v12  ;;  %v6785_v17 = vadd.f32 -0.28449672, %v6777_v28 }
0x100b   : > { %v6852_v55 = vsub.f32 1.0, %v6844_v49  ;;  %v6845_v51 = vmul.f32 %v8245_v59, %v6805_v50  ;;  %v6808_v6 = vmul.f32 %v9750_v1, %v6800_v23  ;;  %v6779_v53 = vmul.f32 %v9769_v2, %v6771_v21 }
0x100c   : > { %v6854_v33 = vsub.f32 1.0, %v6846_v37  ;;  %v6810_v32 = vmul.f32 %v9753_v0, %v6802_v11  ;;  %v6793_v39 = vmul.f32 %v9761_v48, %v6785_v17  ;;  %v6886_v43 = vmul.f32 0.5, %v9685_v41 }
0x100d   : > { %v6868_v38 = vsub.f32 0.0, %v6852_v55  ;;  %v6853_v25 = vsub.f32 1.0, %v6845_v51  ;;  %v6885_v36 = vmul.f32 0.5, %v9687_v29  ;;  %v6847_v44 = vmul.f32 %v8247_v58, %v6807_v9 }
0x100e   : > { %v6870_v10 = vsub.f32 0.0, %v6854_v33  ;;  %v6848_v13 = vmul.f32 %v8249_v56, %v6808_v6  ;;  %v6850_v57 = vmul.f32 %v8251_v47, %v6810_v32  ;;  %v6801_v59 = vadd.f32 0.2548296, %v6793_v39 }
0x100f   : > { %v6787_v49 = vadd.f32 -0.28449672, %v6779_v53  ;;  %v6876_v1 = vsel %vm6860_vm8, %v6852_v55, %v6868_v38  ;;  %v6869_v52 = vsub.f32 0.0, %v6853_v25  ;;  %v6855_v29 = vsub.f32 1.0, %v6847_v44 }
0x1010   : > { %v6856_v0 = vsub.f32 1.0, %v6848_v13  ;;  %v6878_v4 = vsel %vm6862_vm9, %v6854_v33, %v6870_v10  ;;  %v6858_v37 = vsub.f32 1.0, %v6850_v57  ;;  %v6809_v41 = vmul.f32 %v9761_v48, %v6801_v59 }
0x1011   : > { %v6888_v34 = vmul.f32 0.5, %v9707_v18  ;;  %v6795_v22 = vmul.f32 %v9769_v2, %v6787_v49  ;;  %v6892_v63 = vadd.f32 1.0, %v6876_v1  ;;  %v6894_v50 = vadd.f32 1.0, %v6878_v4 }
0x1012   : > { %v6872_v58 = vsub.f32 0.0, %v6856_v0  ;;  %v6874_v15 = vsub.f32 0.0, %v6858_v37  ;;  %v6849_v19 = vmul.f32 %v8253_v62, %v6809_v41  ;;  %v6877_v56 = vsel %vm6861_vm10, %v6853_v25, %v6869_v52  ;;  %v8255_v16 = vpop.eup %8254 }
0x1013   : > { %v6803_v8 = vadd.f32 0.2548296, %v6795_v22  ;;  %v6871_v18 = vsub.f32 0.0, %v6855_v29  ;;  %v6890_v55 = vmul.f32 0.5, %v9709_v20  ;;  %v6900_v46 = vmul.f32 %v6892_v63, %v6884_v3 }
0x1014   : > { %v6880_v5 = vsel %vm6864_vm11, %v6856_v0, %v6872_v58  ;;  %v6882_v24 = vsel %vm6866_vm12, %v6858_v37, %v6874_v15  ;;  %v6857_v30 = vsub.f32 1.0, %v6849_v19  ;;  %v6902_v54 = vmul.f32 %v6894_v50, %v6886_v43 }
0x1015   : > { %v6896_v48 = vadd.f32 1.0, %v6880_v5  ;;  %v6898_v33 = vadd.f32 1.0, %v6882_v24  ;;  %v6811_v31 = vmul.f32 %v9769_v2, %v6803_v8  ;;  %v6893_v51 = vadd.f32 1.0, %v6877_v56 }
0x1016   : > { %v6873_v47 = vsub.f32 0.0, %v6857_v30  ;;  %v6889_v9 = vmul.f32 0.5, %v9714_v45  ;;  %v6879_v23 = vsel %vm6863_vm14, %v6855_v29, %v6871_v18  ;;  %v6887_v25 = vmul.f32 0.5, %v9689_v40 }
0x1017   : > { %v6904_v60 = vmul.f32 %v6896_v48, %v6888_v34  ;;  %v6906_v12 = vmul.f32 %v6898_v33, %v6890_v55  ;;  %v6851_v27 = vmul.f32 %v8255_v16, %v6811_v31  ;;  %v6901_v2 = vmul.f32 %v6893_v51, %v6885_v36 }
0x1018   : > { %v6881_v21 = vsel %vm6865_vm13, %v6857_v30, %v6873_v47  ;;  %v6895_v61 = vadd.f32 1.0, %v6879_v23 }
0x1019   : > { %v6973_v28 = vpack.c.bf16 %v6904_v60, %v6900_v46  ;;  %v6975_v20 = vpack.c.bf16 %v6906_v12, %v6902_v54  ;;  %v6897_v11 = vadd.f32 1.0, %v6881_v21  ;;  %v6859_v17 = vsub.f32 1.0, %v6851_v27 }
0x101a   : > { %v6903_v45 = vmul.f32 %v6895_v61, %v6887_v25 }
0x101b   : > { %v6905_v3 = vmul.f32 %v6897_v11, %v6889_v9  ;;  %v6875_v38 = vsub.f32 0.0, %v6859_v17 }
0x101d   : > { %v6883_v10 = vsel %vm6867_vm15, %v6859_v17, %v6875_v38  ;;  %v6974_v6 = vpack.c.bf16 %v6905_v3, %v6901_v2 }
0x101e   : > { %v6899_v32 = vadd.f32 1.0, %v6883_v10 }
0x101f   : > { %7207 = vmatprep.mubr.bf16.mxu1 %v6974_v6 }
0x1020   : > { %v6907_v39 = vmul.f32 %v6899_v32, %v6891_v7  ;;  %7208 = vmatmul.mubr.bf16.vlgmr.msra.gmra.mrb[56].mxu1 %v6973_v28 }
0x1022   : > { %v6976_v53 = vpack.c.bf16 %v6907_v39, %v6903_v45 }
0x1024   : > { %7248 = vmatprep.mubr.bf16.mxu0 %v6976_v53 }
0x1025   : > { %7249 = vmatmul.mubr.bf16.vlgmr.msra.gmra.mrb[32].mxu0 %v6975_v20 }
0x10f3   : > { %v7718_v43 = vpop.f32.mrb[56].mxu1 }
0x10f4   : > { %v7719_v36 = vpop.f32.mrb[57].mxu1 }
0x10f5   : > { %v7720_v44 = vadd.f32 %v7719_v36, %v7718_v43  ;;  %v7721_v40 = vpop.f32.mrb[58].mxu1 }
0x10f6   : > { %v7722_v14 = vpop.f32.mrb[59].mxu1 }
0x10f7   : > { %v7723_v13 = vadd.f32 %v7722_v14, %v7721_v40  ;;  %v7210_v59 = vadd.f32 %v7720_v44, %v7580_v26 }
0x10f8   : > { %v7740_v57 = vpop.f32.mrb[32].mxu0 }
0x10f9   : > { %v7741_v49 = vpop.f32.mrb[33].mxu0  ;;  %v7213_v62 = vadd.f32 %v7723_v13, %v7580_v26 }
0x10fa   : > { %v7742_v1 = vadd.f32 %v7741_v49, %v7740_v57  ;;  %v7743_v0 = vpop.f32.mrb[34].mxu0 }
0x10fb   : > { %v7744_v4 = vpop.f32.mrb[35].mxu0 }
0x10fc   : > { %v7251_v52 = vadd.f32 %v7742_v1, %v7210_v59  ;;  %v7745_v37 = vadd.f32 %v7744_v4, %v7743_v0 }
0x10fe   : > { %v7257_v41 = vadd.f32 %v7251_v52, %v9457_v35  ;;  %v7254_v29 = vadd.f32 %v7745_v37, %v7213_v62 }
0x1100   : > { %7259 = vst [vmem:[%s797_s25] sm:$0xff] %v7257_v41  ;;  %v7258_v58 = vadd.f32 %v7254_v29, %v9460_v42 }
0x1102   : > { %7260 = vst [vmem:[%s797_s25 + $0x8] sm:$0xff] %v7258_v58 }
0x1103   : > { %8269 = shalt.err (!%p8266_p5)
}
0x1104   : > { %s8270_s6 = scalar_lea.hbm %s9822_s24, 256  ;;  %s8274_s23 = scalar_lea.hbm %s9954_s2, 512 }
0x1105   : > { %p8271_p6 = scmp.ne.s32.totalorder %s9822_s24, %s8270_s6  ;;  %p8275_p10 = scmp.lt.u32.totalorder %s9822_s24, %s9954_s2 }
0x1106   : > { %p8276_p11 = scmp.lt.u32.totalorder %s8274_s23, %s8270_s6  ;;  %p8278_p13 = scmp.lt.u32.totalorder %s8270_s6, %s9822_s24 }
0x1107   : > { %p8272_p7 = pnand %p8271_p6, %p8502_p4 }
0x1108   : > { %p8277_p12 = por %p8276_p11, %p8275_p10 }
0x1109   : > { %p8273_p9 = pneg %p8272_p7 }
0x110a   : > { %p8279_p0 = por %p8278_p13, %p8277_p12 }
0x110c   : > { %p8280_p1 = pnand %p8279_p0, %p8273_p9 }
0x110e   : > { %8283 = shalt.err (!%p8280_p1)
}
0x110f   : > { %s8345_s21 = smov 128   ;;  %s8346_s28 = smov 8  }
0x1110   : > { %7926 = dma.vmem_to_hbm [thread:$0]  (%p8502_p4), %s9816_s3, 256, %s9822_s24, %s9824_s4, %s8345_s21, %s8345_s21, %s8346_s28  }
0x1111 PF: > { %s9955_s30 = sld [smem:[#allocation10_spill]]  ;;  %s9956_s5 = sld [smem:[#allocation5_spill]] }
0x1117   : > { %p7932_p2 = scmp.ge.s32.totalorder %s9955_s30, 2  ;;  %s7292_s22 = sand.u32 1, %s9956_s5  }
0x1118   : > { %s7293_s26 = scalar_lea.sflag [#allocation3], %s7292_s22 }
0x1119   : > { %p7929_p3 = pnand %p7932_p2, %p8509_p8 }
0x111b   : > { %8309 = dma.done.wait (!%p7929_p3), %s7293_s26, 256  }
0x111c   : > { %8311 = vsyncadd (!%p7929_p3), %s7293_s26, 4294967040  ;;  %s35_s0 = sadd.s32 1, %s9955_s30   ;;  %s9958_s3 = sld [smem:[#allocation6_spill]] }
0x111d   : > { %p32_p5 = scmp.ge.s32.totalorder %s35_s0, 4   ;;  %s9959_s28 = sld [smem:[#allocation7_spill]] }
0x111e   : > { %s9960_s29 = sld [smem:[#allocation14_spill]]  ;;  %s9961_s30 = sld [smem:[#allocation9_spill]] }
0x111f   : > { %s9962_s4 = sld [smem:[#allocation11_spill]]  ;;  %34 = sbr.rel (!%p32_p5) target bundleno = 15 (0xf), region = 158 }
0x1126   :  { %7298 = vsyncpa [#allocation3], 1 }
0x1127   :  { %7300 = vsyncpa [#allocation3 + $0x1], 1 }

// kernel: decoder_layer_pallas.2
= control target key start
LH: loop header
LB: loop body
LE: loop exit
PB: predicated region body
PF: predicated region fallthrough
CT: control target
= control target key end

     0   :  { %s1001_s21 = smov 0   ;;  %s1003_s22 = smov 0   ;;  %s1145_s0 = inlined_call_operand.vmem [shape: f32[2,16,128], index: 0, kind: input, shape index: {}]   ;;  %s1146_s1 = inlined_call_operand.vmem [shape: f32[1,128], index: 1, kind: input, shape index: {}]   ;;  %s1147_s2 = inlined_call_operand.vmem [shape: f32[1,128], index: 2, kind: input, shape index: {}]   ;;  %s1148_s3 = inlined_call_operand.vmem [shape: bf16[128,384], index: 3, kind: input, shape index: {}]   ;;  %s1149_s4 = inlined_call_operand.vmem [shape: f32[1,384], index: 4, kind: input, shape index: {}]   ;;  %s1150_s5 = inlined_call_operand.vmem [shape: bf16[2,16,128], index: 5, kind: output, shape index: {0}]   ;;  %s1151_s6 = inlined_call_operand.vmem [shape: bf16[2,16,256], index: 6, kind: output, shape index: {1}]  }
   0x1   :  { %s1005_s23 = smov 0  }
   0x2 LB: > { %s29_s24 = sadd.s32 1, %s957_s22  ;;  %p796_p0 = scmp.ge.s32.totalorder %s961_s23, 1  ;;  %s961_s23 = sphi %s1005_s23, %s17_s23   ;;  %s957_s22 = sphi %s1003_s22, %s1153_s22   ;;  %s953_s21 = sphi %s1001_s21, %s1152_s21  }
   0x3   : > { %p31_p1 = scmp.ge.s32.totalorder %s29_s24, 2  ;;  %p238_p2 = scmp.lt.s32.totalorder %s961_s23, 3 }
   0x5   : > { %s1155_s24 = smov (%p31_p1, %s29_s24), 0  ;;  %p239_p3 = pnand %p796_p0, %p238_p2 }
   0x6   : > { %p287_p4 = scmp.lt.s32.totalorder (!%p239_p3), %s953_s21, 1  ;;  %v903_v2 = vld [vmem:[%s1148_s3 + $0x4] ss:$12 sps:$4 sm:$0xff] (!%p239_p3)   ;;  %v905_v3 = vld [vmem:[%s1148_s3] ss:$12 sps:$4 sm:$0xff] (!%p239_p3)   ;;  %v963_v4 = vmov (!%p239_p3), 0.0   ;;  %v396_v53 = vlaneseq (!%p239_p3) }
   0x7   : > { %242 = sbr.rel (%p239_p3) target bundleno = 556 (0x22c), region = 40  ;;  %856 = vmatprep.subr.bf16.mxu1 (!%p239_p3), %v963_v4  ;;  %v906_v5 = vld [vmem:[%s1148_s3 + $0x8] ss:$12 sps:$4 sm:$0xff] (!%p239_p3)   ;;  %539 = vmatprep.subr.bf16.mxu0 (!%p239_p3), %v903_v2  ;;  %v909_v15 = vld [vmem:[%s1148_s3 + $0x18] ss:$12 sps:$4 sm:$0xff] (!%p239_p3)   ;;  %v964_v30 = vmov (!%p239_p3), 0  }
   0x8   : > { %v907_v6 = vld [vmem:[%s1148_s3 + $0x1c] ss:$12 sps:$4 sm:$0xff] (!%p239_p3)   ;;  %540 = vmatpush1.bf16.msra.mxu0 (!%p239_p3), %v905_v3  ;;  %857 = vmatpush3.bf16.msra.mxu1 (!%p239_p3), %v906_v5  ;;  %v910_v16 = vld [vmem:[%s1148_s3 + $0x20] ss:$12 sps:$4 sm:$0xff] (!%p239_p3)   ;;  %v914_v19 = vld [vmem:[%s1148_s3 + $0x38] ss:$12 sps:$4 sm:$0xff] (!%p239_p3)  }
   0x9   : > { %541 = vmatprep.subr.bf16.mxu0 (!%p239_p3), %v907_v6  ;;  %858 = vmatprep.subr.bf16.mxu1 (!%p239_p3), %v963_v4  ;;  %v911_v17 = vld [vmem:[%s1148_s3 + $0x34] ss:$12 sps:$4 sm:$0xff] (!%p239_p3)   ;;  %v913_v18 = vld [vmem:[%s1148_s3 + $0x30] ss:$12 sps:$4 sm:$0xff] (!%p239_p3)   ;;  %v915_v20 = vld [vmem:[%s1148_s3 + $0x4c] ss:$12 sps:$4 sm:$0xff] (!%p239_p3)  }
   0xa   : > { %v917_v21 = vld [vmem:[%s1148_s3 + $0x48] ss:$12 sps:$4 sm:$0xff] (!%p239_p3)   ;;  %v918_v22 = vld [vmem:[%s1148_s3 + $0x50] ss:$12 sps:$4 sm:$0xff] (!%p239_p3)   ;;  %v921_v24 = vld [vmem:[%s1148_s3 + $0x60] ss:$12 sps:$4 sm:$0xff] (!%p239_p3)   ;;  %571 = vmatprep.mubr.bf16.mxu0 (!%p239_p3), %v964_v30 }
   0xb   : > { %v919_v23 = vld [vmem:[%s1148_s3 + $0x64] ss:$12 sps:$4 sm:$0xff] (!%p239_p3)   ;;  %v922_v25 = vld [vmem:[%s1148_s3 + $0x68] ss:$12 sps:$4 sm:$0xff] (!%p239_p3)   ;;  %v926_v28 = vld [vmem:[%s1148_s3 + $0x80] ss:$12 sps:$4 sm:$0xff] (!%p239_p3)  }
   0xc   : > { %542 = vmatpush1.bf16.msra.mxu0 (!%p239_p3), %v909_v15  ;;  %859 = vmatpush3.bf16.msra.mxu1 (!%p239_p3), %v910_v16  ;;  %v923_v26 = vld [vmem:[%s1148_s3 + $0x7c] ss:$12 sps:$4 sm:$0xff] (!%p239_p3)   ;;  %v925_v27 = vld [vmem:[%s1148_s3 + $0x78] ss:$12 sps:$4 sm:$0xff] (!%p239_p3)   ;;  %v927_v29 = vld [vmem:[%s1148_s3 + $0x94] ss:$12 sps:$4 sm:$0xff] (!%p239_p3)  }
   0xd   : > { %860 = vmatprep.subr.bf16.mxu1 (!%p239_p3), %v963_v4  ;;  %543 = vmatprep.subr.bf16.mxu0 (!%p239_p3), %v911_v17  ;;  %vm965_vm0 = vmmov (!%p239_p3), 0   ;;  %v929_v31 = vld [vmem:[%s1148_s3 + $0x90] ss:$12 sps:$4 sm:$0xff] (!%p239_p3)   ;;  %v930_v32 = vld [vmem:[%s1148_s3 + $0x98] ss:$12 sps:$4 sm:$0xff] (!%p239_p3)   ;;  %v397_v54 = vshrl.u32 (!%p239_p3), %v396_v53, 7 }
   0xe   : > { %s1157_s21 = smov (!%p287_p4, %s953_s21), 1  ;;  %872 = vmatprep.mubr.msk.bf16.mxu1 %vm965_vm0, %v963_v4  ;;  %v931_v33 = vld [vmem:[%s1148_s3 + $0xac] ss:$12 sps:$4 sm:$0xff]   ;;  %v933_v34 = vld [vmem:[%s1148_s3 + $0xa8] ss:$12 sps:$4 sm:$0xff]  }
   0xf   : > { %s835_s25 = sshll.u32 %s1157_s21, 4  ;;  %v934_v35 = vld [vmem:[%s1148_s3 + $0xb0] ss:$12 sps:$4 sm:$0xff]   ;;  %v803_v44 = vld [vmem:[%s1146_s1] ss:$0 sm:$0xff]  ;;  %v398_v55 = vsub.s32 0, %v397_v54 }
  0x10   : > { %s294_s28 = scalar_lea.vmem %s1145_s0, %s835_s25  ;;  %544 = vmatpush1.bf16.msra.mxu0 %v913_v18  ;;  %861 = vmatpush3.bf16.msra.mxu1 %v914_v19  ;;  %v804_v48 = vld [vmem:[%s1147_s2] ss:$0 sm:$0xff]  ;;  %v406_v56 = vsub.s32 2, %v397_v54  ;;  %v402_v58 = vsub.s32 1, %v397_v54  ;;  %s836_s29 = sshll.u32 %s1157_s21, 3 }
  0x11   : > { %v318_v0 = vld [vmem:[%s294_s28] sm:$0xff]  ;;  %v319_v1 = vld [vmem:[%s294_s28 + $0x8] sm:$0xff]  ;;  %862 = vmatprep.subr.bf16.mxu1 %v963_v4  ;;  %545 = vmatprep.subr.bf16.mxu0 %v915_v20  ;;  %s315_s28 = scalar_lea.vmem %s1151_s6, %s835_s25  ;;  %s304_s8 = scalar_lea.vmem %s1150_s5, %s836_s29 }
  0x12   : > { %322 = vadd.xlane.f32.xlu0 %v318_v0  ;;  %v393_v57 = vld [vmem:[%s1149_s4] sm:$0x7] }
  0x13   : > { %v399_v59 = vrot.slane %v393_v57, %v398_v55  ;;  %v407_v60 = vrot.slane %v393_v57, %v406_v56  ;;  %v403_v61 = vrot.slane %v393_v57, %v402_v58 }
  0x14   : > { %546 = vmatpush1.bf16.msra.mxu0 %v917_v21  ;;  %863 = vmatpush3.bf16.msra.mxu1 %v918_v22 }
  0x15   : > { %864 = vmatprep.subr.bf16.mxu1 %v963_v4  ;;  %547 = vmatprep.subr.bf16.mxu0 %v919_v23 }
  0x16   : > { %324 = vadd.xlane.f32.xlu0 %v319_v1 }
  0x18   : > { %548 = vmatpush1.bf16.msra.mxu0 %v921_v24  ;;  %865 = vmatpush3.bf16.msra.mxu1 %v922_v25 }
  0x19   : > { %549 = vmatprep.subr.bf16.mxu0 %v923_v26  ;;  %866 = vmatprep.subr.bf16.mxu1 %v963_v4 }
  0x1c   : > { %550 = vmatpush1.bf16.msra.mxu0 %v925_v27  ;;  %867 = vmatpush3.bf16.msra.mxu1 %v926_v28 }
  0x1d   : > { %551 = vmatprep.subr.bf16.mxu0 %v927_v29  ;;  %868 = vmatprep.subr.bf16.mxu1 %v963_v4 }
  0x20   : > { %552 = vmatpush1.bf16.msra.mxu0 %v929_v31  ;;  %869 = vmatpush3.bf16.msra.mxu1 %v930_v32 }
  0x21   : > { %553 = vmatprep.subr.bf16.mxu0 %v931_v33  ;;  %870 = vmatprep.subr.bf16.mxu1 %v963_v4 }
  0x24   : > { %554 = vmatpush1.bf16.msra.mxu0 %v933_v34  ;;  %871 = vmatpush3.bf16.msra.mxu1 %v934_v35 }
  0x9f   : > { %v323_v7 = vpop.xlane.xlu0 %322 }
  0xa0   : > { %v327_v8 = vmul.f32 0.0078125, %v323_v7 }
  0xa2   : > { %v1041_v9 = vsub.f32 %v318_v0, %v327_v8 }
  0xa3   : > { %v325_v10 = vpop.xlane.xlu0 %324 }
  0xa4   : > { %v328_v11 = vmul.f32 0.0078125, %v325_v10  ;;  %v331_v12 = vmul.f32 %v1041_v9, %v1041_v9 }
  0xa6   : > { %v1045_v13 = vsub.f32 %v319_v1, %v328_v11  ;;  %333 = vadd.xlane.f32.xlu1 %v331_v12 }
  0xa8   : > { %v332_v14 = vmul.f32 %v1045_v13, %v1045_v13 }
  0xaa   : > { %335 = vadd.xlane.f32.xlu1 %v332_v14 }
 0x133   : > { %v334_v36 = vpop.xlane.xlu1 %333 }
 0x134   : > { %v337_v37 = vmul.f32 0.0078125, %v334_v36 }
 0x136   : > { %v339_v38 = vadd.f32 1e-05, %v337_v37 }
 0x137   : > { %v336_v39 = vpop.xlane.xlu1 %335 }
 0x138   : > { %935 = vrsqrt.f32 %v339_v38  ;;  %v338_v40 = vmul.f32 0.0078125, %v336_v39 }
 0x13a   : > { %v340_v41 = vadd.f32 1e-05, %v338_v40 }
 0x13c   : > { %937 = vrsqrt.f32 %v340_v41 }
 0x142   : > { %v936_v42 = vpop.eup %935 }
 0x143   : > { %v343_v43 = vmul.f32 %v936_v42, %v1041_v9 }
 0x145   : > { %v351_v47 = vmul.f32 %v803_v44, %v343_v43 }
 0x146   : > { %v938_v45 = vpop.eup %937 }
 0x147   : > { %v344_v46 = vmul.f32 %v938_v45, %v1045_v13  ;;  %v359_v50 = vadd.f32 %v804_v48, %v351_v47 }
 0x149   : > { %v352_v49 = vmul.f32 %v803_v44, %v344_v46 }
 0x14b   : > { %v360_v51 = vadd.f32 %v804_v48, %v352_v49 }
 0x14d   : > { %v394_v52 = vpack.c.bf16 %v360_v51, %v359_v50 }
 0x14f   : > { %572 = vmatmul.mubr.bf16.vlgmr.msra.gmra.mrb[0].mxu0 %v394_v52  ;;  %873 = vmatmul.mubr.bf16.vlgmr.msra.gmra.mrb[0].mxu1 %v394_v52 }
 0x222   : > { %v573_v62 = vpop.f32.mrb[0].mxu0  ;;  %v616_v63 = vpop.f32.mrb[0].mxu1 }
 0x223   : > { %v574_v0 = vadd.f32 %v573_v62, %v399_v59  ;;  %v617_v1 = vadd.f32 %v616_v63, %v407_v60  ;;  %v575_v2 = vpop.f32.mrb[1].mxu0  ;;  %v874_v3 = vpop.f32.mrb[1].mxu1 }
 0x224   : > { %v576_v4 = vadd.f32 %v575_v2, %v403_v61  ;;  %v577_v5 = vpop.f32.mrb[2].mxu0  ;;  %v619_v6 = vpop.f32.mrb[2].mxu1 }
 0x225   : > { %v578_v7 = vadd.f32 %v577_v5, %v399_v59  ;;  %v620_v8 = vadd.f32 %v619_v6, %v407_v60  ;;  %v579_v9 = vpop.f32.mrb[3].mxu0  ;;  %v875_v10 = vpop.f32.mrb[3].mxu1  ;;  %v623_v13 = vmul.f32 0.17677669, %v574_v0 }
 0x226   : > { %v840_v11 = vpack.c.bf16 %v617_v1, %v576_v4  ;;  %v580_v12 = vadd.f32 %v579_v9, %v403_v61 }
 0x227   : > { %v624_v14 = vmul.f32 0.17677669, %v578_v7 }
 0x228   : > { %647 = vst [vmem:[%s315_s28] sm:$0xff] %v840_v11  ;;  %v841_v15 = vpack.c.bf16 %v620_v8, %v580_v12 }
 0x229   : > { %v845_v16 = vpack.c.bf16 %v624_v14, %v623_v13 }
 0x22a   : > { %648 = vst [vmem:[%s315_s28 + $0x8] sm:$0xff] %v841_v15 }
 0x22b   : > { %846 = vst [vmem:[%s304_s8] sm:$0xff] %v845_v16  }
 0x22c PF: > { %s17_s23 = sadd.s32 1, %s961_s23   ;;  %s1152_s21 = smov %s957_s22 }
 0x22d   : > { %p14_p5 = scmp.ge.s32.totalorder %s17_s23, 4   ;;  %s1153_s22 = smov %s1155_s24 }
 0x22f   :  { %16 = sbr.rel (!%p14_p5) target bundleno = 2 (0x2), region = 82 }

// kernel: decoder_layer_pallas.3
= control target key start
LH: loop header
LB: loop body
LE: loop exit
PB: predicated region body
PF: predicated region fallthrough
CT: control target
= control target key end

     0   :  { %s9864_s0 = inlined_call_operand.vmem [shape: f32[2,16,128], index: 0, kind: input, shape index: {}]   ;;  %s9865_s1 = inlined_call_operand.vmem [shape: bf16[2,16,128], index: 1, kind: input, shape index: {}]   ;;  %s9866_s2 = inlined_call_operand.vmem [shape: bf16[2,16,256], index: 2, kind: input, shape index: {}]   ;;  %s9867_s3 = inlined_call_operand.vmem [shape: f32[2,8,128], index: 3, kind: input, shape index: {}]   ;;  %s9868_s4 = inlined_call_operand.vmem [shape: bf16[1,16,16], index: 4, kind: input, shape index: {}]   ;;  %s9869_s5 = inlined_call_operand.vmem [shape: s32[2,16,1], index: 5, kind: input, shape index: {}]   ;;  %s9870_s6 = inlined_call_operand.vmem [shape: bf16[128,128], index: 6, kind: input, shape index: {}]   ;;  %s9871_s7 = inlined_call_operand.vmem [shape: f32[1,128], index: 7, kind: input, shape index: {}]   ;;  %s9872_s8 = inlined_call_operand.vmem [shape: bf16[128,128], index: 8, kind: input, shape index: {}]   ;;  %s9873_s9 = inlined_call_operand.vmem [shape: f32[1,128], index: 9, kind: input, shape index: {}]   ;;  %s9874_s10 = inlined_call_operand.vmem [shape: bf16[128,256], index: 10, kind: input, shape index: {}]   ;;  %s9875_s11 = inlined_call_operand.vmem [shape: f32[1,256], index: 11, kind: input, shape index: {}]   ;;  %s9876_s12 = inlined_call_operand.vmem [shape: bf16[128,128], index: 12, kind: input, shape index: {}]   ;;  %s9877_s13 = inlined_call_operand.vmem [shape: f32[1,128], index: 13, kind: input, shape index: {}]   ;;  %s9878_s14 = inlined_call_operand.vmem [shape: f32[1,128], index: 14, kind: input, shape index: {}]   ;;  %s9879_s15 = inlined_call_operand.vmem [shape: f32[1,128], index: 15, kind: input, shape index: {}]   ;;  %s9880_s16 = inlined_call_operand.vmem [shape: f32[1,128], index: 16, kind: input, shape index: {}]   ;;  %s9881_s17 = inlined_call_operand.vmem [shape: f32[1,128], index: 17, kind: input, shape index: {}]   ;;  %s9882_s18 = inlined_call_operand.vmem [shape: bf16[128,512], index: 18, kind: input, shape index: {}]   ;;  %s9883_s19 = inlined_call_operand.vmem [shape: f32[1,512], index: 19, kind: input, shape index: {}]   ;;  %s9884_s20 = inlined_call_operand.vmem [shape: bf16[512,128], index: 20, kind: input, shape index: {}]   ;;  %s9885_s21 = inlined_call_operand.vmem [shape: f32[1,128], index: 21, kind: input, shape index: {}]   ;;  %s9886_s22 = inlined_call_operand.hbm [shape: f32[2,16,128], index: 22, kind: output, shape index: {}]  }
   0x1   :  { %9908 = sst [smem:[#allocation15_spill]] %s9864_s0 }
   0x2   :  { %9909 = sst [smem:[#allocation16_spill]] %s9865_s1 }
   0x3   :  { %9910 = sst [smem:[#allocation17_spill]] %s9866_s2 }
   0x4   :  { %9911 = sst [smem:[#allocation18_spill]] %s9867_s3 }
   0x5   :  { %9912 = sst [smem:[#allocation19_spill]] %s9868_s4 }
   0x6   :  { %9913 = sst [smem:[#allocation20_spill]] %s9869_s5 }
   0x7   :  { %9914 = sst [smem:[#allocation21_spill]] %s9870_s6 }
   0x8   :  { %9915 = sst [smem:[#allocation22_spill]] %s9883_s19 }
   0x9   :  { %9916 = sst [smem:[#allocation23_spill]] %s9885_s21 }
   0xa   :  { %9917 = sst [smem:[#allocation24_spill]] %s9886_s22 }
   0xb   :  { %27 = vsyncpa [#allocation3], 0 }
   0xc   :  { %29 = vsyncpa [#allocation3 + $0x1], 0  ;;  %s8456_s3 = smov 0   ;;  %s8458_s28 = smov 0  }
   0xd   :  { %s8460_s29 = smov 0   ;;  %s8462_s30 = smov 0  }
   0xe   :  { %s8464_s4 = smov 0   ;;  %s8466_s0 = smov 0  }
   0xf LB: > { %9918 = sst [smem:[#allocation5_spill]] %s8308_s3  ;;  %s7431_s23 = sadd.s32 4294967295, %s8328_s0   ;;  %s8328_s0 = sphi %s8466_s0, %s35_s0   ;;  %s8324_s4 = sphi %s8464_s4, %s9956_s4   ;;  %s8320_s30 = sphi %s8462_s30, %s9955_s30   ;;  %s8316_s29 = sphi %s8460_s29, %s9954_s29   ;;  %s8312_s28 = sphi %s8458_s28, %s9953_s28   ;;  %s8308_s3 = sphi %s8456_s3, %s9952_s3  }
  0x10   : > { %9919 = sst [smem:[#allocation6_spill]] %s8312_s28  ;;  %s7432_s1 = sadd.s32 4294967294, %s8328_s0  }
  0x11   : > { %9920 = sst [smem:[#allocation7_spill]] %s8316_s29  ;;  %s47_s5 = sadd.s32 1, %s8324_s4 }
  0x12   : > { %9921 = sst [smem:[#allocation8_spill]] %s8320_s30  ;;  %s554_s24 = sadd.s32 1, %s8316_s29 }
  0x13   : > { %9922 = sst [smem:[#allocation9_spill]] %s8324_s4  ;;  %p49_p0 = scmp.ge.s32.totalorder %s47_s5, 2 }
  0x14   : > { %9923 = sst [smem:[#allocation10_spill]] %s8328_s0  ;;  %p564_p1 = scmp.ne.s32.totalorder %s8316_s29, %s8312_s28 }
  0x15   : > { %p565_p2 = scmp.eq.s32.totalorder %s7431_s23, 1  ;;  %p570_p3 = scmp.ne.s32.totalorder %s8312_s28, %s8308_s3 }
  0x16   : > { %s9958_s5 = smov (%p49_p0, %s47_s5), 0  ;;  %p571_p5 = scmp.eq.s32.totalorder %s7432_s1, 1 }
  0x17   : > { %9924 = sst [smem:[#allocation11_spill]] %s9958_s5  ;;  %p8496_p4 = por %p565_p2, %p564_p1 }
  0x18   : > { %s549_s25 = ssub.s32 %s8324_s4, %s9958_s5  ;;  %p7436_p6 = scmp.ge.s32.totalorder %s8328_s0, 1 }
  0x19   : > { %s9925_s6 = scalar_select %p8496_p4, 1, 0 }
  0x1a   : > { %p552_p7 = scmp.eq.s32.totalorder %s549_s25, 0  ;;  %p8503_p8 = por %p571_p5, %p570_p3 }
  0x1b   : > { %9926 = sst [smem:[#allocation12_spill]] %s9925_s6  ;;  %p700_p9 = scmp.lt.s32.totalorder %s8328_s0, 3 }
  0x1c   : > { %s9927_s26 = scalar_select %p8503_p8, 1, 0 }
  0x1d   : > { %s8509_s2 = scalar_select %p552_p7, %s8316_s29, %s554_s24  }
  0x1e   : > { %9928 = sst [smem:[#allocation13_spill]] %s9927_s26  ;;  %p701_p10 = pnand %p7436_p6, %p700_p9 }
  0x1f   : > { %9929 = sst [smem:[#allocation14_spill]] %s8509_s2  ;;  %p799_p11 = scmp.lt.s32.totalorder (!%p701_p10), %s8320_s30, 1  ;;  %v8333_v4 = vmov (!%p701_p10), 0.0   ;;  %vm8334_vm0 = vmmov (!%p701_p10), 0   ;;  %v8335_v12 = vmov (!%p701_p10), 1983009808   ;;  %v889_v14 = vlaneseq (!%p701_p10) }
  0x20   : > { %704 = sbr.rel (%p701_p10) target bundleno = 4369 (0x1111), region = 108  ;;  %s9930_s5 = sld [smem:[#allocation17_spill]] (!%p701_p10)  ;;  %7740 = vmatprep.subr.bf16.mxu1 (!%p701_p10), %v8333_v4  ;;  %7744 = vmatprep.mubr.msk.bf16.mxu1 (!%p701_p10), %vm8334_vm0, %v8333_v4  ;;  %v887_v13 = vunpack.c.l.s4 (!%p701_p10), %v8335_v12  ;;  %v8336_v24 = vmov (!%p701_p10), 1934713408   ;;  %vm1256_vm1 = vcmask (!%p701_p10), 261120   ;;  %vm1442_vm2 = vcmask (!%p701_p10), 130048  }
  0x21   : > { %s9894_s24 = smov (!%p701_p10), 96   ;;  %s9898_s2 = smov (!%p701_p10), 64   ;;  %v8574_v19 = vshrl.u32 (!%p701_p10), %v889_v14, 7  ;;  %v904_v25 = vunpack.c.l.s4 (!%p701_p10), %v8336_v24  ;;  %vm2273_vm3 = vcmask (!%p701_p10), 523264   ;;  %vm2276_vm4 = vcmask (!%p701_p10), 785408  }
  0x22   : > { %s9931_s25 = sld [smem:[#allocation16_spill]] (!%p701_p10)  ;;  %s9896_s3 = smov (!%p701_p10), 32   ;;  %v888_v18 = vunpack.c.0.s8 (!%p701_p10), %v887_v13  ;;  %vm4281_vm7 = vcmask (!%p701_p10), 64512  }
  0x23   : > { %v905_v34 = vunpack.c.0.s8 (!%p701_p10), %v904_v25  ;;  %s9940_s22 = sld [smem:[#allocation15_spill]] (!%p701_p10)  ;;  %s9941_s0 = sld [smem:[#allocation20_spill]] (!%p701_p10) }
  0x24   : > { %v8577_v26 = vsub.s32 (!%p701_p10), %v888_v18, %v8574_v19  ;;  %s9943_s1 = sld [smem:[#allocation6_spill]] (!%p701_p10) }
  0x25   : > { %v8583_v47 = vsub.s32 (!%p701_p10), %v905_v34, %v8574_v19 }
  0x27   : > { %s8513_s27 = scalar_select %p799_p11, %s8320_s30, 1 }
  0x28   : > { %s9947_s30 = sld [smem:[#allocation24_spill]] }
  0x29   : > { %s8516_s23 = sshll.u32 %s8513_s27, 4  ;;  %s9893_s29 = sshll.u32 %s8513_s27, 3 }
  0x2a   : > { %s822_s4 = scalar_lea.vmem %s9930_s5, %s8516_s23  ;;  %s816_s26 = scalar_lea.vmem %s9931_s25, %s9893_s29 }
  0x2b   : > { %v8522_v0 = vld [vmem:[%s822_s4] sm:$0xff]  ;;  %v8528_v1 = vld [vmem:[%s822_s4 + $0x8] sm:$0xff]  ;;  %s9932_s5 = sld [smem:[#allocation19_spill]]  ;;  %s9933_s4 = sld [smem:[#allocation21_spill]] }
  0x2c   : > { %1025 = vrot.lane.b32.xlu0 %v8522_v0, %s9894_s24  ;;  %1029 = vrot.lane.b32.xlu1 %v8522_v0, %s9898_s2  ;;  %v845_v2 = vld [vmem:[%s816_s26] sm:$0xf]  ;;  %v846_v3 = vld [vmem:[%s816_s26 + $0x4] sm:$0xf]  ;;  %v7451_v5 = vcombine.low %v8522_v0, %v8528_v1  ;;  %s9935_s29 = smov 64   ;;  %s9936_s25 = smov 32  }
  0x2d   : > { %v876_v22 = vshrl.u32 %v846_v3, 16  ;;  %v864_v28 = vshrl.u32 %v845_v2, 16  ;;  %s795_s6 = sand.u32 1, %s9943_s1   ;;  %s8338_s1 = smov [#allocation2]  }
  0x30   : > { %1027 = vrot.lane.b32.xlu0 %v8528_v1, %s9894_s24  ;;  %1031 = vrot.lane.b32.xlu1 %v8528_v1, %s9898_s2 }
  0x31   : > { %s9934_s26 = smov %s9933_s4 }
  0x34   : > { %1033 = vrot.lane.b32.xlu0 %v8522_v0, %s9896_s3  ;;  %1035 = vrot.lane.b32.xlu1 %v8528_v1, %s9896_s3 }
  0x38   : > { %849 = vrot.lane.b32.xlu0 %v845_v2, %s9894_s24  ;;  %851 = vrot.lane.b32.xlu1 %v846_v3, %s9894_s24  ;;  %s9938_s24 = sshll.u32 %s8513_s27, 3  ;;  %s841_s27 = scalar_lea.vmem %s9941_s0, %s8516_s23 }
  0x39   : > { %s9944_s0 = sld [smem:[#allocation23_spill]] }
  0x3c   : > { %853 = vrot.lane.b32.xlu0 %v845_v2, %s9898_s2  ;;  %855 = vrot.lane.b32.xlu1 %v846_v3, %s9898_s2  ;;  %s9948_s2 = smov %s9947_s30 }
  0x40   : > { %857 = vrot.lane.b32.xlu0 %v845_v2, %s9896_s3  ;;  %859 = vrot.lane.b32.xlu1 %v846_v3, %s9896_s3  ;;  %s9937_s3 = smov 96  }
  0x5e   : > { %1189 = vxpose.xlu0.c.b16.start.end [1/1] (short) (narrow) %v7451_v5, 32 }
  0x9e   : > { %v8555_v6 = vpop.permute.xlu0 %1025  ;;  %v8557_v7 = vpop.permute.xlu1 %1029 }
  0xa2   : > { %v8559_v8 = vpop.permute.xlu0 %1027  ;;  %v8561_v9 = vpop.permute.xlu1 %1031 }
  0xa3   : > { %v7452_v10 = vcombine.low %v8555_v6, %v8559_v8  ;;  %v7453_v11 = vcombine.low %v8557_v7, %v8561_v9 }
  0xa5   : > { %1205 = vxpose.xlu1.c.b16.start.end [1/1] (short) (narrow) %v7452_v10, 32  ;;  %1221 = vxpose.xlu0.c.b16.start.end [1/1] (short) (narrow) %v7453_v11, 32 }
  0xa6   : > { %v8567_v15 = vpop.permute.xlu1 %1035  ;;  %v8569_v16 = vpop.permute.xlu0 %1033 }
  0xa7   : > { %v7454_v17 = vcombine.low %v8569_v16, %v8567_v15 }
  0xaa   : > { %v852_v20 = vpop.permute.xlu1 %851  ;;  %v850_v21 = vpop.permute.xlu0 %849  ;;  %1237 = vxpose.xlu0.c.b16.start.end [1/1] (short) (narrow) %v7454_v17, 32 }
  0xab   : > { %v877_v23 = vshrl.u32 %v852_v20, 16  ;;  %v875_v27 = vpack.i.b16 %v852_v20, %v846_v3  ;;  %v863_v29 = vpack.i.b16 %v850_v21, %v845_v2  ;;  %v865_v30 = vshrl.u32 %v850_v21, 16 }
  0xad   : > { %v878_v33 = vpack.i.b16 %v877_v23, %v876_v22  ;;  %v960_v37 = vrot.slane %v875_v27, %v8577_v26  ;;  %v866_v38 = vpack.i.b16 %v865_v30, %v864_v28  ;;  %v892_v39 = vrot.slane %v863_v29, %v8577_v26 }
  0xae   : > { %v856_v31 = vpop.permute.xlu1 %855  ;;  %v854_v32 = vpop.permute.xlu0 %853 }
  0xaf   : > { %v882_v35 = vshrl.u32 %v856_v31, 16  ;;  %v870_v36 = vshrl.u32 %v854_v32, 16  ;;  %v994_v46 = vrot.slane %v878_v33, %v8577_v26  ;;  %v926_v52 = vrot.slane %v866_v38, %v8577_v26 }
  0xb2   : > { %v860_v40 = vpop.permute.xlu1 %859  ;;  %v858_v41 = vpop.permute.xlu0 %857 }
  0xb3   : > { %v881_v42 = vpack.i.b16 %v860_v40, %v856_v31  ;;  %v883_v43 = vshrl.u32 %v860_v40, 16  ;;  %v869_v44 = vpack.i.b16 %v858_v41, %v854_v32  ;;  %v871_v45 = vshrl.u32 %v858_v41, 16 }
  0xb5   : > { %v884_v48 = vpack.i.b16 %v883_v43, %v882_v35  ;;  %v968_v49 = vrot.slane %v881_v42, %v8577_v26  ;;  %v872_v50 = vpack.i.b16 %v871_v45, %v870_v36  ;;  %v900_v51 = vrot.slane %v869_v44, %v8577_v26 }
  0xb6   : > { %v8337_v43 = vmov 0  }
  0xb7   : > { %v969_v53 = vcombine.low %v960_v37, %v968_v49  ;;  %v970_v54 = vcombine.high %v960_v37, %v968_v49  ;;  %v1002_v55 = vrot.slane %v884_v48, %v8577_v26  ;;  %v901_v56 = vcombine.low %v892_v39, %v900_v51 }
  0xb8   : > { %v902_v57 = vcombine.high %v892_v39, %v900_v51  ;;  %v934_v58 = vrot.slane %v872_v50, %v8577_v26 }
  0xb9   : > { %v977_v59 = vrot.slane %v969_v53, %v8583_v47  ;;  %v984_v60 = vrot.slane %v970_v54, %v8583_v47  ;;  %v1003_v61 = vcombine.low %v994_v46, %v1002_v55  ;;  %v1004_v62 = vcombine.high %v994_v46, %v1002_v55 }
  0xba   : > { %v909_v63 = vrot.slane %v901_v56, %v8583_v47  ;;  %v916_v2 = vrot.slane %v902_v57, %v8583_v47  ;;  %v935_v3 = vcombine.low %v926_v52, %v934_v58  ;;  %v936_v5 = vcombine.high %v926_v52, %v934_v58 }
  0xbb   : > { %v1011_v10 = vrot.slane %v1003_v61, %v8583_v47  ;;  %v1018_v11 = vrot.slane %v1004_v62, %v8583_v47  ;;  %v1099_v12 = vcombine.low %v977_v59, %v984_v60  ;;  %v7449_v13 = vcombine.high %v977_v59, %v984_v60 }
  0xbc   : > { %v943_v17 = vrot.slane %v935_v3, %v8583_v47  ;;  %v950_v18 = vrot.slane %v936_v5, %v8583_v47  ;;  %v1049_v20 = vcombine.low %v909_v63, %v916_v2  ;;  %v7447_v21 = vcombine.high %v909_v63, %v916_v2 }
  0xbd   : > { %v1106_v22 = vrot.slane %v1099_v12, %v8577_v26  ;;  %v1114_v23 = vrot.slane %v7449_v13, %v8577_v26  ;;  %v1124_v24 = vcombine.low %v1011_v10, %v1018_v11  ;;  %v7450_v25 = vcombine.high %v1011_v10, %v1018_v11 }
  0xbe   : > { %v1056_v27 = vrot.slane %v1049_v20, %v8577_v26  ;;  %v1064_v28 = vrot.slane %v7447_v21, %v8577_v26  ;;  %v1074_v29 = vcombine.low %v943_v17, %v950_v18  ;;  %v7448_v30 = vcombine.high %v943_v17, %v950_v18 }
  0xbf   : > { %v1115_v31 = vcombine.low %v1106_v22, %v1114_v23  ;;  %v1131_v32 = vrot.slane %v1124_v24, %v8577_v26  ;;  %v1139_v33 = vrot.slane %v7450_v25, %v8577_v26  ;;  %v7618_v24 = vld [vmem:[%s9932_s5] sm:$0xff]   ;;  %s9939_s5 = sld [smem:[#allocation18_spill]] }
  0xc0   : > { %v1065_v34 = vcombine.low %v1056_v27, %v1064_v28  ;;  %v1081_v35 = vrot.slane %v1074_v29, %v8577_v26  ;;  %v1089_v36 = vrot.slane %v7448_v30, %v8577_v26  ;;  %v7619_v25 = vunpack.c.l.bf16 %v7618_v24 }
  0xc1   : > { %v1122_v37 = vrot.slane %v1115_v31, %v8583_v47  ;;  %v1140_v38 = vcombine.low %v1131_v32, %v1139_v33  ;;  %v7620_v27 = vunpack.c.h.bf16 %v7618_v24 }
  0xc2   : > { %v1072_v39 = vrot.slane %v1065_v34, %v8583_v47  ;;  %v1090_v40 = vcombine.low %v1081_v35, %v1089_v36 }
  0xc3   : > { %v1147_v41 = vrot.slane %v1140_v38, %v8583_v47  ;;  %v1164_v42 = vshrl.u32 %v1122_v37, 16  ;;  %v1123_v44 = vcombine.high %v1122_v37, %v8337_v43 }
  0xc4   : > { %v1197_v45 = vpop.trf.xlu0  ;;  %v1097_v46 = vrot.slane %v1090_v40, %v8583_v47  ;;  %v1152_v48 = vshrl.u32 %v1072_v39, 16  ;;  %v1073_v49 = vcombine.high %v1072_v39, %v8337_v43 }
  0xc5   : > { %7741 = vmatpush3.bf16.msra.mxu1 %v1197_v45  ;;  %v1163_v50 = vpack.i.b16 %v1147_v41, %v1122_v37  ;;  %v1165_v51 = vshrl.u32 %v1147_v41, 16  ;;  %v1148_v52 = vcombine.high %v1147_v41, %v8337_v43  ;;  %v1170_v53 = vshrl.u32 %v1123_v44, 16  ;;  %s826_s21 = scalar_lea.vmem %s9939_s5, %s9938_s24  ;;  %s9942_s5 = sld [smem:[#allocation22_spill]] }
  0xc6   : > { %7742 = vmatprep.subr.bf16.mxu1 %v8333_v4  ;;  %v1151_v54 = vpack.i.b16 %v1097_v46, %v1072_v39  ;;  %v1153_v55 = vshrl.u32 %v1097_v46, 16  ;;  %v1098_v56 = vcombine.high %v1097_v46, %v8337_v43  ;;  %v1158_v57 = vshrl.u32 %v1073_v49, 16 }
  0xc7   : > { %v1166_v58 = vpack.i.b16 %v1165_v51, %v1164_v42  ;;  %v1169_v59 = vpack.i.b16 %v1148_v52, %v1123_v44  ;;  %v1171_v60 = vshrl.u32 %v1148_v52, 16 }
  0xc8   : > { %v1198_v61 = vpop.trf.xlu0  ;;  %v7455_v62 = vcombine.low %v1151_v54, %v1163_v50  ;;  %v1154_v63 = vpack.i.b16 %v1153_v55, %v1152_v48  ;;  %v1157_v2 = vpack.i.b16 %v1098_v56, %v1073_v49  ;;  %v1159_v3 = vshrl.u32 %v1098_v56, 16 }
  0xc9   : > { %7743 = vmatpush3.bf16.msra.mxu1 %v1198_v61  ;;  %v1172_v5 = vpack.i.b16 %v1171_v60, %v1170_v53 }
  0xca   : > { %7748 = vmatprep.subr.bf16.mxu1 %v8333_v4  ;;  %v7457_v10 = vcombine.low %v1154_v63, %v1166_v58  ;;  %v7459_v11 = vcombine.low %v1157_v2, %v1169_v59  ;;  %v1160_v12 = vpack.i.b16 %v1159_v3, %v1158_v57 }
  0xcc   : > { %7745 = vmatmul.mubr.msk.bf16.vlgmr.msra.gmra.mrb[0].mxu1 %vm1256_vm1, %v7455_v62  ;;  %v7461_v13 = vcombine.low %v1160_v12, %v1172_v5 }
  0xcd   : > { %7752 = vmatprep.mubr.msk.bf16.mxu1 %vm8334_vm0, %v8333_v4 }
 0x10b   : > { %v1213_v17 = vpop.trf.xlu1  ;;  %v1229_v18 = vpop.trf.xlu0 }
 0x10c   : > { %7749 = vmatpush3.bf16.msra.mxu1 %v1213_v17 }
 0x10d   : > { %7750 = vmatprep.subr.bf16.mxu1 %v8333_v4 }
 0x10f   : > { %v1214_v20 = vpop.trf.xlu1  ;;  %v1230_v21 = vpop.trf.xlu0 }
 0x110   : > { %7751 = vmatpush3.bf16.msra.mxu1 %v1214_v20 }
 0x111   : > { %7756 = vmatprep.subr.bf16.mxu1 %v8333_v4 }
 0x113   : > { %7753 = vmatmul.mubr.msk.bf16.vlgmr.msra.gmra.mrb[4].mxu1 %vm1256_vm1, %v7457_v10  ;;  %v1245_v22 = vpop.trf.xlu0 }
 0x114   : > { %7757 = vmatpush3.bf16.msra.mxu1 %v1229_v18  ;;  %7760 = vmatprep.mubr.msk.bf16.mxu1 %vm8334_vm0, %v8333_v4 }
 0x115   : > { %7758 = vmatprep.subr.bf16.mxu1 %v8333_v4 }
 0x117   : > { %v1246_v23 = vpop.trf.xlu0 }
 0x118   : > { %7759 = vmatpush3.bf16.msra.mxu1 %v1230_v21 }
 0x119   : > { %7764 = vmatprep.subr.bf16.mxu1 %v8333_v4 }
 0x11b   : > { %7761 = vmatmul.mubr.msk.bf16.vlgmr.msra.gmra.mrb[8].mxu1 %vm1256_vm1, %v7459_v11 }
 0x11c   : > { %7765 = vmatpush3.bf16.msra.mxu1 %v1245_v22  ;;  %7768 = vmatprep.mubr.msk.bf16.mxu1 %vm8334_vm0, %v8333_v4 }
 0x11d   : > { %7766 = vmatprep.subr.bf16.mxu1 %v8333_v4 }
 0x120   : > { %7767 = vmatpush3.bf16.msra.mxu1 %v1246_v23 }
 0x123   : > { %7769 = vmatmul.mubr.msk.bf16.vlgmr.msra.gmra.mrb[12].mxu1 %vm1256_vm1, %v7461_v13 }
 0x19f   : > { %v1294_v28 = vpop.f32.mrb[0].mxu1 }
 0x1a0   : > { %v1295_v29 = vadd.f32 %v7619_v25, %v1294_v28  ;;  %v7746_v30 = vpop.f32.mrb[1].mxu1 }
 0x1a1   : > { %v1297_v31 = vpop.f32.mrb[2].mxu1 }
 0x1a2   : > { %v1298_v32 = vadd.f32 %v7620_v27, %v1297_v31  ;;  %v1443_v33 = vsel %vm1442_vm2, %v1295_v29, -inf  ;;  %v7747_v34 = vpop.f32.mrb[3].mxu1 }
 0x1a3   : > { %1444 = vmax.xlane.f32.xlu1 %v1443_v33 }
 0x1a4   : > { %v1446_v35 = vsel %vm1442_vm2, %v1298_v32, -inf }
 0x1a5   : > { %1447 = vmax.xlane.f32.xlu0 %v1446_v35 }
 0x1e6   : > { %v1341_v36 = vpop.f32.mrb[4].mxu1 }
 0x1e7   : > { %v1342_v37 = vadd.f32 %v7619_v25, %v1341_v36  ;;  %v7754_v38 = vpop.f32.mrb[5].mxu1 }
 0x1e8   : > { %v1344_v39 = vpop.f32.mrb[6].mxu1 }
 0x1e9   : > { %v1345_v40 = vadd.f32 %v7620_v27, %v1344_v39  ;;  %v7755_v41 = vpop.f32.mrb[7].mxu1  ;;  %v1449_v42 = vsel %vm1442_vm2, %v1342_v37, -inf }
 0x1ea   : > { %1450 = vmax.xlane.f32.xlu1 %v1449_v42 }
 0x1eb   : > { %v1452_v44 = vsel %vm1442_vm2, %v1345_v40, -inf }
 0x1ee   : > { %1453 = vmax.xlane.f32.xlu1 %v1452_v44  ;;  %v1388_v45 = vpop.f32.mrb[8].mxu1 }
 0x1ef   : > { %v1389_v46 = vadd.f32 %v7619_v25, %v1388_v45  ;;  %v7762_v48 = vpop.f32.mrb[9].mxu1 }
 0x1f0   : > { %v1391_v49 = vpop.f32.mrb[10].mxu1 }
 0x1f1   : > { %v1392_v50 = vadd.f32 %v7620_v27, %v1391_v49  ;;  %v7763_v51 = vpop.f32.mrb[11].mxu1  ;;  %v1455_v52 = vsel %vm1442_vm2, %v1389_v46, -inf }
 0x1f2   : > { %1456 = vmax.xlane.f32.xlu0 %v1455_v52  ;;  %v1037_v52 = vrot.slane %v8522_v0, 4 }
 0x1f3   : > { %v1458_v53 = vsel %vm1442_vm2, %v1392_v50, -inf }
 0x1f4   : > { %1459 = vmax.xlane.f32.xlu1 %v1458_v53  ;;  %v1038_v53 = vrot.slane %v8528_v1, 4 }
 0x1f6   : > { %v1435_v54 = vpop.f32.mrb[12].mxu1 }
 0x1f7   : > { %v1436_v55 = vadd.f32 %v7619_v25, %v1435_v54  ;;  %v7770_v56 = vpop.f32.mrb[13].mxu1  ;;  %v1040_v54 = vrot.slane %v8559_v8, 4 }
 0x1f8   : > { %v1438_v57 = vpop.f32.mrb[14].mxu1  ;;  %v1039_v56 = vrot.slane %v8555_v6, 4 }
 0x1f9   : > { %v1439_v58 = vadd.f32 %v7620_v27, %v1438_v57  ;;  %v7771_v59 = vpop.f32.mrb[15].mxu1  ;;  %v1461_v60 = vsel %vm1442_vm2, %v1436_v55, -inf  ;;  %v1041_v57 = vrot.slane %v8557_v7, 4 }
 0x1fa   : > { %1462 = vmax.xlane.f32.xlu0 %v1461_v60  ;;  %v7464_v59 = vcombine.low %v1039_v56, %v1040_v54  ;;  %v1043_v60 = vrot.slane %v8569_v16, 4 }
 0x1fb   : > { %v1464_v61 = vsel %vm1442_vm2, %v1439_v58, -inf }
 0x1fc   : > { %1465 = vmax.xlane.f32.xlu1 %v1464_v61  ;;  %v1044_v61 = vrot.slane %v8567_v15, 4 }
 0x1fe   : > { %v7466_v0 = vcombine.low %v1043_v60, %v1044_v61 }
 0x230   : > { %v1445_v62 = vpop.xlane.xlu1 %1444 }
 0x231   : > { %v1467_v63 = vsub.f32 %v1295_v29, %v1445_v62 }
 0x232   : > { %v1448_v2 = vpop.xlane.xlu0 %1447 }
 0x233   : > { %v1475_v3 = vmul.f32 1.442695, %v1467_v63  ;;  %v1468_v5 = vsub.f32 %v1298_v32, %v1448_v2 }
 0x235   : > { %8146 = vpow2.f32 %v1475_v3  ;;  %v1477_v10 = vmul.f32 1.442695, %v1468_v5 }
 0x237   : > { %8148 = vpow2.f32 %v1477_v10 }
 0x23f   : > { %v8642_v11 = vpop.eup %8146 }
 0x240   : > { %v1491_v12 = vsel %vm1442_vm2, %v8642_v11, 0.0 }
 0x241   : > { %v8646_v13 = vpop.eup %8148  ;;  %1492 = vadd.xlane.f32.xlu0 %v1491_v12 }
 0x242   : > { %v1494_v17 = vsel %vm1442_vm2, %v8646_v13, 0.0 }
 0x243   : > { %1495 = vadd.xlane.f32.xlu1 %v1494_v17 }
 0x277   : > { %v1451_v18 = vpop.xlane.xlu1 %1450 }
 0x278   : > { %v1469_v20 = vsub.f32 %v1342_v37, %v1451_v18 }
 0x27a   : > { %v1479_v21 = vmul.f32 1.442695, %v1469_v20 }
 0x27b   : > { %v1454_v22 = vpop.xlane.xlu1 %1453 }
 0x27c   : > { %8150 = vpow2.f32 %v1479_v21  ;;  %v1470_v23 = vsub.f32 %v1345_v40, %v1454_v22 }
 0x27e   : > { %v1481_v24 = vmul.f32 1.442695, %v1470_v23 }
 0x27f   : > { %v1457_v25 = vpop.xlane.xlu0 %1456 }
 0x280   : > { %8152 = vpow2.f32 %v1481_v24  ;;  %v1471_v27 = vsub.f32 %v1389_v46, %v1457_v25 }
 0x281   : > { %v1460_v28 = vpop.xlane.xlu1 %1459 }
 0x282   : > { %v1483_v29 = vmul.f32 1.442695, %v1471_v27  ;;  %v1472_v30 = vsub.f32 %v1392_v50, %v1460_v28 }
 0x284   : > { %8154 = vpow2.f32 %v1483_v29  ;;  %v1485_v31 = vmul.f32 1.442695, %v1472_v30 }
 0x286   : > { %v8650_v32 = vpop.eup %8150  ;;  %8156 = vpow2.f32 %v1485_v31 }
 0x287   : > { %v1463_v33 = vpop.xlane.xlu0 %1462  ;;  %v1497_v34 = vsel %vm1442_vm2, %v8650_v32, 0.0 }
 0x288   : > { %v1473_v35 = vsub.f32 %v1436_v55, %v1463_v33  ;;  %1498 = vadd.xlane.f32.xlu0 %v1497_v34  ;;  %v7463_v55 = vcombine.low %v1037_v52, %v1038_v53 }
 0x289   : > { %v1466_v36 = vpop.xlane.xlu1 %1465 }
 0x28a   : > { %v8153_v37 = vpop.eup %8152  ;;  %v1487_v38 = vmul.f32 1.442695, %v1473_v35  ;;  %v1474_v39 = vsub.f32 %v1439_v58, %v1466_v36  ;;  %v1042_v58 = vrot.slane %v8561_v9, 4 }
 0x28b   : > { %v1500_v40 = vsel %vm1442_vm2, %v8153_v37, 0.0 }
 0x28c   : > { %8158 = vpow2.f32 %v1487_v38  ;;  %v1489_v41 = vmul.f32 1.442695, %v1474_v39  ;;  %1501 = vadd.xlane.f32.xlu1 %v1500_v40  ;;  %v7465_v62 = vcombine.low %v1041_v57, %v1042_v58 }
 0x28e   : > { %v8655_v42 = vpop.eup %8154  ;;  %8160 = vpow2.f32 %v1489_v41 }
 0x28f   : > { %v1503_v44 = vsel %vm1442_vm2, %v8655_v42, 0.0 }
 0x290   : > { %v8157_v45 = vpop.eup %8156  ;;  %1504 = vadd.xlane.f32.xlu0 %v1503_v44 }
 0x291   : > { %v1506_v46 = vsel %vm1442_vm2, %v8157_v45, 0.0 }
 0x292   : > { %1507 = vadd.xlane.f32.xlu1 %v1506_v46 }
 0x296   : > { %v8660_v48 = vpop.eup %8158 }
 0x297   : > { %v1509_v49 = vsel %vm1442_vm2, %v8660_v48, 0.0 }
 0x298   : > { %v8664_v50 = vpop.eup %8160  ;;  %1510 = vadd.xlane.f32.xlu0 %v1509_v49 }
 0x299   : > { %v1512_v51 = vsel %vm1442_vm2, %v8664_v50, 0.0 }
 0x29a   : > { %1513 = vadd.xlane.f32.xlu1 %v1512_v51 }
 0x2c5   : > { %1551 = vxpose.xlu0.c.b16.start.end [1/1] (short) (narrow) %v7463_v55, 32 }
 0x2c7   : > { %1567 = vxpose.xlu1.c.b16.start.end [1/1] (short) (narrow) %v7464_v59, 32 }
 0x2ca   : > { %1583 = vxpose.xlu0.c.b16.start.end [1/1] (short) (narrow) %v7465_v62, 32  ;;  %v8018_v62 = vld [vmem:[%s9933_s4] sm:$0xff]   ;;  %s9818_s4 = scalar_lea.sflag [#allocation3], %s795_s6 }
 0x2cc   : > { %1599 = vxpose.xlu1.c.b16.start.end [1/1] (short) (narrow) %v7466_v0, 32  ;;  %v8019_v0 = vld [vmem:[%s9934_s26 + $0x8] sm:$0xff]  }
 0x2ce   : > { %v1493_v1 = vpop.xlane.xlu0 %1492 }
 0x2cf   : > { %8162 = vrcp.f32 %v1493_v1  ;;  %v8020_v1 = vld [vmem:[%s9934_s26 + $0x10] sm:$0xff]  }
 0x2d0   : > { %v1496_v8 = vpop.xlane.xlu1 %1495 }
 0x2d1   : > { %8164 = vrcp.f32 %v1496_v8  ;;  %v8021_v8 = vld [vmem:[%s9934_s26 + $0x18] sm:$0xff]  }
 0x2d9   : > { %v8163_v6 = vpop.eup %8162 }
 0x2da   : > { %v1523_v7 = vmul.f32 %v8163_v6, %v8642_v11  ;;  %v8022_v6 = vld [vmem:[%s9934_s26 + $0x20] sm:$0xff]  }
 0x2db   : > { %v8165_v63 = vpop.eup %8164 }
 0x2dc   : > { %v1524_v9 = vmul.f32 %v8165_v63, %v8646_v13  ;;  %v8023_v63 = vld [vmem:[%s9934_s26 + $0x28] sm:$0xff]  }
 0x2de   : > { %v1531_v2 = vpack.c.bf16 %v1524_v9, %v1523_v7 }
 0x2e0   : > { %7912 = vmatprep.subr.msk.bf16.mxu0 %vm1442_vm2, %v1531_v2  ;;  %v1622_v15 = vsel %vm1442_vm2, %v1531_v2, 0 }
 0x2e1   : > { %7773 = vmatpush3.bf16.xpose.msra.mxu0 %v1622_v15 }
 0x315   : > { %v1499_v16 = vpop.xlane.xlu0 %1498 }
 0x316   : > { %8166 = vrcp.f32 %v1499_v16 }
 0x319   : > { %v1502_v3 = vpop.xlane.xlu1 %1501 }
 0x31a   : > { %8168 = vrcp.f32 %v1502_v3 }
 0x31d   : > { %v1505_v5 = vpop.xlane.xlu0 %1504 }
 0x31e   : > { %8170 = vrcp.f32 %v1505_v5 }
 0x31f   : > { %v1508_v10 = vpop.xlane.xlu1 %1507 }
 0x320   : > { %8172 = vrcp.f32 %v1508_v10  ;;  %v8167_v12 = vpop.eup %8166 }
 0x321   : > { %v1525_v11 = vmul.f32 %v8167_v12, %v8650_v32 }
 0x324   : > { %v8169_v17 = vpop.eup %8168 }
 0x325   : > { %v1511_v18 = vpop.xlane.xlu0 %1510  ;;  %v1526_v13 = vmul.f32 %v8169_v17, %v8153_v37 }
 0x326   : > { %8174 = vrcp.f32 %v1511_v18 }
 0x327   : > { %v1514_v20 = vpop.xlane.xlu1 %1513  ;;  %v1532_v21 = vpack.c.bf16 %v1526_v13, %v1525_v11 }
 0x328   : > { %v8171_v22 = vpop.eup %8170  ;;  %8176 = vrcp.f32 %v1514_v20 }
 0x329   : > { %7913 = vmatprep.subr.msk.bf16.mxu1 %vm1442_vm2, %v1532_v21  ;;  %v1680_v23 = vsel %vm1442_vm2, %v1532_v21, 0  ;;  %v1527_v27 = vmul.f32 %v8171_v22, %v8655_v42 }
 0x32a   : > { %v8173_v24 = vpop.eup %8172  ;;  %7779 = vmatpush3.bf16.xpose.msra.mxu1 %v1680_v23 }
 0x32b   : > { %v1559_v25 = vpop.trf.xlu0  ;;  %v1528_v28 = vmul.f32 %v8173_v24, %v8157_v45 }
 0x32c   : > { %7774 = vmatprep.mubr.msk.bf16.mxu0 %vm1442_vm2, %v1559_v25 }
 0x32d   : > { %v1575_v29 = vpop.trf.xlu1  ;;  %v1533_v30 = vpack.c.bf16 %v1528_v28, %v1527_v27 }
 0x32e   : > { %7780 = vmatprep.mubr.msk.bf16.mxu1 %vm1442_vm2, %v1575_v29 }
 0x32f   : > { %7914 = vmatprep.subr.msk.bf16.mxu0 %vm1442_vm2, %v1533_v30  ;;  %v1560_v31 = vpop.trf.xlu0  ;;  %v1738_v32 = vsel %vm1442_vm2, %v1533_v30, 0 }
 0x330   : > { %v8175_v33 = vpop.eup %8174  ;;  %7775 = vmatmul.mubr.msk.bf16.vlgmr.msra.gmra.mrb[0].mxu0 %vm1442_vm2, %v1560_v31 }
 0x331   : > { %7785 = vmatpush3.bf16.xpose.msra.mxu0 %v1738_v32  ;;  %v1576_v34 = vpop.trf.xlu1  ;;  %v1529_v36 = vmul.f32 %v8175_v33, %v8660_v48 }
 0x332   : > { %v8177_v35 = vpop.eup %8176  ;;  %7781 = vmatmul.mubr.msk.bf16.vlgmr.msra.gmra.mrb[16].mxu1 %vm1442_vm2, %v1576_v34  ;;  %7796 = vmatprep.subr.bf16.mxu0 %v8333_v4 }
 0x333   : > { %v1530_v37 = vmul.f32 %v8177_v35, %v8664_v50  ;;  %v1591_v38 = vpop.trf.xlu0 }
 0x334   : > { %7786 = vmatprep.mubr.msk.bf16.mxu0 %vm1442_vm2, %v1591_v38 }
 0x335   : > { %v1534_v39 = vpack.c.bf16 %v1530_v37, %v1529_v36  ;;  %v1607_v40 = vpop.trf.xlu1 }
 0x336   : > { %7792 = vmatprep.mubr.msk.bf16.mxu1 %vm1442_vm2, %v1607_v40 }
 0x337   : > { %7915 = vmatprep.subr.msk.bf16.mxu1 %vm1442_vm2, %v1534_v39  ;;  %v1796_v41 = vsel %vm1442_vm2, %v1534_v39, 0  ;;  %v1592_v42 = vpop.trf.xlu0 }
 0x338   : > { %7791 = vmatpush3.bf16.xpose.msra.mxu1 %v1796_v41  ;;  %7787 = vmatmul.mubr.msk.bf16.vlgmr.msra.gmra.mrb[4].mxu0 %vm1442_vm2, %v1592_v42 }
 0x339   : > { %7812 = vmatprep.mubr.msk.bf16.mxu0 %vm8334_vm0, %v8333_v4  ;;  %7816 = vmatprep.subr.bf16.mxu1 %v8333_v4  ;;  %v1608_v44 = vpop.trf.xlu1 }
 0x33a   : > { %7797 = vmatpush3.bf16.msra.mxu0 %v8018_v62  ;;  %v8024_v62 = vld [vmem:[%s9934_s26 + $0x30] sm:$0xff]  }
 0x33b   : > { %7798 = vmatprep.subr.bf16.mxu0 %v8333_v4 }
 0x33e   : > { %7799 = vmatpush3.bf16.msra.mxu0 %v8019_v0 }
 0x33f   : > { %7793 = vmatmul.mubr.msk.bf16.vlgmr.msra.gmra.mrb[20].mxu1 %vm1442_vm2, %v1608_v44  ;;  %7800 = vmatprep.subr.bf16.mxu0 %v8333_v4 }
 0x340   : > { %7832 = vmatprep.mubr.msk.bf16.mxu1 %vm8334_vm0, %v8333_v4 }
 0x342   : > { %7801 = vmatpush3.bf16.msra.mxu0 %v8020_v1 }
 0x343   : > { %7802 = vmatprep.subr.bf16.mxu0 %v8333_v4 }
 0x346   : > { %7803 = vmatpush3.bf16.msra.mxu0 %v8021_v8 }
 0x347   : > { %7804 = vmatprep.subr.bf16.mxu0 %v8333_v4 }
 0x34a   : > { %7805 = vmatpush3.bf16.msra.mxu0 %v8022_v6 }
 0x34b   : > { %7806 = vmatprep.subr.bf16.mxu0 %v8333_v4 }
 0x34e   : > { %7807 = vmatpush3.bf16.msra.mxu0 %v8023_v63 }
 0x34f   : > { %7808 = vmatprep.subr.bf16.mxu0 %v8333_v4 }
 0x352   : > { %7809 = vmatpush3.bf16.msra.mxu0 %v8024_v62  ;;  %v8038_v62 = vld [vmem:[%s9874_s10 + $0x40] ss:$8 sps:$4 sm:$0xff]  }
 0x353   : > { %7810 = vmatprep.subr.bf16.mxu0 %v8333_v4 }
 0x403   : > { %v7776_v45 = vpop.f32.mrb[0].mxu0 }
 0x404   : > { %v1658_v46 = vpop.f32.mrb[1].mxu0 }
 0x405   : > { %v7782_v48 = vpop.f32.mrb[16].mxu1  ;;  %1847 = vxpose.xlu0.b32.start [1/4] (short) (narrow) %v1658_v46, 16  ;;  %v7777_v49 = vpop.f32.mrb[2].mxu0 }
 0x406   : > { %v1661_v50 = vpop.f32.mrb[3].mxu0  ;;  %v1716_v51 = vpop.f32.mrb[17].mxu1 }
 0x407   : > { %1879 = vxpose.xlu1.b32.start [1/4] (short) (narrow) %v1716_v51, 16  ;;  %v7783_v52 = vpop.f32.mrb[18].mxu1 }
 0x408   : > { %v1719_v53 = vpop.f32.mrb[19].mxu1 }
 0x409   : > { %1848 = vxpose.xlu0.b32.cont [2/4] (short) (narrow) %v1661_v50, 16 }
 0x40b   : > { %1880 = vxpose.xlu1.b32.cont [2/4] (short) (narrow) %v1719_v53, 16  ;;  %v7788_v54 = vpop.f32.mrb[4].mxu0 }
 0x40c   : > { %v1774_v55 = vpop.f32.mrb[5].mxu0 }
 0x40d   : > { %1849 = vxpose.xlu0.b32.cont [3/4] (short) (narrow) %v7776_v45, 16  ;;  %v7789_v56 = vpop.f32.mrb[6].mxu0 }
 0x40e   : > { %v1777_v57 = vpop.f32.mrb[7].mxu0 }
 0x40f   : > { %1881 = vxpose.xlu1.b32.cont [3/4] (short) (narrow) %v7782_v48, 16 }
 0x411   : > { %1850 = vxpose.xlu0.b32.end [4/4] (short) (narrow) %v7777_v49, 16 }
 0x412   : > { %v7794_v58 = vpop.f32.mrb[20].mxu1 }
 0x413   : > { %1882 = vxpose.xlu1.b32.end [4/4] (short) (narrow) %v7783_v52, 16  ;;  %v1832_v59 = vpop.f32.mrb[21].mxu1 }
 0x414   : > { %v7795_v60 = vpop.f32.mrb[22].mxu1 }
 0x415   : > { %1911 = vxpose.xlu0.b32.start [1/4] (short) (narrow) %v1774_v55, 16  ;;  %v1835_v61 = vpop.f32.mrb[23].mxu1 }
 0x417   : > { %1943 = vxpose.xlu1.b32.start [1/4] (short) (narrow) %v1832_v59, 16 }
 0x419   : > { %1912 = vxpose.xlu0.b32.cont [2/4] (short) (narrow) %v1777_v57, 16 }
 0x41b   : > { %1944 = vxpose.xlu1.b32.cont [2/4] (short) (narrow) %v1835_v61, 16 }
 0x41d   : > { %1913 = vxpose.xlu0.b32.cont [3/4] (short) (narrow) %v7788_v54, 16 }
 0x41f   : > { %1945 = vxpose.xlu1.b32.cont [3/4] (short) (narrow) %v7794_v58, 16 }
 0x421   : > { %1914 = vxpose.xlu0.b32.end [4/4] (short) (narrow) %v7789_v56, 16 }
 0x423   : > { %1946 = vxpose.xlu1.b32.end [4/4] (short) (narrow) %v7795_v60, 16 }
 0x485   : > { %v1863_v7 = vpop.trf.xlu0 }
 0x487   : > { %v1895_v9 = vpop.trf.xlu1 }
 0x489   : > { %v1864_v2 = vpop.trf.xlu0 }
 0x48b   : > { %v1896_v15 = vpop.trf.xlu1 }
 0x495   : > { %v1927_v16 = vpop.trf.xlu0 }
 0x496   : > { %v1975_v3 = vcombine.low %v1863_v7, %v1927_v16  ;;  %v1976_v5 = vcombine.high %v1863_v7, %v1927_v16 }
 0x497   : > { %v1959_v10 = vpop.trf.xlu1 }
 0x498   : > { %v1991_v12 = vcombine.low %v1895_v9, %v1959_v10  ;;  %v1992_v17 = vcombine.high %v1895_v9, %v1959_v10  ;;  %v1983_v11 = vrot.slane %v1975_v3, %v8577_v26  ;;  %v1990_v13 = vrot.slane %v1976_v5, %v8577_v26 }
 0x499   : > { %v1928_v18 = vpop.trf.xlu0 }
 0x49a   : > { %v1999_v20 = vrot.slane %v1991_v12, %v8577_v26  ;;  %v2006_v21 = vrot.slane %v1992_v17, %v8577_v26  ;;  %v2043_v22 = vcombine.low %v1864_v2, %v1928_v18  ;;  %v2044_v23 = vcombine.high %v1864_v2, %v1928_v18  ;;  %v8025_v12 = vld [vmem:[%s9934_s26 + $0x38] sm:$0xff]   ;;  %s806_s26 = scalar_lea.vmem %s9940_s22, %s8516_s23  ;;  %s7437_s23 = sshll.u32 %s795_s6, 4 }
 0x49b   : > { %v1960_v24 = vpop.trf.xlu1  ;;  %7811 = vmatpush3.bf16.msra.mxu0 %v8025_v12  ;;  %v2280_v12 = vld [vmem:[%s806_s26 + $0x8] sm:$0xff]  ;;  %s8254_s22 = sshll.u32 %s8338_s1, 4  ;;  %s8255_s22 = int_to_ptr.vmem [resolvable:$false] %s8254_s22 }
 0x49c   : > { %v2007_v25 = vcombine.low %v1983_v11, %v1999_v20  ;;  %v2008_v27 = vcombine.high %v1983_v11, %v1999_v20  ;;  %v2023_v28 = vcombine.low %v1990_v13, %v2006_v21  ;;  %v2024_v29 = vcombine.high %v1990_v13, %v2006_v21 }
 0x49d   : > { %v2059_v30 = vcombine.low %v1896_v15, %v1960_v24  ;;  %v2060_v31 = vcombine.high %v1896_v15, %v1960_v24  ;;  %v2051_v36 = vrot.slane %v2043_v22, %v8577_v26  ;;  %v2058_v37 = vrot.slane %v2044_v23, %v8577_v26 }
 0x49e   : > { %v2015_v32 = vrot.slane %v2007_v25, %v8583_v47  ;;  %v2022_v33 = vrot.slane %v2008_v27, %v8583_v47  ;;  %v2031_v34 = vrot.slane %v2023_v28, %v8583_v47  ;;  %v2038_v35 = vrot.slane %v2024_v29, %v8583_v47 }
 0x49f   : > { %v2067_v38 = vrot.slane %v2059_v30, %v8577_v26  ;;  %v2074_v39 = vrot.slane %v2060_v31, %v8577_v26  ;;  %v8028_v30 = vld [vmem:[%s9874_s10 + $0x4] ss:$8 sps:$4 sm:$0xff]  }
 0x4a0   : > { %v2111_v40 = vcombine.low %v2015_v32, %v2022_v33  ;;  %v7475_v41 = vcombine.high %v2015_v32, %v2022_v33  ;;  %v2127_v42 = vcombine.low %v2031_v34, %v2038_v35  ;;  %v7476_v44 = vcombine.high %v2031_v34, %v2038_v35  ;;  %2663 = vmatprep.subr.bf16.mxu0 %v8028_v30 }
 0x4a1   : > { %v2075_v45 = vcombine.low %v2051_v36, %v2067_v38  ;;  %v2076_v46 = vcombine.high %v2051_v36, %v2067_v38  ;;  %v2091_v48 = vcombine.low %v2058_v37, %v2074_v39  ;;  %v2092_v49 = vcombine.high %v2058_v37, %v2074_v39 }
 0x4a2   : > { %v2118_v50 = vrot.slane %v2111_v40, %v8577_v26  ;;  %v2126_v51 = vrot.slane %v7475_v41, %v8577_v26  ;;  %v2134_v52 = vrot.slane %v2127_v42, %v8577_v26  ;;  %v2142_v53 = vrot.slane %v7476_v44, %v8577_v26 }
 0x4a3   : > { %v2083_v54 = vrot.slane %v2075_v45, %v8583_v47  ;;  %v2090_v55 = vrot.slane %v2076_v46, %v8583_v47  ;;  %v2099_v56 = vrot.slane %v2091_v48, %v8583_v47  ;;  %v2106_v57 = vrot.slane %v2092_v49, %v8583_v47 }
 0x4a4   : > { %v2144_v58 = vcombine.high %v2118_v50, %v2126_v51  ;;  %v2160_v59 = vcombine.high %v2134_v52, %v2142_v53  ;;  %v2143_v60 = vcombine.low %v2118_v50, %v2126_v51  ;;  %v2159_v61 = vcombine.low %v2134_v52, %v2142_v53  ;;  %v8026_v53 = vld [vmem:[%s9874_s10] ss:$8 sps:$4 sm:$0xff]  }
 0x4a5   : > { %v2179_v0 = vcombine.low %v2083_v54, %v2090_v55  ;;  %v7477_v1 = vcombine.high %v2083_v54, %v2090_v55  ;;  %v2195_v8 = vcombine.low %v2099_v56, %v2106_v57  ;;  %v7478_v6 = vcombine.high %v2099_v56, %v2106_v57  ;;  %v8031_v55 = vld [vmem:[%s9874_s10 + $0x14] ss:$8 sps:$4 sm:$0xff]   ;;  %v8029_v56 = vld [vmem:[%s9874_s10 + $0x10] ss:$8 sps:$4 sm:$0xff]   ;;  %v8034_v57 = vld [vmem:[%s9874_s10 + $0x24] ss:$8 sps:$4 sm:$0xff]  }
 0x4a6   : > { %v2151_v63 = vrot.slane %v2143_v60, %v8583_v47  ;;  %v2167_v7 = vrot.slane %v2159_v61, %v8583_v47  ;;  %v2158_v3 = vrot.slane %v2144_v58, %v8583_v47  ;;  %v2174_v5 = vrot.slane %v2160_v59, %v8583_v47  ;;  %v8032_v58 = vld [vmem:[%s9874_s10 + $0x20] ss:$8 sps:$4 sm:$0xff]   ;;  %v8037_v59 = vld [vmem:[%s9874_s10 + $0x34] ss:$8 sps:$4 sm:$0xff]   ;;  %v8035_v60 = vld [vmem:[%s9874_s10 + $0x30] ss:$8 sps:$4 sm:$0xff]  }
 0x4a7   : > { %v2186_v9 = vrot.slane %v2179_v0, %v8577_v26  ;;  %v2194_v2 = vrot.slane %v7477_v1, %v8577_v26  ;;  %v2202_v15 = vrot.slane %v2195_v8, %v8577_v26  ;;  %v2210_v16 = vrot.slane %v7478_v6, %v8577_v26  ;;  %v8040_v61 = vld [vmem:[%s9874_s10 + $0x44] ss:$8 sps:$4 sm:$0xff]   ;;  %v8043_v0 = vld [vmem:[%s9874_s10 + $0x54] ss:$8 sps:$4 sm:$0xff]   ;;  %v8041_v1 = vld [vmem:[%s9874_s10 + $0x50] ss:$8 sps:$4 sm:$0xff]  }
 0x4a8   : > { %v2175_v10 = vcombine.low %v2151_v63, %v2167_v7  ;;  %v2177_v24 = vcombine.low %v2158_v3, %v2174_v5  ;;  %v2176_v27 = vcombine.high %v2151_v63, %v2167_v7  ;;  %v2178_v34 = vcombine.high %v2158_v3, %v2174_v5  ;;  %v8046_v8 = vld [vmem:[%s9874_s10 + $0x64] ss:$8 sps:$4 sm:$0xff]   ;;  %v8044_v6 = vld [vmem:[%s9874_s10 + $0x60] ss:$8 sps:$4 sm:$0xff]   ;;  %v8049_v63 = vld [vmem:[%s9874_s10 + $0x74] ss:$8 sps:$4 sm:$0xff]  }
 0x4a9   : > { %v2212_v17 = vcombine.high %v2186_v9, %v2194_v2  ;;  %v2228_v18 = vcombine.high %v2202_v15, %v2210_v16  ;;  %v2211_v11 = vcombine.low %v2186_v9, %v2194_v2  ;;  %v2227_v13 = vcombine.low %v2202_v15, %v2210_v16  ;;  %v8047_v7 = vld [vmem:[%s9874_s10 + $0x70] ss:$8 sps:$4 sm:$0xff]   ;;  %v2553_v9 = vld [vmem:[%s826_s21] sm:$0xff] }
 0x4aa   : > { %v2571_v2 = vpack.c.bf16 %v2553_v9, %v2553_v9  ;;  %v7479_v15 = vld [vmem:[%s9871_s7] ss:$0 sm:$0xff] }
 0x4ab   : > { %v2226_v20 = vrot.slane %v2212_v17, %v8583_v47  ;;  %v2242_v21 = vrot.slane %v2228_v18, %v8583_v47  ;;  %v2219_v22 = vrot.slane %v2211_v11, %v8583_v47  ;;  %v2235_v23 = vrot.slane %v2227_v13, %v8583_v47  ;;  %v2279_v16 = vld [vmem:[%s806_s26] sm:$0xff]  ;;  %s8256_s26 = scalar_lea.vmem %s8255_s22, 512 }
 0x4ad   : > { %v2245_v25 = vcombine.low %v2226_v20, %v2242_v21  ;;  %v2244_v28 = vcombine.high %v2219_v22, %v2235_v23  ;;  %v2243_v29 = vcombine.low %v2219_v22, %v2235_v23  ;;  %v2246_v33 = vcombine.high %v2226_v20, %v2242_v21  ;;  %v2570_v21 = vld [vmem:[%s9875_s11] sm:$0x3] }
 0x4ae   : > { %v2575_v22 = vsub.s32 0, %v8574_v19 }
 0x4af   : > { %v7990_v31 = vpack.i.bf16 %v2245_v25, %v2177_v24  ;;  %v7985_v32 = vpack.i.bf16 %v2244_v28, %v2176_v27  ;;  %v7995_v35 = vpack.i.bf16 %v2246_v33, %v2178_v34  ;;  %v2579_v27 = vsub.s32 1, %v8574_v19 }
 0x4b0   : > { %v2576_v23 = vrot.slane %v2570_v21, %v2575_v22 }
 0x4b1   : > { %7991 = vrot.lane.b32.xlu1 %v7990_v31, %s9935_s29  ;;  %7986 = vrot.lane.b32.xlu0 %v7985_v32, %s9936_s25  ;;  %v2580_v31 = vrot.slane %v2570_v21, %v2579_v27 }
 0x4b5   : > { %7996 = vrot.lane.b32.xlu1 %v7995_v35, %s9937_s3 }
 0x523   : > { %v7992_v36 = vpop.permute.xlu1 %7991  ;;  %v7987_v37 = vpop.permute.xlu0 %7986 }
 0x524   : > { %v7989_v38 = vunpack.i.h.bf16 %v7987_v37  ;;  %v7988_v39 = vunpack.i.l.bf16 %v7987_v37  ;;  %v7994_v40 = vunpack.i.h.bf16 %v7992_v36  ;;  %v7993_v41 = vunpack.i.l.bf16 %v7992_v36 }
 0x526   : > { %v2271_v42 = vsel %vm1256_vm1, %v2175_v10, %v7988_v39  ;;  %v2272_v44 = vsel %vm1256_vm1, %v2243_v29, %v7989_v38  ;;  %v8050_v29 = vld [vmem:[%s9872_s8] sm:$0xff]  }
 0x527   : > { %v7997_v45 = vpop.permute.xlu1 %7996  ;;  %v2274_v49 = vsel %vm2273_vm3, %v2271_v42, %v7993_v41  ;;  %v2275_v50 = vsel %vm2273_vm3, %v2272_v44, %v7994_v40  ;;  %7817 = vmatpush3.bf16.msra.mxu1 %v8050_v29  ;;  %v8051_v42 = vld [vmem:[%s9872_s8 + $0x8] sm:$0xff]   ;;  %v8052_v44 = vld [vmem:[%s9872_s8 + $0x10] sm:$0xff]  }
 0x528   : > { %v7999_v46 = vunpack.i.h.bf16 %v7997_v45  ;;  %v7998_v48 = vunpack.i.l.bf16 %v7997_v45  ;;  %7818 = vmatprep.subr.bf16.mxu1 %v8333_v4  ;;  %v8053_v45 = vld [vmem:[%s9872_s8 + $0x18] sm:$0xff]  }
 0x52a   : > { %v2277_v51 = vsel %vm2276_vm4, %v2274_v49, %v7998_v48  ;;  %v2278_v52 = vsel %vm2276_vm4, %v2275_v50, %v7999_v46  ;;  %v8054_v46 = vld [vmem:[%s9872_s8 + $0x20] sm:$0xff]   ;;  %v8055_v48 = vld [vmem:[%s9872_s8 + $0x28] sm:$0xff]   ;;  %v8056_v49 = vld [vmem:[%s9872_s8 + $0x30] sm:$0xff]  }
 0x52b   : > { %v2298_v54 = vpack.c.bf16 %v2278_v52, %v2277_v51  ;;  %7819 = vmatpush3.bf16.msra.mxu1 %v8051_v42  ;;  %v8057_v50 = vld [vmem:[%s9872_s8 + $0x38] sm:$0xff]  }
 0x52c   : > { %7820 = vmatprep.subr.bf16.mxu1 %v8333_v4 }
 0x52d   : > { %7813 = vmatmul.mubr.bf16.vlgmr.msra.gmra.mrb[8].mxu0 %v2298_v54 }
 0x52e   : > { %2664 = vmatpush1.bf16.msra.mxu0 %v8026_v53  ;;  %2695 = vmatprep.mubr.bf16.mxu0 %v8337_v43 }
 0x52f   : > { %2665 = vmatprep.subr.bf16.mxu0 %v8031_v55  ;;  %7821 = vmatpush3.bf16.msra.mxu1 %v8052_v44 }
 0x530   : > { %7822 = vmatprep.subr.bf16.mxu1 %v8333_v4 }
 0x532   : > { %2666 = vmatpush1.bf16.msra.mxu0 %v8029_v56 }
 0x533   : > { %2667 = vmatprep.subr.bf16.mxu0 %v8034_v57  ;;  %7823 = vmatpush3.bf16.msra.mxu1 %v8053_v45 }
 0x534   : > { %7824 = vmatprep.subr.bf16.mxu1 %v8333_v4 }
 0x536   : > { %2668 = vmatpush1.bf16.msra.mxu0 %v8032_v58 }
 0x537   : > { %2669 = vmatprep.subr.bf16.mxu0 %v8037_v59  ;;  %7825 = vmatpush3.bf16.msra.mxu1 %v8054_v46 }
 0x538   : > { %7826 = vmatprep.subr.bf16.mxu1 %v8333_v4 }
 0x53a   : > { %2670 = vmatpush1.bf16.msra.mxu0 %v8035_v60 }
 0x53b   : > { %2671 = vmatprep.subr.bf16.mxu0 %v8040_v61  ;;  %7827 = vmatpush3.bf16.msra.mxu1 %v8055_v48 }
 0x53c   : > { %7828 = vmatprep.subr.bf16.mxu1 %v8333_v4 }
 0x53e   : > { %2672 = vmatpush1.bf16.msra.mxu0 %v8038_v62 }
 0x53f   : > { %2673 = vmatprep.subr.bf16.mxu0 %v8043_v0  ;;  %7829 = vmatpush3.bf16.msra.mxu1 %v8056_v49 }
 0x540   : > { %7830 = vmatprep.subr.bf16.mxu1 %v8333_v4 }
 0x542   : > { %2674 = vmatpush1.bf16.msra.mxu0 %v8041_v1 }
 0x543   : > { %2675 = vmatprep.subr.bf16.mxu0 %v8046_v8  ;;  %7831 = vmatpush3.bf16.msra.mxu1 %v8057_v50 }
 0x544   : > { %7836 = vmatprep.subr.bf16.mxu1 %v8333_v4 }
 0x546   : > { %2676 = vmatpush1.bf16.msra.mxu0 %v8044_v6 }
 0x547   : > { %2677 = vmatprep.subr.bf16.mxu0 %v8049_v63 }
 0x54a   : > { %2678 = vmatpush1.bf16.msra.mxu0 %v8047_v7 }
 0x54d   : > { %2696 = vmatmul.mubr.bf16.vlgmr.msra.gmra.mrb[12].mxu0 %v2571_v2 }
 0x600   : > { %v2387_v3 = vpop.f32.mrb[8].mxu0 }
 0x601   : > { %v2388_v5 = vadd.f32 %v7479_v15, %v2387_v3  ;;  %v7814_v10 = vpop.f32.mrb[9].mxu0 }
 0x602   : > { %v2390_v17 = vpop.f32.mrb[10].mxu0 }
 0x603   : > { %v8837_v18 = vadd.f32 %v2388_v5, %v2279_v16  ;;  %v2391_v11 = vadd.f32 %v7479_v15, %v2390_v17  ;;  %v7815_v13 = vpop.f32.mrb[11].mxu0  ;;  %v7488_v17 = vld [vmem:[%s9878_s14] ss:$0 sm:$0xff] }
 0x605   : > { %v8839_v20 = vadd.f32 %v2391_v11, %v2280_v12  ;;  %2398 = vadd.xlane.f32.xlu0 %v8837_v18 }
 0x607   : > { %2400 = vadd.xlane.f32.xlu1 %v8839_v20 }
 0x620   : > { %v2697_v24 = vpop.f32.mrb[12].mxu0 }
 0x621   : > { %v8849_v25 = vadd.f32 %v2697_v24, %v2576_v23  ;;  %v2699_v28 = vpop.f32.mrb[13].mxu0 }
 0x622   : > { %v2701_v30 = vpop.f32.mrb[14].mxu0  ;;  %v8862_v33 = vadd.f32 %v2699_v28, %v2580_v31  ;;  %v7489_v28 = vld [vmem:[%s9879_s15] ss:$0 sm:$0xff] }
 0x623   : > { %2712 = vrot.lane.b32.xlu1 %v8849_v25, %s9937_s3  ;;  %v2702_v32 = vpop.f32.mrb[15].mxu0 }
 0x627   : > { %2718 = vrot.lane.b32.xlu1 %v8849_v25, %s9936_s25 }
 0x692   : > { %v2399_v34 = vpop.xlane.xlu0 %2398 }
 0x693   : > { %v2403_v35 = vmul.f32 0.0078125, %v2399_v34 }
 0x694   : > { %v2401_v36 = vpop.xlane.xlu1 %2400 }
 0x695   : > { %v2404_v37 = vmul.f32 0.0078125, %v2401_v36  ;;  %v2405_v38 = vsub.f32 %v8837_v18, %v2403_v35 }
 0x697   : > { %v2407_v39 = vmul.f32 %v2405_v38, %v2405_v38  ;;  %v2406_v40 = vsub.f32 %v8839_v20, %v2404_v37 }
 0x698   : > { %v2713_v51 = vpop.permute.xlu1 %2712 }
 0x699   : > { %2409 = vadd.xlane.f32.xlu0 %v2407_v39  ;;  %v2408_v41 = vmul.f32 %v2406_v40, %v2406_v40 }
 0x69c   : > { %v2719_v54 = vpop.permute.xlu1 %2718 }
 0x69d   : > { %2411 = vadd.xlane.f32.xlu0 %v2408_v41  ;;  %v2737_v58 = vcombine.low %v2713_v51, %v2719_v54  ;;  %v2738_v59 = vcombine.high %v2713_v51, %v2719_v54 }
 0x69f   : > { %v2745_v62 = vrot.slane %v2737_v58, %v8577_v26  ;;  %v2752_v8 = vrot.slane %v2738_v59, %v8577_v26 }
 0x6b3   : > { %2715 = vrot.lane.b32.xlu0 %v8849_v25, %s9935_s29 }
 0x726   : > { %v2410_v52 = vpop.xlane.xlu0 %2409 }
 0x727   : > { %v2413_v53 = vmul.f32 0.0078125, %v2410_v52 }
 0x729   : > { %v2415_v55 = vadd.f32 1e-05, %v2413_v53 }
 0x72a   : > { %v2412_v56 = vpop.xlane.xlu0 %2411 }
 0x72b   : > { %8178 = vrsqrt.f32 %v2415_v55  ;;  %v2414_v57 = vmul.f32 0.0078125, %v2412_v56 }
 0x72d   : > { %v2416_v60 = vadd.f32 1e-05, %v2414_v57 }
 0x72e   : > { %v2716_v61 = vpop.permute.xlu0 %2715 }
 0x72f   : > { %8180 = vrsqrt.f32 %v2416_v60  ;;  %v2721_v0 = vcombine.low %v8849_v25, %v2716_v61  ;;  %v2722_v1 = vcombine.high %v8849_v25, %v2716_v61 }
 0x731   : > { %v2729_v6 = vrot.slane %v2721_v0, %v8577_v26  ;;  %v2736_v63 = vrot.slane %v2722_v1, %v8577_v26 }
 0x733   : > { %v2753_v7 = vcombine.low %v2729_v6, %v2745_v62  ;;  %v2754_v9 = vcombine.high %v2729_v6, %v2745_v62  ;;  %v2769_v2 = vcombine.low %v2736_v63, %v2752_v8  ;;  %v2770_v23 = vcombine.high %v2736_v63, %v2752_v8 }
 0x735   : > { %v8179_v15 = vpop.eup %8178  ;;  %v2768_v16 = vrot.slane %v2754_v9, %v8583_v47  ;;  %v2761_v3 = vrot.slane %v2753_v7, %v8583_v47  ;;  %v2777_v11 = vrot.slane %v2769_v2, %v8583_v47  ;;  %v2784_v32 = vrot.slane %v2770_v23, %v8583_v47 }
 0x736   : > { %v2419_v5 = vmul.f32 %v8179_v15, %v2405_v38 }
 0x737   : > { %v2791_v10 = vpack.c.bf16 %v2768_v16, %v2768_v16  ;;  %v2789_v12 = vpack.c.bf16 %v2761_v3, %v2761_v3  ;;  %v2786_v13 = vcombine.high %v2768_v16, %v8333_v4  ;;  %v2793_v29 = vpack.c.bf16 %v2777_v11, %v2777_v11 }
 0x738   : > { %v2427_v25 = vmul.f32 %v7488_v17, %v2419_v5  ;;  %v2787_v34 = vcombine.high %v2777_v11, %v8333_v4  ;;  %v2795_v38 = vpack.c.bf16 %v2784_v32, %v2784_v32  ;;  %v2785_v41 = vcombine.high %v2761_v3, %v8333_v4 }
 0x739   : > { %v8181_v21 = vpop.eup %8180  ;;  %2929 = vxpose.xlu0.c.b16.start.end [1/1] (short) (narrow) %v2791_v10, 32  ;;  %2897 = vxpose.xlu1.c.b16.start.end [1/1] (short) (narrow) %v2789_v12, 32  ;;  %v2792_v30 = vpack.c.bf16 %v2786_v13, %v2786_v13 }
 0x73a   : > { %v2420_v24 = vmul.f32 %v8181_v21, %v2406_v40  ;;  %v2435_v35 = vadd.f32 %v7489_v28, %v2427_v25  ;;  %v2794_v39 = vpack.c.bf16 %v2787_v34, %v2787_v34  ;;  %v2788_v40 = vcombine.high %v2784_v32, %v8333_v4 }
 0x73b   : > { %v2790_v44 = vpack.c.bf16 %v2785_v41, %v2785_v41 }
 0x73c   : > { %v2428_v31 = vmul.f32 %v7488_v17, %v2420_v24  ;;  %v2796_v42 = vpack.c.bf16 %v2788_v40, %v2788_v40 }
 0x73e   : > { %2961 = vxpose.xlu0.c.b16.start.end [1/1] (short) (narrow) %v2793_v29, 32  ;;  %2945 = vxpose.xlu1.c.b16.start.end [1/1] (short) (narrow) %v2792_v30, 32  ;;  %v2436_v36 = vadd.f32 %v7489_v28, %v2428_v31 }
 0x740   : > { %v2454_v37 = vpack.c.bf16 %v2436_v36, %v2435_v35 }
 0x742   : > { %7833 = vmatmul.mubr.bf16.vlgmr.msra.gmra.mrb[24].mxu1 %v2454_v37 }
 0x743   : > { %2993 = vxpose.xlu0.c.b16.start.end [1/1] (short) (narrow) %v2795_v38, 32  ;;  %2977 = vxpose.xlu1.c.b16.start.end [1/1] (short) (narrow) %v2794_v39, 32 }
 0x744   : > { %7840 = vmatprep.mubr.msk.bf16.mxu1 %vm8334_vm0, %v8333_v4 }
 0x748   : > { %3009 = vxpose.xlu1.c.b16.start.end [1/1] (short) (narrow) %v2796_v42, 32  ;;  %2913 = vxpose.xlu0.c.b16.start.end [1/1] (short) (narrow) %v2790_v44, 32 }
 0x79f   : > { %v2937_v45 = vpop.trf.xlu0  ;;  %v2905_v46 = vpop.trf.xlu1 }
 0x7a0   : > { %v3037_v58 = vshrl.u32 %v2937_v45, 16  ;;  %v3029_v62 = vshrl.u32 %v2905_v46, 16 }
 0x7a3   : > { %v8918_v48 = vpop.trf.xlu0  ;;  %v8920_v49 = vpop.trf.xlu1 }
 0x7a7   : > { %v2969_v50 = vpop.trf.xlu0  ;;  %v2953_v51 = vpop.trf.xlu1 }
 0x7a8   : > { %v3045_v59 = vshrl.u32 %v2969_v50, 16  ;;  %v3038_v60 = vshrl.u32 %v2953_v51, 16  ;;  %v3035_v0 = vpack.i.b16 %v2953_v51, %v2937_v45 }
 0x7aa   : > { %v3039_v16 = vpack.i.b16 %v3038_v60, %v3037_v58 }
 0x7ab   : > { %v8922_v52 = vpop.trf.xlu0  ;;  %v8924_v53 = vpop.trf.xlu1 }
 0x7af   : > { %v3001_v54 = vpop.trf.xlu0  ;;  %v2985_v55 = vpop.trf.xlu1 }
 0x7b0   : > { %v3046_v61 = vshrl.u32 %v2985_v55, 16  ;;  %v3053_v1 = vshrl.u32 %v3001_v54, 16  ;;  %v3043_v8 = vpack.i.b16 %v2985_v55, %v2969_v50 }
 0x7b2   : > { %v3047_v3 = vpack.i.b16 %v3046_v61, %v3045_v59 }
 0x7b3   : > { %v8926_v56 = vpop.trf.xlu0  ;;  %v8928_v57 = vpop.trf.xlu1 }
 0x7b7   : > { %v3017_v6 = vpop.trf.xlu1  ;;  %v2921_v63 = vpop.trf.xlu0 }
 0x7b8   : > { %v3051_v7 = vpack.i.b16 %v3017_v6, %v3001_v54  ;;  %v3054_v9 = vshrl.u32 %v3017_v6, 16  ;;  %v3027_v2 = vpack.i.b16 %v2921_v63, %v2905_v46  ;;  %v3030_v15 = vshrl.u32 %v2921_v63, 16 }
 0x7b9   : > { %v3070_v6 = vshrl.u32 %v8924_v53, 16  ;;  %v3085_v63 = vshrl.u32 %v8926_v56, 16 }
 0x7ba   : > { %v3055_v5 = vpack.i.b16 %v3054_v9, %v3053_v1  ;;  %v3105_v10 = vcombine.low %v3035_v0, %v3051_v7  ;;  %v3031_v12 = vpack.i.b16 %v3030_v15, %v3029_v62  ;;  %v3089_v17 = vcombine.low %v3027_v2, %v3043_v8 }
 0x7bb   : > { %v3106_v11 = vcombine.high %v3035_v0, %v3051_v7  ;;  %v3090_v13 = vcombine.high %v3027_v2, %v3043_v8  ;;  %v3018_v59 = vpop.trf.xlu1  ;;  %v2922_v60 = vpop.trf.xlu0  ;;  %v3069_v62 = vshrl.u32 %v8918_v48, 16  ;;  %v3061_v0 = vshrl.u32 %v8920_v49, 16 }
 0x7bc   : > { %v3097_v21 = vrot.slane %v3089_v17, %v8577_v26  ;;  %v3113_v23 = vrot.slane %v3105_v10, %v8577_v26  ;;  %v3157_v24 = vcombine.low %v3031_v12, %v3047_v3  ;;  %v3173_v25 = vcombine.low %v3039_v16, %v3055_v5 }
 0x7bd   : > { %v3104_v34 = vrot.slane %v3090_v13, %v8577_v26  ;;  %v3120_v35 = vrot.slane %v3106_v11, %v8577_v26  ;;  %v3158_v36 = vcombine.high %v3031_v12, %v3047_v3  ;;  %v3174_v38 = vcombine.high %v3039_v16, %v3055_v5 }
 0x7be   : > { %v3121_v28 = vcombine.low %v3097_v21, %v3113_v23  ;;  %v3165_v29 = vrot.slane %v3157_v24, %v8577_v26  ;;  %v3181_v30 = vrot.slane %v3173_v25, %v8577_v26  ;;  %v3122_v31 = vcombine.high %v3097_v21, %v3113_v23 }
 0x7bf   : > { %v3172_v41 = vrot.slane %v3158_v36, %v8577_v26  ;;  %v3188_v42 = vrot.slane %v3174_v38, %v8577_v26  ;;  %v3137_v45 = vcombine.low %v3104_v34, %v3120_v35  ;;  %v3138_v54 = vcombine.high %v3104_v34, %v3120_v35 }
 0x7c0   : > { %v3129_v32 = vrot.slane %v3121_v28, %v8583_v47  ;;  %v3189_v37 = vcombine.low %v3165_v29, %v3181_v30  ;;  %v3190_v40 = vcombine.high %v3165_v29, %v3181_v30  ;;  %v3136_v44 = vrot.slane %v3122_v31, %v8583_v47 }
 0x7c1   : > { %v3205_v50 = vcombine.low %v3172_v41, %v3188_v42  ;;  %v3145_v51 = vrot.slane %v3137_v45, %v8583_v47  ;;  %v3206_v58 = vcombine.high %v3172_v41, %v3188_v42  ;;  %v3152_v61 = vrot.slane %v3138_v54, %v8583_v47 }
 0x7c2   : > { %3361 = vxpose.xlu0.c.b16.start.end [1/1] (short) (narrow) %v3129_v32, 16  ;;  %v3197_v39 = vrot.slane %v3189_v37, %v8583_v47  ;;  %v3204_v46 = vrot.slane %v3190_v40, %v8583_v47  ;;  %v3077_v1 = vshrl.u32 %v8922_v52, 16  ;;  %v3067_v8 = vpack.i.b16 %v8924_v53, %v8918_v48 }
 0x7c3   : > { %v3213_v55 = vrot.slane %v3205_v50, %v8583_v47  ;;  %v3078_v7 = vshrl.u32 %v8928_v57, 16  ;;  %v3086_v9 = vshrl.u32 %v3018_v59, 16  ;;  %v3062_v2 = vshrl.u32 %v2922_v60, 16 }
 0x7c4   : > { %3377 = vxpose.xlu1.c.b16.start.end [1/1] (short) (narrow) %v3197_v39, 16  ;;  %v3220_v15 = vrot.slane %v3206_v58, %v8583_v47  ;;  %v3075_v16 = vpack.i.b16 %v8928_v57, %v8922_v52  ;;  %v3083_v3 = vpack.i.b16 %v3018_v59, %v8926_v56  ;;  %v3059_v5 = vpack.i.b16 %v2922_v60, %v8920_v49 }
 0x7c5   : > { %v3153_v48 = vcombine.high %v3129_v32, %v8337_v43  ;;  %v3071_v53 = vpack.i.b16 %v3070_v6, %v3069_v62  ;;  %v3079_v10 = vpack.i.b16 %v3078_v7, %v3077_v1  ;;  %v3087_v12 = vpack.i.b16 %v3086_v9, %v3085_v63 }
 0x7c6   : > { %3425 = vxpose.xlu0.c.b16.start.end [1/1] (short) (narrow) %v3136_v44, 16  ;;  %v3063_v17 = vpack.i.b16 %v3062_v2, %v3061_v0  ;;  %v3221_v11 = vcombine.high %v3197_v39, %v8337_v43  ;;  %v3241_v13 = vcombine.low %v3067_v8, %v3083_v3  ;;  %v3225_v21 = vcombine.low %v3059_v5, %v3075_v16 }
 0x7c7   : > { %v3154_v23 = vcombine.high %v3136_v44, %v8337_v43  ;;  %v3222_v52 = vcombine.high %v3204_v46, %v8337_v43  ;;  %v3309_v49 = vcombine.low %v3071_v53, %v3087_v12  ;;  %v3155_v57 = vcombine.high %v3145_v51, %v8337_v43 }
 0x7c8   : > { %3441 = vxpose.xlu1.c.b16.start.end [1/1] (short) (narrow) %v3204_v46, 16  ;;  %v3293_v56 = vcombine.low %v3063_v17, %v3079_v10  ;;  %v3233_v24 = vrot.slane %v3225_v21, %v8577_v26  ;;  %v3249_v25 = vrot.slane %v3241_v13, %v8577_v26  ;;  %v3223_v28 = vcombine.high %v3213_v55, %v8337_v43 }
 0x7c9   : > { %v3317_v30 = vrot.slane %v3309_v49, %v8577_v26  ;;  %v3242_v31 = vcombine.high %v3067_v8, %v3083_v3  ;;  %v3226_v32 = vcombine.high %v3059_v5, %v3075_v16  ;;  %v3156_v34 = vcombine.high %v3152_v61, %v8337_v43  ;;  %v7490_v5 = vld [vmem:[%s9873_s9] ss:$0 sm:$0xff] }
 0x7ca   : > { %3489 = vxpose.xlu0.c.b16.start.end [1/1] (short) (narrow) %v3145_v51, 16  ;;  %v3301_v29 = vrot.slane %v3293_v56, %v8577_v26  ;;  %v3257_v35 = vcombine.low %v3233_v24, %v3249_v25  ;;  %v3224_v36 = vcombine.high %v3220_v15, %v8337_v43  ;;  %v3294_v38 = vcombine.high %v3063_v17, %v3079_v10  ;;  %v2886_v56 = vld [vmem:[%s841_s27 + $0x8] sm:$0xff] }
 0x7cb   : > { %v3310_v39 = vcombine.high %v3071_v53, %v3087_v12  ;;  %v3256_v40 = vrot.slane %v3242_v31, %v8577_v26  ;;  %v3240_v41 = vrot.slane %v3226_v32, %v8577_v26  ;;  %v3258_v44 = vcombine.high %v3233_v24, %v3249_v25 }
 0x7cc   : > { %3505 = vxpose.xlu1.c.b16.start.end [1/1] (short) (narrow) %v3213_v55, 16  ;;  %v3325_v37 = vcombine.low %v3301_v29, %v3317_v30  ;;  %v3265_v42 = vrot.slane %v3257_v35, %v8583_v47  ;;  %v3326_v46 = vcombine.high %v3301_v29, %v3317_v30  ;;  %v3308_v50 = vrot.slane %v3294_v38, %v8577_v26 }
 0x7cd   : > { %v3324_v51 = vrot.slane %v3310_v39, %v8577_v26  ;;  %v3272_v54 = vrot.slane %v3258_v44, %v8583_v47  ;;  %v3273_v55 = vcombine.low %v3240_v41, %v3256_v40 }
 0x7ce   : > { %3553 = vxpose.xlu0.c.b16.start.end [1/1] (short) (narrow) %v3152_v61, 16  ;;  %v3333_v45 = vrot.slane %v3325_v37, %v8583_v47  ;;  %v3340_v58 = vrot.slane %v3326_v46, %v8583_v47  ;;  %v3274_v61 = vcombine.high %v3240_v41, %v3256_v40  ;;  %v3289_v6 = vcombine.high %v3265_v42, %v8337_v43 }
 0x7cf   : > { %v3341_v59 = vcombine.low %v3308_v50, %v3324_v51  ;;  %v3281_v60 = vrot.slane %v3273_v55, %v8583_v47  ;;  %v3342_v0 = vcombine.high %v3308_v50, %v3324_v51  ;;  %v3290_v7 = vcombine.high %v3272_v54, %v8337_v43 }
 0x7d0   : > { %3569 = vxpose.xlu1.c.b16.start.end [1/1] (short) (narrow) %v3220_v15, 16  ;;  %v3288_v1 = vrot.slane %v3274_v61, %v8583_v47  ;;  %v3357_v63 = vcombine.high %v3333_v45, %v8337_v43  ;;  %v3358_v9 = vcombine.high %v3340_v58, %v8337_v43 }
 0x7d1   : > { %v3349_v62 = vrot.slane %v3341_v59, %v8583_v47  ;;  %v3356_v8 = vrot.slane %v3342_v0, %v8583_v47  ;;  %v3291_v2 = vcombine.high %v3281_v60, %v8337_v43 }
 0x7d2   : > { %3393 = vxpose.xlu0.c.b16.start.end [1/1] (short) (narrow) %v3153_v48, 16  ;;  %v3292_v16 = vcombine.high %v3288_v1, %v8337_v43 }
 0x7d3   : > { %v3359_v15 = vcombine.high %v3349_v62, %v8337_v43  ;;  %v3360_v3 = vcombine.high %v3356_v8, %v8337_v43 }
 0x7d4   : > { %3409 = vxpose.xlu1.c.b16.start.end [1/1] (short) (narrow) %v3221_v11, 16 }
 0x7d6   : > { %3457 = vxpose.xlu0.c.b16.start.end [1/1] (short) (narrow) %v3154_v23, 16 }
 0x7d8   : > { %3473 = vxpose.xlu1.c.b16.start.end [1/1] (short) (narrow) %v3222_v52, 16  ;;  %v2885_v52 = vld [vmem:[%s841_s27] sm:$0xff]  ;;  %s9945_s27 = sld [smem:[#allocation8_spill]] }
 0x7da   : > { %3521 = vxpose.xlu0.c.b16.start.end [1/1] (short) (narrow) %v3155_v57, 16 }
 0x7dc   : > { %3537 = vxpose.xlu1.c.b16.start.end [1/1] (short) (narrow) %v3223_v28, 16 }
 0x7de   : > { %3585 = vxpose.xlu0.c.b16.start.end [1/1] (short) (narrow) %v3156_v34, 16  ;;  %s7616_s19 = sshll.u32 %s9945_s27, 8 }
 0x7df   : > { %s9816_s24 = scalar_lea.hbm %s9947_s30, %s7616_s19 }
 0x7e0   : > { %3601 = vxpose.xlu1.c.b16.start.end [1/1] (short) (narrow) %v3224_v36, 16 }
 0x7e2   : > { %3617 = vxpose.xlu0.c.b16.start.end [1/1] (short) (narrow) %v3265_v42, 16 }
 0x7e4   : > { %3633 = vxpose.xlu1.c.b16.start.end [1/1] (short) (narrow) %v3333_v45, 16 }
 0x7e6   : > { %3681 = vxpose.xlu0.c.b16.start.end [1/1] (short) (narrow) %v3272_v54, 16 }
 0x7e8   : > { %3697 = vxpose.xlu1.c.b16.start.end [1/1] (short) (narrow) %v3340_v58, 16 }
 0x7ea   : > { %3745 = vxpose.xlu0.c.b16.start.end [1/1] (short) (narrow) %v3281_v60, 16 }
 0x7ec   : > { %3761 = vxpose.xlu1.c.b16.start.end [1/1] (short) (narrow) %v3349_v62, 16 }
 0x7ee   : > { %3809 = vxpose.xlu0.c.b16.start.end [1/1] (short) (narrow) %v3288_v1, 16 }
 0x7f0   : > { %3825 = vxpose.xlu1.c.b16.start.end [1/1] (short) (narrow) %v3356_v8, 16 }
 0x7f2   : > { %3649 = vxpose.xlu0.c.b16.start.end [1/1] (short) (narrow) %v3289_v6, 16 }
 0x7f4   : > { %3665 = vxpose.xlu1.c.b16.start.end [1/1] (short) (narrow) %v3357_v63, 16 }
 0x7f6   : > { %3713 = vxpose.xlu0.c.b16.start.end [1/1] (short) (narrow) %v3290_v7, 16 }
 0x7f8   : > { %3729 = vxpose.xlu1.c.b16.start.end [1/1] (short) (narrow) %v3358_v9, 16 }
 0x7fa   : > { %3777 = vxpose.xlu0.c.b16.start.end [1/1] (short) (narrow) %v3291_v2, 16 }
 0x7fc   : > { %3793 = vxpose.xlu1.c.b16.start.end [1/1] (short) (narrow) %v3359_v15, 16 }
 0x7fe   : > { %3841 = vxpose.xlu0.c.b16.start.end [1/1] (short) (narrow) %v3292_v16, 16 }
 0x800   : > { %3857 = vxpose.xlu1.c.b16.start.end [1/1] (short) (narrow) %v3360_v3, 16 }
 0x804   : > { %8001 = vset.pattern.permute.xlu1 %v8337_v43 }
 0x807   : > { %8000 = vset.pattern.permute.xlu0 %v8337_v43 }
 0x815   : > { %v2543_v48 = vpop.f32.mrb[24].mxu1 }
 0x816   : > { %v2544_v53 = vadd.f32 %v7490_v5, %v2543_v48  ;;  %v7834_v10 = vpop.f32.mrb[25].mxu1 }
 0x817   : > { %v2546_v12 = vpop.f32.mrb[26].mxu1 }
 0x818   : > { %v2547_v17 = vadd.f32 %v7490_v5, %v2546_v12  ;;  %v7835_v11 = vpop.f32.mrb[27].mxu1  ;;  %v2550_v13 = vmul.f32 0.17677669, %v2544_v53 }
 0x81a   : > { %v2551_v21 = vmul.f32 0.17677669, %v2547_v17 }
 0x81c   : > { %v8995_v23 = vpack.c.bf16 %v2551_v21, %v2550_v13 }
 0x81e   : > { %2707 = vrot.lane.b32.xlu1 %v8995_v23, %s9935_s29  ;;  %2705 = vrot.lane.b32.xlu0 %v8995_v23, %s9937_s3 }
 0x822   : > { %2709 = vrot.lane.b32.xlu1 %v8995_v23, %s9936_s25  ;;  %2888 = vperm.xlu0 %8000, %v2885_v52  }
 0x826   : > { %2891 = vperm.xlu1 %8001, %v2886_v56   ;;  %2798 = vrot.lane.b32.xlu0 %v8862_v33, %s9937_s3 }
 0x828   : > { %v3369_v49 = vpop.trf.xlu0 }
 0x82a   : > { %2801 = vrot.lane.b32.xlu1 %v8862_v33, %s9935_s29  ;;  %v3385_v57 = vpop.trf.xlu1 }
 0x82c   : > { %v3433_v24 = vpop.trf.xlu0 }
 0x82d   : > { %v3873_v36 = vcombine.low %v3369_v49, %v3433_v24 }
 0x82e   : > { %2804 = vrot.lane.b32.xlu1 %v8862_v33, %s9936_s25  ;;  %v3449_v25 = vpop.trf.xlu1 }
 0x82f   : > { %v3923_v39 = vcombine.low %v3385_v57, %v3449_v25  ;;  %v3880_v44 = vrot.slane %v3873_v36, %v8577_v26 }
 0x830   : > { %v3497_v28 = vpop.trf.xlu0 }
 0x831   : > { %v3930_v50 = vrot.slane %v3923_v39, %v8577_v26 }
 0x832   : > { %v3513_v29 = vpop.trf.xlu1 }
 0x834   : > { %v3561_v30 = vpop.trf.xlu0 }
 0x835   : > { %v3889_v42 = vcombine.low %v3497_v28, %v3561_v30 }
 0x836   : > { %v3577_v31 = vpop.trf.xlu1 }
 0x837   : > { %v3939_v51 = vcombine.low %v3513_v29, %v3577_v31  ;;  %v3896_v58 = vrot.slane %v3889_v42, %v8577_v26 }
 0x838   : > { %v3401_v32 = vpop.trf.xlu0 }
 0x839   : > { %v3946_v0 = vrot.slane %v3939_v51, %v8577_v26 }
 0x83a   : > { %v3417_v34 = vpop.trf.xlu1 }
 0x83c   : > { %v3465_v35 = vpop.trf.xlu0 }
 0x83d   : > { %v3881_v37 = vcombine.low %v3401_v32, %v3465_v35 }
 0x83e   : > { %v3481_v38 = vpop.trf.xlu1 }
 0x83f   : > { %v3931_v40 = vcombine.low %v3417_v34, %v3481_v38  ;;  %v3888_v45 = vrot.slane %v3881_v37, %v8577_v26 }
 0x840   : > { %v3529_v41 = vpop.trf.xlu0 }
 0x841   : > { %v3938_v54 = vrot.slane %v3931_v40, %v8577_v26  ;;  %v3905_v60 = vcombine.low %v3880_v44, %v3888_v45 }
 0x842   : > { %v3545_v46 = vpop.trf.xlu1 }
 0x843   : > { %v3955_v1 = vcombine.low %v3930_v50, %v3938_v54  ;;  %v9021_v7 = vrot.slane %v3905_v60, %v8583_v47 }
 0x844   : > { %v3593_v55 = vpop.trf.xlu0 }
 0x845   : > { %v3897_v59 = vcombine.low %v3529_v41, %v3593_v55  ;;  %v9028_v16 = vrot.slane %v3955_v1, %v8583_v47 }
 0x846   : > { %v3609_v61 = vpop.trf.xlu1 }
 0x847   : > { %v3904_v62 = vrot.slane %v3897_v59, %v8577_v26  ;;  %v3947_v8 = vcombine.low %v3545_v46, %v3609_v61 }
 0x848   : > { %v3625_v6 = vpop.trf.xlu0 }
 0x849   : > { %v3913_v63 = vcombine.low %v3896_v58, %v3904_v62  ;;  %v3954_v9 = vrot.slane %v3947_v8, %v8577_v26 }
 0x84a   : > { %v3641_v15 = vpop.trf.xlu1 }
 0x84b   : > { %v9025_v2 = vrot.slane %v3913_v63, %v8583_v47  ;;  %v3963_v3 = vcombine.low %v3946_v0, %v3954_v9 }
 0x84c   : > { %v3689_v5 = vpop.trf.xlu0 }
 0x84d   : > { %v3970_v48 = vrot.slane %v3963_v3, %v8583_v47  ;;  %v3921_v53 = vcombine.low %v9021_v7, %v9025_v2  ;;  %v3973_v24 = vcombine.low %v3625_v6, %v3689_v5 }
 0x84e   : > { %v3705_v10 = vpop.trf.xlu1 }
 0x84f   : > { %v3971_v17 = vcombine.low %v9028_v16, %v3970_v48  ;;  %v4023_v29 = vcombine.low %v3641_v15, %v3705_v10  ;;  %v3980_v34 = vrot.slane %v3973_v24, %v8577_v26  ;;  %v4077_v63 = vshrl.u32 %v3921_v53, 16 }
 0x850   : > { %v3753_v12 = vpop.trf.xlu0 }
 0x851   : > { %v4075_v11 = vpack.i.b16 %v3971_v17, %v3921_v53  ;;  %v4030_v37 = vrot.slane %v4023_v29, %v8577_v26  ;;  %v4078_v9 = vshrl.u32 %v3971_v17, 16  ;;  %v3922_v53 = vcombine.high %v9021_v7, %v9025_v2 }
 0x852   : > { %v3769_v13 = vpop.trf.xlu1 }
 0x853   : > { %7837 = vmatpush3.bf16.msra.mxu1 %v4075_v11  ;;  %v4079_v5 = vpack.i.b16 %v4078_v9, %v4077_v63 }
 0x854   : > { %v3817_v21 = vpop.trf.xlu0  ;;  %7838 = vmatprep.subr.bf16.mxu1 %v8333_v4 }
 0x855   : > { %v3989_v32 = vcombine.low %v3753_v12, %v3817_v21  ;;  %v3972_v12 = vcombine.high %v9028_v16, %v3970_v48 }
 0x856   : > { %v3833_v52 = vpop.trf.xlu1 }
 0x857   : > { %v4039_v38 = vcombine.low %v3769_v13, %v3833_v52  ;;  %v3996_v41 = vrot.slane %v3989_v32, %v8577_v26  ;;  %v4083_v21 = vpack.i.b16 %v3972_v12, %v3922_v53  ;;  %v4085_v52 = vshrl.u32 %v3922_v53, 16 }
 0x858   : > { %v3657_v56 = vpop.trf.xlu0 }
 0x859   : > { %v4046_v50 = vrot.slane %v4039_v38, %v8577_v26 }
 0x85a   : > { %v3673_v49 = vpop.trf.xlu1 }
 0x85c   : > { %v3721_v57 = vpop.trf.xlu0 }
 0x85d   : > { %v3981_v25 = vcombine.low %v3657_v56, %v3721_v57  ;;  %v4086_v56 = vshrl.u32 %v3972_v12, 16 }
 0x85e   : > { %v3737_v28 = vpop.trf.xlu1 }
 0x85f   : > { %v4031_v30 = vcombine.low %v3673_v49, %v3737_v28  ;;  %v3988_v35 = vrot.slane %v3981_v25, %v8577_v26  ;;  %v4087_v2 = vpack.i.b16 %v4086_v56, %v4085_v52 }
 0x860   : > { %v3785_v31 = vpop.trf.xlu0 }
 0x861   : > { %v4038_v39 = vrot.slane %v4031_v30, %v8577_v26  ;;  %v4005_v44 = vcombine.low %v3980_v34, %v3988_v35 }
 0x862   : > { %v3801_v36 = vpop.trf.xlu1 }
 0x863   : > { %v4055_v51 = vcombine.low %v4030_v37, %v4038_v39  ;;  %v4012_v58 = vrot.slane %v4005_v44, %v8583_v47 }
 0x864   : > { %v3849_v40 = vpop.trf.xlu0 }
 0x865   : > { %v3997_v42 = vcombine.low %v3785_v31, %v3849_v40  ;;  %v4062_v61 = vrot.slane %v4055_v51, %v8583_v47 }
 0x866   : > { %v3865_v45 = vpop.trf.xlu1 }
 0x867   : > { %v4004_v46 = vrot.slane %v3997_v42, %v8577_v26  ;;  %v4047_v54 = vcombine.low %v3801_v36, %v3865_v45 }
 0x869   : > { %v4013_v55 = vcombine.low %v3996_v41, %v4004_v46  ;;  %v4054_v59 = vrot.slane %v4047_v54, %v8577_v26 }
 0x86b   : > { %v4020_v60 = vrot.slane %v4013_v55, %v8583_v47  ;;  %v4063_v62 = vcombine.low %v4046_v50, %v4054_v59 }
 0x86d   : > { %v4070_v0 = vrot.slane %v4063_v62, %v8583_v47  ;;  %v4021_v1 = vcombine.low %v4012_v58, %v4020_v60  ;;  %v4022_v11 = vcombine.high %v4012_v58, %v4020_v60 }
 0x86f   : > { %v4071_v8 = vcombine.low %v4062_v61, %v4070_v0  ;;  %v4093_v15 = vshrl.u32 %v4021_v1, 16  ;;  %v4072_v17 = vcombine.high %v4062_v61, %v4070_v0  ;;  %v4101_v16 = vshrl.u32 %v4022_v11, 16 }
 0x871   : > { %v4091_v6 = vpack.i.b16 %v4071_v8, %v4021_v1  ;;  %v4094_v3 = vshrl.u32 %v4071_v8, 16  ;;  %v4102_v48 = vshrl.u32 %v4072_v17, 16 }
 0x873   : > { %7839 = vmatpush3.bf16.msra.mxu1 %v4091_v6  ;;  %v4095_v10 = vpack.i.b16 %v4094_v3, %v4093_v15  ;;  %v4103_v49 = vpack.i.b16 %v4102_v48, %v4101_v16 }
 0x874   : > { %7844 = vmatprep.subr.bf16.mxu1 %v8333_v4 }
 0x876   : > { %7841 = vmatmul.mubr.msk.bf16.vlgmr.msra.gmra.mrb[28].mxu1 %vm1256_vm1, %v8995_v23  ;;  %v4099_v23 = vpack.i.b16 %v4072_v17, %v4022_v11 }
 0x877   : > { %7845 = vmatpush3.bf16.msra.mxu1 %v4079_v5  ;;  %7848 = vmatprep.mubr.msk.bf16.mxu1 %vm8334_vm0, %v8333_v4 }
 0x878   : > { %7846 = vmatprep.subr.bf16.mxu1 %v8333_v4 }
 0x87b   : > { %7847 = vmatpush3.bf16.msra.mxu1 %v4095_v10 }
 0x87c   : > { %7852 = vmatprep.subr.bf16.mxu1 %v8333_v4 }
 0x890   : > { %v2706_v13 = vpop.permute.xlu0 %2705  ;;  %v2708_v7 = vpop.permute.xlu1 %2707 }
 0x891   : > { %7849 = vmatmul.mubr.msk.bf16.vlgmr.msra.gmra.mrb[32].mxu1 %vm1256_vm1, %v2706_v13 }
 0x892   : > { %7853 = vmatpush3.bf16.msra.mxu1 %v4083_v21  ;;  %7856 = vmatprep.mubr.msk.bf16.mxu1 %vm8334_vm0, %v8333_v4 }
 0x893   : > { %7854 = vmatprep.subr.bf16.mxu1 %v8333_v4 }
 0x894   : > { %v2710_v57 = vpop.permute.xlu1 %2709 }
 0x896   : > { %7855 = vmatpush3.bf16.msra.mxu1 %v4099_v23 }
 0x897   : > { %7860 = vmatprep.subr.bf16.mxu1 %v8333_v4 }
 0x899   : > { %7857 = vmatmul.mubr.msk.bf16.vlgmr.msra.gmra.mrb[36].mxu1 %vm1256_vm1, %v2708_v7 }
 0x89a   : > { %7861 = vmatpush3.bf16.msra.mxu1 %v4087_v2  ;;  %7864 = vmatprep.mubr.msk.bf16.mxu1 %vm8334_vm0, %v8333_v4 }
 0x89b   : > { %7862 = vmatprep.subr.bf16.mxu1 %v8333_v4 }
 0x89e   : > { %7863 = vmatpush3.bf16.msra.mxu1 %v4103_v49 }
 0x8a1   : > { %7865 = vmatmul.mubr.msk.bf16.vlgmr.msra.gmra.mrb[40].mxu1 %vm1256_vm1, %v2710_v57  ;;  %v9069_v25 = vpop.permute.xlu0 %2888 }
 0x8a5   : > { %v9067_v24 = vpop.permute.xlu1 %2891  ;;  %v2799_v30 = vpop.permute.xlu0 %2798 }
 0x8a9   : > { %v2802_v28 = vpop.permute.xlu1 %2801 }
 0x8aa   : > { %v2807_v29 = vcombine.low %v8862_v33, %v2802_v28  ;;  %v2808_v35 = vcombine.high %v8862_v33, %v2802_v28 }
 0x8ac   : > { %v2815_v36 = vrot.slane %v2807_v29, %v8577_v26  ;;  %v2822_v41 = vrot.slane %v2808_v35, %v8577_v26 }
 0x8ad   : > { %v2805_v31 = vpop.permute.xlu1 %2804 }
 0x8ae   : > { %v2823_v32 = vcombine.low %v2799_v30, %v2805_v31  ;;  %v2824_v34 = vcombine.high %v2799_v30, %v2805_v31 }
 0x8b0   : > { %v2831_v37 = vrot.slane %v2823_v32, %v8577_v26  ;;  %v2838_v38 = vrot.slane %v2824_v34, %v8577_v26 }
 0x8b2   : > { %v2839_v39 = vcombine.low %v2815_v36, %v2831_v37  ;;  %v2840_v40 = vcombine.high %v2815_v36, %v2831_v37  ;;  %v2855_v45 = vcombine.low %v2822_v41, %v2838_v38  ;;  %v2856_v55 = vcombine.high %v2822_v41, %v2838_v38 }
 0x8b4   : > { %v2847_v42 = vrot.slane %v2839_v39, %v8583_v47  ;;  %v2854_v44 = vrot.slane %v2840_v40, %v8583_v47  ;;  %v2863_v54 = vrot.slane %v2855_v45, %v8583_v47  ;;  %v2870_v61 = vrot.slane %v2856_v55, %v8583_v47 }
 0x8b6   : > { %v2871_v46 = vcombine.high %v2847_v42, %v8333_v4  ;;  %v2875_v50 = vpack.c.bf16 %v2847_v42, %v2847_v42  ;;  %v2872_v33 = vcombine.high %v2854_v44, %v8333_v4  ;;  %v2877_v58 = vpack.c.bf16 %v2854_v44, %v2854_v44 }
 0x8b7   : > { %v2873_v60 = vcombine.high %v2863_v54, %v8333_v4  ;;  %v2879_v62 = vpack.c.bf16 %v2863_v54, %v2863_v54  ;;  %v2874_v1 = vcombine.high %v2870_v61, %v8333_v4  ;;  %v2881_v8 = vpack.c.bf16 %v2870_v61, %v2870_v61 }
 0x8b8   : > { %v2876_v51 = vpack.c.bf16 %v2871_v46, %v2871_v46  ;;  %4374 = vxpose.xlu1.c.b16.start.end [1/1] (short) (narrow) %v2875_v50, 32  ;;  %v2878_v59 = vpack.c.bf16 %v2872_v33, %v2872_v33 }
 0x8b9   : > { %v2880_v0 = vpack.c.bf16 %v2873_v60, %v2873_v60  ;;  %v2882_v6 = vpack.c.bf16 %v2874_v1, %v2874_v1 }
 0x8ba   : > { %4390 = vxpose.xlu0.c.b16.start.end [1/1] (short) (narrow) %v2876_v51, 32 }
 0x8bd   : > { %4406 = vxpose.xlu1.c.b16.start.end [1/1] (short) (narrow) %v2877_v58, 32 }
 0x8bf   : > { %4422 = vxpose.xlu0.c.b16.start.end [1/1] (short) (narrow) %v2878_v59, 32 }
 0x8c2   : > { %4438 = vxpose.xlu1.c.b16.start.end [1/1] (short) (narrow) %v2879_v62, 32 }
 0x8c4   : > { %4454 = vxpose.xlu0.c.b16.start.end [1/1] (short) (narrow) %v2880_v0, 32 }
 0x8c7   : > { %4470 = vxpose.xlu1.c.b16.start.end [1/1] (short) (narrow) %v2881_v8, 32 }
 0x8c9   : > { %4486 = vxpose.xlu0.c.b16.start.end [1/1] (short) (narrow) %v2882_v6, 32 }
 0x91e   : > { %v4382_v63 = vpop.trf.xlu1 }
 0x91f   : > { %v4506_v16 = vshrl.u32 %v4382_v63, 16 }
 0x920   : > { %v4398_v9 = vpop.trf.xlu0 }
 0x921   : > { %v4507_v49 = vshrl.u32 %v4398_v9, 16  ;;  %v9091_v31 = vpack.i.b16 %v4398_v9, %v4382_v63 }
 0x922   : > { %v4383_v15 = vpop.trf.xlu1 }
 0x923   : > { %v4538_v21 = vshrl.u32 %v4383_v15, 16  ;;  %v9103_v46 = vpack.i.b16 %v4507_v49, %v4506_v16 }
 0x924   : > { %v4399_v3 = vpop.trf.xlu0 }
 0x925   : > { %v4539_v23 = vshrl.u32 %v4399_v3, 16  ;;  %v9087_v57 = vpack.i.b16 %v4399_v3, %v4383_v15 }
 0x926   : > { %v4414_v5 = vpop.trf.xlu1 }
 0x927   : > { %v4514_v32 = vshrl.u32 %v4414_v5, 16  ;;  %v9093_v36 = vpack.i.b16 %v4539_v23, %v4538_v21 }
 0x928   : > { %v4430_v10 = vpop.trf.xlu0 }
 0x929   : > { %v4515_v34 = vshrl.u32 %v4430_v10, 16  ;;  %v4512_v41 = vpack.i.b16 %v4430_v10, %v4414_v5 }
 0x92a   : > { %v4415_v53 = vpop.trf.xlu1 }
 0x92b   : > { %v4516_v33 = vpack.i.b16 %v4515_v34, %v4514_v32  ;;  %v4546_v58 = vshrl.u32 %v4415_v53, 16 }
 0x92c   : > { %v4431_v12 = vpop.trf.xlu0 }
 0x92d   : > { %v4547_v59 = vshrl.u32 %v4431_v12, 16  ;;  %v9113_v9 = vpack.i.b16 %v4431_v12, %v4415_v53  ;;  %v2884_v53 = vand.u32 127, %v889_v14 }
 0x92e   : > { %v4446_v17 = vpop.trf.xlu1 }
 0x92f   : > { %v4522_v52 = vshrl.u32 %v4446_v17, 16  ;;  %v9115_v3 = vpack.i.b16 %v4547_v59, %v4546_v58  ;;  %vm2893_vm5 = vcmp.gt.s32.totalorder %v2884_v53, %v9069_v25  ;;  %vm2894_vm6 = vcmp.gt.s32.totalorder %v2884_v53, %v9067_v24 }
 0x930   : > { %v4462_v11 = vpop.trf.xlu0  ;;  %v9161_v24 = vsel %vm2894_vm6, -1e+30, %v8333_v4 }
 0x931   : > { %v4523_v56 = vshrl.u32 %v4462_v11, 16  ;;  %v9085_v48 = vpack.i.b16 %v4462_v11, %v4446_v17 }
 0x932   : > { %v4447_v13 = vpop.trf.xlu1 }
 0x933   : > { %v4554_v7 = vshrl.u32 %v4447_v13, 16  ;;  %v9095_v37 = vpack.i.b16 %v4523_v56, %v4522_v52  ;;  %v4566_v42 = vcombine.low %v9091_v31, %v9085_v48  ;;  %v4567_v32 = vcombine.high %v9091_v31, %v9085_v48 }
 0x934   : > { %v4463_v2 = vpop.trf.xlu0  ;;  %v9156_v48 = vsel %vm2893_vm5, -1e+30, %v8333_v4 }
 0x935   : > { %v9089_v28 = vpack.i.b16 %v4463_v2, %v4447_v13  ;;  %v4555_v29 = vshrl.u32 %v4463_v2, 16  ;;  %v4634_v60 = vcombine.low %v9103_v46, %v9095_v37  ;;  %v4574_v0 = vrot.slane %v4566_v42, %v8577_v26 }
 0x936   : > { %v4478_v30 = vpop.trf.xlu1  ;;  %v4635_v31 = vcombine.high %v9103_v46, %v9095_v37 }
 0x937   : > { %v4530_v35 = vshrl.u32 %v4478_v30, 16  ;;  %v9097_v38 = vpack.i.b16 %v4555_v29, %v4554_v7  ;;  %v4703_v39 = vcombine.high %v9087_v57, %v9089_v28  ;;  %v4642_v5 = vrot.slane %v4634_v60, %v8577_v26 }
 0x938   : > { %v4494_v40 = vpop.trf.xlu0  ;;  %v4649_v60 = vrot.slane %v4635_v31, %v8577_v26 }
 0x939   : > { %v4528_v44 = vpack.i.b16 %v4494_v40, %v4478_v30  ;;  %v4531_v45 = vshrl.u32 %v4494_v40, 16  ;;  %v4771_v50 = vcombine.high %v9093_v36, %v9097_v38  ;;  %v9128_v12 = vrot.slane %v4703_v39, %v8577_v26 }
 0x93a   : > { %v4479_v51 = vpop.trf.xlu1 }
 0x93b   : > { %v4532_v54 = vpack.i.b16 %v4531_v45, %v4530_v35  ;;  %v4582_v55 = vcombine.low %v4512_v41, %v4528_v44  ;;  %v4562_v61 = vshrl.u32 %v4479_v51, 16  ;;  %v9134_v56 = vrot.slane %v4771_v50, %v8577_v26 }
 0x93c   : > { %v4495_v62 = vpop.trf.xlu0  ;;  %v4583_v7 = vcombine.high %v4512_v41, %v4528_v44  ;;  %v4581_v44 = vrot.slane %v4567_v32, %v8577_v26 }
 0x93d   : > { %v4590_v1 = vrot.slane %v4582_v55, %v8577_v26  ;;  %v4650_v8 = vcombine.low %v4516_v33, %v4532_v54  ;;  %v9111_v6 = vpack.i.b16 %v4495_v62, %v4479_v51  ;;  %v4563_v63 = vshrl.u32 %v4495_v62, 16 }
 0x93e   : > { %v4597_v35 = vrot.slane %v4583_v7, %v8577_v26  ;;  %v4651_v39 = vcombine.high %v4516_v33, %v4532_v54 }
 0x93f   : > { %v4598_v15 = vcombine.low %v4574_v0, %v4590_v1  ;;  %v4658_v10 = vrot.slane %v4650_v8, %v8577_v26  ;;  %v9119_v17 = vpack.i.b16 %v4563_v63, %v4562_v61  ;;  %v4719_v11 = vcombine.high %v9113_v9, %v9111_v6 }
 0x940   : > { %v4599_v2 = vcombine.high %v4574_v0, %v4590_v1  ;;  %v4614_v25 = vcombine.low %v4581_v44, %v4597_v35  ;;  %v4665_v33 = vrot.slane %v4651_v39, %v8577_v26  ;;  %v4718_v1 = vcombine.low %v9113_v9, %v9111_v6 }
 0x941   : > { %v4606_v13 = vrot.slane %v4598_v15, %v8583_v47  ;;  %v4787_v21 = vcombine.high %v9115_v3, %v9119_v17  ;;  %v4666_v23 = vcombine.low %v4642_v5, %v4658_v10  ;;  %v9131_v52 = vrot.slane %v4719_v11, %v8577_v26 }
 0x942   : > { %v4613_v41 = vrot.slane %v4599_v2, %v8583_v47  ;;  %v4667_v42 = vcombine.high %v4642_v5, %v4658_v10  ;;  %v4622_v62 = vrot.slane %v4614_v25, %v8583_v47  ;;  %v4682_v0 = vcombine.low %v4649_v60, %v4665_v33 }
 0x943   : > { %4838 = vxpose.xlu1.c.b16.start.end [1/1] (short) (narrow) %v4606_v13, 16  ;;  %v9137_v16 = vrot.slane %v4787_v21, %v8577_v26  ;;  %v4750_v49 = vcombine.low %v9128_v12, %v9131_v52  ;;  %v4751_v14 = vcombine.high %v9128_v12, %v9131_v52  ;;  %v4674_v29 = vrot.slane %v4666_v23, %v8583_v47 }
 0x944   : > { %v4630_v30 = vcombine.high %v4606_v13, %v8337_v43  ;;  %v4681_v55 = vrot.slane %v4667_v42, %v8583_v47  ;;  %v4631_v58 = vcombine.high %v4613_v41, %v8337_v43  ;;  %v4615_v8 = vcombine.high %v4581_v44, %v4597_v35 }
 0x945   : > { %v4818_v34 = vcombine.low %v9134_v56, %v9137_v16  ;;  %4854 = vxpose.xlu0.c.b16.start.end [1/1] (short) (narrow) %v4674_v29, 16  ;;  %v4698_v40 = vcombine.high %v4674_v29, %v8337_v43  ;;  %v4819_v37 = vcombine.high %v9134_v56, %v9137_v16  ;;  %v4690_v63 = vrot.slane %v4682_v0, %v8583_v47 }
 0x946   : > { %v4699_v61 = vcombine.high %v4681_v55, %v8337_v43  ;;  %v4632_v15 = vcombine.high %v4622_v62, %v8337_v43  ;;  %v4702_v5 = vcombine.low %v9087_v57, %v9089_v28  ;;  %v4726_v10 = vrot.slane %v4718_v1, %v8577_v26 }
 0x947   : > { %4870 = vxpose.xlu1.c.b16.start.end [1/1] (short) (narrow) %v4630_v30, 16  ;;  %v4786_v11 = vcombine.low %v9115_v3, %v9119_v17  ;;  %v4700_v13 = vcombine.high %v4690_v63, %v8337_v43  ;;  %v4629_v21 = vrot.slane %v4615_v8, %v8583_v47  ;;  %v4683_v6 = vcombine.high %v4649_v60, %v4665_v33 }
 0x948   : > { %v4710_v9 = vrot.slane %v4702_v5, %v8577_v26  ;;  %v4770_v23 = vcombine.low %v9093_v36, %v9097_v38 }
 0x949   : > { %v4142_v45 = vpop.f32.mrb[28].mxu1  ;;  %4886 = vxpose.xlu0.c.b16.start.end [1/1] (short) (narrow) %v4698_v40, 16  ;;  %v4794_v28 = vrot.slane %v4786_v11, %v8577_v26  ;;  %v4697_v53 = vrot.slane %v4683_v6, %v8583_v47  ;;  %v4633_v7 = vcombine.high %v4629_v21, %v8337_v43 }
 0x94a   : > { %v9164_v50 = vadd.f32 %v4142_v45, %v9156_v48  ;;  %v7842_v51 = vpop.f32.mrb[29].mxu1  ;;  %v4734_v57 = vcombine.low %v4710_v9, %v4726_v10  ;;  %v4778_v3 = vrot.slane %v4770_v23, %v8577_v26  ;;  %v4735_v38 = vcombine.high %v4710_v9, %v4726_v10 }
 0x94b   : > { %4902 = vxpose.xlu1.c.b16.start.end [1/1] (short) (narrow) %v4613_v41, 16  ;;  %v4145_v54 = vpop.f32.mrb[30].mxu1  ;;  %v4701_v17 = vcombine.high %v4697_v53, %v8337_v43 }
 0x94c   : > { %v9172_v46 = vadd.f32 %v4145_v54, %v9161_v24  ;;  %v7843_v59 = vpop.f32.mrb[31].mxu1  ;;  %v4742_v2 = vrot.slane %v4734_v57, %v8583_v47  ;;  %v4802_v29 = vcombine.low %v4778_v3, %v4794_v28  ;;  %v4749_v31 = vrot.slane %v4735_v38, %v8583_v47 }
 0x94d   : > { %4918 = vxpose.xlu0.c.b16.start.end [1/1] (short) (narrow) %v4681_v55, 16  ;;  %v4803_v45 = vcombine.high %v4778_v3, %v4794_v28 }
 0x94e   : > { %v4810_v35 = vrot.slane %v4802_v29, %v8583_v47  ;;  %v4766_v39 = vcombine.high %v4742_v2, %v8337_v43 }
 0x94f   : > { %4934 = vxpose.xlu1.c.b16.start.end [1/1] (short) (narrow) %v4631_v58, 16  ;;  %v4817_v54 = vrot.slane %v4803_v45, %v8583_v47 }
 0x950   : > { %v4834_v44 = vcombine.high %v4810_v35, %v8337_v43 }
 0x951   : > { %4950 = vxpose.xlu0.c.b16.start.end [1/1] (short) (narrow) %v4699_v61, 16  ;;  %v4835_v11 = vcombine.high %v4817_v54, %v8337_v43 }
 0x953   : > { %4966 = vxpose.xlu1.c.b16.start.end [1/1] (short) (narrow) %v4622_v62, 16 }
 0x955   : > { %4982 = vxpose.xlu0.c.b16.start.end [1/1] (short) (narrow) %v4690_v63, 16  ;;  %v4282_v63 = vsel %vm4281_vm7, %v9164_v50, -inf }
 0x957   : > { %4998 = vxpose.xlu1.c.b16.start.end [1/1] (short) (narrow) %v4632_v15, 16  ;;  %v4285_v15 = vsel %vm4281_vm7, %v9172_v46, -inf }
 0x959   : > { %5014 = vxpose.xlu0.c.b16.start.end [1/1] (short) (narrow) %v4700_v13, 16 }
 0x95b   : > { %5030 = vxpose.xlu1.c.b16.start.end [1/1] (short) (narrow) %v4629_v21, 16 }
 0x95d   : > { %5046 = vxpose.xlu0.c.b16.start.end [1/1] (short) (narrow) %v4697_v53, 16 }
 0x95f   : > { %5062 = vxpose.xlu1.c.b16.start.end [1/1] (short) (narrow) %v4633_v7, 16 }
 0x961   : > { %5078 = vxpose.xlu0.c.b16.start.end [1/1] (short) (narrow) %v4701_v17, 16 }
 0x963   : > { %5094 = vxpose.xlu1.c.b16.start.end [1/1] (short) (narrow) %v4742_v2, 16 }
 0x964   : > { %v4186_v36 = vpop.f32.mrb[32].mxu1 }
 0x965   : > { %v9198_v30 = vadd.f32 %v4186_v36, %v9156_v48  ;;  %v7850_v32 = vpop.f32.mrb[33].mxu1  ;;  %5110 = vxpose.xlu0.c.b16.start.end [1/1] (short) (narrow) %v4810_v35, 16 }
 0x966   : > { %v4189_v40 = vpop.f32.mrb[34].mxu1 }
 0x967   : > { %v9203_v41 = vadd.f32 %v4189_v40, %v9161_v24  ;;  %v7851_v42 = vpop.f32.mrb[35].mxu1  ;;  %5126 = vxpose.xlu1.c.b16.start.end [1/1] (short) (narrow) %v4766_v39, 16 }
 0x969   : > { %5142 = vxpose.xlu0.c.b16.start.end [1/1] (short) (narrow) %v4834_v44, 16  ;;  %v4291_v5 = vsel %vm4281_vm7, %v9203_v41, -inf }
 0x96b   : > { %5158 = vxpose.xlu1.c.b16.start.end [1/1] (short) (narrow) %v4749_v31, 16 }
 0x96c   : > { %v4230_v25 = vpop.f32.mrb[36].mxu1 }
 0x96d   : > { %v9208_v51 = vadd.f32 %v4230_v25, %v9156_v48  ;;  %v7858_v33 = vpop.f32.mrb[37].mxu1  ;;  %5174 = vxpose.xlu0.c.b16.start.end [1/1] (short) (narrow) %v4817_v54, 16 }
 0x96e   : > { %v4233_v55 = vpop.f32.mrb[38].mxu1 }
 0x96f   : > { %v9212_v58 = vadd.f32 %v4233_v55, %v9161_v24  ;;  %v7859_v59 = vpop.f32.mrb[39].mxu1  ;;  %v4294_v53 = vsel %vm4281_vm7, %v9208_v51, -inf }
 0x971   : > { %v4297_v23 = vsel %vm4281_vm7, %v9212_v58, -inf }
 0x974   : > { %v4274_v60 = vpop.f32.mrb[40].mxu1 }
 0x975   : > { %v9215_v61 = vadd.f32 %v4274_v60, %v9156_v48  ;;  %v7866_v62 = vpop.f32.mrb[41].mxu1  ;;  %v4288_v48 = vsel %vm4281_vm7, %v9198_v30, -inf }
 0x976   : > { %v4277_v0 = vpop.f32.mrb[42].mxu1 }
 0x977   : > { %v9218_v1 = vadd.f32 %v4277_v0, %v9161_v24  ;;  %v7867_v8 = vpop.f32.mrb[43].mxu1  ;;  %v4767_v24 = vcombine.high %v4749_v31, %v8337_v43  ;;  %v4300_v17 = vsel %vm4281_vm7, %v9215_v61, -inf }
 0x978   : > { %4283 = vmax.xlane.f32.xlu1 %v4282_v63 }
 0x979   : > { %v4303_v32 = vsel %vm4281_vm7, %v9218_v1, -inf }
 0x97a   : > { %4286 = vmax.xlane.f32.xlu0 %v4285_v15 }
 0x97c   : > { %4292 = vmax.xlane.f32.xlu1 %v4291_v5 }
 0x97e   : > { %4289 = vmax.xlane.f32.xlu0 %v4288_v48 }
 0x9a9   : > { %5190 = vxpose.xlu1.c.b16.start.end [1/1] (short) (narrow) %v4767_v24, 16  ;;  %v4846_v10 = vpop.trf.xlu1 }
 0x9ab   : > { %5206 = vxpose.xlu0.c.b16.start.end [1/1] (short) (narrow) %v4835_v11, 16  ;;  %v4862_v13 = vpop.trf.xlu0 }
 0x9ad   : > { %v4878_v21 = vpop.trf.xlu1 }
 0x9af   : > { %v4894_v6 = vpop.trf.xlu0 }
 0x9b1   : > { %v4910_v9 = vpop.trf.xlu1 }
 0x9b2   : > { %v5350_v2 = vcombine.low %v4846_v10, %v4910_v9 }
 0x9b3   : > { %v4926_v57 = vpop.trf.xlu0 }
 0x9b4   : > { %v5357_v35 = vrot.slane %v5350_v2, %v8577_v26  ;;  %v5400_v39 = vcombine.low %v4862_v13, %v4926_v57 }
 0x9b5   : > { %v4942_v28 = vpop.trf.xlu1 }
 0x9b6   : > { %4298 = vmax.xlane.f32.xlu1 %v4297_v23  ;;  %v5358_v29 = vcombine.low %v4878_v21, %v4942_v28  ;;  %v5407_v25 = vrot.slane %v5400_v39, %v8577_v26 }
 0x9b7   : > { %v4958_v7 = vpop.trf.xlu0 }
 0x9b8   : > { %4295 = vmax.xlane.f32.xlu0 %v4294_v53  ;;  %v5365_v40 = vrot.slane %v5358_v29, %v8577_v26  ;;  %v5408_v31 = vcombine.low %v4894_v6, %v4958_v7 }
 0x9b9   : > { %v4974_v3 = vpop.trf.xlu1 }
 0x9ba   : > { %v5382_v33 = vcombine.low %v5357_v35, %v5365_v40  ;;  %v5415_v59 = vrot.slane %v5408_v31, %v8577_v26 }
 0x9bb   : > { %v4990_v36 = vpop.trf.xlu0 }
 0x9bc   : > { %4301 = vmax.xlane.f32.xlu0 %v4300_v17  ;;  %v5389_v63 = vrot.slane %v5382_v33, %v8583_v47  ;;  %v5432_v48 = vcombine.low %v5407_v25, %v5415_v59  ;;  %v4758_v33 = vrot.slane %v4750_v49, %v8583_v47  ;;  %v4826_v59 = vrot.slane %v4818_v34, %v8583_v47 }
 0x9bd   : > { %v5006_v38 = vpop.trf.xlu1 }
 0x9be   : > { %v5439_v23 = vrot.slane %v5432_v48, %v8583_v47  ;;  %v4836_v49 = vcombine.high %v4826_v59, %v8337_v43 }
 0x9bf   : > { %v5022_v42 = vpop.trf.xlu0 }
 0x9c0   : > { %4304 = vmax.xlane.f32.xlu0 %v4303_v32 }
 0x9c1   : > { %v5038_v44 = vpop.trf.xlu1 }
 0x9c2   : > { %v5366_v45 = vcombine.low %v4974_v3, %v5038_v44 }
 0x9c3   : > { %v5054_v54 = vpop.trf.xlu0 }
 0x9c4   : > { %v5373_v60 = vrot.slane %v5366_v45, %v8577_v26  ;;  %v5416_v62 = vcombine.low %v4990_v36, %v5054_v54  ;;  %v4768_v54 = vcombine.high %v4758_v33, %v8337_v43 }
 0x9c5   : > { %v5070_v55 = vpop.trf.xlu1 }
 0x9c6   : > { %v5374_v0 = vcombine.low %v5006_v38, %v5070_v55  ;;  %v5423_v24 = vrot.slane %v5416_v62, %v8577_v26  ;;  %v9271_v55 = vrot.slane %v4751_v14, %v8583_v47 }
 0x9c7   : > { %v5086_v15 = vpop.trf.xlu0 }
 0x9c8   : > { %v5381_v8 = vrot.slane %v5374_v0, %v8577_v26  ;;  %v5424_v11 = vcombine.low %v5022_v42, %v5086_v15 }
 0x9c9   : > { %v5102_v5 = vpop.trf.xlu1 }
 0x9ca   : > { %v5390_v10 = vcombine.low %v5373_v60, %v5381_v8  ;;  %v5431_v21 = vrot.slane %v5424_v11, %v8577_v26  ;;  %v9283_v60 = vrot.slane %v4819_v37, %v8583_v47 }
 0x9cb   : > { %v5118_v6 = vpop.trf.xlu0 }
 0x9cc   : > { %v5397_v13 = vrot.slane %v5390_v10, %v8583_v47  ;;  %v5440_v53 = vcombine.low %v5423_v24, %v5431_v21 }
 0x9cd   : > { %v5134_v9 = vpop.trf.xlu1 }
 0x9ce   : > { %v5398_v57 = vcombine.low %v5389_v63, %v5397_v13  ;;  %v9249_v28 = vcombine.high %v5389_v63, %v5397_v13  ;;  %v5447_v7 = vrot.slane %v5440_v53, %v8583_v47 }
 0x9cf   : > { %v5150_v3 = vpop.trf.xlu0 }
 0x9d0   : > { %v5448_v2 = vcombine.low %v5439_v23, %v5447_v7  ;;  %v9252_v29 = vcombine.high %v5439_v23, %v5447_v7  ;;  %v5553_v38 = vshrl.u32 %v5398_v57, 16  ;;  %v5559_v32 = vshrl.u32 %v9249_v28, 16 }
 0x9d1   : > { %v5166_v17 = vpop.trf.xlu1 }
 0x9d2   : > { %v5450_v36 = vcombine.low %v5102_v5, %v5166_v17  ;;  %v5552_v35 = vpack.i.b16 %v5448_v2, %v5398_v57  ;;  %v5554_v39 = vshrl.u32 %v5448_v2, 16  ;;  %v5558_v40 = vpack.i.b16 %v9252_v29, %v9249_v28 }
 0x9d3   : > { %v5182_v42 = vpop.trf.xlu0  ;;  %v5560_v44 = vshrl.u32 %v9252_v29, 16 }
 0x9d4   : > { %v5500_v31 = vcombine.low %v5118_v6, %v5182_v42  ;;  %7870 = vmatprep.mubr.msk.bf16.mxu0 %vm4281_vm7, %v5552_v35  ;;  %v5555_v45 = vpack.i.b16 %v5554_v39, %v5553_v38  ;;  %v9291_v37 = vrot.slane %v5450_v36, %v8577_v26 }
 0x9d5   : > { %v9259_v25 = vpack.i.b16 %v5560_v44, %v5559_v32 }
 0x9d6   : > { %7876 = vmatprep.mubr.msk.bf16.mxu1 %vm4281_vm7, %v5555_v45 }
 0x9e3   : > { %5222 = vxpose.xlu1.c.b16.start.end [1/1] (short) (narrow) %v4758_v33, 16 }
 0x9e7   : > { %5254 = vxpose.xlu1.c.b16.start.end [1/1] (short) (narrow) %v4768_v54, 16 }
 0x9eb   : > { %5286 = vxpose.xlu1.c.b16.start.end [1/1] (short) (narrow) %v9271_v55, 16 }
 0x9ed   : > { %5238 = vxpose.xlu0.c.b16.start.end [1/1] (short) (narrow) %v4826_v59, 16 }
 0x9f1   : > { %5270 = vxpose.xlu0.c.b16.start.end [1/1] (short) (narrow) %v4836_v49, 16 }
 0x9f5   : > { %5302 = vxpose.xlu0.c.b16.start.end [1/1] (short) (narrow) %v9283_v60, 16 }
 0xa05   : > { %v4284_v12 = vpop.xlane.xlu1 %4283 }
 0xa06   : > { %v4306_v52 = vsub.f32 %v9164_v50, %v4284_v12 }
 0xa07   : > { %v4287_v62 = vpop.xlane.xlu0 %4286 }
 0xa08   : > { %v4314_v14 = vmul.f32 1.442695, %v4306_v52  ;;  %v4307_v34 = vsub.f32 %v9172_v46, %v4287_v62  ;;  %v4769_v52 = vcombine.high %v9271_v55, %v8337_v43 }
 0xa09   : > { %v4293_v0 = vpop.xlane.xlu1 %4292 }
 0xa0a   : > { %8182 = vpow2.f32 %v4314_v14  ;;  %v4309_v8 = vsub.f32 %v9203_v41, %v4293_v0  ;;  %v4316_v63 = vmul.f32 1.442695, %v4307_v34  ;;  %v9299_v41 = vrot.slane %v5500_v31, %v8577_v26 }
 0xa0b   : > { %v4290_v5 = vpop.xlane.xlu0 %4289  ;;  %v4837_v14 = vcombine.high %v9283_v60, %v8337_v43 }
 0xa0c   : > { %v4320_v15 = vmul.f32 1.442695, %v4309_v8  ;;  %8184 = vpow2.f32 %v4316_v63  ;;  %v4308_v56 = vsub.f32 %v9198_v30, %v4290_v5 }
 0xa0e   : > { %8186 = vpow2.f32 %v4320_v15  ;;  %v4318_v50 = vmul.f32 1.442695, %v4308_v56 }
 0xa0f   : > { %v5198_v16 = vpop.trf.xlu1 }
 0xa10   : > { %v5458_v48 = vcombine.low %v5134_v9, %v5198_v16  ;;  %8188 = vpow2.f32 %v4318_v50 }
 0xa11   : > { %v5214_v46 = vpop.trf.xlu0 }
 0xa12   : > { %v9294_v24 = vrot.slane %v5458_v48, %v8577_v26  ;;  %v5508_v11 = vcombine.low %v5150_v3, %v5214_v46 }
 0xa14   : > { %v9296_v10 = vpop.eup %8182  ;;  %v5482_v30 = vcombine.low %v9291_v37, %v9294_v24  ;;  %v9306_v21 = vrot.slane %v5508_v11, %v8577_v26 }
 0xa15   : > { %v4330_v13 = vsel %vm4281_vm7, %v9296_v10, 0.0 }
 0xa16   : > { %4331 = vadd.xlane.f32.xlu1 %v4330_v13  ;;  %v8185_v6 = vpop.eup %8184  ;;  %v5532_v9 = vcombine.low %v9299_v41, %v9306_v21 }
 0xa17   : > { %v4333_v23 = vsel %vm4281_vm7, %v8185_v6, 0.0 }
 0xa18   : > { %v9311_v57 = vpop.eup %8186  ;;  %4334 = vadd.xlane.f32.xlu0 %v4333_v23  ;;  %v5539_v37 = vrot.slane %v5532_v9, %v8583_v47 }
 0xa19   : > { %v4339_v7 = vsel %vm4281_vm7, %v9311_v57, 0.0 }
 0xa1a   : > { %v8189_v53 = vpop.eup %8188 }
 0xa1b   : > { %v4336_v3 = vsel %vm4281_vm7, %v8189_v53, 0.0 }
 0xa1c   : > { %4340 = vadd.xlane.f32.xlu0 %v4339_v7  ;;  %4337 = vadd.xlane.f32.xlu1 %v4336_v3 }
 0xa43   : > { %v4299_v17 = vpop.xlane.xlu1 %4298 }
 0xa44   : > { %v4311_v2 = vsub.f32 %v9212_v58, %v4299_v17 }
 0xa45   : > { %v4296_v38 = vpop.xlane.xlu0 %4295 }
 0xa46   : > { %v4324_v36 = vmul.f32 1.442695, %v4311_v2  ;;  %v4310_v32 = vsub.f32 %v9208_v51, %v4296_v38 }
 0xa48   : > { %8190 = vpow2.f32 %v4324_v36  ;;  %v4322_v35 = vmul.f32 1.442695, %v4310_v32 }
 0xa49   : > { %v4302_v39 = vpop.xlane.xlu0 %4301  ;;  %v5230_v62 = vpop.trf.xlu1 }
 0xa4a   : > { %8192 = vpow2.f32 %v4322_v35  ;;  %v4312_v42 = vsub.f32 %v9215_v61, %v4302_v39 }
 0xa4c   : > { %v4326_v44 = vmul.f32 1.442695, %v4312_v42 }
 0xa4d   : > { %v4305_v31 = vpop.xlane.xlu0 %4304  ;;  %v5262_v34 = vpop.trf.xlu1 }
 0xa4e   : > { %8194 = vpow2.f32 %v4326_v44  ;;  %v4313_v45 = vsub.f32 %v9218_v1, %v4305_v31 }
 0xa50   : > { %v4328_v54 = vmul.f32 1.442695, %v4313_v45 }
 0xa51   : > { %v5294_v63 = vpop.trf.xlu1 }
 0xa52   : > { %v8191_v33 = vpop.eup %8190  ;;  %8196 = vpow2.f32 %v4328_v54  ;;  %v5466_v39 = vcombine.low %v5230_v62, %v5294_v63  ;;  %v5489_v62 = vrot.slane %v5482_v30, %v8583_v47 }
 0xa53   : > { %v4345_v59 = vsel %vm4281_vm7, %v8191_v33, 0.0  ;;  %v5246_v0 = vpop.trf.xlu0 }
 0xa54   : > { %4346 = vadd.xlane.f32.xlu0 %v4345_v59  ;;  %v8193_v58 = vpop.eup %8192  ;;  %v5473_v45 = vrot.slane %v5466_v39, %v8577_v26  ;;  %v8058_v39 = vld [vmem:[%s9876_s12] sm:$0xff]  }
 0xa55   : > { %v4342_v49 = vsel %vm4281_vm7, %v8193_v58, 0.0 }
 0xa56   : > { %4343 = vadd.xlane.f32.xlu1 %v4342_v49 }
 0xa57   : > { %v5278_v8 = vpop.trf.xlu0 }
 0xa58   : > { %v9322_v51 = vpop.eup %8194 }
 0xa59   : > { %v4348_v61 = vsel %vm4281_vm7, %v9322_v51, 0.0 }
 0xa5a   : > { %4349 = vadd.xlane.f32.xlu1 %v4348_v61 }
 0xa5b   : > { %v5310_v15 = vpop.trf.xlu0 }
 0xa5c   : > { %v9326_v12 = vpop.eup %8196  ;;  %v5516_v54 = vcombine.low %v5246_v0, %v5310_v15 }
 0xa5d   : > { %v4351_v1 = vsel %vm4281_vm7, %v9326_v12, 0.0 }
 0xa5e   : > { %4352 = vadd.xlane.f32.xlu0 %v4351_v1 }
 0xa87   : > { %5318 = vxpose.xlu1.c.b16.start.end [1/1] (short) (narrow) %v4769_v52, 16 }
 0xa8b   : > { %5334 = vxpose.xlu0.c.b16.start.end [1/1] (short) (narrow) %v4837_v14, 16 }
 0xaa3   : > { %v4332_v5 = vpop.xlane.xlu1 %4331 }
 0xaa4   : > { %8198 = vrcp.f32 %v4332_v5 }
 0xaa5   : > { %v4335_v56 = vpop.xlane.xlu0 %4334 }
 0xaa6   : > { %8200 = vrcp.f32 %v4335_v56 }
 0xaa9   : > { %v4338_v16 = vpop.xlane.xlu1 %4337  ;;  %v4341_v50 = vpop.xlane.xlu0 %4340 }
 0xaaa   : > { %8202 = vrcp.f32 %v4338_v16 }
 0xaab   : > { %8204 = vrcp.f32 %v4341_v50 }
 0xaae   : > { %v8199_v55 = vpop.eup %8198 }
 0xaaf   : > { %v4362_v46 = vmul.f32 %v8199_v55, %v9296_v10 }
 0xab0   : > { %v8201_v48 = vpop.eup %8200 }
 0xab1   : > { %v4363_v60 = vmul.f32 %v8201_v48, %v8185_v6 }
 0xab3   : > { %v4370_v11 = vpack.c.bf16 %v4363_v60, %v4362_v46 }
 0xab4   : > { %v8203_v13 = vpop.eup %8202 }
 0xab5   : > { %v8205_v23 = vpop.eup %8204  ;;  %7916 = vmatprep.subr.msk.bf16.mxu0 %vm4281_vm7, %v4370_v11  ;;  %v5581_v7 = vsel %vm4281_vm7, %v4370_v11, 0  ;;  %v4364_v3 = vmul.f32 %v8203_v13, %v8189_v53 }
 0xab6   : > { %7869 = vmatpush3.bf16.xpose.msra.mxu0 %v5581_v7  ;;  %v4365_v17 = vmul.f32 %v8205_v23, %v9311_v57 }
 0xab8   : > { %v4371_v2 = vpack.c.bf16 %v4365_v17, %v4364_v3 }
 0xaba   : > { %7917 = vmatprep.subr.msk.bf16.mxu1 %vm4281_vm7, %v4371_v2  ;;  %v5639_v36 = vsel %vm4281_vm7, %v4371_v2, 0 }
 0xabb   : > { %7875 = vmatpush3.bf16.xpose.msra.mxu1 %v5639_v36 }
 0xae1   : > { %v4347_v38 = vpop.xlane.xlu0 %4346 }
 0xae2   : > { %8206 = vrcp.f32 %v4347_v38 }
 0xae3   : > { %v4344_v10 = vpop.xlane.xlu1 %4343 }
 0xae4   : > { %8208 = vrcp.f32 %v4344_v10 }
 0xae7   : > { %v4350_v6 = vpop.xlane.xlu1 %4349 }
 0xae8   : > { %8210 = vrcp.f32 %v4350_v6 }
 0xaeb   : > { %v4353_v32 = vpop.xlane.xlu0 %4352 }
 0xaec   : > { %v8207_v35 = vpop.eup %8206  ;;  %8212 = vrcp.f32 %v4353_v32 }
 0xaed   : > { %v5326_v53 = vpop.trf.xlu1  ;;  %v4367_v31 = vmul.f32 %v8207_v35, %v8191_v33 }
 0xaee   : > { %v8209_v42 = vpop.eup %8208  ;;  %v5474_v44 = vcombine.low %v5262_v34, %v5326_v53  ;;  %v8059_v53 = vld [vmem:[%s9876_s12 + $0x8] sm:$0xff]  }
 0xaef   : > { %v4366_v57 = vmul.f32 %v8209_v42, %v8193_v58  ;;  %v5523_v58 = vrot.slane %v5516_v54, %v8577_v26  ;;  %v8060_v42 = vld [vmem:[%s9876_s12 + $0x10] sm:$0xff]  }
 0xaf0   : > { %v5481_v59 = vrot.slane %v5474_v44, %v8577_v26  ;;  %v8061_v44 = vld [vmem:[%s9876_s12 + $0x18] sm:$0xff]  }
 0xaf1   : > { %v5342_v49 = vpop.trf.xlu0  ;;  %v4372_v61 = vpack.c.bf16 %v4367_v31, %v4366_v57  ;;  %v8062_v57 = vld [vmem:[%s9876_s12 + $0x20] sm:$0xff]   ;;  %v8063_v31 = vld [vmem:[%s9876_s12 + $0x28] sm:$0xff]  }
 0xaf2   : > { %v5490_v1 = vcombine.low %v5473_v45, %v5481_v59  ;;  %v5524_v52 = vcombine.low %v5278_v8, %v5342_v49  ;;  %v8211_v14 = vpop.eup %8210 }
 0xaf3   : > { %7918 = vmatprep.subr.msk.bf16.mxu0 %vm4281_vm7, %v4372_v61  ;;  %v4368_v8 = vmul.f32 %v8211_v14, %v9322_v51 }
 0xaf4   : > { %v5497_v33 = vrot.slane %v5490_v1, %v8583_v47  ;;  %v5531_v0 = vrot.slane %v5524_v52, %v8577_v26 }
 0xaf6   : > { %v8213_v34 = vpop.eup %8212  ;;  %v5498_v63 = vcombine.low %v5489_v62, %v5497_v33  ;;  %v5499_v15 = vcombine.high %v5489_v62, %v5497_v33  ;;  %v5540_v5 = vcombine.low %v5523_v58, %v5531_v0 }
 0xaf7   : > { %v4369_v56 = vmul.f32 %v8213_v34, %v9326_v12  ;;  %v5697_v12 = vsel %vm4281_vm7, %v4372_v61, 0 }
 0xaf8   : > { %v5547_v24 = vrot.slane %v5540_v5, %v8583_v47  ;;  %v5565_v55 = vshrl.u32 %v5498_v63, 16  ;;  %v5571_v48 = vshrl.u32 %v5499_v15, 16 }
 0xaf9   : > { %v4373_v30 = vpack.c.bf16 %v4369_v56, %v4368_v8 }
 0xafa   : > { %v5548_v16 = vcombine.low %v5539_v37, %v5547_v24  ;;  %v5549_v50 = vcombine.high %v5539_v37, %v5547_v24 }
 0xafb   : > { %7919 = vmatprep.subr.msk.bf16.mxu1 %vm4281_vm7, %v4373_v30  ;;  %v5755_v21 = vsel %vm4281_vm7, %v4373_v30, 0 }
 0xafc   : > { %v5564_v46 = vpack.i.b16 %v5548_v16, %v5498_v63  ;;  %v5566_v60 = vshrl.u32 %v5548_v16, 16  ;;  %v5570_v11 = vpack.i.b16 %v5549_v50, %v5499_v15  ;;  %v5572_v51 = vshrl.u32 %v5549_v50, 16 }
 0xafe   : > { %7871 = vmatmul.mubr.msk.bf16.vlgmr.msra.gmra.mrb[16].mxu0 %vm4281_vm7, %v5564_v46  ;;  %v5567_v13 = vpack.i.b16 %v5566_v60, %v5565_v55  ;;  %v5573_v41 = vpack.i.b16 %v5572_v51, %v5571_v48 }
 0xaff   : > { %7881 = vmatpush3.bf16.xpose.msra.mxu0 %v5697_v12  ;;  %7882 = vmatprep.mubr.msk.bf16.mxu0 %vm4281_vm7, %v5558_v40 }
 0xb00   : > { %7877 = vmatmul.mubr.msk.bf16.vlgmr.msra.gmra.mrb[44].mxu1 %vm4281_vm7, %v5567_v13  ;;  %7892 = vmatprep.subr.bf16.mxu0 %v8333_v4 }
 0xb01   : > { %7887 = vmatpush3.bf16.xpose.msra.mxu1 %v5755_v21  ;;  %7888 = vmatprep.mubr.msk.bf16.mxu1 %vm4281_vm7, %v9259_v25 }
 0xb06   : > { %7883 = vmatmul.mubr.msk.bf16.vlgmr.msra.gmra.mrb[20].mxu0 %vm4281_vm7, %v5570_v11 }
 0xb07   : > { %7908 = vmatprep.mubr.msk.bf16.mxu0 %vm8334_vm0, %v8333_v4  ;;  %7893 = vmatpush3.bf16.msra.mxu0 %v8058_v39 }
 0xb08   : > { %7889 = vmatmul.mubr.msk.bf16.vlgmr.msra.gmra.mrb[48].mxu1 %vm4281_vm7, %v5573_v41  ;;  %7894 = vmatprep.subr.bf16.mxu0 %v8333_v4 }
 0xb09   : > { %6638 = vmatprep.mubr.bf16.mxu1 %v8337_v43 }
 0xb0b   : > { %7895 = vmatpush3.bf16.msra.mxu0 %v8059_v53 }
 0xb0c   : > { %7896 = vmatprep.subr.bf16.mxu0 %v8333_v4 }
 0xb0f   : > { %7897 = vmatpush3.bf16.msra.mxu0 %v8060_v42 }
 0xb10   : > { %7898 = vmatprep.subr.bf16.mxu0 %v8333_v4 }
 0xb13   : > { %7899 = vmatpush3.bf16.msra.mxu0 %v8061_v44 }
 0xb14   : > { %7900 = vmatprep.subr.bf16.mxu0 %v8333_v4 }
 0xb17   : > { %7901 = vmatpush3.bf16.msra.mxu0 %v8062_v57 }
 0xb18   : > { %7902 = vmatprep.subr.bf16.mxu0 %v8333_v4 }
 0xb1b   : > { %7903 = vmatpush3.bf16.msra.mxu0 %v8063_v31 }
 0xb1c   : > { %7904 = vmatprep.subr.bf16.mxu0 %v8333_v4 }
 0xbd1   : > { %v7872_v28 = vpop.f32.mrb[16].mxu0 }
 0xbd2   : > { %v5617_v29 = vpop.f32.mrb[17].mxu0 }
 0xbd3   : > { %v7878_v40 = vpop.f32.mrb[44].mxu1  ;;  %5806 = vxpose.xlu1.b32.start [1/4] (short) (narrow) %v5617_v29, 16  ;;  %v7873_v9 = vpop.f32.mrb[18].mxu0 }
 0xbd4   : > { %v5620_v23 = vpop.f32.mrb[19].mxu0  ;;  %v5675_v7 = vpop.f32.mrb[45].mxu1 }
 0xbd5   : > { %5838 = vxpose.xlu0.b32.start [1/4] (short) (narrow) %v5675_v7, 16  ;;  %v7879_v3 = vpop.f32.mrb[46].mxu1 }
 0xbd6   : > { %v5678_v17 = vpop.f32.mrb[47].mxu1 }
 0xbd7   : > { %5807 = vxpose.xlu1.b32.cont [2/4] (short) (narrow) %v5620_v23, 16 }
 0xbd9   : > { %5839 = vxpose.xlu0.b32.cont [2/4] (short) (narrow) %v5678_v17, 16  ;;  %v7884_v25 = vpop.f32.mrb[20].mxu0 }
 0xbda   : > { %v5733_v2 = vpop.f32.mrb[21].mxu0 }
 0xbdb   : > { %v7890_v36 = vpop.f32.mrb[48].mxu1  ;;  %5808 = vxpose.xlu1.b32.cont [3/4] (short) (narrow) %v7872_v28, 16  ;;  %v7885_v38 = vpop.f32.mrb[22].mxu0 }
 0xbdc   : > { %v5736_v10 = vpop.f32.mrb[23].mxu0  ;;  %v5791_v6 = vpop.f32.mrb[49].mxu1 }
 0xbdd   : > { %5840 = vxpose.xlu0.b32.cont [3/4] (short) (narrow) %v7878_v40, 16  ;;  %v7891_v32 = vpop.f32.mrb[50].mxu1 }
 0xbde   : > { %v5794_v35 = vpop.f32.mrb[51].mxu1 }
 0xbdf   : > { %5809 = vxpose.xlu1.b32.end [4/4] (short) (narrow) %v7873_v9, 16 }
 0xbe1   : > { %5841 = vxpose.xlu0.b32.end [4/4] (short) (narrow) %v7879_v3, 16 }
 0xbe3   : > { %5902 = vxpose.xlu1.b32.start [1/4] (short) (narrow) %v5791_v6, 16 }
 0xbe5   : > { %5870 = vxpose.xlu0.b32.start [1/4] (short) (narrow) %v5733_v2, 16 }
 0xbe7   : > { %5903 = vxpose.xlu1.b32.cont [2/4] (short) (narrow) %v5794_v35, 16 }
 0xbe9   : > { %5871 = vxpose.xlu0.b32.cont [2/4] (short) (narrow) %v5736_v10, 16 }
 0xbeb   : > { %5904 = vxpose.xlu1.b32.cont [3/4] (short) (narrow) %v7890_v36, 16 }
 0xbed   : > { %5872 = vxpose.xlu0.b32.cont [3/4] (short) (narrow) %v7884_v25, 16 }
 0xbef   : > { %5905 = vxpose.xlu1.b32.end [4/4] (short) (narrow) %v7891_v32, 16 }
 0xbf1   : > { %5873 = vxpose.xlu0.b32.end [4/4] (short) (narrow) %v7885_v38, 16 }
 0xc53   : > { %v5822_v45 = vpop.trf.xlu1 }
 0xc55   : > { %v5854_v54 = vpop.trf.xlu0 }
 0xc57   : > { %v5823_v59 = vpop.trf.xlu1 }
 0xc59   : > { %v5855_v49 = vpop.trf.xlu0 }
 0xc63   : > { %v5918_v61 = vpop.trf.xlu1 }
 0xc64   : > { %v5950_v1 = vcombine.low %v5854_v54, %v5918_v61  ;;  %v5951_v52 = vcombine.high %v5854_v54, %v5918_v61 }
 0xc65   : > { %v5886_v14 = vpop.trf.xlu0 }
 0xc66   : > { %v5934_v62 = vcombine.low %v5822_v45, %v5886_v14  ;;  %v5935_v58 = vcombine.high %v5822_v45, %v5886_v14  ;;  %v5958_v0 = vrot.slane %v5950_v1, %v8577_v26  ;;  %v5965_v34 = vrot.slane %v5951_v52, %v8577_v26 }
 0xc67   : > { %v5919_v33 = vpop.trf.xlu1 }
 0xc68   : > { %v5942_v63 = vrot.slane %v5934_v62, %v8577_v26  ;;  %v5949_v15 = vrot.slane %v5935_v58, %v8577_v26  ;;  %v6018_v5 = vcombine.low %v5855_v49, %v5919_v33  ;;  %v6019_v8 = vcombine.high %v5855_v49, %v5919_v33  ;;  %v8064_v49 = vld [vmem:[%s9876_s12 + $0x30] sm:$0xff]  }
 0xc69   : > { %v5887_v56 = vpop.trf.xlu0  ;;  %7905 = vmatpush3.bf16.msra.mxu0 %v8064_v49 }
 0xc6a   : > { %v5966_v37 = vcombine.low %v5942_v63, %v5958_v0  ;;  %v5967_v24 = vcombine.high %v5942_v63, %v5958_v0  ;;  %v5982_v30 = vcombine.low %v5949_v15, %v5965_v34  ;;  %v5983_v16 = vcombine.high %v5949_v15, %v5965_v34  ;;  %7906 = vmatprep.subr.bf16.mxu0 %v8333_v4 }
 0xc6b   : > { %v6002_v50 = vcombine.low %v5823_v59, %v5887_v56  ;;  %v6003_v55 = vcombine.high %v5823_v59, %v5887_v56  ;;  %v6026_v51 = vrot.slane %v6018_v5, %v8577_v26  ;;  %v6033_v12 = vrot.slane %v6019_v8, %v8577_v26 }
 0xc6c   : > { %v5974_v48 = vrot.slane %v5966_v37, %v8583_v47  ;;  %v5981_v46 = vrot.slane %v5967_v24, %v8583_v47  ;;  %v5990_v60 = vrot.slane %v5982_v30, %v8583_v47  ;;  %v5997_v11 = vrot.slane %v5983_v16, %v8583_v47  ;;  %v8065_v37 = vld [vmem:[%s9876_s12 + $0x38] sm:$0xff]  }
 0xc6d   : > { %v6010_v13 = vrot.slane %v6002_v50, %v8577_v26  ;;  %v6017_v41 = vrot.slane %v6003_v55, %v8577_v26  ;;  %7907 = vmatpush3.bf16.msra.mxu0 %v8065_v37  ;;  %v8095_v37 = vld [vmem:[%s9882_s18 + $0x8c] ss:$16 sps:$4 sm:$0xff]  }
 0xc6e   : > { %v6070_v21 = vcombine.low %v5974_v48, %v5981_v46  ;;  %v7527_v28 = vcombine.high %v5974_v48, %v5981_v46  ;;  %v6086_v29 = vcombine.low %v5990_v60, %v5997_v11  ;;  %v7528_v40 = vcombine.high %v5990_v60, %v5997_v11 }
 0xc6f   : > { %v6034_v9 = vcombine.low %v6010_v13, %v6026_v51  ;;  %v6035_v23 = vcombine.high %v6010_v13, %v6026_v51  ;;  %v6050_v7 = vcombine.low %v6017_v41, %v6033_v12  ;;  %v6051_v3 = vcombine.high %v6017_v41, %v6033_v12 }
 0xc70   : > { %v6077_v17 = vrot.slane %v6070_v21, %v8577_v26  ;;  %v6085_v25 = vrot.slane %v7527_v28, %v8577_v26  ;;  %v6093_v2 = vrot.slane %v6086_v29, %v8577_v26  ;;  %v6101_v36 = vrot.slane %v7528_v40, %v8577_v26 }
 0xc71   : > { %v6042_v38 = vrot.slane %v6034_v9, %v8583_v47  ;;  %v6049_v10 = vrot.slane %v6035_v23, %v8583_v47  ;;  %v6058_v6 = vrot.slane %v6050_v7, %v8583_v47  ;;  %v6065_v32 = vrot.slane %v6051_v3, %v8583_v47 }
 0xc72   : > { %v6103_v35 = vcombine.high %v6077_v17, %v6085_v25  ;;  %v6119_v39 = vcombine.high %v6093_v2, %v6101_v36  ;;  %v6102_v53 = vcombine.low %v6077_v17, %v6085_v25  ;;  %v6118_v42 = vcombine.low %v6093_v2, %v6101_v36  ;;  %v7531_v36 = vld [vmem:[%s9877_s13] ss:$0 sm:$0xff] }
 0xc73   : > { %v6138_v44 = vcombine.low %v6042_v38, %v6049_v10  ;;  %v7529_v57 = vcombine.high %v6042_v38, %v6049_v10  ;;  %v6154_v31 = vcombine.low %v6058_v6, %v6065_v32  ;;  %v7530_v45 = vcombine.high %v6058_v6, %v6065_v32 }
 0xc74   : > { %v6110_v54 = vrot.slane %v6102_v53, %v8583_v47  ;;  %v6126_v59 = vrot.slane %v6118_v42, %v8583_v47  ;;  %v6117_v62 = vrot.slane %v6103_v35, %v8583_v47  ;;  %v6133_v58 = vrot.slane %v6119_v39, %v8583_v47 }
 0xc75   : > { %v6145_v61 = vrot.slane %v6138_v44, %v8577_v26  ;;  %v6153_v1 = vrot.slane %v7529_v57, %v8577_v26  ;;  %v6161_v52 = vrot.slane %v6154_v31, %v8577_v26  ;;  %v6169_v14 = vrot.slane %v7530_v45, %v8577_v26  ;;  %v8068_v44 = vld [vmem:[%s9882_s18 + $0x4] ss:$16 sps:$4 sm:$0xff]   ;;  %v8077_v31 = vld [vmem:[%s9882_s18 + $0x2c] ss:$16 sps:$4 sm:$0xff]   ;;  %v8072_v45 = vld [vmem:[%s9882_s18 + $0x20] ss:$16 sps:$4 sm:$0xff]  }
 0xc76   : > { %v6134_v33 = vcombine.low %v6110_v54, %v6126_v59  ;;  %v6136_v24 = vcombine.low %v6117_v62, %v6133_v58  ;;  %v6135_v16 = vcombine.high %v6110_v54, %v6126_v59  ;;  %v6137_v60 = vcombine.high %v6117_v62, %v6133_v58  ;;  %v8074_v57 = vld [vmem:[%s9882_s18 + $0x24] ss:$16 sps:$4 sm:$0xff]   ;;  %6606 = vmatprep.subr.bf16.mxu1 %v8068_v44  ;;  %v8075_v54 = vld [vmem:[%s9882_s18 + $0x28] ss:$16 sps:$4 sm:$0xff]  }
 0xc77   : > { %v6171_v0 = vcombine.high %v6145_v61, %v6153_v1  ;;  %v6187_v34 = vcombine.high %v6161_v52, %v6169_v14  ;;  %v6170_v63 = vcombine.low %v6145_v61, %v6153_v1  ;;  %v6186_v15 = vcombine.low %v6161_v52, %v6169_v14  ;;  %v8117_v44 = vld [vmem:[%s9884_s20 + $0x80] sm:$0xff]  }
 0xc79   : > { %v6185_v5 = vrot.slane %v6171_v0, %v8583_v47  ;;  %v6201_v8 = vrot.slane %v6187_v34, %v8583_v47  ;;  %v6178_v56 = vrot.slane %v6170_v63, %v8583_v47  ;;  %v6194_v26 = vrot.slane %v6186_v15, %v8583_v47  ;;  %v8083_v0 = vld [vmem:[%s9882_s18 + $0x4c] ss:$16 sps:$4 sm:$0xff]   ;;  %v8078_v34 = vld [vmem:[%s9882_s18 + $0x40] ss:$16 sps:$4 sm:$0xff]   ;;  %v8081_v63 = vld [vmem:[%s9882_s18 + $0x48] ss:$16 sps:$4 sm:$0xff]  }
 0xc7a   : > { %v8086_v15 = vld [vmem:[%s9882_s18 + $0x64] ss:$16 sps:$4 sm:$0xff]  }
 0xc7b   : > { %v6204_v30 = vcombine.low %v6185_v5, %v6201_v8  ;;  %v6203_v50 = vcombine.high %v6178_v56, %v6194_v26  ;;  %v6202_v55 = vcombine.low %v6178_v56, %v6194_v26  ;;  %v6205_v46 = vcombine.high %v6185_v5, %v6201_v8  ;;  %v8089_v5 = vld [vmem:[%s9882_s18 + $0x6c] ss:$16 sps:$4 sm:$0xff]   ;;  %v8084_v8 = vld [vmem:[%s9882_s18 + $0x60] ss:$16 sps:$4 sm:$0xff]   ;;  %v8087_v56 = vld [vmem:[%s9882_s18 + $0x68] ss:$16 sps:$4 sm:$0xff]  }
 0xc7c   : > { %v8092_v26 = vld [vmem:[%s9882_s18 + $0x84] ss:$16 sps:$4 sm:$0xff]  }
 0xc7d   : > { %v8007_v48 = vpack.i.bf16 %v6204_v30, %v6136_v24  ;;  %v8002_v4 = vpack.i.bf16 %v6203_v50, %v6135_v16  ;;  %v8012_v11 = vpack.i.bf16 %v6205_v46, %v6137_v60  ;;  %v8090_v24 = vld [vmem:[%s9882_s18 + $0x80] ss:$16 sps:$4 sm:$0xff]   ;;  %v8093_v30 = vld [vmem:[%s9882_s18 + $0x88] ss:$16 sps:$4 sm:$0xff]   ;;  %v8098_v50 = vld [vmem:[%s9882_s18 + $0xa4] ss:$16 sps:$4 sm:$0xff]  }
 0xc7e   : > { %v8096_v16 = vld [vmem:[%s9882_s18 + $0xa0] ss:$16 sps:$4 sm:$0xff]   ;;  %v8107_v46 = vld [vmem:[%s9882_s18 + $0xcc] ss:$16 sps:$4 sm:$0xff]  }
 0xc7f   : > { %8008 = vrot.lane.b32.xlu1 %v8007_v48, %s9935_s29  ;;  %8003 = vrot.lane.b32.xlu0 %v8002_v4, %s9936_s25  ;;  %v8101_v48 = vld [vmem:[%s9882_s18 + $0xac] ss:$16 sps:$4 sm:$0xff]   ;;  %v8104_v4 = vld [vmem:[%s9882_s18 + $0xc4] ss:$16 sps:$4 sm:$0xff]   ;;  %s797_s25 = scalar_lea.vmem [#allocation2], %s7437_s23 }
 0xc80   : > { %v8102_v60 = vld [vmem:[%s9882_s18 + $0xc0] ss:$16 sps:$4 sm:$0xff]  }
 0xc83   : > { %8013 = vrot.lane.b32.xlu1 %v8012_v11, %s9937_s3  ;;  %v8105_v11 = vld [vmem:[%s9882_s18 + $0xc8] ss:$16 sps:$4 sm:$0xff]   ;;  %s7277_s3 = sshll.u32 %s797_s25, 4  ;;  %s9810_s3 = int_to_ptr.vmem [resolvable:$true] %s7277_s3 }
 0xc84   : > { %p8257_p1 = scmp.lt.s32.totalorder %s9810_s3, %s8255_s22 }
 0xcf1   : > { %v8009_v47 = vpop.permute.xlu1 %8008  ;;  %v8004_v51 = vpop.permute.xlu0 %8003 }
 0xcf2   : > { %v8006_v12 = vunpack.i.h.bf16 %v8004_v51  ;;  %v8005_v13 = vunpack.i.l.bf16 %v8004_v51  ;;  %v8011_v41 = vunpack.i.h.bf16 %v8009_v47  ;;  %v8010_v21 = vunpack.i.l.bf16 %v8009_v47  ;;  %v8110_v47 = vld [vmem:[%s9882_s18 + $0xe4] ss:$16 sps:$4 sm:$0xff]   ;;  %v8113_v51 = vld [vmem:[%s9882_s18 + $0xec] ss:$16 sps:$4 sm:$0xff]  }
 0xcf4   : > { %v6230_v28 = vsel %vm1256_vm1, %v6134_v33, %v8005_v13  ;;  %v6231_v29 = vsel %vm1256_vm1, %v6202_v55, %v8006_v12  ;;  %v8080_v33 = vld [vmem:[%s9882_s18 + $0x44] ss:$16 sps:$4 sm:$0xff]   ;;  %v8099_v55 = vld [vmem:[%s9882_s18 + $0xa8] ss:$16 sps:$4 sm:$0xff]   ;;  %v8108_v12 = vld [vmem:[%s9882_s18 + $0xe0] ss:$16 sps:$4 sm:$0xff]  }
 0xcf5   : > { %v8014_v40 = vpop.permute.xlu1 %8013  ;;  %v6232_v7 = vsel %vm2273_vm3, %v6230_v28, %v8010_v21  ;;  %v6233_v3 = vsel %vm2273_vm3, %v6231_v29, %v8011_v41  ;;  %v8111_v13 = vld [vmem:[%s9882_s18 + $0xe8] ss:$16 sps:$4 sm:$0xff]  }
 0xcf6   : > { %v8016_v9 = vunpack.i.h.bf16 %v8014_v40  ;;  %v8015_v23 = vunpack.i.l.bf16 %v8014_v40 }
 0xcf8   : > { %v6234_v17 = vsel %vm2276_vm4, %v6232_v7, %v8015_v23  ;;  %v6235_v25 = vsel %vm2276_vm4, %v6233_v3, %v8016_v9  ;;  %v7540_v7 = vld [vmem:[%s9880_s16] ss:$0 sm:$0xff] }
 0xcf9   : > { %v6253_v2 = vpack.c.bf16 %v6235_v25, %v6234_v17 }
 0xcfb   : > { %7909 = vmatmul.mubr.bf16.vlgmr.msra.gmra.mrb[24].mxu0 %v6253_v2 }
 0xcfc   : > { %6681 = vmatprep.mubr.bf16.mxu0 %v8337_v43  ;;  %v8066_v43 = vld [vmem:[%s9882_s18] ss:$16 sps:$4 sm:$0xff]  }
 0xcfd   : > { %6607 = vmatpush1.bf16.msra.mxu1 %v8066_v43  ;;  %v8116_v43 = vld [vmem:[%s9884_s20] sm:$0xff]  }
 0xcfe   : > { %6608 = vmatprep.subr.bf16.mxu1 %v8074_v57  ;;  %v8120_v57 = vld [vmem:[%s9884_s20 + $0x8] sm:$0xff]  }
 0xd01   : > { %6609 = vmatpush1.bf16.msra.mxu1 %v8072_v45  ;;  %v8122_v45 = vld [vmem:[%s9884_s20 + $0x50] sm:$0xff]  }
 0xd02   : > { %6610 = vmatprep.subr.bf16.mxu1 %v8080_v33  ;;  %v8132_v33 = vld [vmem:[%s9884_s20 + $0x20] sm:$0xff]  }
 0xd05   : > { %6611 = vmatpush1.bf16.msra.mxu1 %v8078_v34  ;;  %v8134_v34 = vld [vmem:[%s9884_s20 + $0x68] sm:$0xff]  }
 0xd06   : > { %6612 = vmatprep.subr.bf16.mxu1 %v8086_v15  ;;  %v8136_v15 = vld [vmem:[%s9884_s20 + $0x28] sm:$0xff]  }
 0xd09   : > { %6613 = vmatpush1.bf16.msra.mxu1 %v8084_v8  ;;  %v8138_v8 = vld [vmem:[%s9884_s20 + $0x70] sm:$0xff]  }
 0xd0a   : > { %6614 = vmatprep.subr.bf16.mxu1 %v8092_v26  ;;  %v8140_v26 = vld [vmem:[%s9884_s20 + $0x30] sm:$0xff]  }
 0xd0d   : > { %6615 = vmatpush1.bf16.msra.mxu1 %v8090_v24  ;;  %v8142_v24 = vld [vmem:[%s9884_s20 + $0x78] sm:$0xff]  }
 0xd0e   : > { %6616 = vmatprep.subr.bf16.mxu1 %v8098_v50  ;;  %v8145_v50 = vld [vmem:[%s9884_s20 + $0xb8] sm:$0xff]  }
 0xd11   : > { %6617 = vmatpush1.bf16.msra.mxu1 %v8096_v16  ;;  %v8144_v16 = vld [vmem:[%s9884_s20 + $0x38] sm:$0xff]  }
 0xd12   : > { %6618 = vmatprep.subr.bf16.mxu1 %v8104_v4  ;;  %v6440_v4 = vsub.s32 3, %v8574_v19 }
 0xd15   : > { %6619 = vmatpush1.bf16.msra.mxu1 %v8102_v60 }
 0xd16   : > { %6620 = vmatprep.subr.bf16.mxu1 %v8110_v47 }
 0xd19   : > { %6621 = vmatpush1.bf16.msra.mxu1 %v8108_v12 }
 0xdce   : > { %v6342_v38 = vpop.f32.mrb[24].mxu0 }
 0xdcf   : > { %v6343_v10 = vadd.f32 %v7531_v36, %v6342_v38  ;;  %v7910_v6 = vpop.f32.mrb[25].mxu0 }
 0xdd0   : > { %v6345_v32 = vpop.f32.mrb[26].mxu0 }
 0xdd1   : > { %v9451_v35 = vadd.f32 %v6343_v10, %v8837_v18  ;;  %v6346_v39 = vadd.f32 %v7531_v36, %v6345_v32  ;;  %v7911_v53 = vpop.f32.mrb[27].mxu0  ;;  %v8069_v18 = vld [vmem:[%s9882_s18 + $0x8] ss:$16 sps:$4 sm:$0xff]   ;;  %v7541_v36 = vld [vmem:[%s9881_s17] ss:$0 sm:$0xff] }
 0xdd2   : > { %v8115_v53 = vld [vmem:[%s9884_s20 + $0xc0] sm:$0xff]  }
 0xdd3   : > { %v9454_v42 = vadd.f32 %v6346_v39, %v8839_v20  ;;  %6353 = vadd.xlane.f32.xlu1 %v9451_v35  ;;  %v8071_v20 = vld [vmem:[%s9882_s18 + $0xc] ss:$16 sps:$4 sm:$0xff]   ;;  %v8114_v39 = vld [vmem:[%s9884_s20 + $0x40] sm:$0xff]  }
 0xdd4   : > { %6649 = vmatprep.subr.bf16.mxu0 %v8071_v20  ;;  %7696 = vmatprep.subr.bf16.mxu1 %v8114_v39  ;;  %v8119_v20 = vld [vmem:[%s9884_s20 + $0xc8] sm:$0xff]  }
 0xdd5   : > { %6355 = vadd.xlane.f32.xlu0 %v9454_v42  ;;  %6650 = vmatpush1.bf16.msra.mxu0 %v8069_v18  ;;  %v8118_v18 = vld [vmem:[%s9884_s20 + $0x48] sm:$0xff]  }
 0xdd6   : > { %6651 = vmatprep.subr.bf16.mxu0 %v8077_v31  ;;  %v8121_v31 = vld [vmem:[%s9884_s20 + $0x88] sm:$0xff]  }
 0xdd9   : > { %6652 = vmatpush1.bf16.msra.mxu0 %v8075_v54  ;;  %v8123_v54 = vld [vmem:[%s9884_s20 + $0xd0] sm:$0xff]  }
 0xdda   : > { %6653 = vmatprep.subr.bf16.mxu0 %v8083_v0  ;;  %v8133_v0 = vld [vmem:[%s9884_s20 + $0xa0] sm:$0xff]  }
 0xddd   : > { %6654 = vmatpush1.bf16.msra.mxu0 %v8081_v63  ;;  %v8135_v63 = vld [vmem:[%s9884_s20 + $0xe8] sm:$0xff]  }
 0xdde   : > { %6655 = vmatprep.subr.bf16.mxu0 %v8089_v5  ;;  %v8137_v5 = vld [vmem:[%s9884_s20 + $0xa8] sm:$0xff]  }
 0xde1   : > { %6656 = vmatpush1.bf16.msra.mxu0 %v8087_v56  ;;  %v8139_v56 = vld [vmem:[%s9884_s20 + $0xf0] sm:$0xff]  }
 0xde2   : > { %6657 = vmatprep.subr.bf16.mxu0 %v8095_v37  ;;  %v8141_v37 = vld [vmem:[%s9884_s20 + $0xb0] sm:$0xff]  }
 0xde5   : > { %6658 = vmatpush1.bf16.msra.mxu0 %v8093_v30  ;;  %v8143_v30 = vld [vmem:[%s9884_s20 + $0xf8] sm:$0xff]  }
 0xde6   : > { %6659 = vmatprep.subr.bf16.mxu0 %v8101_v48  ;;  %v6423_v48 = vld [vmem:[%s9942_s5] sm:$0xf]  ;;  %s8250_s5 = scalar_lea.vmem %s9810_s3, 256 }
 0xde7   : > { %v6441_v47 = vrot.slane %v6423_v48, %v6440_v4  ;;  %p8251_p12 = scmp.ne.s32.totalorder %s9810_s3, %s8250_s5  ;;  %p8258_p2 = scmp.lt.s32.totalorder %s8256_s26, %s8250_s5 }
 0xde9   : > { %6660 = vmatpush1.bf16.msra.mxu0 %v8099_v55  ;;  %v6436_v55 = vsub.s32 2, %v8574_v19  ;;  %p8252_p13 = pnand %p8251_p12, %p8496_p4  ;;  %p8259_p3 = por %p8258_p2, %p8257_p1 }
 0xdea   : > { %6661 = vmatprep.subr.bf16.mxu0 %v8107_v46  ;;  %v6429_v46 = vrot.slane %v6423_v48, %v2575_v22 }
 0xdeb   : > { %v6437_v60 = vrot.slane %v6423_v48, %v6436_v55  ;;  %p8253_p0 = pneg %p8252_p13 }
 0xded   : > { %6662 = vmatpush1.bf16.msra.mxu0 %v8105_v11  ;;  %v6433_v11 = vrot.slane %v6423_v48, %v2579_v27  ;;  %p8260_p5 = pnand %p8259_p3, %p8253_p0 }
 0xdee   : > { %6663 = vmatprep.subr.bf16.mxu0 %v8113_v51 }
 0xdf1   : > { %6664 = vmatpush1.bf16.msra.mxu0 %v8111_v13 }
 0xdf2   : > { %7718 = vmatprep.subr.bf16.mxu0 %v8115_v53 }
 0xe60   : > { %v6354_v59 = vpop.xlane.xlu1 %6353 }
 0xe61   : > { %v6357_v49 = vmul.f32 0.0078125, %v6354_v59  ;;  %v8124_v59 = vld [vmem:[%s9884_s20 + $0x10] sm:$0xff]  }
 0xe62   : > { %v6356_v61 = vpop.xlane.xlu0 %6355 }
 0xe63   : > { %v9483_v1 = vsub.f32 %v9451_v35, %v6357_v49  ;;  %v6358_v52 = vmul.f32 0.0078125, %v6356_v61  ;;  %v8125_v49 = vld [vmem:[%s9884_s20 + $0x90] sm:$0xff]   ;;  %v8126_v61 = vld [vmem:[%s9884_s20 + $0x58] sm:$0xff]  }
 0xe65   : > { %v9486_v14 = vsub.f32 %v9454_v42, %v6358_v52  ;;  %v6361_v62 = vmul.f32 %v9483_v1, %v9483_v1  ;;  %v8128_v52 = vld [vmem:[%s9884_s20 + $0x18] sm:$0xff]  }
 0xe67   : > { %6363 = vadd.xlane.f32.xlu0 %v6361_v62  ;;  %v6362_v58 = vmul.f32 %v9486_v14, %v9486_v14  ;;  %v8130_v62 = vld [vmem:[%s9884_s20 + $0x60] sm:$0xff]  }
 0xe69   : > { %6365 = vadd.xlane.f32.xlu1 %v6362_v58  ;;  %v8131_v58 = vld [vmem:[%s9884_s20 + $0xe0] sm:$0xff]  }
 0xef4   : > { %v6364_v41 = vpop.xlane.xlu0 %6363 }
 0xef5   : > { %v6367_v21 = vmul.f32 0.0078125, %v6364_v41 }
 0xef6   : > { %v6366_v28 = vpop.xlane.xlu1 %6365 }
 0xef7   : > { %v6369_v29 = vadd.f32 1e-05, %v6367_v21  ;;  %v6368_v40 = vmul.f32 0.0078125, %v6366_v28 }
 0xef9   : > { %8214 = vrsqrt.f32 %v6369_v29  ;;  %v6370_v9 = vadd.f32 1e-05, %v6368_v40 }
 0xefb   : > { %8216 = vrsqrt.f32 %v6370_v9 }
 0xf03   : > { %v8215_v23 = vpop.eup %8214 }
 0xf04   : > { %v6373_v3 = vmul.f32 %v8215_v23, %v9483_v1  ;;  %v8127_v1 = vld [vmem:[%s9884_s20 + $0xd8] sm:$0xff]  }
 0xf05   : > { %v8217_v17 = vpop.eup %8216 }
 0xf06   : > { %v6374_v25 = vmul.f32 %v8217_v17, %v9486_v14  ;;  %v6381_v2 = vmul.f32 %v7540_v7, %v6373_v3  ;;  %v8129_v14 = vld [vmem:[%s9884_s20 + $0x98] sm:$0xff]  }
 0xf08   : > { %v6382_v38 = vmul.f32 %v7540_v7, %v6374_v25  ;;  %v6389_v10 = vadd.f32 %v7541_v36, %v6381_v2 }
 0xf0a   : > { %v6390_v6 = vadd.f32 %v7541_v36, %v6382_v38 }
 0xf0c   : > { %v6424_v32 = vpack.c.bf16 %v6390_v6, %v6389_v10 }
 0xf0e   : > { %6639 = vmatmul.mubr.bf16.vlgmr.msra.gmra.mrb[52].mxu1 %v6424_v32  ;;  %6682 = vmatmul.mubr.bf16.vlgmr.msra.gmra.mrb[28].mxu0 %v6424_v32 }
 0xf0f   : > { %7697 = vmatpush3.bf16.msra.mxu1 %v8116_v43  ;;  %7719 = vmatpush3.bf16.msra.mxu0 %v8117_v44 }
 0xf10   : > { %7698 = vmatprep.subr.bf16.mxu1 %v8118_v18  ;;  %7720 = vmatprep.subr.bf16.mxu0 %v8119_v20 }
 0xf13   : > { %7699 = vmatpush3.bf16.msra.mxu1 %v8120_v57  ;;  %7721 = vmatpush3.bf16.msra.mxu0 %v8121_v31 }
 0xf14   : > { %7700 = vmatprep.subr.bf16.mxu1 %v8122_v45  ;;  %7722 = vmatprep.subr.bf16.mxu0 %v8123_v54 }
 0xf17   : > { %7701 = vmatpush3.bf16.msra.mxu1 %v8124_v59  ;;  %7723 = vmatpush3.bf16.msra.mxu0 %v8125_v49 }
 0xf18   : > { %7702 = vmatprep.subr.bf16.mxu1 %v8126_v61  ;;  %7724 = vmatprep.subr.bf16.mxu0 %v8127_v1 }
 0xf1b   : > { %7703 = vmatpush3.bf16.msra.mxu1 %v8128_v52  ;;  %7725 = vmatpush3.bf16.msra.mxu0 %v8129_v14 }
 0xf1c   : > { %7704 = vmatprep.subr.bf16.mxu1 %v8130_v62  ;;  %7726 = vmatprep.subr.bf16.mxu0 %v8131_v58 }
 0xf1f   : > { %7705 = vmatpush3.bf16.msra.mxu1 %v8132_v33  ;;  %7727 = vmatpush3.bf16.msra.mxu0 %v8133_v0 }
 0xf20   : > { %7706 = vmatprep.subr.bf16.mxu1 %v8134_v34  ;;  %7728 = vmatprep.subr.bf16.mxu0 %v8135_v63 }
 0xf23   : > { %7707 = vmatpush3.bf16.msra.mxu1 %v8136_v15  ;;  %7729 = vmatpush3.bf16.msra.mxu0 %v8137_v5 }
 0xf24   : > { %7708 = vmatprep.subr.bf16.mxu1 %v8138_v8  ;;  %7730 = vmatprep.subr.bf16.mxu0 %v8139_v56 }
 0xf27   : > { %7709 = vmatpush3.bf16.msra.mxu1 %v8140_v26  ;;  %7731 = vmatpush3.bf16.msra.mxu0 %v8141_v37 }
 0xf28   : > { %7710 = vmatprep.subr.bf16.mxu1 %v8142_v24  ;;  %7732 = vmatprep.subr.bf16.mxu0 %v8143_v30 }
 0xf2b   : > { %7711 = vmatpush3.bf16.msra.mxu1 %v8144_v16  ;;  %7733 = vmatpush3.bf16.msra.mxu0 %v8145_v50 }
 0xfe1   : > { %v6640_v51 = vpop.f32.mrb[52].mxu1  ;;  %v6683_v12 = vpop.f32.mrb[28].mxu0 }
 0xfe2   : > { %v9677_v13 = vadd.f32 %v6640_v51, %v6429_v46  ;;  %v9679_v41 = vadd.f32 %v6683_v12, %v6437_v60  ;;  %v6642_v21 = vpop.f32.mrb[53].mxu1  ;;  %v6685_v28 = vpop.f32.mrb[29].mxu0 }
 0xfe3   : > { %v9681_v29 = vadd.f32 %v6642_v21, %v6433_v11  ;;  %v9683_v40 = vadd.f32 %v6685_v28, %v6441_v47  ;;  %v6644_v9 = vpop.f32.mrb[54].mxu1  ;;  %v6687_v23 = vpop.f32.mrb[30].mxu0 }
 0xfe4   : > { %v9686_v22 = vmul.f32 0.70710677, %v9677_v13  ;;  %v9689_v19 = vmul.f32 0.70710677, %v9679_v41  ;;  %v6646_v53 = vpop.f32.mrb[55].mxu1  ;;  %v6689_v43 = vpop.f32.mrb[31].mxu0  ;;  %v9701_v18 = vadd.f32 %v6644_v9, %v6429_v46  ;;  %v9703_v20 = vadd.f32 %v6687_v23, %v6437_v60 }
 0xfe5   : > { %v9692_v27 = vmul.f32 0.70710677, %v9681_v29  ;;  %v9695_v7 = vmul.f32 0.70710677, %v9683_v40  ;;  %v9708_v45 = vadd.f32 %v6646_v53, %v6433_v11  ;;  %v9718_v14 = vadd.f32 %v6689_v43, %v6441_v47 }
 0xfe6   : > { %v6700_v3 = vand.u32 2147483647, %v9686_v22  ;;  %v6702_v17 = vand.u32 2147483647, %v9689_v19  ;;  %v9706_v31 = vmul.f32 0.70710677, %v9701_v18 }
 0xfe7   : > { %v6701_v25 = vand.u32 2147483647, %v9692_v27  ;;  %v6703_v2 = vand.u32 2147483647, %v9695_v7  ;;  %v9711_v54 = vmul.f32 0.70710677, %v9703_v20 }
 0xfe8   : > { %v6708_v36 = vmul.f32 0.3275911, %v6700_v3  ;;  %v6710_v38 = vmul.f32 0.3275911, %v6702_v17  ;;  %v6812_v59 = vsub.f32 0.0, %v6700_v3  ;;  %v6814_v1 = vsub.f32 0.0, %v6702_v17 }
 0xfe9   : > { %v6709_v10 = vmul.f32 0.3275911, %v6701_v25  ;;  %v6711_v39 = vmul.f32 0.3275911, %v6703_v2  ;;  %v6704_v49 = vand.u32 2147483647, %v9706_v31 }
 0xfea   : > { %v6716_v6 = vadd.f32 1.0, %v6708_v36  ;;  %v6718_v32 = vadd.f32 1.0, %v6710_v38  ;;  %v9715_v61 = vmul.f32 0.70710677, %v9708_v45  ;;  %v6706_v52 = vand.u32 2147483647, %v9711_v54 }
 0xfeb   : > { %v6717_v44 = vadd.f32 1.0, %v6709_v10  ;;  %v6719_v57 = vadd.f32 1.0, %v6711_v39  ;;  %v6813_v62 = vsub.f32 0.0, %v6701_v25  ;;  %v6712_v58 = vmul.f32 0.3275911, %v6704_v49 }
 0xfec   : > { %8218 = vrcp.f32 %v6716_v6  ;;  %v6705_v33 = vand.u32 2147483647, %v9715_v61  ;;  %v6815_v0 = vsub.f32 0.0, %v6703_v2  ;;  %v6714_v34 = vmul.f32 0.3275911, %v6706_v52 }
 0xfed   : > { %8220 = vrcp.f32 %v6718_v32  ;;  %v6820_v63 = vmul.f32 %v6812_v59, %v6700_v3  ;;  %v6720_v15 = vadd.f32 1.0, %v6712_v58  ;;  %v6822_v8 = vmul.f32 %v6814_v1, %v6702_v17 }
 0xfee   : > { %8222 = vrcp.f32 %v6717_v44  ;;  %v6713_v5 = vmul.f32 0.3275911, %v6705_v33  ;;  %v6722_v56 = vadd.f32 1.0, %v6714_v34  ;;  %v9722_v26 = vmul.f32 0.70710677, %v9718_v14 }
 0xfef   : > { %8224 = vrcp.f32 %v6719_v57  ;;  %v6821_v24 = vmul.f32 %v6813_v62, %v6701_v25  ;;  %v6816_v30 = vsub.f32 0.0, %v6704_v49  ;;  %v6823_v48 = vmul.f32 %v6815_v0, %v6703_v2 }
 0xff0   : > { %8226 = vrcp.f32 %v6720_v15  ;;  %v6721_v16 = vadd.f32 1.0, %v6713_v5  ;;  %v9730_v4 = vand.u32 2147483647, %v9722_v26  ;;  %v6828_v46 = vmul.f32 1.442695, %v6820_v63 }
 0xff1   : > { %8228 = vrcp.f32 %v6722_v56  ;;  %v6818_v11 = vsub.f32 0.0, %v6706_v52  ;;  %v6832_v51 = vmul.f32 1.442695, %v6822_v8  ;;  %v6830_v9 = vmul.f32 1.442695, %v6821_v24 }
 0xff2   : > { %v6715_v12 = vmul.f32 0.3275911, %v9730_v4  ;;  %v6824_v23 = vmul.f32 %v6816_v30, %v6704_v49  ;;  %8230 = vrcp.f32 %v6721_v16  ;;  %v6834_v25 = vmul.f32 1.442695, %v6823_v48 }
 0xff3   : > { %8232 = vpow2.f32 %v6828_v46  ;;  %v6826_v10 = vmul.f32 %v6818_v11, %v6706_v52  ;;  %v6817_v6 = vsub.f32 0.0, %v6705_v33  ;;  %v6819_v24 = vsub.f32 0.0, %v9730_v4 }
 0xff4   : > { %v6723_v2 = vadd.f32 1.0, %v6715_v12  ;;  %v6836_v44 = vmul.f32 1.442695, %v6824_v23  ;;  %vm6860_vm8 = vcmp.ge.f32.partialorder %v9686_v22, 0.0  ;;  %vm6862_vm9 = vcmp.ge.f32.partialorder %v9689_v19, 0.0 }
 0xff5   : > { %v6840_v52 = vmul.f32 1.442695, %v6826_v10  ;;  %v6825_v58 = vmul.f32 %v6817_v6, %v6705_v33  ;;  %vm6861_vm10 = vcmp.ge.f32.partialorder %v9692_v27, 0.0  ;;  %vm6864_vm11 = vcmp.ge.f32.partialorder %v9706_v31, 0.0 }
 0xff6   : > { %v9724_v37 = vpop.eup %8218  ;;  %8234 = vrcp.f32 %v6723_v2  ;;  %vm6866_vm12 = vcmp.ge.f32.partialorder %v9711_v54, 0.0  ;;  %vm6865_vm13 = vcmp.ge.f32.partialorder %v9715_v61, 0.0  ;;  %vm6863_vm14 = vcmp.ge.f32.partialorder %v9695_v7, 0.0 }
 0xff7   : > { %v9726_v50 = vpop.eup %8220  ;;  %v6740_v55 = vmul.f32 1.0614054, %v9724_v37  ;;  %8236 = vpow2.f32 %v6832_v51  ;;  %v6838_v11 = vmul.f32 1.442695, %v6825_v58  ;;  %vm6867_vm15 = vcmp.ge.f32.partialorder %v9722_v26, 0.0 }
 0xff8   : > { %v6742_v60 = vmul.f32 1.0614054, %v9726_v50  ;;  %v9734_v21 = vpop.eup %8222  ;;  %8238 = vpow2.f32 %v6830_v9  ;;  %v6891_v7 = vmul.f32 0.5, %v9718_v14  ;;  %v7574_v26 = vld [vmem:[%s9944_s0] ss:$0 sm:$0xff] }
 0xff9   : > { %v6748_v47 = vadd.f32 -1.4531521, %v6740_v55  ;;  %v6741_v17 = vmul.f32 1.0614054, %v9734_v21  ;;  %v9738_v36 = vpop.eup %8224  ;;  %8240 = vpow2.f32 %v6834_v25  ;;  %v6827_v25 = vmul.f32 %v6819_v24, %v9730_v4 }
 0xffa   : > { %v6750_v28 = vadd.f32 -1.4531521, %v6742_v60  ;;  %v6743_v53 = vmul.f32 1.0614054, %v9738_v36  ;;  %v9744_v1 = vpop.eup %8226  ;;  %8242 = vpow2.f32 %v6836_v44 }
 0xffb   : > { %v6756_v3 = vmul.f32 %v9724_v37, %v6748_v47  ;;  %v6749_v39 = vadd.f32 -1.4531521, %v6741_v17  ;;  %v9747_v0 = vpop.eup %8228  ;;  %v6744_v5 = vmul.f32 1.0614054, %v9744_v1  ;;  %8244 = vpow2.f32 %v6840_v52 }
 0xffc   : > { %v6758_v38 = vmul.f32 %v9726_v50, %v6750_v28  ;;  %v6751_v49 = vadd.f32 -1.4531521, %v6743_v53  ;;  %v6746_v56 = vmul.f32 1.0614054, %v9747_v0  ;;  %v9755_v48 = vpop.eup %8230  ;;  %8246 = vpow2.f32 %v6838_v11 }
 0xffd   : > { %v6764_v32 = vadd.f32 1.4214138, %v6756_v3  ;;  %v6757_v59 = vmul.f32 %v9734_v21, %v6749_v39  ;;  %v6752_v33 = vadd.f32 -1.4531521, %v6744_v5  ;;  %v8233_v9 = vpop.eup %8232  ;;  %v6745_v17 = vmul.f32 1.0614054, %v9755_v48 }
 0xffe   : > { %v6766_v43 = vadd.f32 1.4214138, %v6758_v38  ;;  %v6759_v15 = vmul.f32 %v9738_v36, %v6751_v49  ;;  %v6754_v60 = vadd.f32 -1.4531521, %v6746_v56 }
 0xfff   : > { %v6772_v57 = vmul.f32 %v9724_v37, %v6764_v32  ;;  %v6765_v63 = vadd.f32 1.4214138, %v6757_v59  ;;  %v6760_v28 = vmul.f32 %v9744_v1, %v6752_v33  ;;  %v6753_v44 = vadd.f32 -1.4531521, %v6745_v17 }
0x1000   : > { %v6774_v62 = vmul.f32 %v9726_v50, %v6766_v43  ;;  %v6767_v55 = vadd.f32 1.4214138, %v6759_v15  ;;  %v6762_v3 = vmul.f32 %v9747_v0, %v6754_v60  ;;  %v9763_v2 = vpop.eup %8234  ;;  %v6842_v60 = vmul.f32 1.442695, %v6827_v25 }
0x1001   : > { %v6780_v34 = vadd.f32 -0.28449672, %v6772_v57  ;;  %v6773_v16 = vmul.f32 %v9734_v21, %v6765_v63  ;;  %v6768_v32 = vadd.f32 1.4214138, %v6760_v28  ;;  %v8237_v39 = vpop.eup %8236  ;;  %v6747_v57 = vmul.f32 1.0614054, %v9763_v2 }
0x1002   : > { %v6782_v8 = vadd.f32 -0.28449672, %v6774_v62  ;;  %v6775_v12 = vmul.f32 %v9738_v36, %v6767_v55  ;;  %v6770_v43 = vadd.f32 1.4214138, %v6762_v3  ;;  %v8239_v59 = vpop.eup %8238  ;;  %v6761_v63 = vmul.f32 %v9755_v48, %v6753_v44 }
0x1003   : > { %v6788_v30 = vmul.f32 %v9724_v37, %v6780_v34  ;;  %v6781_v51 = vadd.f32 -0.28449672, %v6773_v16  ;;  %v6776_v52 = vmul.f32 %v9744_v1, %v6768_v32  ;;  %v8241_v58 = vpop.eup %8240  ;;  %v6755_v15 = vadd.f32 -1.4531521, %v6747_v57 }
0x1004   : > { %v6790_v46 = vmul.f32 %v9726_v50, %v6782_v8  ;;  %v6783_v6 = vadd.f32 -0.28449672, %v6775_v12  ;;  %v6778_v34 = vmul.f32 %v9747_v0, %v6770_v43  ;;  %v8243_v56 = vpop.eup %8242  ;;  %v6884_v3 = vmul.f32 0.5, %v9677_v13 }
0x1005   : > { %v6796_v47 = vadd.f32 0.2548296, %v6788_v30  ;;  %v6789_v10 = vmul.f32 %v9734_v21, %v6781_v51  ;;  %v6784_v8 = vadd.f32 -0.28449672, %v6776_v52  ;;  %v6769_v30 = vadd.f32 1.4214138, %v6761_v63 }
0x1006   : > { %v6798_v23 = vadd.f32 0.2548296, %v6790_v46  ;;  %v6791_v4 = vmul.f32 %v9738_v36, %v6783_v6  ;;  %v6786_v24 = vadd.f32 -0.28449672, %v6778_v34  ;;  %v6763_v16 = vmul.f32 %v9763_v2, %v6755_v15 }
0x1007   : > { %v6804_v38 = vmul.f32 %v9724_v37, %v6796_v47  ;;  %v6797_v62 = vadd.f32 0.2548296, %v6789_v10  ;;  %v6792_v46 = vmul.f32 %v9744_v1, %v6784_v8  ;;  %v8245_v47 = vpop.eup %8244  ;;  %v6777_v28 = vmul.f32 %v9755_v48, %v6769_v30 }
0x1008   : > { %v6806_v53 = vmul.f32 %v9726_v50, %v6798_v23  ;;  %v6799_v5 = vadd.f32 0.2548296, %v6791_v4  ;;  %v6794_v12 = vmul.f32 %v9747_v0, %v6786_v24  ;;  %8248 = vpow2.f32 %v6842_v60 }
0x1009   : > { %v6844_v49 = vmul.f32 %v8233_v9, %v6804_v38  ;;  %v6805_v50 = vmul.f32 %v9734_v21, %v6797_v62  ;;  %v6771_v21 = vadd.f32 1.4214138, %v6763_v16  ;;  %v6800_v23 = vadd.f32 0.2548296, %v6792_v46  ;;  %v8247_v62 = vpop.eup %8246 }
0x100a   : > { %v6846_v37 = vmul.f32 %v8237_v39, %v6806_v53  ;;  %v6807_v9 = vmul.f32 %v9738_v36, %v6799_v5  ;;  %v6802_v11 = vadd.f32 0.2548296, %v6794_v12  ;;  %v6785_v17 = vadd.f32 -0.28449672, %v6777_v28 }
0x100b   : > { %v6852_v55 = vsub.f32 1.0, %v6844_v49  ;;  %v6845_v51 = vmul.f32 %v8239_v59, %v6805_v50  ;;  %v6808_v6 = vmul.f32 %v9744_v1, %v6800_v23  ;;  %v6779_v53 = vmul.f32 %v9763_v2, %v6771_v21 }
0x100c   : > { %v6854_v33 = vsub.f32 1.0, %v6846_v37  ;;  %v6810_v32 = vmul.f32 %v9747_v0, %v6802_v11  ;;  %v6793_v39 = vmul.f32 %v9755_v48, %v6785_v17  ;;  %v6886_v43 = vmul.f32 0.5, %v9679_v41 }
0x100d   : > { %v6868_v38 = vsub.f32 0.0, %v6852_v55  ;;  %v6853_v25 = vsub.f32 1.0, %v6845_v51  ;;  %v6885_v36 = vmul.f32 0.5, %v9681_v29  ;;  %v6847_v44 = vmul.f32 %v8241_v58, %v6807_v9 }
0x100e   : > { %v6870_v10 = vsub.f32 0.0, %v6854_v33  ;;  %v6848_v13 = vmul.f32 %v8243_v56, %v6808_v6  ;;  %v6850_v57 = vmul.f32 %v8245_v47, %v6810_v32  ;;  %v6801_v59 = vadd.f32 0.2548296, %v6793_v39 }
0x100f   : > { %v6787_v49 = vadd.f32 -0.28449672, %v6779_v53  ;;  %v6876_v1 = vsel %vm6860_vm8, %v6852_v55, %v6868_v38  ;;  %v6869_v52 = vsub.f32 0.0, %v6853_v25  ;;  %v6855_v29 = vsub.f32 1.0, %v6847_v44 }
0x1010   : > { %v6856_v0 = vsub.f32 1.0, %v6848_v13  ;;  %v6878_v4 = vsel %vm6862_vm9, %v6854_v33, %v6870_v10  ;;  %v6858_v37 = vsub.f32 1.0, %v6850_v57  ;;  %v6809_v41 = vmul.f32 %v9755_v48, %v6801_v59 }
0x1011   : > { %v6888_v34 = vmul.f32 0.5, %v9701_v18  ;;  %v6795_v22 = vmul.f32 %v9763_v2, %v6787_v49  ;;  %v6892_v63 = vadd.f32 1.0, %v6876_v1  ;;  %v6894_v50 = vadd.f32 1.0, %v6878_v4 }
0x1012   : > { %v6872_v58 = vsub.f32 0.0, %v6856_v0  ;;  %v6874_v15 = vsub.f32 0.0, %v6858_v37  ;;  %v6849_v19 = vmul.f32 %v8247_v62, %v6809_v41  ;;  %v6877_v56 = vsel %vm6861_vm10, %v6853_v25, %v6869_v52  ;;  %v8249_v16 = vpop.eup %8248 }
0x1013   : > { %v6803_v8 = vadd.f32 0.2548296, %v6795_v22  ;;  %v6871_v18 = vsub.f32 0.0, %v6855_v29  ;;  %v6890_v55 = vmul.f32 0.5, %v9703_v20  ;;  %v6900_v46 = vmul.f32 %v6892_v63, %v6884_v3 }
0x1014   : > { %v6880_v5 = vsel %vm6864_vm11, %v6856_v0, %v6872_v58  ;;  %v6882_v24 = vsel %vm6866_vm12, %v6858_v37, %v6874_v15  ;;  %v6857_v30 = vsub.f32 1.0, %v6849_v19  ;;  %v6902_v54 = vmul.f32 %v6894_v50, %v6886_v43 }
0x1015   : > { %v6896_v48 = vadd.f32 1.0, %v6880_v5  ;;  %v6898_v33 = vadd.f32 1.0, %v6882_v24  ;;  %v6811_v31 = vmul.f32 %v9763_v2, %v6803_v8  ;;  %v6893_v51 = vadd.f32 1.0, %v6877_v56 }
0x1016   : > { %v6873_v47 = vsub.f32 0.0, %v6857_v30  ;;  %v6889_v9 = vmul.f32 0.5, %v9708_v45  ;;  %v6879_v23 = vsel %vm6863_vm14, %v6855_v29, %v6871_v18  ;;  %v6887_v25 = vmul.f32 0.5, %v9683_v40 }
0x1017   : > { %v6904_v60 = vmul.f32 %v6896_v48, %v6888_v34  ;;  %v6906_v12 = vmul.f32 %v6898_v33, %v6890_v55  ;;  %v6851_v27 = vmul.f32 %v8249_v16, %v6811_v31  ;;  %v6901_v2 = vmul.f32 %v6893_v51, %v6885_v36 }
0x1018   : > { %v6881_v21 = vsel %vm6865_vm13, %v6857_v30, %v6873_v47  ;;  %v6895_v61 = vadd.f32 1.0, %v6879_v23 }
0x1019   : > { %v6973_v28 = vpack.c.bf16 %v6904_v60, %v6900_v46  ;;  %v6975_v20 = vpack.c.bf16 %v6906_v12, %v6902_v54  ;;  %v6897_v11 = vadd.f32 1.0, %v6881_v21  ;;  %v6859_v17 = vsub.f32 1.0, %v6851_v27 }
0x101a   : > { %v6903_v45 = vmul.f32 %v6895_v61, %v6887_v25 }
0x101b   : > { %v6905_v3 = vmul.f32 %v6897_v11, %v6889_v9  ;;  %v6875_v38 = vsub.f32 0.0, %v6859_v17 }
0x101d   : > { %v6883_v10 = vsel %vm6867_vm15, %v6859_v17, %v6875_v38  ;;  %v6974_v6 = vpack.c.bf16 %v6905_v3, %v6901_v2 }
0x101e   : > { %v6899_v32 = vadd.f32 1.0, %v6883_v10 }
0x101f   : > { %7207 = vmatprep.mubr.bf16.mxu1 %v6974_v6 }
0x1020   : > { %v6907_v39 = vmul.f32 %v6899_v32, %v6891_v7  ;;  %7208 = vmatmul.mubr.bf16.vlgmr.msra.gmra.mrb[56].mxu1 %v6973_v28 }
0x1022   : > { %v6976_v53 = vpack.c.bf16 %v6907_v39, %v6903_v45 }
0x1024   : > { %7248 = vmatprep.mubr.bf16.mxu0 %v6976_v53 }
0x1025   : > { %7249 = vmatmul.mubr.bf16.vlgmr.msra.gmra.mrb[32].mxu0 %v6975_v20 }
0x10f3   : > { %v7712_v43 = vpop.f32.mrb[56].mxu1 }
0x10f4   : > { %v7713_v36 = vpop.f32.mrb[57].mxu1 }
0x10f5   : > { %v7714_v44 = vadd.f32 %v7713_v36, %v7712_v43  ;;  %v7715_v40 = vpop.f32.mrb[58].mxu1 }
0x10f6   : > { %v7716_v14 = vpop.f32.mrb[59].mxu1 }
0x10f7   : > { %v7717_v13 = vadd.f32 %v7716_v14, %v7715_v40  ;;  %v7210_v59 = vadd.f32 %v7714_v44, %v7574_v26 }
0x10f8   : > { %v7734_v57 = vpop.f32.mrb[32].mxu0 }
0x10f9   : > { %v7735_v49 = vpop.f32.mrb[33].mxu0  ;;  %v7213_v62 = vadd.f32 %v7717_v13, %v7574_v26 }
0x10fa   : > { %v7736_v1 = vadd.f32 %v7735_v49, %v7734_v57  ;;  %v7737_v0 = vpop.f32.mrb[34].mxu0 }
0x10fb   : > { %v7738_v4 = vpop.f32.mrb[35].mxu0 }
0x10fc   : > { %v7251_v52 = vadd.f32 %v7736_v1, %v7210_v59  ;;  %v7739_v37 = vadd.f32 %v7738_v4, %v7737_v0 }
0x10fe   : > { %v7257_v41 = vadd.f32 %v7251_v52, %v9451_v35  ;;  %v7254_v29 = vadd.f32 %v7739_v37, %v7213_v62 }
0x1100   : > { %7259 = vst [vmem:[%s797_s25] sm:$0xff] %v7257_v41  ;;  %v7258_v58 = vadd.f32 %v7254_v29, %v9454_v42 }
0x1102   : > { %7260 = vst [vmem:[%s797_s25 + $0x8] sm:$0xff] %v7258_v58 }
0x1103   : > { %8263 = shalt.err (!%p8260_p5)
}
0x1104   : > { %s8264_s6 = scalar_lea.hbm %s9816_s24, 256  ;;  %s8268_s23 = scalar_lea.hbm %s9948_s2, 512 }
0x1105   : > { %p8265_p6 = scmp.ne.s32.totalorder %s9816_s24, %s8264_s6  ;;  %p8269_p10 = scmp.lt.u32.totalorder %s9816_s24, %s9948_s2 }
0x1106   : > { %p8270_p11 = scmp.lt.u32.totalorder %s8268_s23, %s8264_s6  ;;  %p8272_p13 = scmp.lt.u32.totalorder %s8264_s6, %s9816_s24 }
0x1107   : > { %p8266_p7 = pnand %p8265_p6, %p8496_p4 }
0x1108   : > { %p8271_p12 = por %p8270_p11, %p8269_p10 }
0x1109   : > { %p8267_p9 = pneg %p8266_p7 }
0x110a   : > { %p8273_p0 = por %p8272_p13, %p8271_p12 }
0x110c   : > { %p8274_p1 = pnand %p8273_p0, %p8267_p9 }
0x110e   : > { %8277 = shalt.err (!%p8274_p1)
}
0x110f   : > { %s8339_s21 = smov 128   ;;  %s8340_s28 = smov 8  }
0x1110   : > { %7920 = dma.vmem_to_hbm [thread:$0]  (%p8496_p4), %s9810_s3, 256, %s9816_s24, %s9818_s4, %s8339_s21, %s8339_s21, %s8340_s28  }
0x1111 PF: > { %s9949_s30 = sld [smem:[#allocation10_spill]]  ;;  %s9950_s5 = sld [smem:[#allocation5_spill]] }
0x1117   : > { %p7926_p2 = scmp.ge.s32.totalorder %s9949_s30, 2  ;;  %s7292_s22 = sand.u32 1, %s9950_s5  }
0x1118   : > { %s7293_s26 = scalar_lea.sflag [#allocation3], %s7292_s22 }
0x1119   : > { %p7923_p3 = pnand %p7926_p2, %p8503_p8 }
0x111b   : > { %8303 = dma.done.wait (!%p7923_p3), %s7293_s26, 256  }
0x111c   : > { %8305 = vsyncadd (!%p7923_p3), %s7293_s26, 4294967040  ;;  %s35_s0 = sadd.s32 1, %s9949_s30   ;;  %s9952_s3 = sld [smem:[#allocation6_spill]] }
0x111d   : > { %p32_p5 = scmp.ge.s32.totalorder %s35_s0, 4   ;;  %s9953_s28 = sld [smem:[#allocation7_spill]] }
0x111e   : > { %s9954_s29 = sld [smem:[#allocation14_spill]]  ;;  %s9955_s30 = sld [smem:[#allocation9_spill]] }
0x111f   : > { %s9956_s4 = sld [smem:[#allocation11_spill]]  ;;  %34 = sbr.rel (!%p32_p5) target bundleno = 15 (0xf), region = 158 }
0x1126   :  { %7298 = vsyncpa [#allocation3], 1 }
0x1127   :  { %7300 = vsyncpa [#allocation3 + $0x1], 1 }

</bundles_post_ra>
